<compile_context>
chip_gen: v5e
topology: v5e:2x2
jax: 0.10.0
libtpu: 0.0.40
codegen_flags: <defaults>
</compile_context>

<pallas_src>
import jax
import jax.numpy as jnp
from jax.experimental import pallas as pl
from jax.experimental.pallas import tpu as pltpu

NUM_FEATURES = 2048   # num_features in the PyTorch module
HIDDEN = 512
NUM_CLASSES = 2
N_PAD = 128           # lane-padded output width (>= NUM_CLASSES, multiple of 128)
TM = 128              # batch tile (matches v5e 128-wide MXU; fits all VMEM budgets)


# ----------------------------- Pallas kernel ------------------------------ #
def fused_classifier_kernel(pooled_ref, wstem_ref, w1_ref, b1_ref,
                            w2_ref, b2_ref, out_ref):
    # Stem Linear(C -> 2048), fused so feats never hit HBM.  bf16 MXU, f32 acc.
    feats = jnp.dot(pooled_ref[...], wstem_ref[...],
                    preferred_element_type=jnp.float32)
    # Linear(2048 -> 512) + bias + ReLU
    h = jnp.dot(feats.astype(jnp.bfloat16), w1_ref[...],
                preferred_element_type=jnp.float32)
    h = jnp.maximum(h + b1_ref[...], 0.0)
    # Dropout(0.5): identity in eval mode (Evaluation.py semantics).
    # TODO(synk): training-mode dropout (pltpu.prng_seed + pltpu.stateful_bernoulli) not wired here.
    # Linear(512 -> num_classes), padded to 128 lanes for lane-dense stores.
    out = jnp.dot(h.astype(jnp.bfloat16), w2_ref[...],
                  preferred_element_type=jnp.float32)
    out_ref[...] = (out + b2_ref[...]).astype(out_ref.dtype)


def glomeruli_classifier_forward(x, params):
    """x: [B, C, H, W] float32 (NCHW, like PyTorch) -> logits [B, 2] float32."""
    B, C = x.shape[0], x.shape[1]

    # Global average pool stays in glue (tiny); the C->2048 matmul is in-kernel.
    pooled = jnp.mean(x, axis=(2, 3))                       # [B, C] f32

    # Pad batch to a multiple of TM so every block satisfies (8,128) tiling
    # and the MXU sees full-height tiles.
    n_tiles = pl.cdiv(B, TM)
    B_pad = n_tiles * TM
    pooled_p = jnp.pad(pooled, ((0, B_pad - B), (0, 0))).astype(jnp.bfloat16)

    # bf16 weights (halves the dominant HBM traffic); biases stay f32.
    wstem = params["w_stem"].astype(jnp.bfloat16)           # [C, 2048]
    w1 = params["w1"].astype(jnp.bfloat16)                  # [2048, 512]
    b1 = params["b1"]                                       # [1, 512] f32
    # Lane-pad the 2-class output to 128.
    w2p = jnp.pad(params["w2"],
                  ((0, 0), (0, N_PAD - NUM_CLASSES))).astype(jnp.bfloat16)
    b2p = jnp.pad(params["b2"], ((0, 0), (0, N_PAD - NUM_CLASSES)))  # [1,128] f32

    flops = 2 * B_pad * (C * NUM_FEATURES + NUM_FEATURES * HIDDEN + HIDDEN * N_PAD)
    bytes_accessed = int(pooled_p.size * 2 + wstem.size * 2 + w1.size * 2
                         + b1.size * 4 + w2p.size * 2 + b2p.size * 4
                         + B_pad * N_PAD * 4)

    out_pad = pl.pallas_call(
        fused_classifier_kernel,
        out_shape=jax.ShapeDtypeStruct((B_pad, N_PAD), jnp.float32),
        grid_spec=pltpu.PrefetchScalarGridSpec(
            num_scalar_prefetch=0,
            grid=(n_tiles,),
            in_specs=[
                # batch-tiled activations
                pl.BlockSpec((TM, C), lambda i: (i, 0)),
                # weights / biases: constant index_map -> DMA'd once, VMEM-resident
                pl.BlockSpec((C, NUM_FEATURES), lambda i: (0, 0)),
                pl.BlockSpec((NUM_FEATURES, HIDDEN), lambda i: (0, 0)),
                pl.BlockSpec((1, HIDDEN), lambda i: (0, 0)),
                pl.BlockSpec((HIDDEN, N_PAD), lambda i: (0, 0)),
                pl.BlockSpec((1, N_PAD), lambda i: (0, 0)),
            ],
            out_specs=pl.BlockSpec((TM, N_PAD), lambda i: (i, 0)),
        ),
        compiler_params=pltpu.CompilerParams(
            dimension_semantics=("parallel",),   # v7x: shard batch over 2 TCs
        ),
        cost_estimate=pl.CostEstimate(
            flops=flops, transcendentals=0, bytes_accessed=bytes_accessed),
    )(pooled_p, wstem, w1, b1, w2p, b2p)

    return out_pad[:B, :NUM_CLASSES]


# --------------------------- params (plain JAX) ---------------------------- #
def init_params(key, in_channels):
    k_stem, k1, kb1, k2, kb2 = jax.random.split(key, 5)

    # PyTorch-Linear-style uniform(-1/sqrt(fan_in), +1/sqrt(fan_in)).
    def lin_init(kw, kb, fan_in, fan_out):
        bound = 1.0 / jnp.sqrt(jnp.float32(fan_in))
        w = jax.random.uniform(kw, (fan_in, fan_out), jnp.float32, -bound, bound)
        b = jax.random.uniform(kb, (1, fan_out), jnp.float32, -bound, bound)
        return w, b

    w1, b1 = lin_init(k1, kb1, NUM_FEATURES, HIDDEN)
    w2, b2 = lin_init(k2, kb2, HIDDEN, NUM_CLASSES)
    w_stem = jax.random.normal(k_stem, (in_channels, NUM_FEATURES), jnp.float32) * 0.02
    return {"w_stem": w_stem, "w1": w1, "b1": b1, "w2": w2, "b2": b2}


if __name__ == "__main__":
    key = jax.random.PRNGKey(0)
    kx, kp = jax.random.split(key)

    B, C, H, W = 2, 4, 16, 16
    x = jax.random.normal(kx, (B, C, H, W), jnp.float32)    # NCHW, like PyTorch
    params = init_params(kp, C)

    logits = jax.jit(glomeruli_classifier_forward)(x, params)
    jax.block_until_ready(logits)

    # Pure-JAX f32 reference of the same forward (eval mode).  Loose tolerance
    # accounts for the kernel's bf16 weight/activation quantization.
    pooled_ref = jnp.mean(x, axis=(2, 3))
    feats_ref = pooled_ref @ params["w_stem"]
    h_ref = jnp.maximum(feats_ref @ params["w1"] + params["b1"], 0.0)
    logits_ref = h_ref @ params["w2"] + params["b2"]

    assert logits.shape == (B, NUM_CLASSES)
    assert jnp.allclose(logits, logits_ref, atol=1e-2, rtol=1e-2), (
        jnp.max(jnp.abs(logits - logits_ref)))

    print("KERNEL_OK")
</pallas_src>

<mosaic_0001>
module attributes {stable_mosaic.version = 11 : i64} {
  func.func @fused_classifier_kernel(%arg0: i32, %arg1: memref<128x4xbf16, #tpu.memory_space<vmem>>, %arg2: memref<4x2048xbf16, #tpu.memory_space<vmem>>, %arg3: memref<2048x512xbf16, #tpu.memory_space<vmem>>, %arg4: memref<1x512xf32, #tpu.memory_space<vmem>>, %arg5: memref<512x128xbf16, #tpu.memory_space<vmem>>, %arg6: memref<1x128xf32, #tpu.memory_space<vmem>>, %arg7: memref<128x128xf32, #tpu.memory_space<vmem>>) attributes {dimension_semantics = [#tpu.dimension_semantics<parallel>], iteration_bounds = array<i64: 1>, scalar_prefetch = 0 : i64, scratch_operands = 0 : i64, tpu.core_type = #tpu.core_type<tc>, window_params = [{transform_indices = @transform_0, window_bounds = array<i64: 128, 4>}, {pipeline_mode = #tpu.pipeline_mode<synchronous>, transform_indices = @transform_1, window_bounds = array<i64: 4, 2048>}, {pipeline_mode = #tpu.pipeline_mode<synchronous>, transform_indices = @transform_2, window_bounds = array<i64: 2048, 512>}, {pipeline_mode = #tpu.pipeline_mode<synchronous>, transform_indices = @transform_3, window_bounds = array<i64: 1, 512>}, {pipeline_mode = #tpu.pipeline_mode<synchronous>, transform_indices = @transform_4, window_bounds = array<i64: 512, 128>}, {pipeline_mode = #tpu.pipeline_mode<synchronous>, transform_indices = @transform_5, window_bounds = array<i64: 1, 128>}, {transform_indices = @transform_6, window_bounds = array<i64: 128, 128>}]} {
    %c0 = arith.constant 0 : index
    %c0_0 = arith.constant 0 : index
    %0 = vector.load %arg1[%c0, %c0_0] : memref<128x4xbf16, #tpu.memory_space<vmem>>, vector<128x4xbf16>
    %c0_1 = arith.constant 0 : index
    %c0_2 = arith.constant 0 : index
    %1 = vector.load %arg2[%c0_1, %c0_2] : memref<4x2048xbf16, #tpu.memory_space<vmem>>, vector<4x2048xbf16>
    %cst = arith.constant dense<0.000000e+00> : vector<128x2048xf32>
    %2 = tpu.matmul %0, %1, %cst {dimension_numbers = #tpu.dot_dimension_numbers<[1], [0], [0], [1], [0, 0, 1, 1], [], []>} : vector<128x4xbf16>, vector<4x2048xbf16>, vector<128x2048xf32> -> vector<128x2048xf32>
    %3 = arith.truncf %2 : vector<128x2048xf32> to vector<128x2048xbf16>
    %c0_3 = arith.constant 0 : index
    %c0_4 = arith.constant 0 : index
    %4 = vector.load %arg3[%c0_3, %c0_4] : memref<2048x512xbf16, #tpu.memory_space<vmem>>, vector<2048x512xbf16>
    %cst_5 = arith.constant dense<0.000000e+00> : vector<128x512xf32>
    %5 = tpu.matmul %3, %4, %cst_5 {dimension_numbers = #tpu.dot_dimension_numbers<[1], [0], [0], [1], [0, 0, 1, 1], [], []>} : vector<128x2048xbf16>, vector<2048x512xbf16>, vector<128x512xf32> -> vector<128x512xf32>
    %c0_6 = arith.constant 0 : index
    %c0_7 = arith.constant 0 : index
    %6 = vector.load %arg4[%c0_6, %c0_7] : memref<1x512xf32, #tpu.memory_space<vmem>>, vector<1x512xf32>
    %7 = vector.broadcast %6 : vector<1x512xf32> to vector<128x512xf32>
    %8 = arith.addf %5, %7 : vector<128x512xf32>
    %cst_8 = arith.constant 0.000000e+00 : f32
    %9 = vector.broadcast %cst_8 : f32 to vector<128x512xf32>
    %10 = arith.maximumf %8, %9 : vector<128x512xf32>
    %11 = arith.truncf %10 : vector<128x512xf32> to vector<128x512xbf16>
    %c0_9 = arith.constant 0 : index
    %c0_10 = arith.constant 0 : index
    %12 = vector.load %arg5[%c0_9, %c0_10] : memref<512x128xbf16, #tpu.memory_space<vmem>>, vector<512x128xbf16>
    %cst_11 = arith.constant dense<0.000000e+00> : vector<128x128xf32>
    %13 = tpu.matmul %11, %12, %cst_11 {dimension_numbers = #tpu.dot_dimension_numbers<[1], [0], [0], [1], [0, 0, 1, 1], [], []>} : vector<128x512xbf16>, vector<512x128xbf16>, vector<128x128xf32> -> vector<128x128xf32>
    %c0_12 = arith.constant 0 : index
    %c0_13 = arith.constant 0 : index
    %14 = vector.load %arg6[%c0_12, %c0_13] : memref<1x128xf32, #tpu.memory_space<vmem>>, vector<1x128xf32>
    %15 = vector.broadcast %14 : vector<1x128xf32> to vector<128x128xf32>
    %16 = arith.addf %13, %15 : vector<128x128xf32>
    %c0_14 = arith.constant 0 : index
    %c0_15 = arith.constant 0 : index
    %17 = vector.load %arg7[%c0_14, %c0_15] : memref<128x128xf32, #tpu.memory_space<vmem>>, vector<128x128xf32>
    tpu.vector_store %arg7[%c0_14, %c0_15], %16 {strides = array<i32>} : memref<128x128xf32, #tpu.memory_space<vmem>>, vector<128x128xf32>,
    return
  }
  func.func @transform_0(%arg0: i32) -> (i32, i32) {
    %c0_i32 = arith.constant 0 : i32
    %c0_i32_0 = arith.constant 0 : i32
    return %arg0, %c0_i32 : i32, i32
  }
  func.func @transform_1(%arg0: i32) -> (i32, i32) {
    %c0_i32 = arith.constant 0 : i32
    %c0_i32_0 = arith.constant 0 : i32
    %c0_i32_1 = arith.constant 0 : i32
    return %c0_i32, %c0_i32_0 : i32, i32
  }
  func.func @transform_2(%arg0: i32) -> (i32, i32) {
    %c0_i32 = arith.constant 0 : i32
    %c0_i32_0 = arith.constant 0 : i32
    %c0_i32_1 = arith.constant 0 : i32
    return %c0_i32, %c0_i32_0 : i32, i32
  }
  func.func @transform_3(%arg0: i32) -> (i32, i32) {
    %c0_i32 = arith.constant 0 : i32
    %c0_i32_0 = arith.constant 0 : i32
    %c0_i32_1 = arith.constant 0 : i32
    return %c0_i32, %c0_i32_0 : i32, i32
  }
  func.func @transform_4(%arg0: i32) -> (i32, i32) {
    %c0_i32 = arith.constant 0 : i32
    %c0_i32_0 = arith.constant 0 : i32
    %c0_i32_1 = arith.constant 0 : i32
    return %c0_i32, %c0_i32_0 : i32, i32
  }
  func.func @transform_5(%arg0: i32) -> (i32, i32) {
    %c0_i32 = arith.constant 0 : i32
    %c0_i32_0 = arith.constant 0 : i32
    %c0_i32_1 = arith.constant 0 : i32
    return %c0_i32, %c0_i32_0 : i32, i32
  }
  func.func @transform_6(%arg0: i32) -> (i32, i32) {
    %c0_i32 = arith.constant 0 : i32
    %c0_i32_0 = arith.constant 0 : i32
    return %arg0, %c0_i32 : i32, i32
  }
}

</mosaic_0001>

<bundles_post_ra>
// kernel: glomeruli_classifier_forward.1
= control target key start
LH: loop header
LB: loop body
LE: loop exit
PB: predicated region body
PF: predicated region fallthrough
CT: control target
= control target key end

     0   :  { %vm134_vm0 = vcmask 1041408   ;;  %vm109_vm1 = vcmask 31744   ;;  %s15869_s1 = inlined_call_operand.vmem [shape: bf16[4,2048], index: 1, kind: input, shape index: {}]   ;;  %s15870_s0 = inlined_call_operand.vmem [shape: bf16[128,4], index: 0, kind: input, shape index: {}]   ;;  %s15871_s2 = inlined_call_operand.vmem [shape: bf16[2048,512], index: 2, kind: input, shape index: {}]   ;;  %s15872_s3 = inlined_call_operand.vmem [shape: f32[1,512], index: 3, kind: input, shape index: {}]   ;;  %s15873_s4 = inlined_call_operand.vmem [shape: bf16[512,128], index: 4, kind: input, shape index: {}]   ;;  %s15874_s5 = inlined_call_operand.vmem [shape: f32[1,128], index: 5, kind: input, shape index: {}]   ;;  %s15875_s6 = inlined_call_operand.vmem [shape: f32[128,128], index: 6, kind: output, shape index: {}]  }
   0x1   :  { %v40_v0 = vld [vmem:[%s15869_s1] sm:$0xff]  ;;  %v41_v1 = vld [vmem:[%s15869_s1 + $0x8] sm:$0xff]  ;;  %v42_v2 = vld [vmem:[%s15869_s1 + $0x10] sm:$0xff] }
   0x2   :  { %85 = vst [vmem:[#allocation1] ss:$4 sm:$0xff] %v40_v0  ;;  %v10812_v8 = vld [vmem:[%s15870_s0] sm:$0xff]  ;;  %v43_v15 = vld [vmem:[%s15869_s1 + $0x18] sm:$0xff]  ;;  %v10834_v21 = vld [vmem:[%s15870_s0 + $0x8] sm:$0xff] }
   0x3   :  { %88 = vst [vmem:[#allocation1 + $0x20] ss:$4 sm:$0xff] %v41_v1  ;;  %v10847_v22 = vld [vmem:[%s15870_s0 + $0x10] sm:$0xff]  ;;  %v10860_v23 = vld [vmem:[%s15870_s0 + $0x18] sm:$0xff]  ;;  %v10873_v24 = vld [vmem:[%s15870_s0 + $0x20] sm:$0xff] }
   0x4   :  { %v10886_v25 = vld [vmem:[%s15870_s0 + $0x28] sm:$0xff]  ;;  %v10899_v26 = vld [vmem:[%s15870_s0 + $0x30] sm:$0xff]  ;;  %v10916_v35 = vld [vmem:[%s15870_s0 + $0x38] sm:$0xff] }
   0x9   :  { %v89_v3 = vld.sshfl [vmem:[#allocation1] sm:$0xff pattern:$0x73625140]  ;;  %v90_v4 = vld.sshfl [vmem:[#allocation1 + $0x8] sm:$0xff pattern:$0x73625140] }
   0xa   :  { %v135_v5 = vsel %vm134_vm0, %v89_v3, 0  ;;  %v137_v6 = vsel %vm134_vm0, %v90_v4, 0  ;;  %v91_v7 = vld.sshfl [vmem:[#allocation1 + $0x10] sm:$0xff pattern:$0x73625140] }
   0xb   :  { %174 = vmatpush.bf16.msra.mxu0 %v135_v5  ;;  %223 = vmatpush.bf16.msra.mxu1 %v137_v6  ;;  %v139_v9 = vsel %vm134_vm0, %v91_v7, 0  ;;  %v92_v10 = vld.sshfl [vmem:[#allocation1 + $0x18] sm:$0xff pattern:$0x73625140] }
   0xc   :  { %272 = vmatpush.bf16.msra.mxu2 %v139_v9  ;;  %98 = vst [vmem:[#allocation1] ss:$4 sm:$0xff] %v42_v2  ;;  %v141_v11 = vsel %vm134_vm0, %v92_v10, 0  ;;  %v95_v12 = vld.sshfl [vmem:[#allocation1 + $0x30] sm:$0xff pattern:$0x73625140] }
   0xd   :  { %321 = vmatpush.bf16.msra.mxu3 %v141_v11  ;;  %v147_v13 = vsel %vm134_vm0, %v95_v12, 0  ;;  %v93_v14 = vld.sshfl [vmem:[#allocation1 + $0x20] sm:$0xff pattern:$0x73625140] }
   0xe   :  { %7901 = vmatmul.msk.bf16.vlgmr.msra.gmra.mxu0 %vm109_vm1, %v10812_v8  ;;  %7909 = vmatmul.msk.bf16.vlgmr.msra.gmra.mxu1 %vm109_vm1, %v10812_v8  ;;  %v143_v16 = vsel %vm134_vm0, %v93_v14, 0  ;;  %v96_v17 = vld.sshfl [vmem:[#allocation1 + $0x38] sm:$0xff pattern:$0x73625140] }
   0xf   :  { %7917 = vmatmul.msk.bf16.vlgmr.msra.gmra.mxu2 %vm109_vm1, %v10812_v8  ;;  %370 = vmatpush.bf16.msrb.mxu0 %v143_v16  ;;  %v149_v18 = vsel %vm134_vm0, %v96_v17, 0  ;;  %v94_v19 = vld.sshfl [vmem:[#allocation1 + $0x28] sm:$0xff pattern:$0x73625140] }
  0x10   :  { %7925 = vmatmul.msk.bf16.vlgmr.msra.gmra.mxu3 %vm109_vm1, %v10812_v8  ;;  %468 = vmatpush.bf16.msrb.mxu2 %v147_v13  ;;  %100 = vst [vmem:[#allocation1 + $0x20] ss:$4 sm:$0xff] %v43_v15  ;;  %v145_v20 = vsel %vm134_vm0, %v94_v19, 0 }
  0x11   :  { %517 = vmatpush.bf16.msrb.mxu3 %v149_v18  ;;  %419 = vmatpush.bf16.msrb.mxu1 %v145_v20 }
  0x13   :  { %v103_v27 = vld.sshfl [vmem:[#allocation1 + $0x10] sm:$0xff pattern:$0x73625140]  ;;  %v101_v28 = vld.sshfl [vmem:[#allocation1] sm:$0xff pattern:$0x73625140] }
  0x14   :  { %v155_v29 = vsel %vm134_vm0, %v103_v27, 0  ;;  %v151_v30 = vsel %vm134_vm0, %v101_v28, 0  ;;  %v104_v31 = vld.sshfl [vmem:[#allocation1 + $0x18] sm:$0xff pattern:$0x73625140] }
  0x15   :  { %664 = vmatpush.bf16.msra.mxu2 %v155_v29  ;;  %566 = vmatpush.bf16.msra.mxu0 %v151_v30  ;;  %v157_v32 = vsel %vm134_vm0, %v104_v31, 0  ;;  %v102_v33 = vld.sshfl [vmem:[#allocation1 + $0x8] sm:$0xff pattern:$0x73625140] }
  0x16   :  { %713 = vmatpush.bf16.msra.mxu3 %v157_v32  ;;  %v153_v34 = vsel %vm134_vm0, %v102_v33, 0 }
  0x17   :  { %615 = vmatpush.bf16.msra.mxu1 %v153_v34 }
  0x1e   :  { %7902 = vmatmul.msk.bf16.gmra.mxu0 %vm109_vm1, %v10834_v21  ;;  %7910 = vmatmul.msk.bf16.gmra.mxu1 %vm109_vm1, %v10834_v21 }
  0x1f   :  { %7918 = vmatmul.msk.bf16.gmra.mxu2 %vm109_vm1, %v10834_v21 }
  0x20   :  { %7926 = vmatmul.msk.bf16.gmra.mxu3 %vm109_vm1, %v10834_v21 }
  0x2e   :  { %7903 = vmatmul.msk.bf16.gmra.mxu0 %vm109_vm1, %v10847_v22  ;;  %7911 = vmatmul.msk.bf16.gmra.mxu1 %vm109_vm1, %v10847_v22 }
  0x2f   :  { %7919 = vmatmul.msk.bf16.gmra.mxu2 %vm109_vm1, %v10847_v22 }
  0x30   :  { %7927 = vmatmul.msk.bf16.gmra.mxu3 %vm109_vm1, %v10847_v22 }
  0x3e   :  { %7904 = vmatmul.msk.bf16.gmra.mxu0 %vm109_vm1, %v10860_v23  ;;  %7912 = vmatmul.msk.bf16.gmra.mxu1 %vm109_vm1, %v10860_v23 }
  0x3f   :  { %7920 = vmatmul.msk.bf16.gmra.mxu2 %vm109_vm1, %v10860_v23 }
  0x40   :  { %7928 = vmatmul.msk.bf16.gmra.mxu3 %vm109_vm1, %v10860_v23 }
  0x4e   :  { %7905 = vmatmul.msk.bf16.gmra.mxu0 %vm109_vm1, %v10873_v24  ;;  %7913 = vmatmul.msk.bf16.gmra.mxu1 %vm109_vm1, %v10873_v24 }
  0x4f   :  { %7921 = vmatmul.msk.bf16.gmra.mxu2 %vm109_vm1, %v10873_v24 }
  0x50   :  { %7929 = vmatmul.msk.bf16.gmra.mxu3 %vm109_vm1, %v10873_v24 }
  0x5e   :  { %7906 = vmatmul.msk.bf16.gmra.mxu0 %vm109_vm1, %v10886_v25  ;;  %7914 = vmatmul.msk.bf16.gmra.mxu1 %vm109_vm1, %v10886_v25 }
  0x5f   :  { %7922 = vmatmul.msk.bf16.gmra.mxu2 %vm109_vm1, %v10886_v25 }
  0x60   :  { %7930 = vmatmul.msk.bf16.gmra.mxu3 %vm109_vm1, %v10886_v25 }
  0x6e   :  { %7907 = vmatmul.msk.bf16.gmra.mxu0 %vm109_vm1, %v10899_v26  ;;  %7915 = vmatmul.msk.bf16.gmra.mxu1 %vm109_vm1, %v10899_v26 }
  0x6f   :  { %7923 = vmatmul.msk.bf16.gmra.mxu2 %vm109_vm1, %v10899_v26 }
  0x70   :  { %7931 = vmatmul.msk.bf16.gmra.mxu3 %vm109_vm1, %v10899_v26 }
  0x7e   :  { %7908 = vmatmul.msk.bf16.gmra.mxu0 %vm109_vm1, %v10916_v35  ;;  %7916 = vmatmul.msk.bf16.gmra.mxu1 %vm109_vm1, %v10916_v35 }
  0x7f   :  { %7924 = vmatmul.msk.bf16.gmra.mxu2 %vm109_vm1, %v10916_v35 }
  0x80   :  { %7932 = vmatmul.msk.bf16.gmra.mxu3 %vm109_vm1, %v10916_v35 }
  0x8b   :  { %v176_v36 = vpop.f32.mrf.mxu0  ;;  %v225_v37 = vpop.f32.mrf.mxu1 }
  0x8e   :  { %7933 = vmatmul.msk.bf16.vlgmr.msrb.gmra.mxu0 %vm109_vm1, %v10812_v8  ;;  %7941 = vmatmul.msk.bf16.vlgmr.msrb.gmra.mxu1 %vm109_vm1, %v10812_v8 }
  0x8f   :  { %7949 = vmatmul.msk.bf16.vlgmr.msrb.gmra.mxu2 %vm109_vm1, %v10812_v8 }
  0x90   :  { %7957 = vmatmul.msk.bf16.vlgmr.msrb.gmra.mxu3 %vm109_vm1, %v10812_v8 }
  0x92   :  { %v274_v38 = vpop.f32.mrf.mxu2 }
  0x93   :  { %v323_v39 = vpop.f32.mrf.mxu3  ;;  %v178_v40 = vpop.f32.mrf.mxu0 }
  0x94   :  { %v10934_v41 = vpack.c.bf16 %v178_v40, %v176_v36  ;;  %v227_v42 = vpop.f32.mrf.mxu1 }
  0x95   :  { %v10936_v43 = vpack.c.bf16 %v227_v42, %v225_v37 }
  0x96   :  { %16027 = vst [vmem:[#allocation2_spill] sm:$0xff] %v10934_v41 }
  0x97   :  { %16028 = vst [vmem:[#allocation3_spill] sm:$0xff] %v10936_v43 }
  0x9a   :  { %v276_v44 = vpop.f32.mrf.mxu2 }
  0x9b   :  { %v10938_v45 = vpack.c.bf16 %v276_v44, %v274_v38  ;;  %v325_v46 = vpop.f32.mrf.mxu3  ;;  %v181_v47 = vpop.f32.mrf.mxu0 }
  0x9c   :  { %v10940_v48 = vpack.c.bf16 %v325_v46, %v323_v39  ;;  %v230_v49 = vpop.f32.mrf.mxu1 }
  0x9d   :  { %16029 = vst [vmem:[#allocation4_spill] sm:$0xff] %v10938_v45 }
  0x9e   :  { %16030 = vst [vmem:[#allocation5_spill] sm:$0xff] %v10940_v48  ;;  %7934 = vmatmul.msk.bf16.gmra.mxu0 %vm109_vm1, %v10834_v21  ;;  %7942 = vmatmul.msk.bf16.gmra.mxu1 %vm109_vm1, %v10834_v21 }
  0x9f   :  { %7950 = vmatmul.msk.bf16.gmra.mxu2 %vm109_vm1, %v10834_v21 }
  0xa0   :  { %7958 = vmatmul.msk.bf16.gmra.mxu3 %vm109_vm1, %v10834_v21 }
  0xa2   :  { %v279_v50 = vpop.f32.mrf.mxu2 }
  0xa3   :  { %v328_v51 = vpop.f32.mrf.mxu3  ;;  %v183_v52 = vpop.f32.mrf.mxu0 }
  0xa4   :  { %v10950_v53 = vpack.c.bf16 %v183_v52, %v181_v47  ;;  %v232_v54 = vpop.f32.mrf.mxu1 }
  0xa5   :  { %v10952_v55 = vpack.c.bf16 %v232_v54, %v230_v49 }
  0xa6   :  { %16031 = vst [vmem:[#allocation6_spill] sm:$0xff] %v10950_v53 }
  0xa7   :  { %16032 = vst [vmem:[#allocation7_spill] sm:$0xff] %v10952_v55 }
  0xaa   :  { %v281_v56 = vpop.f32.mrf.mxu2 }
  0xab   :  { %v10954_v57 = vpack.c.bf16 %v281_v56, %v279_v50  ;;  %v330_v58 = vpop.f32.mrf.mxu3  ;;  %v186_v59 = vpop.f32.mrf.mxu0 }
  0xac   :  { %v10956_v60 = vpack.c.bf16 %v330_v58, %v328_v51  ;;  %v235_v61 = vpop.f32.mrf.mxu1 }
  0xad   :  { %16033 = vst [vmem:[#allocation8_spill] sm:$0xff] %v10954_v57 }
  0xae   :  { %16034 = vst [vmem:[#allocation9_spill] sm:$0xff] %v10956_v60  ;;  %7935 = vmatmul.msk.bf16.gmra.mxu0 %vm109_vm1, %v10847_v22  ;;  %7943 = vmatmul.msk.bf16.gmra.mxu1 %vm109_vm1, %v10847_v22 }
  0xaf   :  { %7951 = vmatmul.msk.bf16.gmra.mxu2 %vm109_vm1, %v10847_v22 }
  0xb0   :  { %7959 = vmatmul.msk.bf16.gmra.mxu3 %vm109_vm1, %v10847_v22 }
  0xb2   :  { %v284_v62 = vpop.f32.mrf.mxu2 }
  0xb3   :  { %v333_v63 = vpop.f32.mrf.mxu3  ;;  %v188_v0 = vpop.f32.mrf.mxu0 }
  0xb4   :  { %v10966_v1 = vpack.c.bf16 %v188_v0, %v186_v59  ;;  %v237_v2 = vpop.f32.mrf.mxu1 }
  0xb5   :  { %v10968_v3 = vpack.c.bf16 %v237_v2, %v235_v61 }
  0xb6   :  { %16035 = vst [vmem:[#allocation10_spill] sm:$0xff] %v10966_v1 }
  0xb7   :  { %16036 = vst [vmem:[#allocation11_spill] sm:$0xff] %v10968_v3 }
  0xba   :  { %v286_v4 = vpop.f32.mrf.mxu2 }
  0xbb   :  { %v10970_v5 = vpack.c.bf16 %v286_v4, %v284_v62  ;;  %v335_v6 = vpop.f32.mrf.mxu3  ;;  %v191_v7 = vpop.f32.mrf.mxu0  ;;  %v107_v62 = vld.sshfl [vmem:[#allocation1 + $0x30] sm:$0xff pattern:$0x73625140]  ;;  %v108_v4 = vld.sshfl [vmem:[#allocation1 + $0x38] sm:$0xff pattern:$0x73625140] }
  0xbc   :  { %v10972_v9 = vpack.c.bf16 %v335_v6, %v333_v63  ;;  %v240_v10 = vpop.f32.mrf.mxu1  ;;  %v105_v63 = vld.sshfl [vmem:[#allocation1 + $0x20] sm:$0xff pattern:$0x73625140]  ;;  %v163_v0 = vsel %vm134_vm0, %v107_v62, 0 }
  0xbd   :  { %16037 = vst [vmem:[#allocation12_spill] sm:$0xff] %v10970_v5  ;;  %v159_v2 = vsel %vm134_vm0, %v105_v63, 0  ;;  %860 = vmatpush.bf16.msrb.mxu2 %v163_v0 }
  0xbe   :  { %16038 = vst [vmem:[#allocation13_spill] sm:$0xff] %v10972_v9  ;;  %7936 = vmatmul.msk.bf16.gmra.mxu0 %vm109_vm1, %v10860_v23  ;;  %7944 = vmatmul.msk.bf16.gmra.mxu1 %vm109_vm1, %v10860_v23 }
  0xbf   :  { %7952 = vmatmul.msk.bf16.gmra.mxu2 %vm109_vm1, %v10860_v23  ;;  %762 = vmatpush.bf16.msrb.mxu0 %v159_v2 }
  0xc0   :  { %7960 = vmatmul.msk.bf16.gmra.mxu3 %vm109_vm1, %v10860_v23 }
  0xc2   :  { %v289_v11 = vpop.f32.mrf.mxu2 }
  0xc3   :  { %v338_v12 = vpop.f32.mrf.mxu3  ;;  %v193_v13 = vpop.f32.mrf.mxu0 }
  0xc4   :  { %v10982_v14 = vpack.c.bf16 %v193_v13, %v191_v7  ;;  %v242_v15 = vpop.f32.mrf.mxu1  ;;  %v165_v7 = vsel %vm134_vm0, %v108_v4, 0 }
  0xc5   :  { %v10984_v16 = vpack.c.bf16 %v242_v15, %v240_v10  ;;  %909 = vmatpush.bf16.msrb.mxu3 %v165_v7 }
  0xc6   :  { %16039 = vst [vmem:[#allocation14_spill] sm:$0xff] %v10982_v14 }
  0xc7   :  { %16040 = vst [vmem:[#allocation15_spill] sm:$0xff] %v10984_v16 }
  0xca   :  { %v291_v17 = vpop.f32.mrf.mxu2 }
  0xcb   :  { %v10986_v18 = vpack.c.bf16 %v291_v17, %v289_v11  ;;  %v340_v19 = vpop.f32.mrf.mxu3  ;;  %v196_v20 = vpop.f32.mrf.mxu0 }
  0xcc   :  { %v10988_v27 = vpack.c.bf16 %v340_v19, %v338_v12  ;;  %v245_v28 = vpop.f32.mrf.mxu1  ;;  %v106_v12 = vld.sshfl [vmem:[#allocation1 + $0x28] sm:$0xff pattern:$0x73625140] }
  0xcd   :  { %16041 = vst [vmem:[#allocation16_spill] sm:$0xff] %v10986_v18  ;;  %v161_v17 = vsel %vm134_vm0, %v106_v12, 0 }
  0xce   :  { %16042 = vst [vmem:[#allocation17_spill] sm:$0xff] %v10988_v27  ;;  %7937 = vmatmul.msk.bf16.gmra.mxu0 %vm109_vm1, %v10873_v24  ;;  %7945 = vmatmul.msk.bf16.gmra.mxu1 %vm109_vm1, %v10873_v24 }
  0xcf   :  { %7953 = vmatmul.msk.bf16.gmra.mxu2 %vm109_vm1, %v10873_v24  ;;  %811 = vmatpush.bf16.msrb.mxu1 %v161_v17 }
  0xd0   :  { %7961 = vmatmul.msk.bf16.gmra.mxu3 %vm109_vm1, %v10873_v24 }
  0xd2   :  { %v294_v29 = vpop.f32.mrf.mxu2 }
  0xd3   :  { %v343_v30 = vpop.f32.mrf.mxu3  ;;  %v198_v31 = vpop.f32.mrf.mxu0 }
  0xd4   :  { %v10998_v32 = vpack.c.bf16 %v198_v31, %v196_v20  ;;  %v247_v33 = vpop.f32.mrf.mxu1 }
  0xd5   :  { %v11000_v34 = vpack.c.bf16 %v247_v33, %v245_v28 }
  0xd6   :  { %16043 = vst [vmem:[#allocation18_spill] sm:$0xff] %v10998_v32 }
  0xd7   :  { %16044 = vst [vmem:[#allocation19_spill] sm:$0xff] %v11000_v34 }
  0xda   :  { %v296_v36 = vpop.f32.mrf.mxu2 }
  0xdb   :  { %v11002_v37 = vpack.c.bf16 %v296_v36, %v294_v29  ;;  %v345_v38 = vpop.f32.mrf.mxu3  ;;  %v201_v39 = vpop.f32.mrf.mxu0 }
  0xdc   :  { %v11004_v40 = vpack.c.bf16 %v345_v38, %v343_v30  ;;  %v250_v42 = vpop.f32.mrf.mxu1 }
  0xdd   :  { %16045 = vst [vmem:[#allocation20_spill] sm:$0xff] %v11002_v37 }
  0xde   :  { %16046 = vst [vmem:[#allocation21_spill] sm:$0xff] %v11004_v40  ;;  %7938 = vmatmul.msk.bf16.gmra.mxu0 %vm109_vm1, %v10886_v25  ;;  %7946 = vmatmul.msk.bf16.gmra.mxu1 %vm109_vm1, %v10886_v25 }
  0xdf   :  { %7954 = vmatmul.msk.bf16.gmra.mxu2 %vm109_vm1, %v10886_v25 }
  0xe0   :  { %7962 = vmatmul.msk.bf16.gmra.mxu3 %vm109_vm1, %v10886_v25 }
  0xe2   :  { %v299_v44 = vpop.f32.mrf.mxu2 }
  0xe3   :  { %v348_v46 = vpop.f32.mrf.mxu3  ;;  %v203_v47 = vpop.f32.mrf.mxu0 }
  0xe4   :  { %v11014_v49 = vpack.c.bf16 %v203_v47, %v201_v39  ;;  %v252_v50 = vpop.f32.mrf.mxu1 }
  0xe5   :  { %v11016_v51 = vpack.c.bf16 %v252_v50, %v250_v42 }
  0xe6   :  { %16047 = vst [vmem:[#allocation22_spill] sm:$0xff] %v11014_v49 }
  0xe7   :  { %16048 = vst [vmem:[#allocation23_spill] sm:$0xff] %v11016_v51 }
  0xea   :  { %v301_v52 = vpop.f32.mrf.mxu2 }
  0xeb   :  { %v11018_v54 = vpack.c.bf16 %v301_v52, %v299_v44  ;;  %v350_v56 = vpop.f32.mrf.mxu3  ;;  %v206_v58 = vpop.f32.mrf.mxu0 }
  0xec   :  { %v11020_v59 = vpack.c.bf16 %v350_v56, %v348_v46  ;;  %v255_v61 = vpop.f32.mrf.mxu1 }
  0xed   :  { %16049 = vst [vmem:[#allocation24_spill] sm:$0xff] %v11018_v54 }
  0xee   :  { %16050 = vst [vmem:[#allocation25_spill] sm:$0xff] %v11020_v59  ;;  %7939 = vmatmul.msk.bf16.gmra.mxu0 %vm109_vm1, %v10899_v26  ;;  %7947 = vmatmul.msk.bf16.gmra.mxu1 %vm109_vm1, %v10899_v26 }
  0xef   :  { %7955 = vmatmul.msk.bf16.gmra.mxu2 %vm109_vm1, %v10899_v26 }
  0xf0   :  { %7963 = vmatmul.msk.bf16.gmra.mxu3 %vm109_vm1, %v10899_v26 }
  0xf2   :  { %v304_v6 = vpop.f32.mrf.mxu2 }
  0xf3   :  { %v353_v10 = vpop.f32.mrf.mxu3  ;;  %v208_v11 = vpop.f32.mrf.mxu0 }
  0xf4   :  { %v11033_v13 = vpack.c.bf16 %v208_v11, %v206_v58  ;;  %v257_v15 = vpop.f32.mrf.mxu1 }
  0xf5   :  { %v11036_v19 = vpack.c.bf16 %v257_v15, %v255_v61 }
  0xf6   :  { %16051 = vst [vmem:[#allocation26_spill] sm:$0xff] %v11033_v13 }
  0xf7   :  { %16052 = vst [vmem:[#allocation27_spill] sm:$0xff] %v11036_v19 }
  0xfa   :  { %v306_v20 = vpop.f32.mrf.mxu2 }
  0xfb   :  { %v11038_v28 = vpack.c.bf16 %v306_v20, %v304_v6  ;;  %v355_v29 = vpop.f32.mrf.mxu3  ;;  %v211_v30 = vpop.f32.mrf.mxu0 }
  0xfc   :  { %v11040_v31 = vpack.c.bf16 %v355_v29, %v353_v10  ;;  %v260_v33 = vpop.f32.mrf.mxu1 }
  0xfd   :  { %16053 = vst [vmem:[#allocation28_spill] sm:$0xff] %v11038_v28 }
  0xfe   :  { %16054 = vst [vmem:[#allocation29_spill] sm:$0xff] %v11040_v31  ;;  %7940 = vmatmul.msk.bf16.gmra.mxu0 %vm109_vm1, %v10916_v35  ;;  %7948 = vmatmul.msk.bf16.gmra.mxu1 %vm109_vm1, %v10916_v35 }
  0xff   :  { %7956 = vmatmul.msk.bf16.gmra.mxu2 %vm109_vm1, %v10916_v35 }
 0x100   :  { %7964 = vmatmul.msk.bf16.gmra.mxu3 %vm109_vm1, %v10916_v35 }
 0x102   :  { %v309_v36 = vpop.f32.mrf.mxu2 }
 0x103   :  { %v358_v38 = vpop.f32.mrf.mxu3  ;;  %v213_v39 = vpop.f32.mrf.mxu0 }
 0x104   :  { %v11050_v42 = vpack.c.bf16 %v213_v39, %v211_v30  ;;  %v262_v44 = vpop.f32.mrf.mxu1 }
 0x105   :  { %v11052_v46 = vpack.c.bf16 %v262_v44, %v260_v33 }
 0x106   :  { %16055 = vst [vmem:[#allocation30_spill] sm:$0xff] %v11050_v42 }
 0x107   :  { %16056 = vst [vmem:[#allocation31_spill] sm:$0xff] %v11052_v46 }
 0x10a   :  { %v311_v47 = vpop.f32.mrf.mxu2 }
 0x10b   :  { %v11054_v50 = vpack.c.bf16 %v311_v47, %v309_v36  ;;  %v360_v52 = vpop.f32.mrf.mxu3  ;;  %v372_v56 = vpop.f32.mrf.mxu0 }
 0x10c   :  { %v11056_v58 = vpack.c.bf16 %v360_v52, %v358_v38  ;;  %v421_v61 = vpop.f32.mrf.mxu1 }
 0x10d   :  { %16057 = vst [vmem:[#allocation32_spill] sm:$0xff] %v11054_v50 }
 0x10e   :  { %16058 = vst [vmem:[#allocation33_spill] sm:$0xff] %v11056_v58  ;;  %7965 = vmatmul.msk.bf16.vlgmr.msra.gmra.mxu0 %vm109_vm1, %v10812_v8  ;;  %7973 = vmatmul.msk.bf16.vlgmr.msra.gmra.mxu1 %vm109_vm1, %v10812_v8 }
 0x10f   :  { %7981 = vmatmul.msk.bf16.vlgmr.msra.gmra.mxu2 %vm109_vm1, %v10812_v8 }
 0x110   :  { %7989 = vmatmul.msk.bf16.vlgmr.msra.gmra.mxu3 %vm109_vm1, %v10812_v8 }
 0x112   :  { %v470_v62 = vpop.f32.mrf.mxu2 }
 0x113   :  { %v519_v63 = vpop.f32.mrf.mxu3  ;;  %v374_v0 = vpop.f32.mrf.mxu0 }
 0x114   :  { %v11066_v2 = vpack.c.bf16 %v374_v0, %v372_v56  ;;  %v423_v4 = vpop.f32.mrf.mxu1 }
 0x115   :  { %v11068_v6 = vpack.c.bf16 %v423_v4, %v421_v61 }
 0x116   :  { %16059 = vst [vmem:[#allocation34_spill] sm:$0xff] %v11066_v2 }
 0x117   :  { %16060 = vst [vmem:[#allocation35_spill] sm:$0xff] %v11068_v6 }
 0x11a   :  { %v472_v7 = vpop.f32.mrf.mxu2 }
 0x11b   :  { %v11070_v10 = vpack.c.bf16 %v472_v7, %v470_v62  ;;  %v521_v11 = vpop.f32.mrf.mxu3  ;;  %v377_v12 = vpop.f32.mrf.mxu0 }
 0x11c   :  { %v11072_v15 = vpack.c.bf16 %v521_v11, %v519_v63  ;;  %v426_v17 = vpop.f32.mrf.mxu1 }
 0x11d   :  { %16061 = vst [vmem:[#allocation36_spill] sm:$0xff] %v11070_v10 }
 0x11e   :  { %16062 = vst [vmem:[#allocation37_spill] sm:$0xff] %v11072_v15  ;;  %7966 = vmatmul.msk.bf16.gmra.mxu0 %vm109_vm1, %v10834_v21  ;;  %7974 = vmatmul.msk.bf16.gmra.mxu1 %vm109_vm1, %v10834_v21 }
 0x11f   :  { %7982 = vmatmul.msk.bf16.gmra.mxu2 %vm109_vm1, %v10834_v21 }
 0x120   :  { %7990 = vmatmul.msk.bf16.gmra.mxu3 %vm109_vm1, %v10834_v21 }
 0x122   :  { %v475_v20 = vpop.f32.mrf.mxu2 }
 0x123   :  { %v524_v29 = vpop.f32.mrf.mxu3  ;;  %v379_v30 = vpop.f32.mrf.mxu0 }
 0x124   :  { %v11082_v33 = vpack.c.bf16 %v379_v30, %v377_v12  ;;  %v428_v36 = vpop.f32.mrf.mxu1 }
 0x125   :  { %v11084_v38 = vpack.c.bf16 %v428_v36, %v426_v17 }
 0x126   :  { %16063 = vst [vmem:[#allocation38_spill] sm:$0xff] %v11082_v33 }
 0x127   :  { %16064 = vst [vmem:[#allocation39_spill] sm:$0xff] %v11084_v38 }
 0x12a   :  { %v477_v39 = vpop.f32.mrf.mxu2 }
 0x12b   :  { %v11086_v44 = vpack.c.bf16 %v477_v39, %v475_v20  ;;  %v526_v47 = vpop.f32.mrf.mxu3  ;;  %v382_v52 = vpop.f32.mrf.mxu0 }
 0x12c   :  { %v11088_v56 = vpack.c.bf16 %v526_v47, %v524_v29  ;;  %v431_v61 = vpop.f32.mrf.mxu1 }
 0x12d   :  { %16065 = vst [vmem:[#allocation40_spill] sm:$0xff] %v11086_v44 }
 0x12e   :  { %16066 = vst [vmem:[#allocation41_spill] sm:$0xff] %v11088_v56  ;;  %7967 = vmatmul.msk.bf16.gmra.mxu0 %vm109_vm1, %v10847_v22  ;;  %7975 = vmatmul.msk.bf16.gmra.mxu1 %vm109_vm1, %v10847_v22 }
 0x12f   :  { %7983 = vmatmul.msk.bf16.gmra.mxu2 %vm109_vm1, %v10847_v22 }
 0x130   :  { %7991 = vmatmul.msk.bf16.gmra.mxu3 %vm109_vm1, %v10847_v22 }
 0x132   :  { %v480_v62 = vpop.f32.mrf.mxu2 }
 0x133   :  { %v529_v63 = vpop.f32.mrf.mxu3  ;;  %v384_v0 = vpop.f32.mrf.mxu0 }
 0x134   :  { %v11098_v4 = vpack.c.bf16 %v384_v0, %v382_v52  ;;  %v433_v7 = vpop.f32.mrf.mxu1 }
 0x135   :  { %v11100_v11 = vpack.c.bf16 %v433_v7, %v431_v61 }
 0x136   :  { %16067 = vst [vmem:[#allocation42_spill] sm:$0xff] %v11098_v4 }
 0x137   :  { %16068 = vst [vmem:[#allocation43_spill] sm:$0xff] %v11100_v11 }
 0x13a   :  { %v482_v12 = vpop.f32.mrf.mxu2 }
 0x13b   :  { %v11102_v17 = vpack.c.bf16 %v482_v12, %v480_v62  ;;  %v531_v20 = vpop.f32.mrf.mxu3  ;;  %v387_v29 = vpop.f32.mrf.mxu0 }
 0x13c   :  { %v11104_v30 = vpack.c.bf16 %v531_v20, %v529_v63  ;;  %v436_v36 = vpop.f32.mrf.mxu1 }
 0x13d   :  { %16069 = vst [vmem:[#allocation44_spill] sm:$0xff] %v11102_v17 }
 0x13e   :  { %16070 = vst [vmem:[#allocation45_spill] sm:$0xff] %v11104_v30  ;;  %7968 = vmatmul.msk.bf16.gmra.mxu0 %vm109_vm1, %v10860_v23  ;;  %7976 = vmatmul.msk.bf16.gmra.mxu1 %vm109_vm1, %v10860_v23 }
 0x13f   :  { %7984 = vmatmul.msk.bf16.gmra.mxu2 %vm109_vm1, %v10860_v23 }
 0x140   :  { %7992 = vmatmul.msk.bf16.gmra.mxu3 %vm109_vm1, %v10860_v23 }
 0x142   :  { %v485_v39 = vpop.f32.mrf.mxu2 }
 0x143   :  { %v534_v47 = vpop.f32.mrf.mxu3  ;;  %v389_v52 = vpop.f32.mrf.mxu0 }
 0x144   :  { %v11114_v61 = vpack.c.bf16 %v389_v52, %v387_v29  ;;  %v438_v62 = vpop.f32.mrf.mxu1 }
 0x145   :  { %v11116_v63 = vpack.c.bf16 %v438_v62, %v436_v36 }
 0x146   :  { %16071 = vst [vmem:[#allocation46_spill] sm:$0xff] %v11114_v61 }
 0x147   :  { %16072 = vst [vmem:[#allocation47_spill] sm:$0xff] %v11116_v63 }
 0x14a   :  { %v487_v0 = vpop.f32.mrf.mxu2 }
 0x14b   :  { %v11118_v7 = vpack.c.bf16 %v487_v0, %v485_v39  ;;  %v536_v12 = vpop.f32.mrf.mxu3  ;;  %v392_v20 = vpop.f32.mrf.mxu0 }
 0x14c   :  { %v11120_v30 = vpack.c.bf16 %v536_v12, %v534_v47  ;;  %v441_v17 = vpop.f32.mrf.mxu1 }
 0x14d   :  { %16073 = vst [vmem:[#allocation48_spill] sm:$0xff] %v11118_v7 }
 0x14e   :  { %16074 = vst [vmem:[#allocation49_spill] sm:$0xff] %v11120_v30  ;;  %7969 = vmatmul.msk.bf16.gmra.mxu0 %vm109_vm1, %v10873_v24  ;;  %7977 = vmatmul.msk.bf16.gmra.mxu1 %vm109_vm1, %v10873_v24 }
 0x14f   :  { %7985 = vmatmul.msk.bf16.gmra.mxu2 %vm109_vm1, %v10873_v24 }
 0x150   :  { %7993 = vmatmul.msk.bf16.gmra.mxu3 %vm109_vm1, %v10873_v24 }
 0x152   :  { %v490_v29 = vpop.f32.mrf.mxu2 }
 0x153   :  { %v539_v36 = vpop.f32.mrf.mxu3  ;;  %v394_v39 = vpop.f32.mrf.mxu0 }
 0x154   :  { %v11130_v52 = vpack.c.bf16 %v394_v39, %v392_v20  ;;  %v443_v47 = vpop.f32.mrf.mxu1 }
 0x155   :  { %v11132_v62 = vpack.c.bf16 %v443_v47, %v441_v17 }
 0x156   :  { %16075 = vst [vmem:[#allocation50_spill] sm:$0xff] %v11130_v52 }
 0x157   :  { %16076 = vst [vmem:[#allocation51_spill] sm:$0xff] %v11132_v62 }
 0x15a   :  { %v492_v0 = vpop.f32.mrf.mxu2 }
 0x15b   :  { %v11134_v12 = vpack.c.bf16 %v492_v0, %v490_v29  ;;  %v541_v30 = vpop.f32.mrf.mxu3  ;;  %v397_v7 = vpop.f32.mrf.mxu0 }
 0x15c   :  { %v11136_v63 = vpack.c.bf16 %v541_v30, %v539_v36  ;;  %v446_v61 = vpop.f32.mrf.mxu1 }
 0x15d   :  { %16077 = vst [vmem:[#allocation52_spill] sm:$0xff] %v11134_v12 }
 0x15e   :  { %16078 = vst [vmem:[#allocation53_spill] sm:$0xff] %v11136_v63  ;;  %7970 = vmatmul.msk.bf16.gmra.mxu0 %vm109_vm1, %v10886_v25  ;;  %7978 = vmatmul.msk.bf16.gmra.mxu1 %vm109_vm1, %v10886_v25 }
 0x15f   :  { %7986 = vmatmul.msk.bf16.gmra.mxu2 %vm109_vm1, %v10886_v25 }
 0x160   :  { %7994 = vmatmul.msk.bf16.gmra.mxu3 %vm109_vm1, %v10886_v25 }
 0x162   :  { %v495_v17 = vpop.f32.mrf.mxu2 }
 0x163   :  { %v544_v20 = vpop.f32.mrf.mxu3  ;;  %v399_v29 = vpop.f32.mrf.mxu0 }
 0x164   :  { %v11146_v39 = vpack.c.bf16 %v399_v29, %v397_v7  ;;  %v448_v30 = vpop.f32.mrf.mxu1  ;;  %v8143_v7 = vld [vmem:[%s15871_s2 + $0xe0] sm:$0xf]  ;;  %v10339_v29 = vld [vmem:[%s15871_s2 + $0x3ec] sm:$0xf0] }
 0x165   :  { %v11148_v36 = vpack.c.bf16 %v448_v30, %v446_v61  ;;  %v8399_v61 = vld [vmem:[%s15871_s2 + $0x2e0] sm:$0xf] }
 0x166   :  { %16079 = vst [vmem:[#allocation54_spill] sm:$0xff] %v11146_v39 }
 0x167   :  { %16080 = vst [vmem:[#allocation55_spill] sm:$0xff] %v11148_v36 }
 0x16a   :  { %v497_v47 = vpop.f32.mrf.mxu2 }
 0x16b   :  { %v11150_v0 = vpack.c.bf16 %v497_v47, %v495_v17  ;;  %v546_v63 = vpop.f32.mrf.mxu3  ;;  %v402_v12 = vpop.f32.mrf.mxu0 }
 0x16c   :  { %v11152_v62 = vpack.c.bf16 %v546_v63, %v544_v20  ;;  %v451_v52 = vpop.f32.mrf.mxu1  ;;  %v10307_v63 = vld [vmem:[%s15871_s2 + $0x2ec] sm:$0xf0] }
 0x16d   :  { %16081 = vst [vmem:[#allocation56_spill] sm:$0xff] %v11150_v0  ;;  %v8400_v17 = vor.u32 %v10307_v63, %v8399_v61  ;;  %v10243_v20 = vld [vmem:[%s15871_s2 + $0xec] sm:$0xf0]  ;;  %v8271_v61 = vld [vmem:[%s15871_s2 + $0x1e0] sm:$0xf] }
 0x16e   :  { %16082 = vst [vmem:[#allocation57_spill] sm:$0xff] %v11152_v62  ;;  %7971 = vmatmul.msk.bf16.gmra.mxu0 %vm109_vm1, %v10899_v26  ;;  %7979 = vmatmul.msk.bf16.gmra.mxu1 %vm109_vm1, %v10899_v26  ;;  %v8144_v47 = vor.u32 %v10243_v20, %v8143_v7  ;;  %v10275_v63 = vld [vmem:[%s15871_s2 + $0x1ec] sm:$0xf0] }
 0x16f   :  { %7987 = vmatmul.msk.bf16.gmra.mxu2 %vm109_vm1, %v10899_v26  ;;  %v8272_v4 = vor.u32 %v10275_v63, %v8271_v61 }
 0x170   :  { %7995 = vmatmul.msk.bf16.gmra.mxu3 %vm109_vm1, %v10899_v26  ;;  %v8527_v26 = vld [vmem:[%s15871_s2 + $0x3e0] sm:$0xf]  ;;  %4259 = vmatpush.bf16.msra.mxu2 %v8400_v17 }
 0x171   :  { %v8528_v62 = vor.u32 %v10339_v29, %v8527_v26  ;;  %4161 = vmatpush.bf16.msra.mxu0 %v8144_v47  ;;  %4210 = vmatpush.bf16.msra.mxu1 %v8272_v4  ;;  %v8383_v4 = vld [vmem:[%s15871_s2 + $0x2c0] sm:$0xf] }
 0x172   :  { %v500_v30 = vpop.f32.mrf.mxu2 }
 0x173   :  { %v549_v0 = vpop.f32.mrf.mxu3  ;;  %v404_v36 = vpop.f32.mrf.mxu0  ;;  %4308 = vmatpush.bf16.msra.mxu3 %v8528_v62 }
 0x174   :  { %v11186_v39 = vpack.c.bf16 %v404_v36, %v402_v12  ;;  %v453_v11 = vpop.f32.mrf.mxu1  ;;  %v10239_v12 = vld [vmem:[%s15871_s2 + $0xcc] sm:$0xf0] }
 0x175   :  { %v11188_v56 = vpack.c.bf16 %v453_v11, %v451_v52  ;;  %v10303_v11 = vld [vmem:[%s15871_s2 + $0x2cc] sm:$0xf0]  ;;  %v8127_v52 = vld [vmem:[%s15871_s2 + $0xc0] sm:$0xf] }
 0x176   :  { %16083 = vst [vmem:[#allocation58_spill] sm:$0xff] %v11186_v39  ;;  %v8384_v62 = vor.u32 %v10303_v11, %v8383_v4  ;;  %v10335_v36 = vld [vmem:[%s15871_s2 + $0x3cc] sm:$0xf0] }
 0x177   :  { %16084 = vst [vmem:[#allocation59_spill] sm:$0xff] %v11188_v56 }
 0x178   :  { %4260 = vmatpush.bf16.msra.mxu2 %v8384_v62 }
 0x17a   :  { %v502_v7 = vpop.f32.mrf.mxu2 }
 0x17b   :  { %v11190_v20 = vpack.c.bf16 %v502_v7, %v500_v30  ;;  %v551_v17 = vpop.f32.mrf.mxu3  ;;  %v407_v26 = vpop.f32.mrf.mxu0  ;;  %v8128_v30 = vor.u32 %v10239_v12, %v8127_v52  ;;  %v8255_v7 = vld [vmem:[%s15871_s2 + $0x1c0] sm:$0xf] }
 0x17c   :  { %v11192_v29 = vpack.c.bf16 %v551_v17, %v549_v0  ;;  %v456_v44 = vpop.f32.mrf.mxu1  ;;  %v10271_v17 = vld [vmem:[%s15871_s2 + $0x1cc] sm:$0xf0] }
 0x17d   :  { %16085 = vst [vmem:[#allocation60_spill] sm:$0xff] %v11190_v20  ;;  %4162 = vmatpush.bf16.msra.mxu0 %v8128_v30  ;;  %v10235_v30 = vld [vmem:[%s15871_s2 + $0xac] sm:$0xf0] }
 0x17e   :  { %16086 = vst [vmem:[#allocation61_spill] sm:$0xff] %v11192_v29  ;;  %7972 = vmatmul.msk.bf16.gmra.mxu0 %vm109_vm1, %v10916_v35  ;;  %7980 = vmatmul.msk.bf16.gmra.mxu1 %vm109_vm1, %v10916_v35  ;;  %v8256_v29 = vor.u32 %v10271_v17, %v8255_v7 }
 0x17f   :  { %7988 = vmatmul.msk.bf16.gmra.mxu2 %vm109_vm1, %v10916_v35 }
 0x180   :  { %7996 = vmatmul.msk.bf16.gmra.mxu3 %vm109_vm1, %v10916_v35  ;;  %v8511_v35 = vld [vmem:[%s15871_s2 + $0x3c0] sm:$0xf]  ;;  %4211 = vmatpush.bf16.msra.mxu1 %v8256_v29 }
 0x181   :  { %v8512_v47 = vor.u32 %v10335_v36, %v8511_v35  ;;  %v8111_v29 = vld [vmem:[%s15871_s2 + $0xa0] sm:$0xf] }
 0x182   :  { %v505_v0 = vpop.f32.mrf.mxu2 }
 0x183   :  { %v554_v61 = vpop.f32.mrf.mxu3  ;;  %v409_v63 = vpop.f32.mrf.mxu0  ;;  %4309 = vmatpush.bf16.msra.mxu3 %v8512_v47  ;;  %v10331_v47 = vld [vmem:[%s15871_s2 + $0x3ac] sm:$0xf0] }
 0x184   :  { %v11226_v4 = vpack.c.bf16 %v409_v63, %v407_v26  ;;  %v458_v11 = vpop.f32.mrf.mxu1  ;;  %v10299_v26 = vld [vmem:[%s15871_s2 + $0x2ac] sm:$0xf0]  ;;  %v8112_v63 = vor.u32 %v10235_v30, %v8111_v29 }
 0x185   :  { %v11228_v20 = vpack.c.bf16 %v458_v11, %v456_v44  ;;  %v8367_v44 = vld [vmem:[%s15871_s2 + $0x2a0] sm:$0xf] }
 0x186   :  { %16087 = vst [vmem:[#allocation62_spill] sm:$0xff] %v11226_v4  ;;  %4163 = vmatpush.bf16.msra.mxu0 %v8112_v63  ;;  %v10231_v63 = vld [vmem:[%s15871_s2 + $0x8c] sm:$0xf0] }
 0x187   :  { %16088 = vst [vmem:[#allocation63_spill] sm:$0xff] %v11228_v20 }
 0x18a   :  { %v507_v52 = vpop.f32.mrf.mxu2 }
 0x18b   :  { %v11230_v12 = vpack.c.bf16 %v507_v52, %v505_v0  ;;  %v556_v62 = vpop.f32.mrf.mxu3  ;;  %v568_v35 = vpop.f32.mrf.mxu0  ;;  %v8368_v0 = vor.u32 %v10299_v26, %v8367_v44  ;;  %v8239_v52 = vld [vmem:[%s15871_s2 + $0x1a0] sm:$0xf] }
 0x18c   :  { %v11232_v36 = vpack.c.bf16 %v556_v62, %v554_v61  ;;  %v617_v56 = vpop.f32.mrf.mxu1  ;;  %v10267_v62 = vld [vmem:[%s15871_s2 + $0x1ac] sm:$0xf0] }
 0x18d   :  { %16089 = vst [vmem:[#allocation64_spill] sm:$0xff] %v11230_v12  ;;  %4261 = vmatpush.bf16.msra.mxu2 %v8368_v0 }
 0x18e   :  { %16090 = vst [vmem:[#allocation65_spill] sm:$0xff] %v11232_v36  ;;  %7997 = vmatmul.msk.bf16.vlgmr.msrb.gmra.mxu0 %vm109_vm1, %v10812_v8  ;;  %8005 = vmatmul.msk.bf16.vlgmr.msrb.gmra.mxu1 %vm109_vm1, %v10812_v8  ;;  %v8240_v36 = vor.u32 %v10267_v62, %v8239_v52 }
 0x18f   :  { %8013 = vmatmul.msk.bf16.vlgmr.msrb.gmra.mxu2 %vm109_vm1, %v10812_v8 }
 0x190   :  { %8021 = vmatmul.msk.bf16.vlgmr.msrb.gmra.mxu3 %vm109_vm1, %v10812_v8  ;;  %v8495_v8 = vld [vmem:[%s15871_s2 + $0x3a0] sm:$0xf]  ;;  %4212 = vmatpush.bf16.msra.mxu1 %v8240_v36 }
 0x191   :  { %v8496_v7 = vor.u32 %v10331_v47, %v8495_v8  ;;  %v8095_v36 = vld [vmem:[%s15871_s2 + $0x80] sm:$0xf] }
 0x192   :  { %v666_v61 = vpop.f32.mrf.mxu2 }
 0x193   :  { %v715_v17 = vpop.f32.mrf.mxu3  ;;  %v570_v11 = vpop.f32.mrf.mxu0  ;;  %4310 = vmatpush.bf16.msra.mxu3 %v8496_v7  ;;  %v10327_v7 = vld [vmem:[%s15871_s2 + $0x38c] sm:$0xf0] }
 0x194   :  { %v11266_v44 = vpack.c.bf16 %v570_v11, %v568_v35  ;;  %v619_v26 = vpop.f32.mrf.mxu1  ;;  %v10295_v35 = vld [vmem:[%s15871_s2 + $0x28c] sm:$0xf0]  ;;  %v8096_v11 = vor.u32 %v10231_v63, %v8095_v36 }
 0x195   :  { %v11268_v12 = vpack.c.bf16 %v619_v26, %v617_v56  ;;  %v8351_v56 = vld [vmem:[%s15871_s2 + $0x280] sm:$0xf] }
 0x196   :  { %4164 = vmatpush.bf16.msra.mxu0 %v8096_v11  ;;  %v10227_v11 = vld [vmem:[%s15871_s2 + $0x6c] sm:$0xf0] }
 0x197   :  { %16091 = vst [vmem:[#allocation66_spill] sm:$0xff] %v11268_v12 }
 0x19a   :  { %v668_v29 = vpop.f32.mrf.mxu2 }
 0x19b   :  { %v11270_v30 = vpack.c.bf16 %v668_v29, %v666_v61  ;;  %v717_v0 = vpop.f32.mrf.mxu3  ;;  %v573_v8 = vpop.f32.mrf.mxu0  ;;  %v8352_v61 = vor.u32 %v10295_v35, %v8351_v56  ;;  %v8223_v29 = vld [vmem:[%s15871_s2 + $0x180] sm:$0xf] }
 0x19c   :  { %v11272_v47 = vpack.c.bf16 %v717_v0, %v715_v17  ;;  %v622_v20 = vpop.f32.mrf.mxu1  ;;  %v10263_v0 = vld [vmem:[%s15871_s2 + $0x18c] sm:$0xf0] }
 0x19d   :  { %16092 = vst [vmem:[#allocation67_spill] sm:$0xff] %v11270_v30  ;;  %4262 = vmatpush.bf16.msra.mxu2 %v8352_v61 }
 0x19e   :  { %16093 = vst [vmem:[#allocation68_spill] sm:$0xff] %v11272_v47  ;;  %7998 = vmatmul.msk.bf16.gmra.mxu0 %vm109_vm1, %v10834_v21  ;;  %8006 = vmatmul.msk.bf16.gmra.mxu1 %vm109_vm1, %v10834_v21  ;;  %v8224_v47 = vor.u32 %v10263_v0, %v8223_v29 }
 0x19f   :  { %8014 = vmatmul.msk.bf16.gmra.mxu2 %vm109_vm1, %v10834_v21 }
 0x1a0   :  { %8022 = vmatmul.msk.bf16.gmra.mxu3 %vm109_vm1, %v10834_v21  ;;  %v8479_v21 = vld [vmem:[%s15871_s2 + $0x380] sm:$0xf]  ;;  %4213 = vmatpush.bf16.msra.mxu1 %v8224_v47 }
 0x1a1   :  { %v8480_v52 = vor.u32 %v10327_v7, %v8479_v21  ;;  %v8079_v47 = vld [vmem:[%s15871_s2 + $0x60] sm:$0xf] }
 0x1a2   :  { %v671_v17 = vpop.f32.mrf.mxu2 }
 0x1a3   :  { %v720_v62 = vpop.f32.mrf.mxu3  ;;  %v575_v26 = vpop.f32.mrf.mxu0  ;;  %4311 = vmatpush.bf16.msra.mxu3 %v8480_v52  ;;  %v10323_v52 = vld [vmem:[%s15871_s2 + $0x36c] sm:$0xf0] }
 0x1a4   :  { %v11306_v56 = vpack.c.bf16 %v575_v26, %v573_v8  ;;  %v624_v35 = vpop.f32.mrf.mxu1  ;;  %v10291_v8 = vld [vmem:[%s15871_s2 + $0x26c] sm:$0xf0]  ;;  %v8080_v26 = vor.u32 %v10227_v11, %v8079_v47 }
 0x1a5   :  { %v11308_v30 = vpack.c.bf16 %v624_v35, %v622_v20  ;;  %v8335_v20 = vld [vmem:[%s15871_s2 + $0x260] sm:$0xf] }
 0x1a6   :  { %4165 = vmatpush.bf16.msra.mxu0 %v8080_v26  ;;  %v10223_v26 = vld [vmem:[%s15871_s2 + $0x4c] sm:$0xf0] }
 0x1a7   :  { %16094 = vst [vmem:[#allocation69_spill] sm:$0xff] %v11308_v30 }
 0x1aa   :  { %v673_v36 = vpop.f32.mrf.mxu2 }
 0x1ab   :  { %v11310_v63 = vpack.c.bf16 %v673_v36, %v671_v17  ;;  %v722_v61 = vpop.f32.mrf.mxu3  ;;  %v578_v21 = vpop.f32.mrf.mxu0  ;;  %v8336_v17 = vor.u32 %v10291_v8, %v8335_v20  ;;  %v8207_v36 = vld [vmem:[%s15871_s2 + $0x160] sm:$0xf] }
 0x1ac   :  { %v11312_v7 = vpack.c.bf16 %v722_v61, %v720_v62  ;;  %v627_v12 = vpop.f32.mrf.mxu1  ;;  %v10259_v61 = vld [vmem:[%s15871_s2 + $0x16c] sm:$0xf0] }
 0x1ad   :  { %16095 = vst [vmem:[#allocation70_spill] sm:$0xff] %v11310_v63  ;;  %4263 = vmatpush.bf16.msra.mxu2 %v8336_v17 }
 0x1ae   :  { %16096 = vst [vmem:[#allocation71_spill] sm:$0xff] %v11312_v7  ;;  %7999 = vmatmul.msk.bf16.gmra.mxu0 %vm109_vm1, %v10847_v22  ;;  %8007 = vmatmul.msk.bf16.gmra.mxu1 %vm109_vm1, %v10847_v22  ;;  %v8208_v7 = vor.u32 %v10259_v61, %v8207_v36 }
 0x1af   :  { %8015 = vmatmul.msk.bf16.gmra.mxu2 %vm109_vm1, %v10847_v22 }
 0x1b0   :  { %8023 = vmatmul.msk.bf16.gmra.mxu3 %vm109_vm1, %v10847_v22  ;;  %v8463_v22 = vld [vmem:[%s15871_s2 + $0x360] sm:$0xf]  ;;  %4214 = vmatpush.bf16.msra.mxu1 %v8208_v7 }
 0x1b1   :  { %v8464_v29 = vor.u32 %v10323_v52, %v8463_v22  ;;  %v8063_v7 = vld [vmem:[%s15871_s2 + $0x40] sm:$0xf] }
 0x1b2   :  { %v676_v62 = vpop.f32.mrf.mxu2 }
 0x1b3   :  { %v725_v0 = vpop.f32.mrf.mxu3  ;;  %v580_v35 = vpop.f32.mrf.mxu0  ;;  %4312 = vmatpush.bf16.msra.mxu3 %v8464_v29  ;;  %v10319_v29 = vld [vmem:[%s15871_s2 + $0x34c] sm:$0xf0] }
 0x1b4   :  { %v11346_v20 = vpack.c.bf16 %v580_v35, %v578_v21  ;;  %v629_v8 = vpop.f32.mrf.mxu1  ;;  %v10287_v21 = vld [vmem:[%s15871_s2 + $0x24c] sm:$0xf0]  ;;  %v8064_v35 = vor.u32 %v10223_v26, %v8063_v7 }
 0x1b5   :  { %v11348_v63 = vpack.c.bf16 %v629_v8, %v627_v12  ;;  %v8319_v12 = vld [vmem:[%s15871_s2 + $0x240] sm:$0xf] }
 0x1b6   :  { %16097 = vst [vmem:[#allocation72_spill] sm:$0xff] %v11346_v20  ;;  %4166 = vmatpush.bf16.msra.mxu0 %v8064_v35  ;;  %v10219_v35 = vld [vmem:[%s15871_s2 + $0x2c] sm:$0xf0] }
 0x1b7   :  { %16098 = vst [vmem:[#allocation73_spill] sm:$0xff] %v11348_v63 }
 0x1ba   :  { %v678_v47 = vpop.f32.mrf.mxu2 }
 0x1bb   :  { %v11350_v11 = vpack.c.bf16 %v678_v47, %v676_v62  ;;  %v727_v17 = vpop.f32.mrf.mxu3  ;;  %v583_v22 = vpop.f32.mrf.mxu0  ;;  %v8320_v62 = vor.u32 %v10287_v21, %v8319_v12  ;;  %v8191_v47 = vld [vmem:[%s15871_s2 + $0x140] sm:$0xf] }
 0x1bc   :  { %v11352_v52 = vpack.c.bf16 %v727_v17, %v725_v0  ;;  %v632_v30 = vpop.f32.mrf.mxu1  ;;  %v10255_v17 = vld [vmem:[%s15871_s2 + $0x14c] sm:$0xf0] }
 0x1bd   :  { %16099 = vst [vmem:[#allocation74_spill] sm:$0xff] %v11350_v11  ;;  %4264 = vmatpush.bf16.msra.mxu2 %v8320_v62 }
 0x1be   :  { %16100 = vst [vmem:[#allocation75_spill] sm:$0xff] %v11352_v52  ;;  %8000 = vmatmul.msk.bf16.gmra.mxu0 %vm109_vm1, %v10860_v23  ;;  %8008 = vmatmul.msk.bf16.gmra.mxu1 %vm109_vm1, %v10860_v23  ;;  %v8192_v52 = vor.u32 %v10255_v17, %v8191_v47 }
 0x1bf   :  { %8016 = vmatmul.msk.bf16.gmra.mxu2 %vm109_vm1, %v10860_v23 }
 0x1c0   :  { %8024 = vmatmul.msk.bf16.gmra.mxu3 %vm109_vm1, %v10860_v23  ;;  %v8447_v23 = vld [vmem:[%s15871_s2 + $0x340] sm:$0xf]  ;;  %4215 = vmatpush.bf16.msra.mxu1 %v8192_v52 }
 0x1c1   :  { %v8448_v36 = vor.u32 %v10319_v29, %v8447_v23  ;;  %v8047_v52 = vld [vmem:[%s15871_s2 + $0x20] sm:$0xf] }
 0x1c2   :  { %v681_v0 = vpop.f32.mrf.mxu2 }
 0x1c3   :  { %v730_v61 = vpop.f32.mrf.mxu3  ;;  %v585_v8 = vpop.f32.mrf.mxu0  ;;  %4313 = vmatpush.bf16.msra.mxu3 %v8448_v36  ;;  %v10315_v36 = vld [vmem:[%s15871_s2 + $0x32c] sm:$0xf0] }
 0x1c4   :  { %v11386_v12 = vpack.c.bf16 %v585_v8, %v583_v22  ;;  %v634_v21 = vpop.f32.mrf.mxu1  ;;  %v10283_v22 = vld [vmem:[%s15871_s2 + $0x22c] sm:$0xf0]  ;;  %v8048_v8 = vor.u32 %v10219_v35, %v8047_v52 }
 0x1c5   :  { %v11388_v11 = vpack.c.bf16 %v634_v21, %v632_v30  ;;  %v8303_v30 = vld [vmem:[%s15871_s2 + $0x220] sm:$0xf] }
 0x1c6   :  { %16101 = vst [vmem:[#allocation76_spill] sm:$0xff] %v11386_v12  ;;  %4167 = vmatpush.bf16.msra.mxu0 %v8048_v8  ;;  %v10215_v8 = vld [vmem:[%s15871_s2 + $0xc] sm:$0xf0] }
 0x1c7   :  { %16102 = vst [vmem:[#allocation77_spill] sm:$0xff] %v11388_v11 }
 0x1ca   :  { %v683_v7 = vpop.f32.mrf.mxu2 }
 0x1cb   :  { %v11390_v26 = vpack.c.bf16 %v683_v7, %v681_v0  ;;  %v732_v62 = vpop.f32.mrf.mxu3  ;;  %v588_v23 = vpop.f32.mrf.mxu0  ;;  %v8304_v0 = vor.u32 %v10283_v22, %v8303_v30  ;;  %v8175_v7 = vld [vmem:[%s15871_s2 + $0x120] sm:$0xf] }
 0x1cc   :  { %v11392_v29 = vpack.c.bf16 %v732_v62, %v730_v61  ;;  %v637_v63 = vpop.f32.mrf.mxu1  ;;  %v10251_v62 = vld [vmem:[%s15871_s2 + $0x12c] sm:$0xf0] }
 0x1cd   :  { %16103 = vst [vmem:[#allocation78_spill] sm:$0xff] %v11390_v26  ;;  %4265 = vmatpush.bf16.msra.mxu2 %v8304_v0 }
 0x1ce   :  { %16104 = vst [vmem:[#allocation79_spill] sm:$0xff] %v11392_v29  ;;  %8001 = vmatmul.msk.bf16.gmra.mxu0 %vm109_vm1, %v10873_v24  ;;  %8009 = vmatmul.msk.bf16.gmra.mxu1 %vm109_vm1, %v10873_v24  ;;  %v8176_v29 = vor.u32 %v10251_v62, %v8175_v7 }
 0x1cf   :  { %8017 = vmatmul.msk.bf16.gmra.mxu2 %vm109_vm1, %v10873_v24 }
 0x1d0   :  { %8025 = vmatmul.msk.bf16.gmra.mxu3 %vm109_vm1, %v10873_v24  ;;  %v8431_v24 = vld [vmem:[%s15871_s2 + $0x320] sm:$0xf]  ;;  %4216 = vmatpush.bf16.msra.mxu1 %v8176_v29 }
 0x1d1   :  { %v8432_v47 = vor.u32 %v10315_v36, %v8431_v24  ;;  %v8031_v29 = vld [vmem:[%s15871_s2] sm:$0xf] }
 0x1d2   :  { %v686_v61 = vpop.f32.mrf.mxu2 }
 0x1d3   :  { %v735_v17 = vpop.f32.mrf.mxu3  ;;  %v590_v21 = vpop.f32.mrf.mxu0  ;;  %4314 = vmatpush.bf16.msra.mxu3 %v8432_v47  ;;  %v10311_v47 = vld [vmem:[%s15871_s2 + $0x30c] sm:$0xf0] }
 0x1d4   :  { %v11426_v30 = vpack.c.bf16 %v590_v21, %v588_v23  ;;  %v639_v22 = vpop.f32.mrf.mxu1  ;;  %v10279_v23 = vld [vmem:[%s15871_s2 + $0x20c] sm:$0xf0]  ;;  %v8032_v21 = vor.u32 %v10215_v8, %v8031_v29 }
 0x1d5   :  { %v11428_v26 = vpack.c.bf16 %v639_v22, %v637_v63  ;;  %v8287_v63 = vld [vmem:[%s15871_s2 + $0x200] sm:$0xf] }
 0x1d6   :  { %16105 = vst [vmem:[#allocation80_spill] sm:$0xff] %v11426_v30  ;;  %4168 = vmatpush.bf16.msra.mxu0 %v8032_v21 }
 0x1d7   :  { %16106 = vst [vmem:[#allocation81_spill] sm:$0xff] %v11428_v26 }
 0x1da   :  { %v688_v52 = vpop.f32.mrf.mxu2 }
 0x1db   :  { %v11430_v35 = vpack.c.bf16 %v688_v52, %v686_v61  ;;  %v737_v0 = vpop.f32.mrf.mxu3  ;;  %v593_v24 = vpop.f32.mrf.mxu0  ;;  %v8288_v61 = vor.u32 %v10279_v23, %v8287_v63  ;;  %v8159_v52 = vld [vmem:[%s15871_s2 + $0x100] sm:$0xf] }
 0x1dc   :  { %v11432_v36 = vpack.c.bf16 %v737_v0, %v735_v17  ;;  %v642_v11 = vpop.f32.mrf.mxu1  ;;  %v10247_v0 = vld [vmem:[%s15871_s2 + $0x10c] sm:$0xf0] }
 0x1dd   :  { %16107 = vst [vmem:[#allocation82_spill] sm:$0xff] %v11430_v35  ;;  %4266 = vmatpush.bf16.msra.mxu2 %v8288_v61 }
 0x1de   :  { %16108 = vst [vmem:[#allocation83_spill] sm:$0xff] %v11432_v36  ;;  %8002 = vmatmul.msk.bf16.gmra.mxu0 %vm109_vm1, %v10886_v25  ;;  %8010 = vmatmul.msk.bf16.gmra.mxu1 %vm109_vm1, %v10886_v25  ;;  %v8160_v36 = vor.u32 %v10247_v0, %v8159_v52 }
 0x1df   :  { %8018 = vmatmul.msk.bf16.gmra.mxu2 %vm109_vm1, %v10886_v25 }
 0x1e0   :  { %8026 = vmatmul.msk.bf16.gmra.mxu3 %vm109_vm1, %v10886_v25  ;;  %v8415_v25 = vld [vmem:[%s15871_s2 + $0x300] sm:$0xf]  ;;  %4217 = vmatpush.bf16.msra.mxu1 %v8160_v36  ;;  %v10435_v36 = vld [vmem:[%s15871_s2 + $0x6ec] sm:$0xf0] }
 0x1e1   :  { %v8416_v7 = vor.u32 %v10311_v47, %v8415_v25 }
 0x1e2   :  { %v691_v17 = vpop.f32.mrf.mxu2 }
 0x1e3   :  { %v740_v62 = vpop.f32.mrf.mxu3  ;;  %v595_v22 = vpop.f32.mrf.mxu0  ;;  %4315 = vmatpush.bf16.msra.mxu3 %v8416_v7  ;;  %v10371_v7 = vld [vmem:[%s15871_s2 + $0x4ec] sm:$0xf0] }
 0x1e4   :  { %v11466_v63 = vpack.c.bf16 %v595_v22, %v593_v24  ;;  %v644_v23 = vpop.f32.mrf.mxu1  ;;  %v10758_v24 = vld [vmem:[%s15870_s0 + $0x30] sm:$0xff] }
 0x1e5   :  { %v11468_v35 = vpack.c.bf16 %v644_v23, %v642_v11  ;;  %v8911_v11 = vld [vmem:[%s15871_s2 + $0x6e0] sm:$0xf]  ;;  %v10467_v22 = vld [vmem:[%s15871_s2 + $0x7ec] sm:$0xf0] }
 0x1e6   :  { %16109 = vst [vmem:[#allocation84_spill] sm:$0xff] %v11466_v63  ;;  %v8912_v21 = vor.u32 %v10435_v36, %v8911_v11  ;;  %v10403_v11 = vld [vmem:[%s15871_s2 + $0x5ec] sm:$0xf0] }
 0x1e7   :  { %16110 = vst [vmem:[#allocation85_spill] sm:$0xff] %v11468_v35 }
 0x1e8   :  { %4455 = vmatpush.bf16.msrb.mxu2 %v8912_v21 }
 0x1ea   :  { %v693_v29 = vpop.f32.mrf.mxu2 }
 0x1eb   :  { %v11470_v8 = vpack.c.bf16 %v693_v29, %v691_v17  ;;  %v742_v61 = vpop.f32.mrf.mxu3  ;;  %v598_v25 = vpop.f32.mrf.mxu0  ;;  %v8655_v17 = vld [vmem:[%s15871_s2 + $0x4e0] sm:$0xf] }
 0x1ec   :  { %v11472_v47 = vpack.c.bf16 %v742_v61, %v740_v62  ;;  %v647_v26 = vpop.f32.mrf.mxu1  ;;  %v9039_v62 = vld [vmem:[%s15871_s2 + $0x7e0] sm:$0xf]  ;;  %v8656_v0 = vor.u32 %v10371_v7, %v8655_v17 }
 0x1ed   :  { %16111 = vst [vmem:[#allocation86_spill] sm:$0xff] %v11470_v8  ;;  %v9040_v23 = vor.u32 %v10467_v22, %v9039_v62 }
 0x1ee   :  { %16112 = vst [vmem:[#allocation87_spill] sm:$0xff] %v11472_v47  ;;  %8003 = vmatmul.msk.bf16.gmra.mxu0 %vm109_vm1, %v10758_v24  ;;  %8011 = vmatmul.msk.bf16.gmra.mxu1 %vm109_vm1, %v10758_v24 }
 0x1ef   :  { %8019 = vmatmul.msk.bf16.gmra.mxu2 %vm109_vm1, %v10758_v24  ;;  %4357 = vmatpush.bf16.msrb.mxu0 %v8656_v0  ;;  %v10367_v0 = vld [vmem:[%s15871_s2 + $0x4cc] sm:$0xf0] }
 0x1f0   :  { %8027 = vmatmul.msk.bf16.gmra.mxu3 %vm109_vm1, %v10758_v24  ;;  %v8783_v24 = vld [vmem:[%s15871_s2 + $0x5e0] sm:$0xf] }
 0x1f1   :  { %4504 = vmatpush.bf16.msrb.mxu3 %v9040_v23  ;;  %v8784_v8 = vor.u32 %v10403_v11, %v8783_v24  ;;  %v9023_v23 = vld [vmem:[%s15871_s2 + $0x7c0] sm:$0xf] }
 0x1f2   :  { %v696_v52 = vpop.f32.mrf.mxu2 }
 0x1f3   :  { %v745_v29 = vpop.f32.mrf.mxu3  ;;  %v600_v61 = vpop.f32.mrf.mxu0  ;;  %4406 = vmatpush.bf16.msrb.mxu1 %v8784_v8  ;;  %v10431_v8 = vld [vmem:[%s15871_s2 + $0x6cc] sm:$0xf0] }
 0x1f4   :  { %v11505_v36 = vpack.c.bf16 %v600_v61, %v598_v25  ;;  %v649_v47 = vpop.f32.mrf.mxu1  ;;  %v10759_v25 = vld [vmem:[%s15870_s0 + $0x38] sm:$0xff] }
 0x1f5   :  { %v11507_v35 = vpack.c.bf16 %v649_v47, %v647_v26  ;;  %v8895_v26 = vld [vmem:[%s15871_s2 + $0x6c0] sm:$0xf] }
 0x1f6   :  { %16113 = vst [vmem:[#allocation88_spill] sm:$0xff] %v11505_v36  ;;  %v8639_v47 = vld [vmem:[%s15871_s2 + $0x4c0] sm:$0xf] }
 0x1f7   :  { %16114 = vst [vmem:[#allocation89_spill] sm:$0xff] %v11507_v35  ;;  %v8640_v24 = vor.u32 %v10367_v0, %v8639_v47 }
 0x1f9   :  { %4358 = vmatpush.bf16.msrb.mxu0 %v8640_v24  ;;  %v9007_v24 = vld [vmem:[%s15871_s2 + $0x7a0] sm:$0xf] }
 0x1fa   :  { %v698_v17 = vpop.f32.mrf.mxu2 }
 0x1fb   :  { %v11509_v7 = vpack.c.bf16 %v698_v17, %v696_v52  ;;  %v747_v21 = vpop.f32.mrf.mxu3  ;;  %v603_v62 = vpop.f32.mrf.mxu0  ;;  %v8896_v52 = vor.u32 %v10431_v8, %v8895_v26  ;;  %v10399_v26 = vld [vmem:[%s15871_s2 + $0x5cc] sm:$0xf0] }
 0x1fc   :  { %v11511_v22 = vpack.c.bf16 %v747_v21, %v745_v29  ;;  %v652_v63 = vpop.f32.mrf.mxu1  ;;  %v10463_v29 = vld [vmem:[%s15871_s2 + $0x7cc] sm:$0xf0] }
 0x1fd   :  { %16115 = vst [vmem:[#allocation90_spill] sm:$0xff] %v11509_v7  ;;  %v9024_v11 = vor.u32 %v10463_v29, %v9023_v23  ;;  %4456 = vmatpush.bf16.msrb.mxu2 %v8896_v52 }
 0x1fe   :  { %16116 = vst [vmem:[#allocation91_spill] sm:$0xff] %v11511_v22  ;;  %8004 = vmatmul.msk.bf16.gmra.mxu0 %vm109_vm1, %v10759_v25  ;;  %8012 = vmatmul.msk.bf16.gmra.mxu1 %vm109_vm1, %v10759_v25 }
 0x1ff   :  { %8020 = vmatmul.msk.bf16.gmra.mxu2 %vm109_vm1, %v10759_v25  ;;  %4505 = vmatpush.bf16.msrb.mxu3 %v9024_v11  ;;  %v10459_v11 = vld [vmem:[%s15871_s2 + $0x7ac] sm:$0xf0] }
 0x200   :  { %8028 = vmatmul.msk.bf16.gmra.mxu3 %vm109_vm1, %v10759_v25  ;;  %v8767_v25 = vld [vmem:[%s15871_s2 + $0x5c0] sm:$0xf] }
 0x201   :  { %v8768_v7 = vor.u32 %v10399_v26, %v8767_v25  ;;  %v9008_v25 = vor.u32 %v10459_v11, %v9007_v24 }
 0x202   :  { %v701_v61 = vpop.f32.mrf.mxu2 }
 0x203   :  { %v750_v17 = vpop.f32.mrf.mxu3  ;;  %v605_v21 = vpop.f32.mrf.mxu0  ;;  %4407 = vmatpush.bf16.msrb.mxu1 %v8768_v7  ;;  %v10427_v7 = vld [vmem:[%s15871_s2 + $0x6ac] sm:$0xf0]  ;;  %4506 = vmatpush.bf16.msrb.mxu3 %v9008_v25 }
 0x204   :  { %v11544_v8 = vpack.c.bf16 %v605_v21, %v603_v62  ;;  %v654_v22 = vpop.f32.mrf.mxu1  ;;  %v8623_v62 = vld [vmem:[%s15871_s2 + $0x4a0] sm:$0xf]  ;;  %v10455_v25 = vld [vmem:[%s15871_s2 + $0x78c] sm:$0xf0] }
 0x205   :  { %v11546_v35 = vpack.c.bf16 %v654_v22, %v652_v63  ;;  %v8879_v63 = vld [vmem:[%s15871_s2 + $0x6a0] sm:$0xf] }
 0x206   :  { %v8880_v22 = vor.u32 %v10427_v7, %v8879_v63  ;;  %v10395_v63 = vld [vmem:[%s15871_s2 + $0x5ac] sm:$0xf0] }
 0x208   :  { %4457 = vmatpush.bf16.msrb.mxu2 %v8880_v22 }
 0x20a   :  { %v703_v47 = vpop.f32.mrf.mxu2 }
 0x20b   :  { %v11548_v0 = vpack.c.bf16 %v703_v47, %v701_v61  ;;  %v752_v52 = vpop.f32.mrf.mxu3  ;;  %v764_v23 = vpop.f32.mrf.mxu0  ;;  %v10363_v61 = vld [vmem:[%s15871_s2 + $0x4ac] sm:$0xf0] }
 0x20c   :  { %v11550_v29 = vpack.c.bf16 %v752_v52, %v750_v17  ;;  %v813_v36 = vpop.f32.mrf.mxu1  ;;  %v8624_v21 = vor.u32 %v10363_v61, %v8623_v62  ;;  %v8751_v52 = vld [vmem:[%s15871_s2 + $0x5a0] sm:$0xf] }
 0x20e   :  { %4169 = vmatmul.bf16.vlgmr.msra.gmra.mxu0 %v10934_v41  ;;  %4218 = vmatmul.bf16.vlgmr.msra.gmra.mxu1 %v10936_v43 }
 0x20f   :  { %4267 = vmatmul.bf16.vlgmr.msra.gmra.mxu2 %v10938_v45  ;;  %4359 = vmatpush.bf16.msrb.mxu0 %v8624_v21  ;;  %v8752_v45 = vor.u32 %v10395_v63, %v8751_v52  ;;  %v8991_v21 = vld [vmem:[%s15871_s2 + $0x780] sm:$0xf] }
 0x210   :  { %4316 = vmatmul.bf16.vlgmr.msra.gmra.mxu3 %v10940_v48  ;;  %v8992_v52 = vor.u32 %v10455_v25, %v8991_v21 }
 0x211   :  { %4408 = vmatpush.bf16.msrb.mxu1 %v8752_v45  ;;  %v8863_v45 = vld [vmem:[%s15871_s2 + $0x680] sm:$0xf] }
 0x212   :  { %v862_v17 = vpop.f32.mrf.mxu2  ;;  %4507 = vmatpush.bf16.msrb.mxu3 %v8992_v52  ;;  %v10451_v52 = vld [vmem:[%s15871_s2 + $0x76c] sm:$0xf0] }
 0x213   :  { %v911_v26 = vpop.f32.mrf.mxu3  ;;  %v766_v47 = vpop.f32.mrf.mxu0 }
 0x214   :  { %v11580_v7 = vpack.c.bf16 %v766_v47, %v764_v23  ;;  %v815_v48 = vpop.f32.mrf.mxu1 }
 0x215   :  { %v11582_v43 = vpack.c.bf16 %v815_v48, %v813_v36  ;;  %v10423_v48 = vld [vmem:[%s15871_s2 + $0x68c] sm:$0xf0]  ;;  %v8607_v36 = vld [vmem:[%s15871_s2 + $0x480] sm:$0xf] }
 0x216   :  { %v8864_v23 = vor.u32 %v10423_v48, %v8863_v45  ;;  %v10391_v45 = vld [vmem:[%s15871_s2 + $0x58c] sm:$0xf0] }
 0x218   :  { %4458 = vmatpush.bf16.msrb.mxu2 %v8864_v23 }
 0x21a   :  { %v864_v62 = vpop.f32.mrf.mxu2 }
 0x21b   :  { %v11584_v61 = vpack.c.bf16 %v864_v62, %v862_v17  ;;  %v913_v22 = vpop.f32.mrf.mxu3  ;;  %v769_v24 = vpop.f32.mrf.mxu0  ;;  %v10359_v17 = vld [vmem:[%s15871_s2 + $0x48c] sm:$0xf0] }
 0x21c   :  { %v11586_v11 = vpack.c.bf16 %v913_v22, %v911_v26  ;;  %v818_v41 = vpop.f32.mrf.mxu1  ;;  %v8608_v47 = vor.u32 %v10359_v17, %v8607_v36  ;;  %v8735_v22 = vld [vmem:[%s15871_s2 + $0x580] sm:$0xf] }
 0x21e   :  { %4174 = vmatmul.bf16.gmra.mxu0 %v10950_v53  ;;  %4223 = vmatmul.bf16.gmra.mxu1 %v10952_v55 }
 0x21f   :  { %4272 = vmatmul.bf16.gmra.mxu2 %v10954_v57  ;;  %4360 = vmatpush.bf16.msrb.mxu0 %v8608_v47  ;;  %v8736_v57 = vor.u32 %v10391_v45, %v8735_v22  ;;  %v8975_v47 = vld [vmem:[%s15871_s2 + $0x760] sm:$0xf] }
 0x220   :  { %4321 = vmatmul.bf16.gmra.mxu3 %v10956_v60  ;;  %v8976_v22 = vor.u32 %v10451_v52, %v8975_v47 }
 0x221   :  { %4409 = vmatpush.bf16.msrb.mxu1 %v8736_v57  ;;  %v10419_v57 = vld [vmem:[%s15871_s2 + $0x66c] sm:$0xf0] }
 0x222   :  { %v867_v26 = vpop.f32.mrf.mxu2  ;;  %4508 = vmatpush.bf16.msrb.mxu3 %v8976_v22  ;;  %v10447_v22 = vld [vmem:[%s15871_s2 + $0x74c] sm:$0xf0] }
 0x223   :  { %v916_v63 = vpop.f32.mrf.mxu3  ;;  %v771_v62 = vpop.f32.mrf.mxu0 }
 0x224   :  { %v11616_v48 = vpack.c.bf16 %v771_v62, %v769_v24  ;;  %v820_v60 = vpop.f32.mrf.mxu1 }
 0x225   :  { %v11618_v55 = vpack.c.bf16 %v820_v60, %v818_v41  ;;  %v8847_v41 = vld [vmem:[%s15871_s2 + $0x660] sm:$0xf] }
 0x226   :  { %v8591_v60 = vld [vmem:[%s15871_s2 + $0x460] sm:$0xf]  ;;  %v8848_v24 = vor.u32 %v10419_v57, %v8847_v41  ;;  %v10387_v41 = vld [vmem:[%s15871_s2 + $0x56c] sm:$0xf0] }
 0x228   :  { %4459 = vmatpush.bf16.msrb.mxu2 %v8848_v24 }
 0x22a   :  { %v869_v36 = vpop.f32.mrf.mxu2 }
 0x22b   :  { %v11620_v17 = vpack.c.bf16 %v869_v36, %v867_v26  ;;  %v918_v23 = vpop.f32.mrf.mxu3  ;;  %v774_v21 = vpop.f32.mrf.mxu0  ;;  %v10355_v26 = vld [vmem:[%s15871_s2 + $0x46c] sm:$0xf0] }
 0x22c   :  { %v11622_v25 = vpack.c.bf16 %v918_v23, %v916_v63  ;;  %v823_v53 = vpop.f32.mrf.mxu1  ;;  %v8592_v62 = vor.u32 %v10355_v26, %v8591_v60  ;;  %v8719_v23 = vld [vmem:[%s15871_s2 + $0x560] sm:$0xf] }
 0x22e   :  { %4179 = vmatmul.bf16.gmra.mxu0 %v10966_v1  ;;  %4228 = vmatmul.bf16.gmra.mxu1 %v10968_v3 }
 0x22f   :  { %4277 = vmatmul.bf16.gmra.mxu2 %v10970_v5  ;;  %4361 = vmatpush.bf16.msrb.mxu0 %v8592_v62  ;;  %v8720_v5 = vor.u32 %v10387_v41, %v8719_v23  ;;  %v8959_v62 = vld [vmem:[%s15871_s2 + $0x740] sm:$0xf] }
 0x230   :  { %4326 = vmatmul.bf16.gmra.mxu3 %v10972_v9  ;;  %v8960_v23 = vor.u32 %v10447_v22, %v8959_v62 }
 0x231   :  { %4410 = vmatpush.bf16.msrb.mxu1 %v8720_v5  ;;  %v10415_v5 = vld [vmem:[%s15871_s2 + $0x64c] sm:$0xf0] }
 0x232   :  { %v872_v63 = vpop.f32.mrf.mxu2  ;;  %4509 = vmatpush.bf16.msrb.mxu3 %v8960_v23  ;;  %v10443_v23 = vld [vmem:[%s15871_s2 + $0x72c] sm:$0xf0] }
 0x233   :  { %v921_v45 = vpop.f32.mrf.mxu3  ;;  %v776_v36 = vpop.f32.mrf.mxu0 }
 0x234   :  { %v11652_v57 = vpack.c.bf16 %v776_v36, %v774_v21  ;;  %v825_v9 = vpop.f32.mrf.mxu1 }
 0x235   :  { %v11654_v3 = vpack.c.bf16 %v825_v9, %v823_v53  ;;  %v8831_v53 = vld [vmem:[%s15871_s2 + $0x640] sm:$0xf] }
 0x236   :  { %v8575_v9 = vld [vmem:[%s15871_s2 + $0x440] sm:$0xf]  ;;  %v8832_v21 = vor.u32 %v10415_v5, %v8831_v53  ;;  %v10383_v53 = vld [vmem:[%s15871_s2 + $0x54c] sm:$0xf0] }
 0x238   :  { %4460 = vmatpush.bf16.msrb.mxu2 %v8832_v21 }
 0x23a   :  { %v874_v60 = vpop.f32.mrf.mxu2 }
 0x23b   :  { %v11656_v26 = vpack.c.bf16 %v874_v60, %v872_v63  ;;  %v923_v24 = vpop.f32.mrf.mxu3  ;;  %v779_v47 = vpop.f32.mrf.mxu0  ;;  %v10351_v63 = vld [vmem:[%s15871_s2 + $0x44c] sm:$0xf0] }
 0x23c   :  { %v11658_v52 = vpack.c.bf16 %v923_v24, %v921_v45  ;;  %v828_v1 = vpop.f32.mrf.mxu1  ;;  %v8576_v36 = vor.u32 %v10351_v63, %v8575_v9  ;;  %v8703_v24 = vld [vmem:[%s15871_s2 + $0x540] sm:$0xf] }
 0x23e   :  { %4184 = vmatmul.bf16.gmra.mxu0 %v10982_v14  ;;  %4233 = vmatmul.bf16.gmra.mxu1 %v10984_v16 }
 0x23f   :  { %4282 = vmatmul.bf16.gmra.mxu2 %v10986_v18  ;;  %4362 = vmatpush.bf16.msrb.mxu0 %v8576_v36  ;;  %v8704_v18 = vor.u32 %v10383_v53, %v8703_v24  ;;  %v8943_v36 = vld [vmem:[%s15871_s2 + $0x720] sm:$0xf] }
 0x240   :  { %4331 = vmatmul.bf16.gmra.mxu3 %v10988_v27  ;;  %v8944_v24 = vor.u32 %v10443_v23, %v8943_v36 }
 0x241   :  { %4411 = vmatpush.bf16.msrb.mxu1 %v8704_v18  ;;  %v10411_v18 = vld [vmem:[%s15871_s2 + $0x62c] sm:$0xf0] }
 0x242   :  { %v877_v45 = vpop.f32.mrf.mxu2  ;;  %4510 = vmatpush.bf16.msrb.mxu3 %v8944_v24  ;;  %v10439_v24 = vld [vmem:[%s15871_s2 + $0x70c] sm:$0xf0] }
 0x243   :  { %v926_v41 = vpop.f32.mrf.mxu3  ;;  %v781_v60 = vpop.f32.mrf.mxu0 }
 0x244   :  { %v11688_v5 = vpack.c.bf16 %v781_v60, %v779_v47  ;;  %v830_v27 = vpop.f32.mrf.mxu1 }
 0x245   :  { %v11690_v16 = vpack.c.bf16 %v830_v27, %v828_v1  ;;  %v8815_v1 = vld [vmem:[%s15871_s2 + $0x620] sm:$0xf] }
 0x246   :  { %v8559_v27 = vld [vmem:[%s15871_s2 + $0x420] sm:$0xf]  ;;  %v8816_v47 = vor.u32 %v10411_v18, %v8815_v1  ;;  %v10379_v1 = vld [vmem:[%s15871_s2 + $0x52c] sm:$0xf0] }
 0x248   :  { %4461 = vmatpush.bf16.msrb.mxu2 %v8816_v47 }
 0x24a   :  { %v879_v9 = vpop.f32.mrf.mxu2 }
 0x24b   :  { %v11692_v63 = vpack.c.bf16 %v879_v9, %v877_v45  ;;  %v928_v21 = vpop.f32.mrf.mxu3  ;;  %v784_v62 = vpop.f32.mrf.mxu0  ;;  %v10347_v45 = vld [vmem:[%s15871_s2 + $0x42c] sm:$0xf0] }
 0x24c   :  { %v11694_v22 = vpack.c.bf16 %v928_v21, %v926_v41  ;;  %v833_v14 = vpop.f32.mrf.mxu1  ;;  %v8560_v60 = vor.u32 %v10347_v45, %v8559_v27  ;;  %v8687_v21 = vld [vmem:[%s15871_s2 + $0x520] sm:$0xf] }
 0x24e   :  { %4189 = vmatmul.bf16.gmra.mxu0 %v10998_v32  ;;  %4238 = vmatmul.bf16.gmra.mxu1 %v11000_v34 }
 0x24f   :  { %4287 = vmatmul.bf16.gmra.mxu2 %v11002_v37  ;;  %4363 = vmatpush.bf16.msrb.mxu0 %v8560_v60  ;;  %v8688_v37 = vor.u32 %v10379_v1, %v8687_v21  ;;  %v8927_v60 = vld [vmem:[%s15871_s2 + $0x700] sm:$0xf] }
 0x250   :  { %4336 = vmatmul.bf16.gmra.mxu3 %v11004_v40  ;;  %v8928_v21 = vor.u32 %v10439_v24, %v8927_v60 }
 0x251   :  { %4412 = vmatpush.bf16.msrb.mxu1 %v8688_v37  ;;  %v10407_v37 = vld [vmem:[%s15871_s2 + $0x60c] sm:$0xf0] }
 0x252   :  { %v882_v41 = vpop.f32.mrf.mxu2  ;;  %4511 = vmatpush.bf16.msrb.mxu3 %v8928_v21  ;;  %v10595_v21 = vld [vmem:[%s15871_s2 + $0xbec] sm:$0xf0] }
 0x253   :  { %v931_v53 = vpop.f32.mrf.mxu3  ;;  %v786_v9 = vpop.f32.mrf.mxu0 }
 0x254   :  { %v11724_v18 = vpack.c.bf16 %v786_v9, %v784_v62  ;;  %v835_v40 = vpop.f32.mrf.mxu1 }
 0x255   :  { %v11726_v34 = vpack.c.bf16 %v835_v40, %v833_v14  ;;  %v8799_v14 = vld [vmem:[%s15871_s2 + $0x600] sm:$0xf] }
 0x256   :  { %v8543_v40 = vld [vmem:[%s15871_s2 + $0x400] sm:$0xf]  ;;  %v8800_v62 = vor.u32 %v10407_v37, %v8799_v14  ;;  %v10375_v14 = vld [vmem:[%s15871_s2 + $0x50c] sm:$0xf0] }
 0x257   :  { %16117 = vst [vmem:[#allocation92_spill] sm:$0xff] %v11726_v34 }
 0x258   :  { %4462 = vmatpush.bf16.msrb.mxu2 %v8800_v62 }
 0x25a   :  { %v884_v27 = vpop.f32.mrf.mxu2 }
 0x25b   :  { %v11728_v45 = vpack.c.bf16 %v884_v27, %v882_v41  ;;  %v933_v47 = vpop.f32.mrf.mxu3  ;;  %v789_v36 = vpop.f32.mrf.mxu0  ;;  %v10343_v41 = vld [vmem:[%s15871_s2 + $0x40c] sm:$0xf0] }
 0x25c   :  { %v11730_v23 = vpack.c.bf16 %v933_v47, %v931_v53  ;;  %v838_v32 = vpop.f32.mrf.mxu1  ;;  %v8544_v9 = vor.u32 %v10343_v41, %v8543_v40  ;;  %v8671_v47 = vld [vmem:[%s15871_s2 + $0x500] sm:$0xf] }
 0x25d   :  { %16118 = vst [vmem:[#allocation93_spill] sm:$0xff] %v11728_v45 }
 0x25e   :  { %16119 = vst [vmem:[#allocation94_spill] sm:$0xff] %v11730_v23  ;;  %4194 = vmatmul.bf16.gmra.mxu0 %v11014_v49  ;;  %4243 = vmatmul.bf16.gmra.mxu1 %v11016_v51 }
 0x25f   :  { %4292 = vmatmul.bf16.gmra.mxu2 %v11018_v54  ;;  %4364 = vmatpush.bf16.msrb.mxu0 %v8544_v9  ;;  %v8672_v54 = vor.u32 %v10375_v14, %v8671_v47  ;;  %v9551_v9 = vld [vmem:[%s15871_s2 + $0xbe0] sm:$0xf] }
 0x260   :  { %4341 = vmatmul.bf16.gmra.mxu3 %v11020_v59  ;;  %v9552_v47 = vor.u32 %v10595_v21, %v9551_v9 }
 0x261   :  { %4413 = vmatpush.bf16.msrb.mxu1 %v8672_v54  ;;  %v10563_v54 = vld [vmem:[%s15871_s2 + $0xaec] sm:$0xf0] }
 0x262   :  { %v887_v53 = vpop.f32.mrf.mxu2  ;;  %4700 = vmatpush.bf16.msra.mxu3 %v9552_v47  ;;  %v10495_v47 = vld [vmem:[%s15871_s2 + $0x8cc] sm:$0xf0] }
 0x263   :  { %v936_v1 = vpop.f32.mrf.mxu3  ;;  %v791_v27 = vpop.f32.mrf.mxu0 }
 0x264   :  { %v11760_v37 = vpack.c.bf16 %v791_v27, %v789_v36  ;;  %v840_v59 = vpop.f32.mrf.mxu1 }
 0x265   :  { %v11762_v51 = vpack.c.bf16 %v840_v59, %v838_v32  ;;  %v9423_v32 = vld [vmem:[%s15871_s2 + $0xae0] sm:$0xf] }
 0x266   :  { %16120 = vst [vmem:[#allocation95_spill] sm:$0xff] %v11760_v37  ;;  %v9167_v59 = vld [vmem:[%s15871_s2 + $0x8e0] sm:$0xf]  ;;  %v9424_v36 = vor.u32 %v10563_v54, %v9423_v32 }
 0x267   :  { %16121 = vst [vmem:[#allocation96_spill] sm:$0xff] %v11762_v51 }
 0x268   :  { %4651 = vmatpush.bf16.msra.mxu2 %v9424_v36 }
 0x26a   :  { %v889_v40 = vpop.f32.mrf.mxu2 }
 0x26b   :  { %v11764_v41 = vpack.c.bf16 %v889_v40, %v887_v53  ;;  %v938_v62 = vpop.f32.mrf.mxu3  ;;  %v794_v60 = vpop.f32.mrf.mxu0  ;;  %v10499_v53 = vld [vmem:[%s15871_s2 + $0x8ec] sm:$0xf0] }
 0x26c   :  { %v11766_v24 = vpack.c.bf16 %v938_v62, %v936_v1  ;;  %v843_v49 = vpop.f32.mrf.mxu1  ;;  %v9168_v27 = vor.u32 %v10499_v53, %v9167_v59 }
 0x26d   :  { %16122 = vst [vmem:[#allocation97_spill] sm:$0xff] %v11764_v41 }
 0x26e   :  { %16123 = vst [vmem:[#allocation98_spill] sm:$0xff] %v11766_v24  ;;  %4199 = vmatmul.bf16.gmra.mxu0 %v11033_v13  ;;  %4248 = vmatmul.bf16.gmra.mxu1 %v11036_v19  ;;  %v16133_v19 = vld [vmem:[#allocation41_spill] sm:$0xff]  ;;  %v16136_v13 = vld [vmem:[#allocation44_spill] sm:$0xff] }
 0x26f   :  { %4297 = vmatmul.bf16.gmra.mxu2 %v11038_v28  ;;  %4553 = vmatpush.bf16.msra.mxu0 %v9168_v27  ;;  %v10531_v28 = vld [vmem:[%s15871_s2 + $0x9ec] sm:$0xf0]  ;;  %v16155_v24 = vld [vmem:[#allocation65_spill] sm:$0xff] }
 0x270   :  { %4346 = vmatmul.bf16.gmra.mxu3 %v11040_v31  ;;  %v9295_v31 = vld [vmem:[%s15871_s2 + $0x9e0] sm:$0xf] }
 0x271   :  { %v9296_v59 = vor.u32 %v10531_v28, %v9295_v31  ;;  %v10559_v28 = vld [vmem:[%s15871_s2 + $0xacc] sm:$0xf0]  ;;  %v9151_v31 = vld [vmem:[%s15871_s2 + $0x8c0] sm:$0xf] }
 0x272   :  { %v892_v1 = vpop.f32.mrf.mxu2 }
 0x273   :  { %v941_v14 = vpop.f32.mrf.mxu3  ;;  %v796_v40 = vpop.f32.mrf.mxu0  ;;  %4602 = vmatpush.bf16.msra.mxu1 %v9296_v59  ;;  %v9152_v59 = vor.u32 %v10495_v47, %v9151_v31  ;;  %v10527_v31 = vld [vmem:[%s15871_s2 + $0x9cc] sm:$0xf0] }
 0x274   :  { %v11790_v62 = vpack.c.bf16 %v796_v40, %v794_v60  ;;  %v845_v32 = vpop.f32.mrf.mxu1  ;;  %v10591_v40 = vld [vmem:[%s15871_s2 + $0xbcc] sm:$0xf0] }
 0x275   :  { %v11792_v54 = vpack.c.bf16 %v845_v32, %v843_v49  ;;  %v9407_v49 = vld [vmem:[%s15871_s2 + $0xac0] sm:$0xf]  ;;  %4554 = vmatpush.bf16.msra.mxu0 %v9152_v59 }
 0x276   :  { %16124 = vst [vmem:[#allocation99_spill] sm:$0xff] %v11790_v62  ;;  %v16152_v62 = vld [vmem:[#allocation61_spill] sm:$0xff] }
 0x277   :  { %16125 = vst [vmem:[#allocation100_spill] sm:$0xff] %v11792_v54  ;;  %v16149_v54 = vld [vmem:[#allocation57_spill] sm:$0xff] }
 0x27a   :  { %v894_v53 = vpop.f32.mrf.mxu2 }
 0x27b   :  { %v11800_v9 = vpack.c.bf16 %v894_v53, %v892_v1  ;;  %v943_v60 = vpop.f32.mrf.mxu3  ;;  %v799_v36 = vpop.f32.mrf.mxu0  ;;  %v9408_v1 = vor.u32 %v10559_v28, %v9407_v49 }
 0x27c   :  { %v11802_v21 = vpack.c.bf16 %v943_v60, %v941_v14  ;;  %v848_v27 = vpop.f32.mrf.mxu1  ;;  %v9535_v14 = vld [vmem:[%s15871_s2 + $0xbc0] sm:$0xf] }
 0x27d   :  { %16126 = vst [vmem:[#allocation101_spill] sm:$0xff] %v11800_v9  ;;  %v9536_v53 = vor.u32 %v10591_v40, %v9535_v14  ;;  %4652 = vmatpush.bf16.msra.mxu2 %v9408_v1  ;;  %v16148_v9 = vld [vmem:[#allocation56_spill] sm:$0xff] }
 0x27e   :  { %16127 = vst [vmem:[#allocation102_spill] sm:$0xff] %v11802_v21  ;;  %4204 = vmatmul.bf16.gmra.mxu0 %v11050_v42  ;;  %4253 = vmatmul.bf16.gmra.mxu1 %v11052_v46  ;;  %v1591_v46 = vld [vmem:[%s15872_s3] sm:$0xf] }
 0x27f   :  { %4302 = vmatmul.bf16.gmra.mxu2 %v11054_v50  ;;  %4701 = vmatpush.bf16.msra.mxu3 %v9536_v53  ;;  %v9279_v42 = vld [vmem:[%s15871_s2 + $0x9c0] sm:$0xf] }
 0x280   :  { %4351 = vmatmul.bf16.gmra.mxu3 %v11056_v58  ;;  %v9280_v1 = vor.u32 %v10527_v31, %v9279_v42  ;;  %v9391_v42 = vld [vmem:[%s15871_s2 + $0xaa0] sm:$0xf]  ;;  %v10491_v31 = vld [vmem:[%s15871_s2 + $0x8ac] sm:$0xf0] }
 0x281   :  { %v16145_v21 = vld [vmem:[#allocation53_spill] sm:$0xff] }
 0x282   :  { %v897_v32 = vpop.f32.mrf.mxu2  ;;  %4603 = vmatpush.bf16.msra.mxu1 %v9280_v1  ;;  %v9519_v1 = vld [vmem:[%s15871_s2 + $0xba0] sm:$0xf] }
 0x283   :  { %v946_v60 = vpop.f32.mrf.mxu3  ;;  %v801_v58 = vpop.f32.mrf.mxu0 }
 0x284   :  { %v11826_v50 = vpack.c.bf16 %v801_v58, %v799_v36  ;;  %v850_v49 = vpop.f32.mrf.mxu1  ;;  %v11839_v58 = vperm.slane %v1591_v46, 0  ;;  %v10555_v46 = vld [vmem:[%s15871_s2 + $0xaac] sm:$0xf0] }
 0x285   :  { %v11828_v28 = vpack.c.bf16 %v850_v49, %v848_v27 }
 0x286   :  { %16128 = vst [vmem:[#allocation103_spill] sm:$0xff] %v11826_v50  ;;  %v16144_v50 = vld [vmem:[#allocation52_spill] sm:$0xff] }
 0x287   :  { %16129 = vst [vmem:[#allocation104_spill] sm:$0xff] %v11828_v28  ;;  %v16141_v28 = vld [vmem:[#allocation49_spill] sm:$0xff] }
 0x28a   :  { %v899_v36 = vpop.f32.mrf.mxu2 }
 0x28b   :  { %v11841_v47 = vpack.c.bf16 %v899_v36, %v897_v32  ;;  %v948_v27 = vpop.f32.mrf.mxu3  ;;  %v4170_v14 = vpop.f32.mrf.mxu0  ;;  %v9135_v32 = vld [vmem:[%s15871_s2 + $0x8a0] sm:$0xf]  ;;  %v10587_v36 = vld [vmem:[%s15871_s2 + $0xbac] sm:$0xf0] }
 0x28c   :  { %v11843_v40 = vpack.c.bf16 %v948_v27, %v946_v60  ;;  %v4171_v59 = vadd.f32 %v4170_v14, %v11839_v58  ;;  %v4219_v53 = vpop.f32.mrf.mxu1  ;;  %v9392_v60 = vor.u32 %v10555_v46, %v9391_v42  ;;  %v9136_v14 = vor.u32 %v10491_v31, %v9135_v32  ;;  %v10523_v32 = vld [vmem:[%s15871_s2 + $0x9ac] sm:$0xf0] }
 0x28d   :  { %16130 = vst [vmem:[#allocation105_spill] sm:$0xff] %v11841_v47  ;;  %v16140_v47 = vld [vmem:[#allocation48_spill] sm:$0xff] }
 0x28e   :  { %16131 = vst [vmem:[#allocation106_spill] sm:$0xff] %v11843_v40  ;;  %v4220_v49 = vadd.f32 %v4219_v53, %v4171_v59  ;;  %4365 = vmatmul.bf16.vlgmr.msrb.gmra.mxu0 %v11066_v2  ;;  %4414 = vmatmul.bf16.vlgmr.msrb.gmra.mxu1 %v11068_v6  ;;  %v9520_v59 = vor.u32 %v10587_v36, %v9519_v1  ;;  %v9263_v2 = vld [vmem:[%s15871_s2 + $0x9a0] sm:$0xf] }
 0x28f   :  { %4463 = vmatmul.bf16.vlgmr.msrb.gmra.mxu2 %v11070_v10  ;;  %4555 = vmatpush.bf16.msra.mxu0 %v9136_v14  ;;  %v16137_v40 = vld [vmem:[#allocation45_spill] sm:$0xff] }
 0x290   :  { %4512 = vmatmul.bf16.vlgmr.msrb.gmra.mxu3 %v11072_v15  ;;  %4653 = vmatpush.bf16.msra.mxu2 %v9392_v60 }
 0x291   :  { %4702 = vmatpush.bf16.msra.mxu3 %v9520_v59 }
 0x292   :  { %v4268_v27 = vpop.f32.mrf.mxu2 }
 0x293   :  { %v4269_v53 = vadd.f32 %v4268_v27, %v4220_v49  ;;  %v4317_v15 = vpop.f32.mrf.mxu3  ;;  %v4172_v10 = vpop.f32.mrf.mxu0  ;;  %v9264_v49 = vor.u32 %v10523_v32, %v9263_v2  ;;  %v9375_v2 = vld [vmem:[%s15871_s2 + $0xa80] sm:$0xf] }
 0x294   :  { %v4173_v42 = vadd.f32 %v4172_v10, %v11839_v58  ;;  %v4221_v46 = vpop.f32.mrf.mxu1 }
 0x295   :  { %v11869_v6 = vadd.f32 %v4317_v15, %v4269_v53  ;;  %4604 = vmatpush.bf16.msra.mxu1 %v9264_v49  ;;  %v16132_v53 = vld [vmem:[#allocation40_spill] sm:$0xff]  ;;  %v9503_v49 = vld [vmem:[%s15871_s2 + $0xb80] sm:$0xf] }
 0x296   :  { %v4222_v31 = vadd.f32 %v4221_v46, %v4173_v42  ;;  %v10551_v42 = vld [vmem:[%s15871_s2 + $0xa8c] sm:$0xf0]  ;;  %v9119_v46 = vld [vmem:[%s15871_s2 + $0x880] sm:$0xf] }
 0x297   :  { %v9376_v32 = vor.u32 %v10551_v42, %v9375_v2 }
 0x299   :  { %4654 = vmatpush.bf16.msra.mxu2 %v9376_v32 }
 0x29a   :  { %v4270_v1 = vpop.f32.mrf.mxu2 }
 0x29b   :  { %v4271_v60 = vadd.f32 %v4270_v1, %v4222_v31  ;;  %v4319_v36 = vpop.f32.mrf.mxu3  ;;  %v4175_v10 = vpop.f32.mrf.mxu0  ;;  %v10487_v31 = vld [vmem:[%s15871_s2 + $0x88c] sm:$0xf0] }
 0x29c   :  { %v4176_v27 = vadd.f32 %v4175_v10, %v11839_v58  ;;  %v4224_v14 = vpop.f32.mrf.mxu1  ;;  %v10583_v1 = vld [vmem:[%s15871_s2 + $0xb8c] sm:$0xf0] }
 0x29d   :  { %v11878_v15 = vadd.f32 %v4319_v36, %v4271_v60  ;;  %v9120_v36 = vor.u32 %v10487_v31, %v9119_v46  ;;  %v9504_v10 = vor.u32 %v10583_v1, %v9503_v49  ;;  %v10519_v46 = vld [vmem:[%s15871_s2 + $0x98c] sm:$0xf0] }
 0x29e   :  { %v4225_v59 = vadd.f32 %v4224_v14, %v4176_v27  ;;  %4370 = vmatmul.bf16.gmra.mxu0 %v11082_v33  ;;  %4419 = vmatmul.bf16.gmra.mxu1 %v11084_v38  ;;  %v9247_v38 = vld [vmem:[%s15871_s2 + $0x980] sm:$0xf]  ;;  %v16135_v33 = vld [vmem:[#allocation43_spill] sm:$0xff] }
 0x29f   :  { %4468 = vmatmul.bf16.gmra.mxu2 %v16132_v53  ;;  %4556 = vmatpush.bf16.msra.mxu0 %v9120_v36 }
 0x2a0   :  { %4517 = vmatmul.bf16.gmra.mxu3 %v16133_v19 }
 0x2a1   :  { %4703 = vmatpush.bf16.msra.mxu3 %v9504_v10 }
 0x2a2   :  { %v4273_v60 = vpop.f32.mrf.mxu2 }
 0x2a3   :  { %v4274_v27 = vadd.f32 %v4273_v60, %v4225_v59  ;;  %v4322_v14 = vpop.f32.mrf.mxu3  ;;  %v4177_v19 = vpop.f32.mrf.mxu0  ;;  %v9248_v59 = vor.u32 %v10519_v46, %v9247_v38  ;;  %v9359_v38 = vld [vmem:[%s15871_s2 + $0xa60] sm:$0xf] }
 0x2a4   :  { %v4178_v2 = vadd.f32 %v4177_v19, %v11839_v58  ;;  %v4226_v42 = vpop.f32.mrf.mxu1 }
 0x2a5   :  { %v11903_v53 = vadd.f32 %v4322_v14, %v4274_v27  ;;  %4605 = vmatpush.bf16.msra.mxu1 %v9248_v59  ;;  %v16134_v14 = vld [vmem:[#allocation42_spill] sm:$0xff]  ;;  %v9487_v59 = vld [vmem:[%s15871_s2 + $0xb60] sm:$0xf] }
 0x2a6   :  { %v4227_v31 = vadd.f32 %v4226_v42, %v4178_v2  ;;  %v10547_v2 = vld [vmem:[%s15871_s2 + $0xa6c] sm:$0xf0]  ;;  %v9103_v42 = vld [vmem:[%s15871_s2 + $0x860] sm:$0xf] }
 0x2a7   :  { %v9360_v46 = vor.u32 %v10547_v2, %v9359_v38 }
 0x2a9   :  { %4655 = vmatpush.bf16.msra.mxu2 %v9360_v46 }
 0x2aa   :  { %v4275_v49 = vpop.f32.mrf.mxu2 }
 0x2ab   :  { %v4276_v32 = vadd.f32 %v4275_v49, %v4227_v31  ;;  %v4324_v1 = vpop.f32.mrf.mxu3  ;;  %v4180_v19 = vpop.f32.mrf.mxu0  ;;  %v10483_v31 = vld [vmem:[%s15871_s2 + $0x86c] sm:$0xf0] }
 0x2ac   :  { %v4181_v60 = vadd.f32 %v4180_v19, %v11839_v58  ;;  %v4229_v36 = vpop.f32.mrf.mxu1  ;;  %v10579_v49 = vld [vmem:[%s15871_s2 + $0xb6c] sm:$0xf0] }
 0x2ad   :  { %v11912_v10 = vadd.f32 %v4324_v1, %v4276_v32  ;;  %v9104_v1 = vor.u32 %v10483_v31, %v9103_v42  ;;  %v9488_v19 = vor.u32 %v10579_v49, %v9487_v59  ;;  %v10515_v42 = vld [vmem:[%s15871_s2 + $0x96c] sm:$0xf0] }
 0x2ae   :  { %v4230_v27 = vadd.f32 %v4229_v36, %v4181_v60  ;;  %4375 = vmatmul.bf16.gmra.mxu0 %v16134_v14  ;;  %4424 = vmatmul.bf16.gmra.mxu1 %v16135_v33  ;;  %v9231_v33 = vld [vmem:[%s15871_s2 + $0x960] sm:$0xf]  ;;  %v16139_v14 = vld [vmem:[#allocation47_spill] sm:$0xff] }
 0x2af   :  { %4473 = vmatmul.bf16.gmra.mxu2 %v16136_v13  ;;  %4557 = vmatpush.bf16.msra.mxu0 %v9104_v1 }
 0x2b0   :  { %4522 = vmatmul.bf16.gmra.mxu3 %v16137_v40 }
 0x2b1   :  { %4704 = vmatpush.bf16.msra.mxu3 %v9488_v19 }
 0x2b2   :  { %v4278_v32 = vpop.f32.mrf.mxu2 }
 0x2b3   :  { %v4279_v60 = vadd.f32 %v4278_v32, %v4230_v27  ;;  %v4327_v36 = vpop.f32.mrf.mxu3  ;;  %v4182_v40 = vpop.f32.mrf.mxu0  ;;  %v9232_v27 = vor.u32 %v10515_v42, %v9231_v33  ;;  %v9343_v33 = vld [vmem:[%s15871_s2 + $0xa40] sm:$0xf] }
 0x2b4   :  { %v4183_v38 = vadd.f32 %v4182_v40, %v11839_v58  ;;  %v4231_v2 = vpop.f32.mrf.mxu1 }
 0x2b5   :  { %v11937_v13 = vadd.f32 %v4327_v36, %v4279_v60  ;;  %4606 = vmatpush.bf16.msra.mxu1 %v9232_v27  ;;  %v16138_v36 = vld [vmem:[#allocation46_spill] sm:$0xff]  ;;  %v9471_v27 = vld [vmem:[%s15871_s2 + $0xb40] sm:$0xf] }
 0x2b6   :  { %v4232_v31 = vadd.f32 %v4231_v2, %v4183_v38  ;;  %v10543_v38 = vld [vmem:[%s15871_s2 + $0xa4c] sm:$0xf0]  ;;  %v9087_v2 = vld [vmem:[%s15871_s2 + $0x840] sm:$0xf] }
 0x2b7   :  { %v9344_v42 = vor.u32 %v10543_v38, %v9343_v33 }
 0x2b9   :  { %4656 = vmatpush.bf16.msra.mxu2 %v9344_v42 }
 0x2ba   :  { %v4280_v59 = vpop.f32.mrf.mxu2 }
 0x2bb   :  { %v4281_v46 = vadd.f32 %v4280_v59, %v4232_v31  ;;  %v4329_v49 = vpop.f32.mrf.mxu3  ;;  %v4185_v40 = vpop.f32.mrf.mxu0  ;;  %v10479_v31 = vld [vmem:[%s15871_s2 + $0x84c] sm:$0xf0] }
 0x2bc   :  { %v4186_v32 = vadd.f32 %v4185_v40, %v11839_v58  ;;  %v4234_v1 = vpop.f32.mrf.mxu1  ;;  %v10575_v59 = vld [vmem:[%s15871_s2 + $0xb4c] sm:$0xf0] }
 0x2bd   :  { %v11946_v19 = vadd.f32 %v4329_v49, %v4281_v46  ;;  %v9088_v49 = vor.u32 %v10479_v31, %v9087_v2  ;;  %v9472_v40 = vor.u32 %v10575_v59, %v9471_v27  ;;  %v10511_v2 = vld [vmem:[%s15871_s2 + $0x94c] sm:$0xf0] }
 0x2be   :  { %v4235_v60 = vadd.f32 %v4234_v1, %v4186_v32  ;;  %4380 = vmatmul.bf16.gmra.mxu0 %v16138_v36  ;;  %4429 = vmatmul.bf16.gmra.mxu1 %v16139_v14  ;;  %v9215_v14 = vld [vmem:[%s15871_s2 + $0x940] sm:$0xf]  ;;  %v16143_v36 = vld [vmem:[#allocation51_spill] sm:$0xff] }
 0x2bf   :  { %4478 = vmatmul.bf16.gmra.mxu2 %v16140_v47  ;;  %4558 = vmatpush.bf16.msra.mxu0 %v9088_v49 }
 0x2c0   :  { %4527 = vmatmul.bf16.gmra.mxu3 %v16141_v28 }
 0x2c1   :  { %4705 = vmatpush.bf16.msra.mxu3 %v9472_v40 }
 0x2c2   :  { %v4283_v46 = vpop.f32.mrf.mxu2 }
 0x2c3   :  { %v4284_v32 = vadd.f32 %v4283_v46, %v4235_v60  ;;  %v4332_v1 = vpop.f32.mrf.mxu3  ;;  %v4187_v28 = vpop.f32.mrf.mxu0  ;;  %v9216_v60 = vor.u32 %v10511_v2, %v9215_v14  ;;  %v9327_v14 = vld [vmem:[%s15871_s2 + $0xa20] sm:$0xf] }
 0x2c4   :  { %v4188_v33 = vadd.f32 %v4187_v28, %v11839_v58  ;;  %v4236_v38 = vpop.f32.mrf.mxu1 }
 0x2c5   :  { %v11971_v47 = vadd.f32 %v4332_v1, %v4284_v32  ;;  %4607 = vmatpush.bf16.msra.mxu1 %v9216_v60  ;;  %v16142_v1 = vld [vmem:[#allocation50_spill] sm:$0xff]  ;;  %v9455_v60 = vld [vmem:[%s15871_s2 + $0xb20] sm:$0xf] }
 0x2c6   :  { %v4237_v31 = vadd.f32 %v4236_v38, %v4188_v33  ;;  %v10539_v33 = vld [vmem:[%s15871_s2 + $0xa2c] sm:$0xf0]  ;;  %v9071_v38 = vld [vmem:[%s15871_s2 + $0x820] sm:$0xf] }
 0x2c7   :  { %v9328_v2 = vor.u32 %v10539_v33, %v9327_v14 }
 0x2c9   :  { %4657 = vmatpush.bf16.msra.mxu2 %v9328_v2 }
 0x2ca   :  { %v4285_v27 = vpop.f32.mrf.mxu2 }
 0x2cb   :  { %v4286_v42 = vadd.f32 %v4285_v27, %v4237_v31  ;;  %v4334_v59 = vpop.f32.mrf.mxu3  ;;  %v4190_v28 = vpop.f32.mrf.mxu0  ;;  %v10475_v31 = vld [vmem:[%s15871_s2 + $0x82c] sm:$0xf0] }
 0x2cc   :  { %v4191_v46 = vadd.f32 %v4190_v28, %v11839_v58  ;;  %v4239_v49 = vpop.f32.mrf.mxu1  ;;  %v10571_v27 = vld [vmem:[%s15871_s2 + $0xb2c] sm:$0xf0] }
 0x2cd   :  { %v11980_v40 = vadd.f32 %v4334_v59, %v4286_v42  ;;  %v9072_v59 = vor.u32 %v10475_v31, %v9071_v38  ;;  %v9456_v28 = vor.u32 %v10571_v27, %v9455_v60  ;;  %v10507_v38 = vld [vmem:[%s15871_s2 + $0x92c] sm:$0xf0] }
 0x2ce   :  { %v4240_v32 = vadd.f32 %v4239_v49, %v4191_v46  ;;  %4385 = vmatmul.bf16.gmra.mxu0 %v16142_v1  ;;  %4434 = vmatmul.bf16.gmra.mxu1 %v16143_v36  ;;  %v9199_v36 = vld [vmem:[%s15871_s2 + $0x920] sm:$0xf]  ;;  %v16147_v1 = vld [vmem:[#allocation55_spill] sm:$0xff] }
 0x2cf   :  { %4483 = vmatmul.bf16.gmra.mxu2 %v16144_v50  ;;  %4559 = vmatpush.bf16.msra.mxu0 %v9072_v59 }
 0x2d0   :  { %4532 = vmatmul.bf16.gmra.mxu3 %v16145_v21 }
 0x2d1   :  { %4706 = vmatpush.bf16.msra.mxu3 %v9456_v28 }
 0x2d2   :  { %v4288_v42 = vpop.f32.mrf.mxu2 }
 0x2d3   :  { %v4289_v46 = vadd.f32 %v4288_v42, %v4240_v32  ;;  %v4337_v49 = vpop.f32.mrf.mxu3  ;;  %v4192_v21 = vpop.f32.mrf.mxu0  ;;  %v9200_v32 = vor.u32 %v10507_v38, %v9199_v36  ;;  %v9311_v36 = vld [vmem:[%s15871_s2 + $0xa00] sm:$0xf] }
 0x2d4   :  { %v4193_v14 = vadd.f32 %v4192_v21, %v11839_v58  ;;  %v4241_v33 = vpop.f32.mrf.mxu1 }
 0x2d5   :  { %v12005_v50 = vadd.f32 %v4337_v49, %v4289_v46  ;;  %4608 = vmatpush.bf16.msra.mxu1 %v9200_v32  ;;  %v16146_v49 = vld [vmem:[#allocation54_spill] sm:$0xff]  ;;  %v9439_v32 = vld [vmem:[%s15871_s2 + $0xb00] sm:$0xf] }
 0x2d6   :  { %v4242_v31 = vadd.f32 %v4241_v33, %v4193_v14  ;;  %v10535_v14 = vld [vmem:[%s15871_s2 + $0xa0c] sm:$0xf0]  ;;  %v9055_v33 = vld [vmem:[%s15871_s2 + $0x800] sm:$0xf] }
 0x2d7   :  { %v9312_v38 = vor.u32 %v10535_v14, %v9311_v36 }
 0x2d9   :  { %4658 = vmatpush.bf16.msra.mxu2 %v9312_v38 }
 0x2da   :  { %v4290_v60 = vpop.f32.mrf.mxu2 }
 0x2db   :  { %v4291_v2 = vadd.f32 %v4290_v60, %v4242_v31  ;;  %v4339_v27 = vpop.f32.mrf.mxu3  ;;  %v4195_v21 = vpop.f32.mrf.mxu0  ;;  %v10471_v31 = vld [vmem:[%s15871_s2 + $0x80c] sm:$0xf0] }
 0x2dc   :  { %v4196_v42 = vadd.f32 %v4195_v21, %v11839_v58  ;;  %v4244_v59 = vpop.f32.mrf.mxu1  ;;  %v10567_v60 = vld [vmem:[%s15871_s2 + $0xb0c] sm:$0xf0] }
 0x2dd   :  { %v12014_v28 = vadd.f32 %v4339_v27, %v4291_v2  ;;  %v9056_v27 = vor.u32 %v10471_v31, %v9055_v33  ;;  %v9440_v21 = vor.u32 %v10567_v60, %v9439_v32  ;;  %v10503_v33 = vld [vmem:[%s15871_s2 + $0x90c] sm:$0xf0] }
 0x2de   :  { %v4245_v46 = vadd.f32 %v4244_v59, %v4196_v42  ;;  %4390 = vmatmul.bf16.gmra.mxu0 %v16146_v49  ;;  %4439 = vmatmul.bf16.gmra.mxu1 %v16147_v1  ;;  %v9183_v1 = vld [vmem:[%s15871_s2 + $0x900] sm:$0xf]  ;;  %v16151_v49 = vld [vmem:[#allocation60_spill] sm:$0xff] }
 0x2df   :  { %4488 = vmatmul.bf16.gmra.mxu2 %v16148_v9  ;;  %4560 = vmatpush.bf16.msra.mxu0 %v9056_v27 }
 0x2e0   :  { %4537 = vmatmul.bf16.gmra.mxu3 %v16149_v54 }
 0x2e1   :  { %4707 = vmatpush.bf16.msra.mxu3 %v9440_v21 }
 0x2e2   :  { %v4293_v2 = vpop.f32.mrf.mxu2 }
 0x2e3   :  { %v4294_v42 = vadd.f32 %v4293_v2, %v4245_v46  ;;  %v4342_v59 = vpop.f32.mrf.mxu3  ;;  %v4197_v54 = vpop.f32.mrf.mxu0  ;;  %v9184_v46 = vor.u32 %v10503_v33, %v9183_v1  ;;  %v9935_v1 = vld [vmem:[%s15871_s2 + $0xee0] sm:$0xf] }
 0x2e4   :  { %v4198_v36 = vadd.f32 %v4197_v54, %v11839_v58  ;;  %v4246_v14 = vpop.f32.mrf.mxu1 }
 0x2e5   :  { %v12039_v9 = vadd.f32 %v4342_v59, %v4294_v42  ;;  %4609 = vmatpush.bf16.msra.mxu1 %v9184_v46  ;;  %v16150_v59 = vld [vmem:[#allocation59_spill] sm:$0xff]  ;;  %v10063_v46 = vld [vmem:[%s15871_s2 + $0xfe0] sm:$0xf] }
 0x2e6   :  { %v4247_v31 = vadd.f32 %v4246_v14, %v4198_v36  ;;  %v10691_v36 = vld [vmem:[%s15871_s2 + $0xeec] sm:$0xf0]  ;;  %v9679_v14 = vld [vmem:[%s15871_s2 + $0xce0] sm:$0xf] }
 0x2e7   :  { %v9936_v33 = vor.u32 %v10691_v36, %v9935_v1 }
 0x2e9   :  { %4847 = vmatpush.bf16.msrb.mxu2 %v9936_v33 }
 0x2ea   :  { %v4295_v32 = vpop.f32.mrf.mxu2 }
 0x2eb   :  { %v4296_v38 = vadd.f32 %v4295_v32, %v4247_v31  ;;  %v4344_v60 = vpop.f32.mrf.mxu3  ;;  %v4200_v54 = vpop.f32.mrf.mxu0  ;;  %v10627_v31 = vld [vmem:[%s15871_s2 + $0xcec] sm:$0xf0] }
 0x2ec   :  { %v4201_v2 = vadd.f32 %v4200_v54, %v11839_v58  ;;  %v4249_v27 = vpop.f32.mrf.mxu1  ;;  %v10723_v32 = vld [vmem:[%s15871_s2 + $0xfec] sm:$0xf0] }
 0x2ed   :  { %v12048_v21 = vadd.f32 %v4344_v60, %v4296_v38  ;;  %v9680_v60 = vor.u32 %v10627_v31, %v9679_v14  ;;  %v10064_v54 = vor.u32 %v10723_v32, %v10063_v46  ;;  %v10659_v14 = vld [vmem:[%s15871_s2 + $0xdec] sm:$0xf0] }
 0x2ee   :  { %v4250_v42 = vadd.f32 %v4249_v27, %v4201_v2  ;;  %4395 = vmatmul.bf16.gmra.mxu0 %v11186_v39  ;;  %4444 = vmatmul.bf16.gmra.mxu1 %v16150_v59  ;;  %v9807_v59 = vld [vmem:[%s15871_s2 + $0xde0] sm:$0xf]  ;;  %v16154_v39 = vld [vmem:[#allocation64_spill] sm:$0xff] }
 0x2ef   :  { %4493 = vmatmul.bf16.gmra.mxu2 %v16151_v49  ;;  %4749 = vmatpush.bf16.msrb.mxu0 %v9680_v60 }
 0x2f0   :  { %4542 = vmatmul.bf16.gmra.mxu3 %v16152_v62 }
 0x2f1   :  { %4896 = vmatpush.bf16.msrb.mxu3 %v10064_v54 }
 0x2f2   :  { %v4298_v38 = vpop.f32.mrf.mxu2 }
 0x2f3   :  { %v4299_v2 = vadd.f32 %v4298_v38, %v4250_v42  ;;  %v4347_v27 = vpop.f32.mrf.mxu3  ;;  %v4202_v62 = vpop.f32.mrf.mxu0  ;;  %v9808_v42 = vor.u32 %v10659_v14, %v9807_v59  ;;  %v9919_v59 = vld [vmem:[%s15871_s2 + $0xec0] sm:$0xf] }
 0x2f4   :  { %v4203_v1 = vadd.f32 %v4202_v62, %v11839_v58  ;;  %v4251_v36 = vpop.f32.mrf.mxu1 }
 0x2f5   :  { %v12073_v49 = vadd.f32 %v4347_v27, %v4299_v2  ;;  %4798 = vmatpush.bf16.msrb.mxu1 %v9808_v42  ;;  %v16153_v27 = vld [vmem:[#allocation63_spill] sm:$0xff]  ;;  %v10047_v42 = vld [vmem:[%s15871_s2 + $0xfc0] sm:$0xf] }
 0x2f6   :  { %v4252_v31 = vadd.f32 %v4251_v36, %v4203_v1  ;;  %v10687_v1 = vld [vmem:[%s15871_s2 + $0xecc] sm:$0xf0]  ;;  %v9663_v36 = vld [vmem:[%s15871_s2 + $0xcc0] sm:$0xf] }
 0x2f7   :  { %v9920_v14 = vor.u32 %v10687_v1, %v9919_v59 }
 0x2f9   :  { %4848 = vmatpush.bf16.msrb.mxu2 %v9920_v14 }
 0x2fa   :  { %v4300_v46 = vpop.f32.mrf.mxu2 }
 0x2fb   :  { %v4301_v33 = vadd.f32 %v4300_v46, %v4252_v31  ;;  %v4349_v32 = vpop.f32.mrf.mxu3  ;;  %v4205_v62 = vpop.f32.mrf.mxu0  ;;  %v10623_v31 = vld [vmem:[%s15871_s2 + $0xccc] sm:$0xf0] }
 0x2fc   :  { %v4206_v38 = vadd.f32 %v4205_v62, %v11839_v58  ;;  %v4254_v60 = vpop.f32.mrf.mxu1  ;;  %v10719_v46 = vld [vmem:[%s15871_s2 + $0xfcc] sm:$0xf0] }
 0x2fd   :  { %v12082_v54 = vadd.f32 %v4349_v32, %v4301_v33  ;;  %v9664_v32 = vor.u32 %v10623_v31, %v9663_v36  ;;  %v10048_v62 = vor.u32 %v10719_v46, %v10047_v42  ;;  %v10655_v36 = vld [vmem:[%s15871_s2 + $0xdcc] sm:$0xf0] }
 0x2fe   :  { %v4255_v2 = vadd.f32 %v4254_v60, %v4206_v38  ;;  %4400 = vmatmul.bf16.gmra.mxu0 %v11226_v4  ;;  %4449 = vmatmul.bf16.gmra.mxu1 %v16153_v27  ;;  %v9791_v27 = vld [vmem:[%s15871_s2 + $0xdc0] sm:$0xf]  ;;  %v16158_v4 = vld [vmem:[#allocation68_spill] sm:$0xff] }
 0x2ff   :  { %4498 = vmatmul.bf16.gmra.mxu2 %v16154_v39  ;;  %4750 = vmatpush.bf16.msrb.mxu0 %v9664_v32 }
 0x300   :  { %4547 = vmatmul.bf16.gmra.mxu3 %v16155_v24 }
 0x301   :  { %4897 = vmatpush.bf16.msrb.mxu3 %v10048_v62 }
 0x302   :  { %v4303_v33 = vpop.f32.mrf.mxu2 }
 0x303   :  { %v4304_v38 = vadd.f32 %v4303_v33, %v4255_v2  ;;  %v4352_v60 = vpop.f32.mrf.mxu3  ;;  %v4207_v24 = vpop.f32.mrf.mxu0  ;;  %v9792_v2 = vor.u32 %v10655_v36, %v9791_v27  ;;  %v9903_v27 = vld [vmem:[%s15871_s2 + $0xea0] sm:$0xf]  ;;  %v10619_v36 = vld [vmem:[%s15871_s2 + $0xcac] sm:$0xf0] }
 0x304   :  { %v4208_v59 = vadd.f32 %v4207_v24, %v11839_v58  ;;  %v4256_v1 = vpop.f32.mrf.mxu1 }
 0x305   :  { %v12107_v39 = vadd.f32 %v4352_v60, %v4304_v38  ;;  %4799 = vmatpush.bf16.msrb.mxu1 %v9792_v2  ;;  %v16156_v38 = vld [vmem:[#allocation66_spill] sm:$0xff]  ;;  %v16157_v60 = vld [vmem:[#allocation67_spill] sm:$0xff] }
 0x306   :  { %v4257_v31 = vadd.f32 %v4256_v1, %v4208_v59  ;;  %v9647_v59 = vld [vmem:[%s15871_s2 + $0xca0] sm:$0xf]  ;;  %v10715_v2 = vld [vmem:[%s15871_s2 + $0xfac] sm:$0xf0] }
 0x30a   :  { %v4305_v42 = vpop.f32.mrf.mxu2 }
 0x30b   :  { %v4306_v14 = vadd.f32 %v4305_v42, %v4257_v31  ;;  %v4354_v46 = vpop.f32.mrf.mxu3  ;;  %v4366_v24 = vpop.f32.mrf.mxu0  ;;  %v10031_v31 = vld [vmem:[%s15871_s2 + $0xfa0] sm:$0xf] }
 0x30c   :  { %v4367_v58 = vadd.f32 %v4366_v24, %v11869_v6  ;;  %v4415_v33 = vpop.f32.mrf.mxu1  ;;  %v10683_v6 = vld [vmem:[%s15871_s2 + $0xeac] sm:$0xf0] }
 0x30d   :  { %v12116_v32 = vadd.f32 %v4354_v46, %v4306_v14  ;;  %v9904_v1 = vor.u32 %v10683_v6, %v9903_v27  ;;  %v9648_v14 = vor.u32 %v10619_v36, %v9647_v59  ;;  %v10032_v46 = vor.u32 %v10715_v2, %v10031_v31  ;;  %v10651_v59 = vld [vmem:[%s15871_s2 + $0xdac] sm:$0xf0] }
 0x30e   :  { %v4416_v62 = vadd.f32 %v4415_v33, %v4367_v58  ;;  %4561 = vmatmul.bf16.vlgmr.msra.gmra.mxu0 %v11266_v44  ;;  %4610 = vmatmul.bf16.vlgmr.msra.gmra.mxu1 %v16156_v38  ;;  %v16161_v38 = vld [vmem:[#allocation71_spill] sm:$0xff] }
 0x30f   :  { %4659 = vmatmul.bf16.vlgmr.msra.gmra.mxu2 %v16157_v60  ;;  %4751 = vmatpush.bf16.msrb.mxu0 %v9648_v14  ;;  %v9775_v60 = vld [vmem:[%s15871_s2 + $0xda0] sm:$0xf] }
 0x310   :  { %4708 = vmatmul.bf16.vlgmr.msra.gmra.mxu3 %v16158_v4  ;;  %4849 = vmatpush.bf16.msrb.mxu2 %v9904_v1 }
 0x311   :  { %4898 = vmatpush.bf16.msrb.mxu3 %v10032_v46 }
 0x312   :  { %v4464_v42 = vpop.f32.mrf.mxu2 }
 0x313   :  { %v4465_v24 = vadd.f32 %v4464_v42, %v4416_v62  ;;  %v4513_v58 = vpop.f32.mrf.mxu3  ;;  %v4368_v33 = vpop.f32.mrf.mxu0  ;;  %v9776_v62 = vor.u32 %v10651_v59, %v9775_v60  ;;  %v9887_v60 = vld [vmem:[%s15871_s2 + $0xe80] sm:$0xf]  ;;  %v10615_v59 = vld [vmem:[%s15871_s2 + $0xc8c] sm:$0xf0] }
 0x314   :  { %v4369_v27 = vadd.f32 %v4368_v33, %v11878_v15  ;;  %v4417_v6 = vpop.f32.mrf.mxu1  ;;  %v16160_v33 = vld [vmem:[#allocation70_spill] sm:$0xff] }
 0x315   :  { %v12141_v4 = vadd.f32 %v4513_v58, %v4465_v24  ;;  %4800 = vmatpush.bf16.msrb.mxu1 %v9776_v62  ;;  %v16159_v58 = vld [vmem:[#allocation69_spill] sm:$0xff]  ;;  %v10711_v62 = vld [vmem:[%s15871_s2 + $0xf8c] sm:$0xf0] }
 0x316   :  { %v4418_v36 = vadd.f32 %v4417_v6, %v4369_v27  ;;  %v9631_v27 = vld [vmem:[%s15871_s2 + $0xc80] sm:$0xf] }
 0x31a   :  { %v4466_v31 = vpop.f32.mrf.mxu2 }
 0x31b   :  { %v4467_v1 = vadd.f32 %v4466_v31, %v4418_v36  ;;  %v4515_v2 = vpop.f32.mrf.mxu3  ;;  %v4371_v15 = vpop.f32.mrf.mxu0  ;;  %v10015_v36 = vld [vmem:[%s15871_s2 + $0xf80] sm:$0xf] }
 0x31c   :  { %v4372_v42 = vadd.f32 %v4371_v15, %v11903_v53  ;;  %v4420_v14 = vpop.f32.mrf.mxu1  ;;  %v10679_v53 = vld [vmem:[%s15871_s2 + $0xe8c] sm:$0xf0] }
 0x31d   :  { %v12150_v46 = vadd.f32 %v4515_v2, %v4467_v1  ;;  %v9888_v6 = vor.u32 %v10679_v53, %v9887_v60  ;;  %v9632_v1 = vor.u32 %v10615_v59, %v9631_v27  ;;  %v10016_v2 = vor.u32 %v10711_v62, %v10015_v36  ;;  %v10647_v27 = vld [vmem:[%s15871_s2 + $0xd8c] sm:$0xf0] }
 0x31e   :  { %v4421_v24 = vadd.f32 %v4420_v14, %v4372_v42  ;;  %4566 = vmatmul.bf16.gmra.mxu0 %v11306_v56  ;;  %4615 = vmatmul.bf16.gmra.mxu1 %v16159_v58  ;;  %v16164_v58 = vld [vmem:[#allocation75_spill] sm:$0xff] }
 0x31f   :  { %4664 = vmatmul.bf16.gmra.mxu2 %v16160_v33  ;;  %4752 = vmatpush.bf16.msrb.mxu0 %v9632_v1  ;;  %v9759_v33 = vld [vmem:[%s15871_s2 + $0xd80] sm:$0xf] }
 0x320   :  { %4713 = vmatmul.bf16.gmra.mxu3 %v16161_v38  ;;  %4850 = vmatpush.bf16.msrb.mxu2 %v9888_v6 }
 0x321   :  { %4899 = vmatpush.bf16.msrb.mxu3 %v10016_v2 }
 0x322   :  { %v4469_v31 = vpop.f32.mrf.mxu2 }
 0x323   :  { %v4470_v15 = vadd.f32 %v4469_v31, %v4421_v24  ;;  %v4518_v42 = vpop.f32.mrf.mxu3  ;;  %v4373_v14 = vpop.f32.mrf.mxu0  ;;  %v9760_v24 = vor.u32 %v10647_v27, %v9759_v33  ;;  %v9871_v33 = vld [vmem:[%s15871_s2 + $0xe60] sm:$0xf]  ;;  %v10611_v27 = vld [vmem:[%s15871_s2 + $0xc6c] sm:$0xf0] }
 0x324   :  { %v4374_v60 = vadd.f32 %v4373_v14, %v11912_v10  ;;  %v4422_v53 = vpop.f32.mrf.mxu1  ;;  %v16163_v14 = vld [vmem:[#allocation74_spill] sm:$0xff] }
 0x325   :  { %v12175_v38 = vadd.f32 %v4518_v42, %v4470_v15  ;;  %4801 = vmatpush.bf16.msrb.mxu1 %v9760_v24  ;;  %v16162_v42 = vld [vmem:[#allocation73_spill] sm:$0xff]  ;;  %v10707_v24 = vld [vmem:[%s15871_s2 + $0xf6c] sm:$0xf0] }
 0x326   :  { %v4423_v59 = vadd.f32 %v4422_v53, %v4374_v60  ;;  %v9615_v60 = vld [vmem:[%s15871_s2 + $0xc60] sm:$0xf] }
 0x32a   :  { %v4471_v36 = vpop.f32.mrf.mxu2 }
 0x32b   :  { %v4472_v6 = vadd.f32 %v4471_v36, %v4423_v59  ;;  %v4520_v62 = vpop.f32.mrf.mxu3  ;;  %v4376_v10 = vpop.f32.mrf.mxu0  ;;  %v9999_v59 = vld [vmem:[%s15871_s2 + $0xf60] sm:$0xf] }
 0x32c   :  { %v4377_v31 = vadd.f32 %v4376_v10, %v11937_v13  ;;  %v4425_v1 = vpop.f32.mrf.mxu1  ;;  %v10675_v13 = vld [vmem:[%s15871_s2 + $0xe6c] sm:$0xf0] }
 0x32d   :  { %v12184_v2 = vadd.f32 %v4520_v62, %v4472_v6  ;;  %v9872_v53 = vor.u32 %v10675_v13, %v9871_v33  ;;  %v9616_v6 = vor.u32 %v10611_v27, %v9615_v60  ;;  %v10000_v62 = vor.u32 %v10707_v24, %v9999_v59  ;;  %v10643_v60 = vld [vmem:[%s15871_s2 + $0xd6c] sm:$0xf0] }
 0x32e   :  { %v4426_v15 = vadd.f32 %v4425_v1, %v4377_v31  ;;  %4571 = vmatmul.bf16.gmra.mxu0 %v11346_v20  ;;  %4620 = vmatmul.bf16.gmra.mxu1 %v16162_v42  ;;  %v16167_v42 = vld [vmem:[#allocation79_spill] sm:$0xff] }
 0x32f   :  { %4669 = vmatmul.bf16.gmra.mxu2 %v16163_v14  ;;  %4753 = vmatpush.bf16.msrb.mxu0 %v9616_v6  ;;  %v9743_v14 = vld [vmem:[%s15871_s2 + $0xd60] sm:$0xf] }
 0x330   :  { %4718 = vmatmul.bf16.gmra.mxu3 %v16164_v58  ;;  %4851 = vmatpush.bf16.msrb.mxu2 %v9872_v53 }
 0x331   :  { %4900 = vmatpush.bf16.msrb.mxu3 %v10000_v62 }
 0x332   :  { %v4474_v36 = vpop.f32.mrf.mxu2 }
 0x333   :  { %v4475_v10 = vadd.f32 %v4474_v36, %v4426_v15  ;;  %v4523_v31 = vpop.f32.mrf.mxu3  ;;  %v4378_v1 = vpop.f32.mrf.mxu0  ;;  %v9744_v15 = vor.u32 %v10643_v60, %v9743_v14  ;;  %v9855_v14 = vld [vmem:[%s15871_s2 + $0xe40] sm:$0xf]  ;;  %v10607_v60 = vld [vmem:[%s15871_s2 + $0xc4c] sm:$0xf0] }
 0x334   :  { %v4379_v33 = vadd.f32 %v4378_v1, %v11946_v19  ;;  %v4427_v13 = vpop.f32.mrf.mxu1  ;;  %v16166_v1 = vld [vmem:[#allocation78_spill] sm:$0xff] }
 0x335   :  { %v12209_v58 = vadd.f32 %v4523_v31, %v4475_v10  ;;  %4802 = vmatpush.bf16.msrb.mxu1 %v9744_v15  ;;  %v16165_v31 = vld [vmem:[#allocation77_spill] sm:$0xff]  ;;  %v10703_v15 = vld [vmem:[%s15871_s2 + $0xf4c] sm:$0xf0] }
 0x336   :  { %v4428_v27 = vadd.f32 %v4427_v13, %v4379_v33  ;;  %v9599_v33 = vld [vmem:[%s15871_s2 + $0xc40] sm:$0xf] }
 0x33a   :  { %v4476_v59 = vpop.f32.mrf.mxu2 }
 0x33b   :  { %v4477_v53 = vadd.f32 %v4476_v59, %v4428_v27  ;;  %v4525_v24 = vpop.f32.mrf.mxu3  ;;  %v4381_v19 = vpop.f32.mrf.mxu0  ;;  %v9983_v27 = vld [vmem:[%s15871_s2 + $0xf40] sm:$0xf] }
 0x33c   :  { %v4382_v36 = vadd.f32 %v4381_v19, %v11971_v47  ;;  %v4430_v6 = vpop.f32.mrf.mxu1  ;;  %v10671_v47 = vld [vmem:[%s15871_s2 + $0xe4c] sm:$0xf0] }
 0x33d   :  { %v12218_v62 = vadd.f32 %v4525_v24, %v4477_v53  ;;  %v9856_v13 = vor.u32 %v10671_v47, %v9855_v14  ;;  %v9600_v53 = vor.u32 %v10607_v60, %v9599_v33  ;;  %v9984_v24 = vor.u32 %v10703_v15, %v9983_v27  ;;  %v10639_v33 = vld [vmem:[%s15871_s2 + $0xd4c] sm:$0xf0] }
 0x33e   :  { %v4431_v10 = vadd.f32 %v4430_v6, %v4382_v36  ;;  %4576 = vmatmul.bf16.gmra.mxu0 %v11386_v12  ;;  %4625 = vmatmul.bf16.gmra.mxu1 %v16165_v31  ;;  %v16170_v31 = vld [vmem:[#allocation83_spill] sm:$0xff] }
 0x33f   :  { %4674 = vmatmul.bf16.gmra.mxu2 %v16166_v1  ;;  %4754 = vmatpush.bf16.msrb.mxu0 %v9600_v53  ;;  %v9727_v1 = vld [vmem:[%s15871_s2 + $0xd40] sm:$0xf] }
 0x340   :  { %4723 = vmatmul.bf16.gmra.mxu3 %v16167_v42  ;;  %4852 = vmatpush.bf16.msrb.mxu2 %v9856_v13 }
 0x341   :  { %4901 = vmatpush.bf16.msrb.mxu3 %v9984_v24 }
 0x342   :  { %v4479_v59 = vpop.f32.mrf.mxu2 }
 0x343   :  { %v4480_v19 = vadd.f32 %v4479_v59, %v4431_v10  ;;  %v4528_v36 = vpop.f32.mrf.mxu3  ;;  %v4383_v6 = vpop.f32.mrf.mxu0  ;;  %v9728_v10 = vor.u32 %v10639_v33, %v9727_v1  ;;  %v9839_v1 = vld [vmem:[%s15871_s2 + $0xe20] sm:$0xf]  ;;  %v10603_v33 = vld [vmem:[%s15871_s2 + $0xc2c] sm:$0xf0] }
 0x344   :  { %v4384_v14 = vadd.f32 %v4383_v6, %v11980_v40  ;;  %v4432_v47 = vpop.f32.mrf.mxu1  ;;  %v16169_v6 = vld [vmem:[#allocation82_spill] sm:$0xff] }
 0x345   :  { %v12243_v42 = vadd.f32 %v4528_v36, %v4480_v19  ;;  %4803 = vmatpush.bf16.msrb.mxu1 %v9728_v10  ;;  %v16168_v36 = vld [vmem:[#allocation81_spill] sm:$0xff]  ;;  %v10699_v10 = vld [vmem:[%s15871_s2 + $0xf2c] sm:$0xf0] }
 0x346   :  { %v4433_v60 = vadd.f32 %v4432_v47, %v4384_v14  ;;  %v9583_v14 = vld [vmem:[%s15871_s2 + $0xc20] sm:$0xf] }
 0x34a   :  { %v4481_v27 = vpop.f32.mrf.mxu2 }
 0x34b   :  { %v4482_v13 = vadd.f32 %v4481_v27, %v4433_v60  ;;  %v4530_v15 = vpop.f32.mrf.mxu3  ;;  %v4386_v40 = vpop.f32.mrf.mxu0  ;;  %v9967_v60 = vld [vmem:[%s15871_s2 + $0xf20] sm:$0xf] }
 0x34c   :  { %v4387_v59 = vadd.f32 %v4386_v40, %v12005_v50  ;;  %v4435_v53 = vpop.f32.mrf.mxu1  ;;  %v10667_v50 = vld [vmem:[%s15871_s2 + $0xe2c] sm:$0xf0] }
 0x34d   :  { %v12252_v24 = vadd.f32 %v4530_v15, %v4482_v13  ;;  %v9840_v47 = vor.u32 %v10667_v50, %v9839_v1  ;;  %v9584_v13 = vor.u32 %v10603_v33, %v9583_v14  ;;  %v9968_v15 = vor.u32 %v10699_v10, %v9967_v60  ;;  %v10635_v14 = vld [vmem:[%s15871_s2 + $0xd2c] sm:$0xf0] }
 0x34e   :  { %v4436_v19 = vadd.f32 %v4435_v53, %v4387_v59  ;;  %4581 = vmatmul.bf16.gmra.mxu0 %v11426_v30  ;;  %4630 = vmatmul.bf16.gmra.mxu1 %v16168_v36  ;;  %v16173_v36 = vld [vmem:[#allocation86_spill] sm:$0xff]  ;;  %v16174_v30 = vld [vmem:[#allocation87_spill] sm:$0xff] }
 0x34f   :  { %4679 = vmatmul.bf16.gmra.mxu2 %v16169_v6  ;;  %4755 = vmatpush.bf16.msrb.mxu0 %v9584_v13  ;;  %v9711_v6 = vld [vmem:[%s15871_s2 + $0xd20] sm:$0xf] }
 0x350   :  { %4728 = vmatmul.bf16.gmra.mxu3 %v16170_v31  ;;  %4853 = vmatpush.bf16.msrb.mxu2 %v9840_v47 }
 0x351   :  { %4902 = vmatpush.bf16.msrb.mxu3 %v9968_v15 }
 0x352   :  { %v4484_v27 = vpop.f32.mrf.mxu2 }
 0x353   :  { %v4485_v40 = vadd.f32 %v4484_v27, %v4436_v19  ;;  %v4533_v59 = vpop.f32.mrf.mxu3  ;;  %v4388_v53 = vpop.f32.mrf.mxu0  ;;  %v9712_v19 = vor.u32 %v10635_v14, %v9711_v6  ;;  %v9823_v6 = vld [vmem:[%s15871_s2 + $0xe00] sm:$0xf]  ;;  %v10599_v14 = vld [vmem:[%s15871_s2 + $0xc0c] sm:$0xf0] }
 0x354   :  { %v4389_v1 = vadd.f32 %v4388_v53, %v12014_v28  ;;  %v4437_v50 = vpop.f32.mrf.mxu1  ;;  %v16172_v53 = vld [vmem:[#allocation85_spill] sm:$0xff] }
 0x355   :  { %v12277_v31 = vadd.f32 %v4533_v59, %v4485_v40  ;;  %4804 = vmatpush.bf16.msrb.mxu1 %v9712_v19  ;;  %v16171_v59 = vld [vmem:[#allocation84_spill] sm:$0xff]  ;;  %v10695_v19 = vld [vmem:[%s15871_s2 + $0xf0c] sm:$0xf0] }
 0x356   :  { %v4438_v33 = vadd.f32 %v4437_v50, %v4389_v1  ;;  %v9567_v1 = vld [vmem:[%s15871_s2 + $0xc00] sm:$0xf] }
 0x35a   :  { %v4486_v60 = vpop.f32.mrf.mxu2 }
 0x35b   :  { %v4487_v47 = vadd.f32 %v4486_v60, %v4438_v33  ;;  %v4535_v10 = vpop.f32.mrf.mxu3  ;;  %v4391_v28 = vpop.f32.mrf.mxu0  ;;  %v9951_v33 = vld [vmem:[%s15871_s2 + $0xf00] sm:$0xf] }
 0x35c   :  { %v4392_v27 = vadd.f32 %v4391_v28, %v12039_v9  ;;  %v4440_v13 = vpop.f32.mrf.mxu1  ;;  %v10663_v9 = vld [vmem:[%s15871_s2 + $0xe0c] sm:$0xf0] }
 0x35d   :  { %v12286_v15 = vadd.f32 %v4535_v10, %v4487_v47  ;;  %v9824_v50 = vor.u32 %v10663_v9, %v9823_v6  ;;  %v9568_v47 = vor.u32 %v10599_v14, %v9567_v1  ;;  %v9952_v10 = vor.u32 %v10695_v19, %v9951_v33  ;;  %v10631_v1 = vld [vmem:[%s15871_s2 + $0xd0c] sm:$0xf0] }
 0x35e   :  { %v4441_v40 = vadd.f32 %v4440_v13, %v4392_v27  ;;  %4586 = vmatmul.bf16.gmra.mxu0 %v16171_v59  ;;  %4635 = vmatmul.bf16.gmra.mxu1 %v16172_v53  ;;  %v16177_v53 = vld [vmem:[#allocation90_spill] sm:$0xff]  ;;  %v16178_v59 = vld [vmem:[#allocation91_spill] sm:$0xff] }
 0x35f   :  { %4684 = vmatmul.bf16.gmra.mxu2 %v16173_v36  ;;  %4756 = vmatpush.bf16.msrb.mxu0 %v9568_v47  ;;  %v9695_v36 = vld [vmem:[%s15871_s2 + $0xd00] sm:$0xf] }
 0x360   :  { %4733 = vmatmul.bf16.gmra.mxu3 %v16174_v30  ;;  %4854 = vmatpush.bf16.msrb.mxu2 %v9824_v50 }
 0x361   :  { %4903 = vmatpush.bf16.msrb.mxu3 %v9952_v10 }
 0x362   :  { %v4489_v60 = vpop.f32.mrf.mxu2 }
 0x363   :  { %v4490_v28 = vadd.f32 %v4489_v60, %v4441_v40  ;;  %v4538_v27 = vpop.f32.mrf.mxu3  ;;  %v4393_v13 = vpop.f32.mrf.mxu0  ;;  %v9696_v40 = vor.u32 %v10631_v1, %v9695_v36  ;;  %v10305_v36 = vld [vmem:[%s15871_s2 + $0x2e4] sm:$0xf]  ;;  %v8145_v1 = vld [vmem:[%s15871_s2 + $0xf0] sm:$0xf0] }
 0x364   :  { %v4394_v6 = vadd.f32 %v4393_v13, %v12048_v21  ;;  %v4442_v9 = vpop.f32.mrf.mxu1  ;;  %v16176_v13 = vld [vmem:[#allocation89_spill] sm:$0xff] }
 0x365   :  { %v12311_v30 = vadd.f32 %v4538_v27, %v4490_v28  ;;  %4805 = vmatpush.bf16.msrb.mxu1 %v9696_v40  ;;  %v16175_v27 = vld [vmem:[#allocation88_spill] sm:$0xff]  ;;  %v8529_v40 = vld [vmem:[%s15871_s2 + $0x3f0] sm:$0xf0] }
 0x366   :  { %v4443_v14 = vadd.f32 %v4442_v9, %v4394_v6  ;;  %v10241_v6 = vld [vmem:[%s15871_s2 + $0xe4] sm:$0xf] }
 0x36a   :  { %v4491_v33 = vpop.f32.mrf.mxu2 }
 0x36b   :  { %v4492_v50 = vadd.f32 %v4491_v33, %v4443_v14  ;;  %v4540_v19 = vpop.f32.mrf.mxu3  ;;  %v4396_v21 = vpop.f32.mrf.mxu0  ;;  %v10337_v14 = vld [vmem:[%s15871_s2 + $0x3e4] sm:$0xf] }
 0x36c   :  { %v4397_v60 = vadd.f32 %v4396_v21, %v12073_v49  ;;  %v4445_v47 = vpop.f32.mrf.mxu1  ;;  %v8401_v49 = vld [vmem:[%s15871_s2 + $0x2f0] sm:$0xf0] }
 0x36d   :  { %v12320_v10 = vadd.f32 %v4540_v19, %v4492_v50  ;;  %v8404_v9 = vor.u32 %v10305_v36, %v8401_v49  ;;  %v8148_v50 = vor.u32 %v10241_v6, %v8145_v1  ;;  %v8532_v19 = vor.u32 %v10337_v14, %v8529_v40  ;;  %v8273_v6 = vld [vmem:[%s15871_s2 + $0x1f0] sm:$0xf0] }
 0x36e   :  { %v4446_v28 = vadd.f32 %v4445_v47, %v4397_v60  ;;  %4591 = vmatmul.bf16.gmra.mxu0 %v16175_v27  ;;  %4640 = vmatmul.bf16.gmra.mxu1 %v16176_v13 }
 0x36f   :  { %4689 = vmatmul.bf16.gmra.mxu2 %v16177_v53  ;;  %4945 = vmatpush.bf16.msra.mxu0 %v8148_v50  ;;  %v10273_v53 = vld [vmem:[%s15871_s2 + $0x1e4] sm:$0xf] }
 0x370   :  { %4738 = vmatmul.bf16.gmra.mxu3 %v16178_v59  ;;  %5043 = vmatpush.bf16.msra.mxu2 %v8404_v9 }
 0x371   :  { %5092 = vmatpush.bf16.msra.mxu3 %v8532_v19 }
 0x372   :  { %v4494_v33 = vpop.f32.mrf.mxu2 }
 0x373   :  { %v4495_v21 = vadd.f32 %v4494_v33, %v4446_v28  ;;  %v4543_v60 = vpop.f32.mrf.mxu3  ;;  %v4398_v47 = vpop.f32.mrf.mxu0  ;;  %v8276_v28 = vor.u32 %v10273_v53, %v8273_v6  ;;  %v10301_v53 = vld [vmem:[%s15871_s2 + $0x2c4] sm:$0xf]  ;;  %v8513_v6 = vld [vmem:[%s15871_s2 + $0x3d0] sm:$0xf0] }
 0x374   :  { %v4399_v36 = vadd.f32 %v4398_v47, %v12082_v54  ;;  %v4447_v49 = vpop.f32.mrf.mxu1 }
 0x375   :  { %v12345_v59 = vadd.f32 %v4543_v60, %v4495_v21  ;;  %4994 = vmatpush.bf16.msra.mxu1 %v8276_v28  ;;  %v10237_v60 = vld [vmem:[%s15871_s2 + $0xc4] sm:$0xf] }
 0x376   :  { %v4448_v1 = vadd.f32 %v4447_v49, %v4399_v36  ;;  %v8129_v36 = vld [vmem:[%s15871_s2 + $0xd0] sm:$0xf0]  ;;  %v10333_v49 = vld [vmem:[%s15871_s2 + $0x3c4] sm:$0xf] }
 0x377   :  { %v8132_v28 = vor.u32 %v10237_v60, %v8129_v36  ;;  %v8257_v60 = vld [vmem:[%s15871_s2 + $0x1d0] sm:$0xf0] }
 0x379   :  { %4946 = vmatpush.bf16.msra.mxu0 %v8132_v28 }
 0x37a   :  { %v4496_v14 = vpop.f32.mrf.mxu2 }
 0x37b   :  { %v4497_v9 = vadd.f32 %v4496_v14, %v4448_v1  ;;  %v4545_v40 = vpop.f32.mrf.mxu3  ;;  %v4401_v54 = vpop.f32.mrf.mxu0  ;;  %v8516_v14 = vor.u32 %v10333_v49, %v8513_v6 }
 0x37c   :  { %v4402_v33 = vadd.f32 %v4401_v54, %v12107_v39  ;;  %v4450_v50 = vpop.f32.mrf.mxu1  ;;  %v8385_v39 = vld [vmem:[%s15871_s2 + $0x2d0] sm:$0xf0] }
 0x37d   :  { %v12354_v19 = vadd.f32 %v4545_v40, %v4497_v9  ;;  %v8388_v47 = vor.u32 %v10301_v53, %v8385_v39  ;;  %5093 = vmatpush.bf16.msra.mxu3 %v8516_v14  ;;  %v10269_v39 = vld [vmem:[%s15871_s2 + $0x1c4] sm:$0xf] }
 0x37e   :  { %v4451_v21 = vadd.f32 %v4450_v50, %v4402_v33  ;;  %4596 = vmatmul.bf16.gmra.mxu0 %v11544_v8  ;;  %4645 = vmatmul.bf16.gmra.mxu1 %v11546_v35 }
 0x37f   :  { %4694 = vmatmul.bf16.gmra.mxu2 %v11548_v0 }
 0x380   :  { %4743 = vmatmul.bf16.gmra.mxu3 %v11550_v29  ;;  %5044 = vmatpush.bf16.msra.mxu2 %v8388_v47 }
 0x382   :  { %v4499_v1 = vpop.f32.mrf.mxu2 }
 0x383   :  { %v4500_v9 = vadd.f32 %v4499_v1, %v4451_v21  ;;  %v4548_v40 = vpop.f32.mrf.mxu3  ;;  %v4403_v54 = vpop.f32.mrf.mxu0  ;;  %v8260_v21 = vor.u32 %v10269_v39, %v8257_v60  ;;  %v10329_v39 = vld [vmem:[%s15871_s2 + $0x3a4] sm:$0xf]  ;;  %v8497_v60 = vld [vmem:[%s15871_s2 + $0x3b0] sm:$0xf0] }
 0x384   :  { %v4404_v33 = vadd.f32 %v4403_v54, %v12116_v32  ;;  %v4452_v50 = vpop.f32.mrf.mxu1  ;;  %v10233_v54 = vld [vmem:[%s15871_s2 + $0xa4] sm:$0xf] }
 0x385   :  { %v12379_v53 = vadd.f32 %v4548_v40, %v4500_v9  ;;  %4995 = vmatpush.bf16.msra.mxu1 %v8260_v21  ;;  %v10297_v40 = vld [vmem:[%s15871_s2 + $0x2a4] sm:$0xf] }
 0x386   :  { %v4453_v36 = vadd.f32 %v4452_v50, %v4404_v33  ;;  %v8113_v50 = vld [vmem:[%s15871_s2 + $0xb0] sm:$0xf0] }
 0x387   :  { %v8116_v21 = vor.u32 %v10233_v54, %v8113_v50  ;;  %v8241_v54 = vld [vmem:[%s15871_s2 + $0x1b0] sm:$0xf0] }
 0x389   :  { %4947 = vmatpush.bf16.msra.mxu0 %v8116_v21 }
 0x38a   :  { %v4501_v49 = vpop.f32.mrf.mxu2 }
 0x38b   :  { %v4502_v47 = vadd.f32 %v4501_v49, %v4453_v36  ;;  %v4550_v6 = vpop.f32.mrf.mxu3  ;;  %v4562_v32 = vpop.f32.mrf.mxu0  ;;  %v8500_v49 = vor.u32 %v10329_v39, %v8497_v60 }
 0x38c   :  { %v4563_v1 = vadd.f32 %v4562_v32, %v12141_v4  ;;  %v4611_v28 = vpop.f32.mrf.mxu1  ;;  %v8369_v4 = vld [vmem:[%s15871_s2 + $0x2b0] sm:$0xf0] }
 0x38d   :  { %v12388_v14 = vadd.f32 %v4550_v6, %v4502_v47  ;;  %v8372_v33 = vor.u32 %v10297_v40, %v8369_v4  ;;  %5094 = vmatpush.bf16.msra.mxu3 %v8500_v49  ;;  %v10265_v4 = vld [vmem:[%s15871_s2 + $0x1a4] sm:$0xf] }
 0x38e   :  { %v4612_v9 = vadd.f32 %v4611_v28, %v4563_v1  ;;  %4757 = vmatmul.bf16.vlgmr.msrb.gmra.mxu0 %v11580_v7  ;;  %4806 = vmatmul.bf16.vlgmr.msrb.gmra.mxu1 %v11582_v43 }
 0x38f   :  { %4855 = vmatmul.bf16.vlgmr.msrb.gmra.mxu2 %v11584_v61 }
 0x390   :  { %4904 = vmatmul.bf16.vlgmr.msrb.gmra.mxu3 %v11586_v11  ;;  %5045 = vmatpush.bf16.msra.mxu2 %v8372_v33 }
 0x392   :  { %v4660_v36 = vpop.f32.mrf.mxu2 }
 0x393   :  { %v4661_v47 = vadd.f32 %v4660_v36, %v4612_v9  ;;  %v4709_v6 = vpop.f32.mrf.mxu3  ;;  %v4564_v32 = vpop.f32.mrf.mxu0  ;;  %v8244_v9 = vor.u32 %v10265_v4, %v8241_v54  ;;  %v10325_v4 = vld [vmem:[%s15871_s2 + $0x384] sm:$0xf]  ;;  %v8481_v54 = vld [vmem:[%s15871_s2 + $0x390] sm:$0xf0] }
 0x394   :  { %v4565_v1 = vadd.f32 %v4564_v32, %v12150_v46  ;;  %v4613_v28 = vpop.f32.mrf.mxu1  ;;  %v10229_v32 = vld [vmem:[%s15871_s2 + $0x84] sm:$0xf] }
 0x395   :  { %v12413_v40 = vadd.f32 %v4709_v6, %v4661_v47  ;;  %4996 = vmatpush.bf16.msra.mxu1 %v8244_v9  ;;  %v10293_v6 = vld [vmem:[%s15871_s2 + $0x284] sm:$0xf] }
 0x396   :  { %v4614_v50 = vadd.f32 %v4613_v28, %v4565_v1  ;;  %v8097_v28 = vld [vmem:[%s15871_s2 + $0x90] sm:$0xf0] }
 0x397   :  { %v8100_v9 = vor.u32 %v10229_v32, %v8097_v28  ;;  %v8225_v32 = vld [vmem:[%s15871_s2 + $0x190] sm:$0xf0] }
 0x399   :  { %4948 = vmatpush.bf16.msra.mxu0 %v8100_v9 }
 0x39a   :  { %v4662_v39 = vpop.f32.mrf.mxu2 }
 0x39b   :  { %v4663_v33 = vadd.f32 %v4662_v39, %v4614_v50  ;;  %v4711_v60 = vpop.f32.mrf.mxu3  ;;  %v4567_v46 = vpop.f32.mrf.mxu0  ;;  %v8484_v39 = vor.u32 %v10325_v4, %v8481_v54 }
 0x39c   :  { %v4568_v36 = vadd.f32 %v4567_v46, %v12175_v38  ;;  %v4616_v21 = vpop.f32.mrf.mxu1  ;;  %v8353_v38 = vld [vmem:[%s15871_s2 + $0x290] sm:$0xf0] }
 0x39d   :  { %v12422_v49 = vadd.f32 %v4711_v60, %v4663_v33  ;;  %v8356_v1 = vor.u32 %v10293_v6, %v8353_v38  ;;  %5095 = vmatpush.bf16.msra.mxu3 %v8484_v39  ;;  %v10261_v38 = vld [vmem:[%s15871_s2 + $0x184] sm:$0xf] }
 0x39e   :  { %v4617_v47 = vadd.f32 %v4616_v21, %v4568_v36  ;;  %4762 = vmatmul.bf16.gmra.mxu0 %v11616_v48  ;;  %4811 = vmatmul.bf16.gmra.mxu1 %v11618_v55 }
 0x39f   :  { %4860 = vmatmul.bf16.gmra.mxu2 %v11620_v17 }
 0x3a0   :  { %4909 = vmatmul.bf16.gmra.mxu3 %v11622_v25  ;;  %5046 = vmatpush.bf16.msra.mxu2 %v8356_v1 }
 0x3a2   :  { %v4665_v50 = vpop.f32.mrf.mxu2 }
 0x3a3   :  { %v4666_v33 = vadd.f32 %v4665_v50, %v4617_v47  ;;  %v4714_v60 = vpop.f32.mrf.mxu3  ;;  %v4569_v46 = vpop.f32.mrf.mxu0  ;;  %v8228_v47 = vor.u32 %v10261_v38, %v8225_v32  ;;  %v10321_v38 = vld [vmem:[%s15871_s2 + $0x364] sm:$0xf]  ;;  %v8465_v32 = vld [vmem:[%s15871_s2 + $0x370] sm:$0xf0] }
 0x3a4   :  { %v4570_v36 = vadd.f32 %v4569_v46, %v12184_v2  ;;  %v4618_v21 = vpop.f32.mrf.mxu1  ;;  %v10225_v46 = vld [vmem:[%s15871_s2 + $0x64] sm:$0xf] }
 0x3a5   :  { %v12447_v6 = vadd.f32 %v4714_v60, %v4666_v33  ;;  %4997 = vmatpush.bf16.msra.mxu1 %v8228_v47  ;;  %v10289_v60 = vld [vmem:[%s15871_s2 + $0x264] sm:$0xf] }
 0x3a6   :  { %v4619_v28 = vadd.f32 %v4618_v21, %v4570_v36  ;;  %v8081_v21 = vld [vmem:[%s15871_s2 + $0x70] sm:$0xf0] }
 0x3a7   :  { %v8084_v47 = vor.u32 %v10225_v46, %v8081_v21  ;;  %v8209_v46 = vld [vmem:[%s15871_s2 + $0x170] sm:$0xf0] }
 0x3a9   :  { %4949 = vmatpush.bf16.msra.mxu0 %v8084_v47 }
 0x3aa   :  { %v4667_v4 = vpop.f32.mrf.mxu2 }
 0x3ab   :  { %v4668_v1 = vadd.f32 %v4667_v4, %v4619_v28  ;;  %v4716_v54 = vpop.f32.mrf.mxu3  ;;  %v4572_v2 = vpop.f32.mrf.mxu0  ;;  %v8468_v4 = vor.u32 %v10321_v38, %v8465_v32 }
 0x3ac   :  { %v4573_v50 = vadd.f32 %v4572_v2, %v12209_v58  ;;  %v4621_v9 = vpop.f32.mrf.mxu1  ;;  %v8337_v58 = vld [vmem:[%s15871_s2 + $0x270] sm:$0xf0] }
 0x3ad   :  { %v12456_v39 = vadd.f32 %v4716_v54, %v4668_v1  ;;  %v8340_v36 = vor.u32 %v10289_v60, %v8337_v58  ;;  %5096 = vmatpush.bf16.msra.mxu3 %v8468_v4  ;;  %v10257_v58 = vld [vmem:[%s15871_s2 + $0x164] sm:$0xf] }
 0x3ae   :  { %v4622_v33 = vadd.f32 %v4621_v9, %v4573_v50  ;;  %4767 = vmatmul.bf16.gmra.mxu0 %v11652_v57  ;;  %4816 = vmatmul.bf16.gmra.mxu1 %v11654_v3 }
 0x3af   :  { %4865 = vmatmul.bf16.gmra.mxu2 %v11656_v26 }
 0x3b0   :  { %4914 = vmatmul.bf16.gmra.mxu3 %v11658_v52  ;;  %5047 = vmatpush.bf16.msra.mxu2 %v8340_v36 }
 0x3b2   :  { %v4670_v28 = vpop.f32.mrf.mxu2 }
 0x3b3   :  { %v4671_v1 = vadd.f32 %v4670_v28, %v4622_v33  ;;  %v4719_v54 = vpop.f32.mrf.mxu3  ;;  %v4574_v2 = vpop.f32.mrf.mxu0  ;;  %v8212_v33 = vor.u32 %v10257_v58, %v8209_v46  ;;  %v10317_v58 = vld [vmem:[%s15871_s2 + $0x344] sm:$0xf]  ;;  %v8449_v46 = vld [vmem:[%s15871_s2 + $0x350] sm:$0xf0] }
 0x3b4   :  { %v4575_v50 = vadd.f32 %v4574_v2, %v12218_v62  ;;  %v4623_v9 = vpop.f32.mrf.mxu1  ;;  %v10221_v2 = vld [vmem:[%s15871_s2 + $0x44] sm:$0xf] }
 0x3b5   :  { %v12481_v60 = vadd.f32 %v4719_v54, %v4671_v1  ;;  %4998 = vmatpush.bf16.msra.mxu1 %v8212_v33  ;;  %v10285_v54 = vld [vmem:[%s15871_s2 + $0x244] sm:$0xf] }
 0x3b6   :  { %v4624_v21 = vadd.f32 %v4623_v9, %v4575_v50  ;;  %v8065_v9 = vld [vmem:[%s15871_s2 + $0x50] sm:$0xf0] }
 0x3b7   :  { %v8068_v33 = vor.u32 %v10221_v2, %v8065_v9  ;;  %v8193_v2 = vld [vmem:[%s15871_s2 + $0x150] sm:$0xf0] }
 0x3b9   :  { %4950 = vmatpush.bf16.msra.mxu0 %v8068_v33 }
 0x3ba   :  { %v4672_v38 = vpop.f32.mrf.mxu2 }
 0x3bb   :  { %v4673_v36 = vadd.f32 %v4672_v38, %v4624_v21  ;;  %v4721_v32 = vpop.f32.mrf.mxu3  ;;  %v4577_v62 = vpop.f32.mrf.mxu0  ;;  %v8452_v38 = vor.u32 %v10317_v58, %v8449_v46 }
 0x3bc   :  { %v4578_v28 = vadd.f32 %v4577_v62, %v12243_v42  ;;  %v4626_v47 = vpop.f32.mrf.mxu1  ;;  %v8321_v42 = vld [vmem:[%s15871_s2 + $0x250] sm:$0xf0] }
 0x3bd   :  { %v12490_v4 = vadd.f32 %v4721_v32, %v4673_v36  ;;  %v8324_v50 = vor.u32 %v10285_v54, %v8321_v42  ;;  %5097 = vmatpush.bf16.msra.mxu3 %v8452_v38  ;;  %v10253_v42 = vld [vmem:[%s15871_s2 + $0x144] sm:$0xf] }
 0x3be   :  { %v4627_v1 = vadd.f32 %v4626_v47, %v4578_v28  ;;  %4772 = vmatmul.bf16.gmra.mxu0 %v11688_v5  ;;  %4821 = vmatmul.bf16.gmra.mxu1 %v11690_v16 }
 0x3bf   :  { %4870 = vmatmul.bf16.gmra.mxu2 %v11692_v63 }
 0x3c0   :  { %4919 = vmatmul.bf16.gmra.mxu3 %v11694_v22  ;;  %5048 = vmatpush.bf16.msra.mxu2 %v8324_v50 }
 0x3c2   :  { %v4675_v21 = vpop.f32.mrf.mxu2 }
 0x3c3   :  { %v4676_v36 = vadd.f32 %v4675_v21, %v4627_v1  ;;  %v4724_v32 = vpop.f32.mrf.mxu3  ;;  %v4579_v62 = vpop.f32.mrf.mxu0  ;;  %v8196_v1 = vor.u32 %v10253_v42, %v8193_v2  ;;  %v10313_v42 = vld [vmem:[%s15871_s2 + $0x324] sm:$0xf]  ;;  %v8433_v2 = vld [vmem:[%s15871_s2 + $0x330] sm:$0xf0] }
 0x3c4   :  { %v4580_v28 = vadd.f32 %v4579_v62, %v12252_v24  ;;  %v4628_v47 = vpop.f32.mrf.mxu1  ;;  %v10217_v62 = vld [vmem:[%s15871_s2 + $0x24] sm:$0xf] }
 0x3c5   :  { %v12515_v54 = vadd.f32 %v4724_v32, %v4676_v36  ;;  %4999 = vmatpush.bf16.msra.mxu1 %v8196_v1  ;;  %v10281_v32 = vld [vmem:[%s15871_s2 + $0x224] sm:$0xf] }
 0x3c6   :  { %v4629_v9 = vadd.f32 %v4628_v47, %v4580_v28  ;;  %v8049_v47 = vld [vmem:[%s15871_s2 + $0x30] sm:$0xf0] }
 0x3c7   :  { %v8052_v1 = vor.u32 %v10217_v62, %v8049_v47  ;;  %v8177_v62 = vld [vmem:[%s15871_s2 + $0x130] sm:$0xf0] }
 0x3c9   :  { %4951 = vmatpush.bf16.msra.mxu0 %v8052_v1 }
 0x3ca   :  { %v4677_v58 = vpop.f32.mrf.mxu2 }
 0x3cb   :  { %v4678_v50 = vadd.f32 %v4677_v58, %v4629_v9  ;;  %v4726_v46 = vpop.f32.mrf.mxu3  ;;  %v4582_v24 = vpop.f32.mrf.mxu0  ;;  %v8436_v58 = vor.u32 %v10313_v42, %v8433_v2 }
 0x3cc   :  { %v4583_v21 = vadd.f32 %v4582_v24, %v12277_v31  ;;  %v4631_v33 = vpop.f32.mrf.mxu1  ;;  %v8305_v31 = vld [vmem:[%s15871_s2 + $0x230] sm:$0xf0] }
 0x3cd   :  { %v12524_v38 = vadd.f32 %v4726_v46, %v4678_v50  ;;  %v8308_v28 = vor.u32 %v10281_v32, %v8305_v31  ;;  %5098 = vmatpush.bf16.msra.mxu3 %v8436_v58  ;;  %v10249_v31 = vld [vmem:[%s15871_s2 + $0x124] sm:$0xf] }
 0x3ce   :  { %v4632_v36 = vadd.f32 %v4631_v33, %v4583_v21  ;;  %4777 = vmatmul.bf16.gmra.mxu0 %v11724_v18  ;;  %4826 = vmatmul.bf16.gmra.mxu1 %v11726_v34 }
 0x3cf   :  { %4875 = vmatmul.bf16.gmra.mxu2 %v11728_v45 }
 0x3d0   :  { %4924 = vmatmul.bf16.gmra.mxu3 %v11730_v23  ;;  %5049 = vmatpush.bf16.msra.mxu2 %v8308_v28 }
 0x3d2   :  { %v4680_v9 = vpop.f32.mrf.mxu2 }
 0x3d3   :  { %v4681_v50 = vadd.f32 %v4680_v9, %v4632_v36  ;;  %v4729_v46 = vpop.f32.mrf.mxu3  ;;  %v4584_v24 = vpop.f32.mrf.mxu0  ;;  %v8180_v36 = vor.u32 %v10249_v31, %v8177_v62  ;;  %v8033_v31 = vld [vmem:[%s15871_s2 + $0x10] sm:$0xf0]  ;;  %v10309_v62 = vld [vmem:[%s15871_s2 + $0x304] sm:$0xf] }
 0x3d4   :  { %v4585_v21 = vadd.f32 %v4584_v24, %v12286_v15  ;;  %v4633_v33 = vpop.f32.mrf.mxu1  ;;  %v10277_v24 = vld [vmem:[%s15871_s2 + $0x204] sm:$0xf] }
 0x3d5   :  { %v12549_v32 = vadd.f32 %v4729_v46, %v4681_v50  ;;  %5000 = vmatpush.bf16.msra.mxu1 %v8180_v36  ;;  %v16179_v46 = vld [vmem:[#allocation98_spill] sm:$0xff] }
 0x3d6   :  { %v4634_v47 = vadd.f32 %v4633_v33, %v4585_v21  ;;  %v10213_v21 = vld [vmem:[%s15871_s2 + $0x4] sm:$0xf] }
 0x3da   :  { %v4682_v42 = vpop.f32.mrf.mxu2 }
 0x3db   :  { %v4683_v28 = vadd.f32 %v4682_v42, %v4634_v47  ;;  %v4731_v2 = vpop.f32.mrf.mxu3  ;;  %v4587_v15 = vpop.f32.mrf.mxu0  ;;  %v8417_v47 = vld [vmem:[%s15871_s2 + $0x310] sm:$0xf0]  ;;  %v8036_v42 = vor.u32 %v10213_v21, %v8033_v31 }
 0x3dc   :  { %v4588_v9 = vadd.f32 %v4587_v15, %v12311_v30  ;;  %v4636_v1 = vpop.f32.mrf.mxu1  ;;  %v8289_v30 = vld [vmem:[%s15871_s2 + $0x210] sm:$0xf0] }
 0x3dd   :  { %v12558_v58 = vadd.f32 %v4731_v2, %v4683_v28  ;;  %v8292_v33 = vor.u32 %v10277_v24, %v8289_v30  ;;  %v8420_v28 = vor.u32 %v10309_v62, %v8417_v47  ;;  %4952 = vmatpush.bf16.msra.mxu0 %v8036_v42  ;;  %v8161_v21 = vld [vmem:[%s15871_s2 + $0x110] sm:$0xf0] }
 0x3de   :  { %v4637_v50 = vadd.f32 %v4636_v1, %v4588_v9  ;;  %4782 = vmatmul.bf16.gmra.mxu0 %v11760_v37  ;;  %4831 = vmatmul.bf16.gmra.mxu1 %v11762_v51  ;;  %v16183_v51 = vld [vmem:[#allocation102_spill] sm:$0xff] }
 0x3df   :  { %4880 = vmatmul.bf16.gmra.mxu2 %v11764_v41  ;;  %5099 = vmatpush.bf16.msra.mxu3 %v8420_v28  ;;  %v16182_v41 = vld [vmem:[#allocation101_spill] sm:$0xff] }
 0x3e0   :  { %4929 = vmatmul.bf16.gmra.mxu3 %v16179_v46  ;;  %5050 = vmatpush.bf16.msra.mxu2 %v8292_v33  ;;  %v10245_v46 = vld [vmem:[%s15871_s2 + $0x104] sm:$0xf] }
 0x3e2   :  { %v4685_v36 = vpop.f32.mrf.mxu2 }
 0x3e3   :  { %v4686_v2 = vadd.f32 %v4685_v36, %v4637_v50  ;;  %v4734_v15 = vpop.f32.mrf.mxu3  ;;  %v4589_v9 = vpop.f32.mrf.mxu0  ;;  %v8164_v50 = vor.u32 %v10245_v46, %v8161_v21  ;;  %v10433_v46 = vld [vmem:[%s15871_s2 + $0x6e4] sm:$0xf]  ;;  %v8657_v21 = vld [vmem:[%s15871_s2 + $0x4f0] sm:$0xf0] }
 0x3e4   :  { %v4590_v1 = vadd.f32 %v4589_v9, %v12320_v10  ;;  %v4638_v24 = vpop.f32.mrf.mxu1  ;;  %v16181_v9 = vld [vmem:[#allocation100_spill] sm:$0xff] }
 0x3e5   :  { %v12583_v30 = vadd.f32 %v4734_v15, %v4686_v2  ;;  %5001 = vmatpush.bf16.msra.mxu1 %v8164_v50  ;;  %v16180_v15 = vld [vmem:[#allocation99_spill] sm:$0xff] }
 0x3e6   :  { %v4639_v31 = vadd.f32 %v4638_v24, %v4590_v1  ;;  %v10369_v1 = vld [vmem:[%s15871_s2 + $0x4e4] sm:$0xf]  ;;  %v9041_v50 = vld [vmem:[%s15871_s2 + $0x7f0] sm:$0xf0] }
 0x3ea   :  { %v4687_v62 = vpop.f32.mrf.mxu2 }
 0x3eb   :  { %v4688_v33 = vadd.f32 %v4687_v62, %v4639_v31  ;;  %v4736_v47 = vpop.f32.mrf.mxu3  ;;  %v4592_v10 = vpop.f32.mrf.mxu0  ;;  %v10465_v31 = vld [vmem:[%s15871_s2 + $0x7e4] sm:$0xf] }
 0x3ec   :  { %v4593_v36 = vadd.f32 %v4592_v10, %v12345_v59  ;;  %v4641_v42 = vpop.f32.mrf.mxu1  ;;  %v8913_v59 = vld [vmem:[%s15871_s2 + $0x6f0] sm:$0xf0] }
 0x3ed   :  { %v12592_v28 = vadd.f32 %v4736_v47, %v4688_v33  ;;  %v8916_v24 = vor.u32 %v10433_v46, %v8913_v59  ;;  %v8660_v33 = vor.u32 %v10369_v1, %v8657_v21  ;;  %v9044_v47 = vor.u32 %v10465_v31, %v9041_v50  ;;  %v8785_v1 = vld [vmem:[%s15871_s2 + $0x5f0] sm:$0xf0] }
 0x3ee   :  { %v4642_v2 = vadd.f32 %v4641_v42, %v4593_v36  ;;  %4787 = vmatmul.bf16.gmra.mxu0 %v16180_v15  ;;  %4836 = vmatmul.bf16.gmra.mxu1 %v16181_v9  ;;  %v10401_v9 = vld [vmem:[%s15871_s2 + $0x5e4] sm:$0xf] }
 0x3ef   :  { %4885 = vmatmul.bf16.gmra.mxu2 %v16182_v41  ;;  %5141 = vmatpush.bf16.msrb.mxu0 %v8660_v33  ;;  %v16195_v15 = vld [vmem:[#allocation9_spill] sm:$0xff] }
 0x3f0   :  { %4934 = vmatmul.bf16.gmra.mxu3 %v16183_v51  ;;  %5239 = vmatpush.bf16.msrb.mxu2 %v8916_v24 }
 0x3f1   :  { %5288 = vmatpush.bf16.msrb.mxu3 %v9044_v47 }
 0x3f2   :  { %v4690_v62 = vpop.f32.mrf.mxu2 }
 0x3f3   :  { %v4691_v10 = vadd.f32 %v4690_v62, %v4642_v2  ;;  %v4739_v36 = vpop.f32.mrf.mxu3  ;;  %v4594_v42 = vpop.f32.mrf.mxu0  ;;  %v8788_v2 = vor.u32 %v10401_v9, %v8785_v1  ;;  %v10365_v9 = vld [vmem:[%s15871_s2 + $0x4c4] sm:$0xf] }
 0x3f4   :  { %v4595_v46 = vadd.f32 %v4594_v42, %v12354_v19  ;;  %v4643_v59 = vpop.f32.mrf.mxu1  ;;  %v16186_v42 = vld [vmem:[#allocation105_spill] sm:$0xff] }
 0x3f5   :  { %v12617_v51 = vadd.f32 %v4739_v36, %v4691_v10  ;;  %5190 = vmatpush.bf16.msrb.mxu1 %v8788_v2  ;;  %v16184_v10 = vld [vmem:[#allocation103_spill] sm:$0xff]  ;;  %v16185_v36 = vld [vmem:[#allocation104_spill] sm:$0xff] }
 0x3f6   :  { %v4644_v41 = vadd.f32 %v4643_v59, %v4595_v46  ;;  %v16187_v46 = vld [vmem:[#allocation106_spill] sm:$0xff]  ;;  %v8641_v2 = vld [vmem:[%s15871_s2 + $0x4d0] sm:$0xf0] }
 0x3fa   :  { %v4692_v21 = vpop.f32.mrf.mxu2 }
 0x3fb   :  { %v4693_v24 = vadd.f32 %v4692_v21, %v4644_v41  ;;  %v4741_v31 = vpop.f32.mrf.mxu3  ;;  %v4597_v19 = vpop.f32.mrf.mxu0  ;;  %v10429_v41 = vld [vmem:[%s15871_s2 + $0x6c4] sm:$0xf] }
 0x3fc   :  { %v4598_v50 = vadd.f32 %v4597_v19, %v12379_v53  ;;  %v4646_v62 = vpop.f32.mrf.mxu1  ;;  %v8897_v53 = vld [vmem:[%s15871_s2 + $0x6d0] sm:$0xf0]  ;;  %v10461_v21 = vld [vmem:[%s15871_s2 + $0x7c4] sm:$0xf] }
 0x3fd   :  { %v12626_v33 = vadd.f32 %v4741_v31, %v4693_v24  ;;  %v8900_v1 = vor.u32 %v10429_v41, %v8897_v53  ;;  %v9025_v24 = vld [vmem:[%s15871_s2 + $0x7d0] sm:$0xf0] }
 0x3fe   :  { %v4647_v47 = vadd.f32 %v4646_v62, %v4598_v50  ;;  %4792 = vmatmul.bf16.gmra.mxu0 %v16184_v10  ;;  %4841 = vmatmul.bf16.gmra.mxu1 %v16185_v36  ;;  %v8644_v62 = vor.u32 %v10365_v9, %v8641_v2  ;;  %v10397_v10 = vld [vmem:[%s15871_s2 + $0x5c4] sm:$0xf] }
 0x3ff   :  { %4890 = vmatmul.bf16.gmra.mxu2 %v16186_v42 }
 0x400   :  { %4939 = vmatmul.bf16.gmra.mxu3 %v16187_v46  ;;  %v9028_v46 = vor.u32 %v10461_v21, %v9025_v24  ;;  %5240 = vmatpush.bf16.msrb.mxu2 %v8900_v1 }
 0x401   :  { %5142 = vmatpush.bf16.msrb.mxu0 %v8644_v62  ;;  %v16191_v62 = vld [vmem:[#allocation5_spill] sm:$0xff] }
 0x402   :  { %v4695_v59 = vpop.f32.mrf.mxu2  ;;  %5289 = vmatpush.bf16.msrb.mxu3 %v9028_v46  ;;  %v16188_v46 = vld [vmem:[#allocation2_spill] sm:$0xff] }
 0x403   :  { %v4696_v31 = vadd.f32 %v4695_v59, %v4647_v47  ;;  %v4744_v19 = vpop.f32.mrf.mxu3  ;;  %v4599_v50 = vpop.f32.mrf.mxu0  ;;  %v8769_v47 = vld [vmem:[%s15871_s2 + $0x5d0] sm:$0xf0] }
 0x404   :  { %v4600_v42 = vadd.f32 %v4599_v50, %v12388_v14  ;;  %v4648_v41 = vpop.f32.mrf.mxu1  ;;  %v8772_v59 = vor.u32 %v10397_v10, %v8769_v47  ;;  %v16190_v50 = vld [vmem:[#allocation4_spill] sm:$0xff]  ;;  %v10425_v10 = vld [vmem:[%s15871_s2 + $0x6a4] sm:$0xf]  ;;  %v8625_v47 = vld [vmem:[%s15871_s2 + $0x4b0] sm:$0xf0] }
 0x405   :  { %v12651_v53 = vadd.f32 %v4744_v19, %v4696_v31  ;;  %v16189_v19 = vld [vmem:[#allocation3_spill] sm:$0xff] }
 0x406   :  { %v4649_v36 = vadd.f32 %v4648_v41, %v4600_v42  ;;  %5191 = vmatpush.bf16.msrb.mxu1 %v8772_v59  ;;  %v10457_v59 = vld [vmem:[%s15871_s2 + $0x7a4] sm:$0xf] }
 0x40a   :  { %v4697_v9 = vpop.f32.mrf.mxu2 }
 0x40b   :  { %v4698_v2 = vadd.f32 %v4697_v9, %v4649_v36  ;;  %v4746_v14 = vpop.f32.mrf.mxu3  ;;  %v4758_v21 = vpop.f32.mrf.mxu0  ;;  %v10361_v36 = vld [vmem:[%s15871_s2 + $0x4a4] sm:$0xf]  ;;  %v9009_v9 = vld [vmem:[%s15871_s2 + $0x7b0] sm:$0xf0] }
 0x40c   :  { %v4759_v1 = vadd.f32 %v4758_v21, %v12413_v40  ;;  %v4807_v24 = vpop.f32.mrf.mxu1  ;;  %v8881_v40 = vld [vmem:[%s15871_s2 + $0x6b0] sm:$0xf0]  ;;  %v9012_v21 = vor.u32 %v10457_v59, %v9009_v9 }
 0x40d   :  { %v12660_v31 = vadd.f32 %v4746_v14, %v4698_v2  ;;  %v8884_v41 = vor.u32 %v10425_v10, %v8881_v40  ;;  %v8628_v14 = vor.u32 %v10361_v36, %v8625_v47  ;;  %v8753_v36 = vld [vmem:[%s15871_s2 + $0x5b0] sm:$0xf0] }
 0x40e   :  { %v4808_v42 = vadd.f32 %v4807_v24, %v4759_v1  ;;  %4953 = vmatmul.bf16.vlgmr.msra.gmra.mxu0 %v16188_v46  ;;  %5002 = vmatmul.bf16.vlgmr.msra.gmra.mxu1 %v16189_v19  ;;  %v10393_v46 = vld [vmem:[%s15871_s2 + $0x5a4] sm:$0xf] }
 0x40f   :  { %5051 = vmatmul.bf16.vlgmr.msra.gmra.mxu2 %v16190_v50  ;;  %5143 = vmatpush.bf16.msrb.mxu0 %v8628_v14  ;;  %v8756_v47 = vor.u32 %v10393_v46, %v8753_v36  ;;  %v10421_v46 = vld [vmem:[%s15871_s2 + $0x684] sm:$0xf] }
 0x410   :  { %5100 = vmatmul.bf16.vlgmr.msra.gmra.mxu3 %v16191_v62  ;;  %5241 = vmatpush.bf16.msrb.mxu2 %v8884_v41 }
 0x411   :  { %5290 = vmatpush.bf16.msrb.mxu3 %v9012_v21  ;;  %5192 = vmatpush.bf16.msrb.mxu1 %v8756_v47  ;;  %v16192_v21 = vld [vmem:[#allocation6_spill] sm:$0xff]  ;;  %v8609_v47 = vld [vmem:[%s15871_s2 + $0x490] sm:$0xf0] }
 0x412   :  { %v4856_v2 = vpop.f32.mrf.mxu2 }
 0x413   :  { %v4857_v1 = vadd.f32 %v4856_v2, %v4808_v42  ;;  %v4905_v24 = vpop.f32.mrf.mxu3  ;;  %v4760_v62 = vpop.f32.mrf.mxu0 }
 0x414   :  { %v4761_v10 = vadd.f32 %v4760_v62, %v12422_v49  ;;  %v4809_v40 = vpop.f32.mrf.mxu1 }
 0x415   :  { %v4906_v50 = vadd.f32 %v4905_v24, %v4857_v1  ;;  %v16193_v1 = vld [vmem:[#allocation7_spill] sm:$0xff] }
 0x416   :  { %v4810_v19 = vadd.f32 %v4809_v40, %v4761_v10  ;;  %v16194_v40 = vld [vmem:[#allocation8_spill] sm:$0xff] }
 0x417   :  { %v7297_v24 = vmax.f32 %v4906_v50, 0.0 }
 0x41a   :  { %v4858_v42 = vpop.f32.mrf.mxu2 }
 0x41b   :  { %v4859_v59 = vadd.f32 %v4858_v42, %v4810_v19  ;;  %v4907_v41 = vpop.f32.mrf.mxu3  ;;  %v4763_v9 = vpop.f32.mrf.mxu0  ;;  %v10357_v19 = vld [vmem:[%s15871_s2 + $0x484] sm:$0xf] }
 0x41c   :  { %v4764_v49 = vadd.f32 %v4763_v9, %v12447_v6  ;;  %v4812_v62 = vpop.f32.mrf.mxu1  ;;  %v8865_v6 = vld [vmem:[%s15871_s2 + $0x690] sm:$0xf0]  ;;  %v10453_v42 = vld [vmem:[%s15871_s2 + $0x784] sm:$0xf]  ;;  %v8612_v9 = vor.u32 %v10357_v19, %v8609_v47 }
 0x41d   :  { %v4908_v2 = vadd.f32 %v4907_v41, %v4859_v59  ;;  %v8868_v50 = vor.u32 %v10421_v46, %v8865_v6  ;;  %v8993_v59 = vld [vmem:[%s15871_s2 + $0x790] sm:$0xf0] }
 0x41e   :  { %v4813_v14 = vadd.f32 %v4812_v62, %v4764_v49  ;;  %4958 = vmatmul.bf16.gmra.mxu0 %v16192_v21  ;;  %5007 = vmatmul.bf16.gmra.mxu1 %v16193_v1  ;;  %v8996_v49 = vor.u32 %v10453_v42, %v8993_v59  ;;  %v8737_v19 = vld [vmem:[%s15871_s2 + $0x590] sm:$0xf0]  ;;  %v16259_v1 = vld [vmem:[#allocation65_spill] sm:$0xff] }
 0x41f   :  { %v7301_v10 = vmax.f32 %v4908_v2, 0.0  ;;  %5056 = vmatmul.bf16.gmra.mxu2 %v16194_v40  ;;  %5144 = vmatpush.bf16.msrb.mxu0 %v8612_v9  ;;  %v16200_v40 = vld [vmem:[#allocation13_spill] sm:$0xff] }
 0x420   :  { %5105 = vmatmul.bf16.gmra.mxu3 %v16195_v15  ;;  %5242 = vmatpush.bf16.msrb.mxu2 %v8868_v50  ;;  %v10389_v15 = vld [vmem:[%s15871_s2 + $0x584] sm:$0xf] }
 0x421   :  { %v12705_v36 = vpack.c.bf16 %v7301_v10, %v7297_v24  ;;  %5291 = vmatpush.bf16.msrb.mxu3 %v8996_v49  ;;  %v8740_v47 = vor.u32 %v10389_v15, %v8737_v19  ;;  %v10417_v15 = vld [vmem:[%s15871_s2 + $0x664] sm:$0xf] }
 0x422   :  { %v4861_v41 = vpop.f32.mrf.mxu2 }
 0x423   :  { %16196 = vst [vmem:[#allocation88_spill] sm:$0xff] %v12705_v36  ;;  %v4862_v62 = vadd.f32 %v4861_v41, %v4813_v14  ;;  %v4910_v2 = vpop.f32.mrf.mxu3  ;;  %v4765_v24 = vpop.f32.mrf.mxu0  ;;  %5193 = vmatpush.bf16.msrb.mxu1 %v8740_v47  ;;  %v10449_v47 = vld [vmem:[%s15871_s2 + $0x764] sm:$0xf] }
 0x424   :  { %v4766_v10 = vadd.f32 %v4765_v24, %v12456_v39  ;;  %v4814_v46 = vpop.f32.mrf.mxu1 }
 0x425   :  { %v4911_v6 = vadd.f32 %v4910_v2, %v4862_v62  ;;  %v16197_v62 = vld [vmem:[#allocation10_spill] sm:$0xff]  ;;  %v16198_v2 = vld [vmem:[#allocation11_spill] sm:$0xff] }
 0x426   :  { %v4815_v36 = vadd.f32 %v4814_v46, %v4766_v10  ;;  %v16199_v46 = vld [vmem:[#allocation12_spill] sm:$0xff] }
 0x427   :  { %v7305_v24 = vmax.f32 %v4911_v6, 0.0  ;;  %v8593_v6 = vld [vmem:[%s15871_s2 + $0x470] sm:$0xf0] }
 0x42a   :  { %v4863_v14 = vpop.f32.mrf.mxu2 }
 0x42b   :  { %v4864_v42 = vadd.f32 %v4863_v14, %v4815_v36  ;;  %v4912_v50 = vpop.f32.mrf.mxu3  ;;  %v4768_v59 = vpop.f32.mrf.mxu0  ;;  %v10353_v36 = vld [vmem:[%s15871_s2 + $0x464] sm:$0xf]  ;;  %v8977_v14 = vld [vmem:[%s15871_s2 + $0x770] sm:$0xf0] }
 0x42c   :  { %v4769_v39 = vadd.f32 %v4768_v59, %v12481_v60  ;;  %v4817_v41 = vpop.f32.mrf.mxu1  ;;  %v8849_v60 = vld [vmem:[%s15871_s2 + $0x670] sm:$0xf0]  ;;  %v8596_v59 = vor.u32 %v10353_v36, %v8593_v6 }
 0x42d   :  { %v4913_v9 = vadd.f32 %v4912_v50, %v4864_v42  ;;  %v8852_v19 = vor.u32 %v10417_v15, %v8849_v60 }
 0x42e   :  { %v4818_v49 = vadd.f32 %v4817_v41, %v4769_v39  ;;  %4963 = vmatmul.bf16.gmra.mxu0 %v16197_v62  ;;  %5012 = vmatmul.bf16.gmra.mxu1 %v16198_v2  ;;  %v8980_v39 = vor.u32 %v10449_v47, %v8977_v14  ;;  %v10385_v62 = vld [vmem:[%s15871_s2 + $0x564] sm:$0xf] }
 0x42f   :  { %v7309_v10 = vmax.f32 %v4913_v9, 0.0  ;;  %5061 = vmatmul.bf16.gmra.mxu2 %v16199_v46  ;;  %5145 = vmatpush.bf16.msrb.mxu0 %v8596_v59  ;;  %v16203_v59 = vld [vmem:[#allocation15_spill] sm:$0xff] }
 0x430   :  { %5110 = vmatmul.bf16.gmra.mxu3 %v16200_v40  ;;  %5243 = vmatpush.bf16.msrb.mxu2 %v8852_v19 }
 0x431   :  { %v12746_v42 = vpack.c.bf16 %v7309_v10, %v7305_v24  ;;  %5292 = vmatpush.bf16.msrb.mxu3 %v8980_v39  ;;  %v8721_v24 = vld [vmem:[%s15871_s2 + $0x570] sm:$0xf0] }
 0x432   :  { %v4866_v50 = vpop.f32.mrf.mxu2  ;;  %v8724_v10 = vor.u32 %v10385_v62, %v8721_v24  ;;  %v10413_v62 = vld [vmem:[%s15871_s2 + $0x644] sm:$0xf] }
 0x433   :  { %16201 = vst [vmem:[#allocation89_spill] sm:$0xff] %v12746_v42  ;;  %v4867_v41 = vadd.f32 %v4866_v50, %v4818_v49  ;;  %v4915_v9 = vpop.f32.mrf.mxu3  ;;  %v4770_v15 = vpop.f32.mrf.mxu0  ;;  %v10445_v24 = vld [vmem:[%s15871_s2 + $0x744] sm:$0xf] }
 0x434   :  { %v4771_v60 = vadd.f32 %v4770_v15, %v12490_v4  ;;  %v4819_v40 = vpop.f32.mrf.mxu1  ;;  %5194 = vmatpush.bf16.msrb.mxu1 %v8724_v10  ;;  %v16205_v15 = vld [vmem:[#allocation17_spill] sm:$0xff]  ;;  %v8961_v10 = vld [vmem:[%s15871_s2 + $0x750] sm:$0xf0] }
 0x435   :  { %v4916_v46 = vadd.f32 %v4915_v9, %v4867_v41  ;;  %v16204_v9 = vld [vmem:[#allocation16_spill] sm:$0xff] }
 0x436   :  { %v4820_v2 = vadd.f32 %v4819_v40, %v4771_v60  ;;  %v16202_v40 = vld [vmem:[#allocation14_spill] sm:$0xff] }
 0x437   :  { %v7313_v39 = vmax.f32 %v4916_v46, 0.0  ;;  %v8577_v46 = vld [vmem:[%s15871_s2 + $0x450] sm:$0xf0] }
 0x43a   :  { %v4868_v49 = vpop.f32.mrf.mxu2 }
 0x43b   :  { %v4869_v36 = vadd.f32 %v4868_v49, %v4820_v2  ;;  %v4917_v19 = vpop.f32.mrf.mxu3  ;;  %v4773_v6 = vpop.f32.mrf.mxu0  ;;  %v10349_v2 = vld [vmem:[%s15871_s2 + $0x444] sm:$0xf] }
 0x43c   :  { %v4774_v4 = vadd.f32 %v4773_v6, %v12515_v54  ;;  %v4822_v47 = vpop.f32.mrf.mxu1  ;;  %v8833_v54 = vld [vmem:[%s15871_s2 + $0x650] sm:$0xf0]  ;;  %v8964_v6 = vor.u32 %v10445_v24, %v8961_v10 }
 0x43d   :  { %v4918_v14 = vadd.f32 %v4917_v19, %v4869_v36  ;;  %v8836_v60 = vor.u32 %v10413_v62, %v8833_v54  ;;  %v8580_v19 = vor.u32 %v10349_v2, %v8577_v46 }
 0x43e   :  { %v4823_v50 = vadd.f32 %v4822_v47, %v4774_v4  ;;  %4968 = vmatmul.bf16.gmra.mxu0 %v16202_v40  ;;  %5017 = vmatmul.bf16.gmra.mxu1 %v16203_v59  ;;  %v16255_v59 = vld [vmem:[#allocation61_spill] sm:$0xff]  ;;  %v16258_v40 = vld [vmem:[#allocation64_spill] sm:$0xff] }
 0x43f   :  { %v7317_v41 = vmax.f32 %v4918_v14, 0.0  ;;  %5066 = vmatmul.bf16.gmra.mxu2 %v16204_v9  ;;  %5146 = vmatpush.bf16.msrb.mxu0 %v8580_v19  ;;  %v10381_v9 = vld [vmem:[%s15871_s2 + $0x544] sm:$0xf]  ;;  %v16207_v19 = vld [vmem:[#allocation18_spill] sm:$0xff] }
 0x440   :  { %5115 = vmatmul.bf16.gmra.mxu3 %v16205_v15  ;;  %5244 = vmatpush.bf16.msrb.mxu2 %v8836_v60 }
 0x441   :  { %v12778_v49 = vpack.c.bf16 %v7317_v41, %v7313_v39  ;;  %5293 = vmatpush.bf16.msrb.mxu3 %v8964_v6  ;;  %v8705_v39 = vld [vmem:[%s15871_s2 + $0x550] sm:$0xf0] }
 0x442   :  { %v4871_v36 = vpop.f32.mrf.mxu2  ;;  %v8708_v41 = vor.u32 %v10381_v9, %v8705_v39  ;;  %v16208_v6 = vld [vmem:[#allocation19_spill] sm:$0xff]  ;;  %v10409_v9 = vld [vmem:[%s15871_s2 + $0x624] sm:$0xf] }
 0x443   :  { %16206 = vst [vmem:[#allocation6_spill] sm:$0xff] %v12778_v49  ;;  %v4872_v4 = vadd.f32 %v4871_v36, %v4823_v50  ;;  %v4920_v47 = vpop.f32.mrf.mxu3  ;;  %v4775_v14 = vpop.f32.mrf.mxu0  ;;  %v10441_v39 = vld [vmem:[%s15871_s2 + $0x724] sm:$0xf] }
 0x444   :  { %v4776_v62 = vadd.f32 %v4775_v14, %v12524_v38  ;;  %v4824_v54 = vpop.f32.mrf.mxu1  ;;  %5195 = vmatpush.bf16.msrb.mxu1 %v8708_v41  ;;  %v16209_v14 = vld [vmem:[#allocation20_spill] sm:$0xff]  ;;  %v8945_v41 = vld [vmem:[%s15871_s2 + $0x730] sm:$0xf0] }
 0x445   :  { %v4921_v42 = vadd.f32 %v4920_v47, %v4872_v4 }
 0x446   :  { %v4825_v15 = vadd.f32 %v4824_v54, %v4776_v62  ;;  %v16210_v62 = vld [vmem:[#allocation21_spill] sm:$0xff] }
 0x447   :  { %v7321_v4 = vmax.f32 %v4921_v42, 0.0  ;;  %v8561_v42 = vld [vmem:[%s15871_s2 + $0x430] sm:$0xf0] }
 0x44a   :  { %v4873_v50 = vpop.f32.mrf.mxu2 }
 0x44b   :  { %v4874_v2 = vadd.f32 %v4873_v50, %v4825_v15  ;;  %v4922_v60 = vpop.f32.mrf.mxu3  ;;  %v4778_v46 = vpop.f32.mrf.mxu0  ;;  %v10345_v15 = vld [vmem:[%s15871_s2 + $0x424] sm:$0xf] }
 0x44c   :  { %v4779_v38 = vadd.f32 %v4778_v46, %v12549_v32  ;;  %v4827_v24 = vpop.f32.mrf.mxu1  ;;  %v8817_v32 = vld [vmem:[%s15871_s2 + $0x630] sm:$0xf0]  ;;  %v8948_v46 = vor.u32 %v10441_v39, %v8945_v41 }
 0x44d   :  { %v4923_v10 = vadd.f32 %v4922_v60, %v4874_v2  ;;  %v8820_v54 = vor.u32 %v10409_v9, %v8817_v32  ;;  %v8564_v60 = vor.u32 %v10345_v15, %v8561_v42 }
 0x44e   :  { %v4828_v36 = vadd.f32 %v4827_v24, %v4779_v38  ;;  %4973 = vmatmul.bf16.gmra.mxu0 %v16207_v19  ;;  %5022 = vmatmul.bf16.gmra.mxu1 %v16208_v6  ;;  %v16251_v6 = vld [vmem:[#allocation57_spill] sm:$0xff]  ;;  %v16254_v19 = vld [vmem:[#allocation60_spill] sm:$0xff] }
 0x44f   :  { %v7325_v47 = vmax.f32 %v4923_v10, 0.0  ;;  %5071 = vmatmul.bf16.gmra.mxu2 %v16209_v14  ;;  %5147 = vmatpush.bf16.msrb.mxu0 %v8564_v60  ;;  %v10377_v14 = vld [vmem:[%s15871_s2 + $0x524] sm:$0xf]  ;;  %v16212_v60 = vld [vmem:[#allocation22_spill] sm:$0xff] }
 0x450   :  { %5120 = vmatmul.bf16.gmra.mxu3 %v16210_v62  ;;  %5245 = vmatpush.bf16.msrb.mxu2 %v8820_v54 }
 0x451   :  { %v12810_v50 = vpack.c.bf16 %v7325_v47, %v7321_v4  ;;  %5294 = vmatpush.bf16.msrb.mxu3 %v8948_v46  ;;  %v8689_v4 = vld [vmem:[%s15871_s2 + $0x530] sm:$0xf0] }
 0x452   :  { %v4876_v2 = vpop.f32.mrf.mxu2  ;;  %v8692_v47 = vor.u32 %v10377_v14, %v8689_v4  ;;  %v16213_v46 = vld [vmem:[#allocation23_spill] sm:$0xff]  ;;  %v10405_v14 = vld [vmem:[%s15871_s2 + $0x604] sm:$0xf] }
 0x453   :  { %16211 = vst [vmem:[#allocation107_spill] sm:$0xff] %v12810_v50  ;;  %v4877_v38 = vadd.f32 %v4876_v2, %v4828_v36  ;;  %v4925_v24 = vpop.f32.mrf.mxu3  ;;  %v4780_v10 = vpop.f32.mrf.mxu0  ;;  %v10437_v4 = vld [vmem:[%s15871_s2 + $0x704] sm:$0xf] }
 0x454   :  { %v4781_v9 = vadd.f32 %v4780_v10, %v12558_v58  ;;  %v4829_v32 = vpop.f32.mrf.mxu1  ;;  %5196 = vmatpush.bf16.msrb.mxu1 %v8692_v47  ;;  %v16214_v10 = vld [vmem:[#allocation24_spill] sm:$0xff]  ;;  %v8929_v47 = vld [vmem:[%s15871_s2 + $0x710] sm:$0xf0] }
 0x455   :  { %v4926_v49 = vadd.f32 %v4925_v24, %v4877_v38 }
 0x456   :  { %v4830_v62 = vadd.f32 %v4829_v32, %v4781_v9  ;;  %v16215_v9 = vld [vmem:[#allocation25_spill] sm:$0xff] }
 0x457   :  { %v7329_v38 = vmax.f32 %v4926_v49, 0.0  ;;  %v8545_v49 = vld [vmem:[%s15871_s2 + $0x410] sm:$0xf0] }
 0x45a   :  { %v4878_v36 = vpop.f32.mrf.mxu2 }
 0x45b   :  { %v4879_v15 = vadd.f32 %v4878_v36, %v4830_v62  ;;  %v4927_v54 = vpop.f32.mrf.mxu3  ;;  %v4783_v42 = vpop.f32.mrf.mxu0  ;;  %v10341_v62 = vld [vmem:[%s15871_s2 + $0x404] sm:$0xf] }
 0x45c   :  { %v4784_v58 = vadd.f32 %v4783_v42, %v12583_v30  ;;  %v4832_v39 = vpop.f32.mrf.mxu1  ;;  %v8801_v30 = vld [vmem:[%s15871_s2 + $0x610] sm:$0xf0]  ;;  %v8932_v42 = vor.u32 %v10437_v4, %v8929_v47 }
 0x45d   :  { %v4928_v41 = vadd.f32 %v4927_v54, %v4879_v15  ;;  %v8804_v32 = vor.u32 %v10405_v14, %v8801_v30  ;;  %v8548_v54 = vor.u32 %v10341_v62, %v8545_v49 }
 0x45e   :  { %v4833_v2 = vadd.f32 %v4832_v39, %v4784_v58  ;;  %4978 = vmatmul.bf16.gmra.mxu0 %v16212_v60  ;;  %5027 = vmatmul.bf16.gmra.mxu1 %v16213_v46  ;;  %v16247_v46 = vld [vmem:[#allocation53_spill] sm:$0xff]  ;;  %v16250_v60 = vld [vmem:[#allocation56_spill] sm:$0xff] }
 0x45f   :  { %v7333_v24 = vmax.f32 %v4928_v41, 0.0  ;;  %5076 = vmatmul.bf16.gmra.mxu2 %v16214_v10  ;;  %5148 = vmatpush.bf16.msrb.mxu0 %v8548_v54  ;;  %v10373_v10 = vld [vmem:[%s15871_s2 + $0x504] sm:$0xf]  ;;  %v16217_v54 = vld [vmem:[#allocation26_spill] sm:$0xff] }
 0x460   :  { %5125 = vmatmul.bf16.gmra.mxu3 %v16215_v9  ;;  %5246 = vmatpush.bf16.msrb.mxu2 %v8804_v32 }
 0x461   :  { %v12842_v36 = vpack.c.bf16 %v7333_v24, %v7329_v38  ;;  %5295 = vmatpush.bf16.msrb.mxu3 %v8932_v42  ;;  %v8673_v38 = vld [vmem:[%s15871_s2 + $0x510] sm:$0xf0] }
 0x462   :  { %v4881_v15 = vpop.f32.mrf.mxu2  ;;  %v8676_v24 = vor.u32 %v10373_v10, %v8673_v38  ;;  %v16218_v42 = vld [vmem:[#allocation27_spill] sm:$0xff]  ;;  %v10561_v10 = vld [vmem:[%s15871_s2 + $0xae4] sm:$0xf] }
 0x463   :  { %16216 = vst [vmem:[#allocation108_spill] sm:$0xff] %v12842_v36  ;;  %v4882_v58 = vadd.f32 %v4881_v15, %v4833_v2  ;;  %v4930_v39 = vpop.f32.mrf.mxu3  ;;  %v4785_v41 = vpop.f32.mrf.mxu0  ;;  %v10593_v38 = vld [vmem:[%s15871_s2 + $0xbe4] sm:$0xf] }
 0x464   :  { %v4786_v14 = vadd.f32 %v4785_v41, %v12592_v28  ;;  %v4834_v30 = vpop.f32.mrf.mxu1  ;;  %5197 = vmatpush.bf16.msrb.mxu1 %v8676_v24  ;;  %v16219_v41 = vld [vmem:[#allocation28_spill] sm:$0xff]  ;;  %v9553_v24 = vld [vmem:[%s15871_s2 + $0xbf0] sm:$0xf0] }
 0x465   :  { %v4931_v50 = vadd.f32 %v4930_v39, %v4882_v58 }
 0x466   :  { %v4835_v9 = vadd.f32 %v4834_v30, %v4786_v14  ;;  %v16220_v14 = vld [vmem:[#allocation29_spill] sm:$0xff] }
 0x467   :  { %v7337_v58 = vmax.f32 %v4931_v50, 0.0  ;;  %v9169_v50 = vld [vmem:[%s15871_s2 + $0x8f0] sm:$0xf0] }
 0x46a   :  { %v4883_v2 = vpop.f32.mrf.mxu2 }
 0x46b   :  { %v4884_v62 = vadd.f32 %v4883_v2, %v4835_v9  ;;  %v4932_v32 = vpop.f32.mrf.mxu3  ;;  %v4788_v49 = vpop.f32.mrf.mxu0  ;;  %v10497_v9 = vld [vmem:[%s15871_s2 + $0x8e4] sm:$0xf] }
 0x46c   :  { %v4789_v28 = vadd.f32 %v4788_v49, %v12617_v51  ;;  %v4837_v4 = vpop.f32.mrf.mxu1  ;;  %v9425_v51 = vld [vmem:[%s15871_s2 + $0xaf0] sm:$0xf0]  ;;  %v9556_v49 = vor.u32 %v10593_v38, %v9553_v24 }
 0x46d   :  { %v4933_v47 = vadd.f32 %v4932_v32, %v4884_v62  ;;  %v9428_v30 = vor.u32 %v10561_v10, %v9425_v51  ;;  %v9172_v32 = vor.u32 %v10497_v9, %v9169_v50 }
 0x46e   :  { %v4838_v15 = vadd.f32 %v4837_v4, %v4789_v28  ;;  %4983 = vmatmul.bf16.gmra.mxu0 %v16217_v54  ;;  %5032 = vmatmul.bf16.gmra.mxu1 %v16218_v42  ;;  %v16243_v42 = vld [vmem:[#allocation49_spill] sm:$0xff]  ;;  %v16246_v54 = vld [vmem:[#allocation52_spill] sm:$0xff] }
 0x46f   :  { %v7341_v39 = vmax.f32 %v4933_v47, 0.0  ;;  %5081 = vmatmul.bf16.gmra.mxu2 %v16219_v41  ;;  %5337 = vmatpush.bf16.msra.mxu0 %v9172_v32  ;;  %v16242_v41 = vld [vmem:[#allocation48_spill] sm:$0xff] }
 0x470   :  { %5130 = vmatmul.bf16.gmra.mxu3 %v16220_v14  ;;  %5435 = vmatpush.bf16.msra.mxu2 %v9428_v30  ;;  %v10529_v14 = vld [vmem:[%s15871_s2 + $0x9e4] sm:$0xf] }
 0x471   :  { %v12874_v2 = vpack.c.bf16 %v7341_v39, %v7337_v58  ;;  %5484 = vmatpush.bf16.msra.mxu3 %v9556_v49  ;;  %v9297_v58 = vld [vmem:[%s15871_s2 + $0x9f0] sm:$0xf0]  ;;  %v16222_v49 = vld [vmem:[#allocation30_spill] sm:$0xff] }
 0x472   :  { %v4886_v62 = vpop.f32.mrf.mxu2  ;;  %v9300_v9 = vor.u32 %v10529_v14, %v9297_v58  ;;  %v10557_v14 = vld [vmem:[%s15871_s2 + $0xac4] sm:$0xf] }
 0x473   :  { %16221 = vst [vmem:[#allocation109_spill] sm:$0xff] %v12874_v2  ;;  %v4887_v28 = vadd.f32 %v4886_v62, %v4838_v15  ;;  %v4935_v4 = vpop.f32.mrf.mxu3  ;;  %v4790_v47 = vpop.f32.mrf.mxu0  ;;  %v16224_v2 = vld [vmem:[#allocation32_spill] sm:$0xff] }
 0x474   :  { %v4791_v10 = vadd.f32 %v4790_v47, %v12626_v33  ;;  %v4839_v51 = vpop.f32.mrf.mxu1  ;;  %5386 = vmatpush.bf16.msra.mxu1 %v9300_v9  ;;  %v9537_v9 = vld [vmem:[%s15871_s2 + $0xbd0] sm:$0xf0] }
 0x475   :  { %v4936_v36 = vadd.f32 %v4935_v4, %v4887_v28  ;;  %v16223_v28 = vld [vmem:[#allocation31_spill] sm:$0xff] }
 0x476   :  { %v4840_v39 = vadd.f32 %v4839_v51, %v4791_v10  ;;  %v16225_v10 = vld [vmem:[#allocation33_spill] sm:$0xff] }
 0x477   :  { %v7345_v4 = vmax.f32 %v4936_v36, 0.0  ;;  %v10493_v51 = vld [vmem:[%s15871_s2 + $0x8c4] sm:$0xf]  ;;  %v9153_v36 = vld [vmem:[%s15871_s2 + $0x8d0] sm:$0xf0] }
 0x47a   :  { %v4888_v15 = vpop.f32.mrf.mxu2 }
 0x47b   :  { %v4889_v50 = vadd.f32 %v4888_v15, %v4840_v39  ;;  %v4937_v30 = vpop.f32.mrf.mxu3  ;;  %v4793_v38 = vpop.f32.mrf.mxu0  ;;  %v10589_v39 = vld [vmem:[%s15871_s2 + $0xbc4] sm:$0xf] }
 0x47c   :  { %v4794_v33 = vadd.f32 %v4793_v38, %v12651_v53  ;;  %v4842_v24 = vpop.f32.mrf.mxu1  ;;  %v9409_v53 = vld [vmem:[%s15871_s2 + $0xad0] sm:$0xf0]  ;;  %v9540_v38 = vor.u32 %v10589_v39, %v9537_v9 }
 0x47d   :  { %v4938_v62 = vadd.f32 %v4937_v30, %v4889_v50  ;;  %v9412_v58 = vor.u32 %v10557_v14, %v9409_v53  ;;  %v9156_v30 = vor.u32 %v10493_v51, %v9153_v36 }
 0x47e   :  { %v4843_v32 = vadd.f32 %v4842_v24, %v4794_v33  ;;  %4988 = vmatmul.bf16.gmra.mxu0 %v16222_v49  ;;  %5037 = vmatmul.bf16.gmra.mxu1 %v16223_v28  ;;  %v16238_v28 = vld [vmem:[#allocation44_spill] sm:$0xff]  ;;  %v16239_v49 = vld [vmem:[#allocation45_spill] sm:$0xff] }
 0x47f   :  { %v7349_v47 = vmax.f32 %v4938_v62, 0.0  ;;  %5086 = vmatmul.bf16.gmra.mxu2 %v16224_v2  ;;  %5338 = vmatpush.bf16.msra.mxu0 %v9156_v30  ;;  %v10525_v2 = vld [vmem:[%s15871_s2 + $0x9c4] sm:$0xf] }
 0x480   :  { %5135 = vmatmul.bf16.gmra.mxu3 %v16225_v10  ;;  %5436 = vmatpush.bf16.msra.mxu2 %v9412_v58 }
 0x481   :  { %v12906_v15 = vpack.c.bf16 %v7349_v47, %v7345_v4  ;;  %5485 = vmatpush.bf16.msra.mxu3 %v9540_v38  ;;  %v9281_v4 = vld [vmem:[%s15871_s2 + $0x9d0] sm:$0xf0] }
 0x482   :  { %v4891_v50 = vpop.f32.mrf.mxu2  ;;  %v9284_v51 = vor.u32 %v10525_v2, %v9281_v4  ;;  %v16230_v4 = vld [vmem:[#allocation37_spill] sm:$0xff] }
 0x483   :  { %16226 = vst [vmem:[#allocation110_spill] sm:$0xff] %v12906_v15  ;;  %v4892_v33 = vadd.f32 %v4891_v50, %v4843_v32  ;;  %v4940_v24 = vpop.f32.mrf.mxu3  ;;  %v4795_v62 = vpop.f32.mrf.mxu0  ;;  %v10760_v32 = vld [vmem:[%s15872_s3] sm:$0xf] }
 0x484   :  { %v4796_v14 = vadd.f32 %v4795_v62, %v12660_v31  ;;  %v4844_v53 = vpop.f32.mrf.mxu1  ;;  %v12918_v58 = vperm.slane %v10760_v32, 1  ;;  %5387 = vmatpush.bf16.msra.mxu1 %v9284_v51  ;;  %v16228_v62 = vld [vmem:[#allocation35_spill] sm:$0xff]  ;;  %v10489_v32 = vld [vmem:[%s15871_s2 + $0x8a4] sm:$0xf] }
 0x485   :  { %v4941_v10 = vadd.f32 %v4940_v24, %v4892_v33  ;;  %v16227_v24 = vld [vmem:[#allocation34_spill] sm:$0xff]  ;;  %v9393_v51 = vld [vmem:[%s15871_s2 + $0xab0] sm:$0xf0] }
 0x486   :  { %v4845_v47 = vadd.f32 %v4844_v53, %v4796_v14  ;;  %v16229_v53 = vld [vmem:[#allocation36_spill] sm:$0xff] }
 0x487   :  { %v7353_v2 = vmax.f32 %v4941_v10, 0.0  ;;  %v9137_v10 = vld [vmem:[%s15871_s2 + $0x8b0] sm:$0xf0] }
 0x48a   :  { %v4893_v31 = vpop.f32.mrf.mxu2 }
 0x48b   :  { %v4894_v36 = vadd.f32 %v4893_v31, %v4845_v47  ;;  %v4942_v39 = vpop.f32.mrf.mxu3  ;;  %v4954_v9 = vpop.f32.mrf.mxu0  ;;  %v10553_v47 = vld [vmem:[%s15871_s2 + $0xaa4] sm:$0xf] }
 0x48c   :  { %v4955_v50 = vadd.f32 %v4954_v9, %v12918_v58  ;;  %v5003_v30 = vpop.f32.mrf.mxu1  ;;  %v9396_v31 = vor.u32 %v10553_v47, %v9393_v51 }
 0x48d   :  { %v4943_v38 = vadd.f32 %v4942_v39, %v4894_v36  ;;  %v10585_v36 = vld [vmem:[%s15871_s2 + $0xba4] sm:$0xf]  ;;  %v9521_v39 = vld [vmem:[%s15871_s2 + $0xbb0] sm:$0xf0] }
 0x48e   :  { %v5004_v33 = vadd.f32 %v5003_v30, %v4955_v50  ;;  %5149 = vmatmul.bf16.vlgmr.msrb.gmra.mxu0 %v16227_v24  ;;  %5198 = vmatmul.bf16.vlgmr.msrb.gmra.mxu1 %v16228_v62  ;;  %v9140_v30 = vor.u32 %v10489_v32, %v9137_v10  ;;  %v10521_v24 = vld [vmem:[%s15871_s2 + $0x9a4] sm:$0xf] }
 0x48f   :  { %v7357_v14 = vmax.f32 %v4943_v38, 0.0  ;;  %5247 = vmatmul.bf16.vlgmr.msrb.gmra.mxu2 %v16229_v53  ;;  %v9524_v38 = vor.u32 %v10585_v36, %v9521_v39 }
 0x490   :  { %5296 = vmatmul.bf16.vlgmr.msrb.gmra.mxu3 %v16230_v4  ;;  %5437 = vmatpush.bf16.msra.mxu2 %v9396_v31 }
 0x491   :  { %v12943_v9 = vpack.c.bf16 %v7357_v14, %v7353_v2  ;;  %5339 = vmatpush.bf16.msra.mxu0 %v9140_v30  ;;  %5486 = vmatpush.bf16.msra.mxu3 %v9524_v38  ;;  %v9265_v2 = vld [vmem:[%s15871_s2 + $0x9b0] sm:$0xf0]  ;;  %v16232_v30 = vld [vmem:[#allocation38_spill] sm:$0xff] }
 0x492   :  { %v5052_v50 = vpop.f32.mrf.mxu2  ;;  %v16233_v38 = vld [vmem:[#allocation39_spill] sm:$0xff] }
 0x493   :  { %16231 = vst [vmem:[#allocation111_spill] sm:$0xff] %v12943_v9  ;;  %v5053_v15 = vadd.f32 %v5052_v50, %v5004_v33  ;;  %v5101_v4 = vpop.f32.mrf.mxu3  ;;  %v4956_v47 = vpop.f32.mrf.mxu0  ;;  %v9268_v33 = vor.u32 %v10521_v24, %v9265_v2  ;;  %v16235_v9 = vld [vmem:[#allocation41_spill] sm:$0xff] }
 0x494   :  { %v4957_v51 = vadd.f32 %v4956_v47, %v12918_v58  ;;  %v5005_v53 = vpop.f32.mrf.mxu1  ;;  %v16234_v47 = vld [vmem:[#allocation40_spill] sm:$0xff]  ;;  %v10549_v24 = vld [vmem:[%s15871_s2 + $0xa84] sm:$0xf] }
 0x495   :  { %v12946_v62 = vadd.f32 %v5101_v4, %v5053_v15  ;;  %5388 = vmatpush.bf16.msra.mxu1 %v9268_v33  ;;  %v10581_v33 = vld [vmem:[%s15871_s2 + $0xb84] sm:$0xf] }
 0x496   :  { %v5006_v14 = vadd.f32 %v5005_v53, %v4957_v51  ;;  %v9377_v53 = vld [vmem:[%s15871_s2 + $0xa90] sm:$0xf0]  ;;  %v10485_v51 = vld [vmem:[%s15871_s2 + $0x884] sm:$0xf] }
 0x497   :  { %v9380_v2 = vor.u32 %v10549_v24, %v9377_v53 }
 0x499   :  { %5438 = vmatpush.bf16.msra.mxu2 %v9380_v2 }
 0x49a   :  { %v5054_v32 = vpop.f32.mrf.mxu2 }
 0x49b   :  { %v5055_v31 = vadd.f32 %v5054_v32, %v5006_v14  ;;  %v5103_v10 = vpop.f32.mrf.mxu3  ;;  %v4959_v36 = vpop.f32.mrf.mxu0  ;;  %v9121_v14 = vld [vmem:[%s15871_s2 + $0x890] sm:$0xf0] }
 0x49c   :  { %v4960_v39 = vadd.f32 %v4959_v36, %v12918_v58  ;;  %v5008_v50 = vpop.f32.mrf.mxu1  ;;  %v9505_v32 = vld [vmem:[%s15871_s2 + $0xb90] sm:$0xf0] }
 0x49d   :  { %v12955_v15 = vadd.f32 %v5103_v10, %v5055_v31  ;;  %v9124_v10 = vor.u32 %v10485_v51, %v9121_v14  ;;  %v9508_v36 = vor.u32 %v10581_v33, %v9505_v32  ;;  %v9249_v51 = vld [vmem:[%s15871_s2 + $0x990] sm:$0xf0] }
 0x49e   :  { %v5009_v4 = vadd.f32 %v5008_v50, %v4960_v39  ;;  %5154 = vmatmul.bf16.gmra.mxu0 %v16232_v30  ;;  %5203 = vmatmul.bf16.gmra.mxu1 %v16233_v38  ;;  %v10517_v38 = vld [vmem:[%s15871_s2 + $0x984] sm:$0xf]  ;;  %v16237_v30 = vld [vmem:[#allocation43_spill] sm:$0xff] }
 0x49f   :  { %5252 = vmatmul.bf16.gmra.mxu2 %v16234_v47  ;;  %5340 = vmatpush.bf16.msra.mxu0 %v9124_v10 }
 0x4a0   :  { %5301 = vmatmul.bf16.gmra.mxu3 %v16235_v9 }
 0x4a1   :  { %5487 = vmatpush.bf16.msra.mxu3 %v9508_v36 }
 0x4a2   :  { %v5057_v31 = vpop.f32.mrf.mxu2 }
 0x4a3   :  { %v5058_v39 = vadd.f32 %v5057_v31, %v5009_v4  ;;  %v5106_v50 = vpop.f32.mrf.mxu3  ;;  %v4961_v9 = vpop.f32.mrf.mxu0  ;;  %v9252_v4 = vor.u32 %v10517_v38, %v9249_v51  ;;  %v10545_v38 = vld [vmem:[%s15871_s2 + $0xa64] sm:$0xf] }
 0x4a4   :  { %v4962_v24 = vadd.f32 %v4961_v9, %v12918_v58  ;;  %v5010_v53 = vpop.f32.mrf.mxu1 }
 0x4a5   :  { %v12980_v47 = vadd.f32 %v5106_v50, %v5058_v39  ;;  %5389 = vmatpush.bf16.msra.mxu1 %v9252_v4  ;;  %v16236_v50 = vld [vmem:[#allocation42_spill] sm:$0xff]  ;;  %v10577_v4 = vld [vmem:[%s15871_s2 + $0xb64] sm:$0xf] }
 0x4a6   :  { %v5011_v14 = vadd.f32 %v5010_v53, %v4962_v24  ;;  %v9361_v24 = vld [vmem:[%s15871_s2 + $0xa70] sm:$0xf0]  ;;  %v10481_v53 = vld [vmem:[%s15871_s2 + $0x864] sm:$0xf] }
 0x4a7   :  { %v9364_v51 = vor.u32 %v10545_v38, %v9361_v24 }
 0x4a9   :  { %5439 = vmatpush.bf16.msra.mxu2 %v9364_v51 }
 0x4aa   :  { %v5059_v33 = vpop.f32.mrf.mxu2 }
 0x4ab   :  { %v5060_v2 = vadd.f32 %v5059_v33, %v5011_v14  ;;  %v5108_v32 = vpop.f32.mrf.mxu3  ;;  %v4964_v9 = vpop.f32.mrf.mxu0  ;;  %v9105_v14 = vld [vmem:[%s15871_s2 + $0x870] sm:$0xf0] }
 0x4ac   :  { %v4965_v31 = vadd.f32 %v4964_v9, %v12918_v58  ;;  %v5013_v10 = vpop.f32.mrf.mxu1  ;;  %v9489_v33 = vld [vmem:[%s15871_s2 + $0xb70] sm:$0xf0] }
 0x4ad   :  { %v12989_v36 = vadd.f32 %v5108_v32, %v5060_v2  ;;  %v9108_v32 = vor.u32 %v10481_v53, %v9105_v14  ;;  %v9492_v9 = vor.u32 %v10577_v4, %v9489_v33  ;;  %v9233_v53 = vld [vmem:[%s15871_s2 + $0x970] sm:$0xf0] }
 0x4ae   :  { %v5014_v39 = vadd.f32 %v5013_v10, %v4965_v31  ;;  %5159 = vmatmul.bf16.gmra.mxu0 %v16236_v50  ;;  %5208 = vmatmul.bf16.gmra.mxu1 %v16237_v30  ;;  %v10513_v30 = vld [vmem:[%s15871_s2 + $0x964] sm:$0xf]  ;;  %v16241_v50 = vld [vmem:[#allocation47_spill] sm:$0xff] }
 0x4af   :  { %5257 = vmatmul.bf16.gmra.mxu2 %v16238_v28  ;;  %5341 = vmatpush.bf16.msra.mxu0 %v9108_v32 }
 0x4b0   :  { %5306 = vmatmul.bf16.gmra.mxu3 %v16239_v49 }
 0x4b1   :  { %5488 = vmatpush.bf16.msra.mxu3 %v9492_v9 }
 0x4b2   :  { %v5062_v2 = vpop.f32.mrf.mxu2 }
 0x4b3   :  { %v5063_v31 = vadd.f32 %v5062_v2, %v5014_v39  ;;  %v5111_v10 = vpop.f32.mrf.mxu3  ;;  %v4966_v49 = vpop.f32.mrf.mxu0  ;;  %v9236_v39 = vor.u32 %v10513_v30, %v9233_v53  ;;  %v10541_v30 = vld [vmem:[%s15871_s2 + $0xa44] sm:$0xf] }
 0x4b4   :  { %v4967_v38 = vadd.f32 %v4966_v49, %v12918_v58  ;;  %v5015_v24 = vpop.f32.mrf.mxu1 }
 0x4b5   :  { %v13014_v28 = vadd.f32 %v5111_v10, %v5063_v31  ;;  %5390 = vmatpush.bf16.msra.mxu1 %v9236_v39  ;;  %v16240_v10 = vld [vmem:[#allocation46_spill] sm:$0xff]  ;;  %v10573_v39 = vld [vmem:[%s15871_s2 + $0xb44] sm:$0xf] }
 0x4b6   :  { %v5016_v14 = vadd.f32 %v5015_v24, %v4967_v38  ;;  %v9345_v38 = vld [vmem:[%s15871_s2 + $0xa50] sm:$0xf0]  ;;  %v10477_v24 = vld [vmem:[%s15871_s2 + $0x844] sm:$0xf] }
 0x4b7   :  { %v9348_v53 = vor.u32 %v10541_v30, %v9345_v38 }
 0x4b9   :  { %5440 = vmatpush.bf16.msra.mxu2 %v9348_v53 }
 0x4ba   :  { %v5064_v4 = vpop.f32.mrf.mxu2 }
 0x4bb   :  { %v5065_v51 = vadd.f32 %v5064_v4, %v5016_v14  ;;  %v5113_v33 = vpop.f32.mrf.mxu3  ;;  %v4969_v49 = vpop.f32.mrf.mxu0  ;;  %v9089_v14 = vld [vmem:[%s15871_s2 + $0x850] sm:$0xf0] }
 0x4bc   :  { %v4970_v2 = vadd.f32 %v4969_v49, %v12918_v58  ;;  %v5018_v32 = vpop.f32.mrf.mxu1  ;;  %v9473_v4 = vld [vmem:[%s15871_s2 + $0xb50] sm:$0xf0] }
 0x4bd   :  { %v13023_v9 = vadd.f32 %v5113_v33, %v5065_v51  ;;  %v9092_v33 = vor.u32 %v10477_v24, %v9089_v14  ;;  %v9476_v49 = vor.u32 %v10573_v39, %v9473_v4  ;;  %v9217_v24 = vld [vmem:[%s15871_s2 + $0x950] sm:$0xf0] }
 0x4be   :  { %v5019_v31 = vadd.f32 %v5018_v32, %v4970_v2  ;;  %5164 = vmatmul.bf16.gmra.mxu0 %v16240_v10  ;;  %5213 = vmatmul.bf16.gmra.mxu1 %v16241_v50  ;;  %v10509_v50 = vld [vmem:[%s15871_s2 + $0x944] sm:$0xf]  ;;  %v16245_v10 = vld [vmem:[#allocation51_spill] sm:$0xff] }
 0x4bf   :  { %5262 = vmatmul.bf16.gmra.mxu2 %v16242_v41  ;;  %5342 = vmatpush.bf16.msra.mxu0 %v9092_v33 }
 0x4c0   :  { %5311 = vmatmul.bf16.gmra.mxu3 %v16243_v42 }
 0x4c1   :  { %5489 = vmatpush.bf16.msra.mxu3 %v9476_v49 }
 0x4c2   :  { %v5067_v51 = vpop.f32.mrf.mxu2 }
 0x4c3   :  { %v5068_v2 = vadd.f32 %v5067_v51, %v5019_v31  ;;  %v5116_v32 = vpop.f32.mrf.mxu3  ;;  %v4971_v42 = vpop.f32.mrf.mxu0  ;;  %v9220_v31 = vor.u32 %v10509_v50, %v9217_v24  ;;  %v10537_v50 = vld [vmem:[%s15871_s2 + $0xa24] sm:$0xf] }
 0x4c4   :  { %v4972_v30 = vadd.f32 %v4971_v42, %v12918_v58  ;;  %v5020_v38 = vpop.f32.mrf.mxu1 }
 0x4c5   :  { %v13048_v41 = vadd.f32 %v5116_v32, %v5068_v2  ;;  %5391 = vmatpush.bf16.msra.mxu1 %v9220_v31  ;;  %v16244_v32 = vld [vmem:[#allocation50_spill] sm:$0xff]  ;;  %v10569_v31 = vld [vmem:[%s15871_s2 + $0xb24] sm:$0xf] }
 0x4c6   :  { %v5021_v14 = vadd.f32 %v5020_v38, %v4972_v30  ;;  %v9329_v30 = vld [vmem:[%s15871_s2 + $0xa30] sm:$0xf0]  ;;  %v10473_v38 = vld [vmem:[%s15871_s2 + $0x824] sm:$0xf] }
 0x4c7   :  { %v9332_v24 = vor.u32 %v10537_v50, %v9329_v30 }
 0x4c9   :  { %5441 = vmatpush.bf16.msra.mxu2 %v9332_v24 }
 0x4ca   :  { %v5069_v39 = vpop.f32.mrf.mxu2 }
 0x4cb   :  { %v5070_v53 = vadd.f32 %v5069_v39, %v5021_v14  ;;  %v5118_v4 = vpop.f32.mrf.mxu3  ;;  %v4974_v42 = vpop.f32.mrf.mxu0  ;;  %v9073_v14 = vld [vmem:[%s15871_s2 + $0x830] sm:$0xf0] }
 0x4cc   :  { %v4975_v51 = vadd.f32 %v4974_v42, %v12918_v58  ;;  %v5023_v33 = vpop.f32.mrf.mxu1  ;;  %v9457_v39 = vld [vmem:[%s15871_s2 + $0xb30] sm:$0xf0] }
 0x4cd   :  { %v13057_v49 = vadd.f32 %v5118_v4, %v5070_v53  ;;  %v9076_v4 = vor.u32 %v10473_v38, %v9073_v14  ;;  %v9460_v42 = vor.u32 %v10569_v31, %v9457_v39  ;;  %v9201_v38 = vld [vmem:[%s15871_s2 + $0x930] sm:$0xf0] }
 0x4ce   :  { %v5024_v2 = vadd.f32 %v5023_v33, %v4975_v51  ;;  %5169 = vmatmul.bf16.gmra.mxu0 %v16244_v32  ;;  %5218 = vmatmul.bf16.gmra.mxu1 %v16245_v10  ;;  %v10505_v10 = vld [vmem:[%s15871_s2 + $0x924] sm:$0xf]  ;;  %v16249_v32 = vld [vmem:[#allocation55_spill] sm:$0xff] }
 0x4cf   :  { %5267 = vmatmul.bf16.gmra.mxu2 %v16246_v54  ;;  %5343 = vmatpush.bf16.msra.mxu0 %v9076_v4 }
 0x4d0   :  { %5316 = vmatmul.bf16.gmra.mxu3 %v16247_v46 }
 0x4d1   :  { %5490 = vmatpush.bf16.msra.mxu3 %v9460_v42 }
 0x4d2   :  { %v5072_v53 = vpop.f32.mrf.mxu2 }
 0x4d3   :  { %v5073_v51 = vadd.f32 %v5072_v53, %v5024_v2  ;;  %v5121_v33 = vpop.f32.mrf.mxu3  ;;  %v4976_v46 = vpop.f32.mrf.mxu0  ;;  %v9204_v2 = vor.u32 %v10505_v10, %v9201_v38  ;;  %v10533_v10 = vld [vmem:[%s15871_s2 + $0xa04] sm:$0xf] }
 0x4d4   :  { %v4977_v50 = vadd.f32 %v4976_v46, %v12918_v58  ;;  %v5025_v30 = vpop.f32.mrf.mxu1 }
 0x4d5   :  { %v13082_v54 = vadd.f32 %v5121_v33, %v5073_v51  ;;  %5392 = vmatpush.bf16.msra.mxu1 %v9204_v2  ;;  %v16248_v33 = vld [vmem:[#allocation54_spill] sm:$0xff]  ;;  %v10565_v2 = vld [vmem:[%s15871_s2 + $0xb04] sm:$0xf] }
 0x4d6   :  { %v5026_v14 = vadd.f32 %v5025_v30, %v4977_v50  ;;  %v9313_v50 = vld [vmem:[%s15871_s2 + $0xa10] sm:$0xf0]  ;;  %v10469_v30 = vld [vmem:[%s15871_s2 + $0x804] sm:$0xf] }
 0x4d7   :  { %v9316_v38 = vor.u32 %v10533_v10, %v9313_v50 }
 0x4d9   :  { %5442 = vmatpush.bf16.msra.mxu2 %v9316_v38 }
 0x4da   :  { %v5074_v31 = vpop.f32.mrf.mxu2 }
 0x4db   :  { %v5075_v24 = vadd.f32 %v5074_v31, %v5026_v14  ;;  %v5123_v39 = vpop.f32.mrf.mxu3  ;;  %v4979_v46 = vpop.f32.mrf.mxu0  ;;  %v9057_v14 = vld [vmem:[%s15871_s2 + $0x810] sm:$0xf0] }
 0x4dc   :  { %v4980_v53 = vadd.f32 %v4979_v46, %v12918_v58  ;;  %v5028_v4 = vpop.f32.mrf.mxu1  ;;  %v9441_v31 = vld [vmem:[%s15871_s2 + $0xb10] sm:$0xf0] }
 0x4dd   :  { %v13091_v42 = vadd.f32 %v5123_v39, %v5075_v24  ;;  %v9060_v39 = vor.u32 %v10469_v30, %v9057_v14  ;;  %v9444_v46 = vor.u32 %v10565_v2, %v9441_v31  ;;  %v9185_v30 = vld [vmem:[%s15871_s2 + $0x910] sm:$0xf0] }
 0x4de   :  { %v5029_v51 = vadd.f32 %v5028_v4, %v4980_v53  ;;  %5174 = vmatmul.bf16.gmra.mxu0 %v16248_v33  ;;  %5223 = vmatmul.bf16.gmra.mxu1 %v16249_v32  ;;  %v10501_v32 = vld [vmem:[%s15871_s2 + $0x904] sm:$0xf]  ;;  %v16253_v33 = vld [vmem:[#allocation59_spill] sm:$0xff] }
 0x4df   :  { %5272 = vmatmul.bf16.gmra.mxu2 %v16250_v60  ;;  %5344 = vmatpush.bf16.msra.mxu0 %v9060_v39 }
 0x4e0   :  { %5321 = vmatmul.bf16.gmra.mxu3 %v16251_v6 }
 0x4e1   :  { %5491 = vmatpush.bf16.msra.mxu3 %v9444_v46 }
 0x4e2   :  { %v5077_v24 = vpop.f32.mrf.mxu2 }
 0x4e3   :  { %v5078_v53 = vadd.f32 %v5077_v24, %v5029_v51  ;;  %v5126_v4 = vpop.f32.mrf.mxu3  ;;  %v4981_v6 = vpop.f32.mrf.mxu0  ;;  %v9188_v51 = vor.u32 %v10501_v32, %v9185_v30  ;;  %v10689_v32 = vld [vmem:[%s15871_s2 + $0xee4] sm:$0xf] }
 0x4e4   :  { %v4982_v10 = vadd.f32 %v4981_v6, %v12918_v58  ;;  %v5030_v50 = vpop.f32.mrf.mxu1 }
 0x4e5   :  { %v13116_v60 = vadd.f32 %v5126_v4, %v5078_v53  ;;  %5393 = vmatpush.bf16.msra.mxu1 %v9188_v51  ;;  %v16252_v4 = vld [vmem:[#allocation58_spill] sm:$0xff]  ;;  %v10721_v51 = vld [vmem:[%s15871_s2 + $0xfe4] sm:$0xf] }
 0x4e6   :  { %v5031_v14 = vadd.f32 %v5030_v50, %v4982_v10  ;;  %v9937_v10 = vld [vmem:[%s15871_s2 + $0xef0] sm:$0xf0]  ;;  %v10625_v50 = vld [vmem:[%s15871_s2 + $0xce4] sm:$0xf] }
 0x4e7   :  { %v9940_v30 = vor.u32 %v10689_v32, %v9937_v10 }
 0x4e9   :  { %5631 = vmatpush.bf16.msrb.mxu2 %v9940_v30 }
 0x4ea   :  { %v5079_v2 = vpop.f32.mrf.mxu2 }
 0x4eb   :  { %v5080_v38 = vadd.f32 %v5079_v2, %v5031_v14  ;;  %v5128_v31 = vpop.f32.mrf.mxu3  ;;  %v4984_v6 = vpop.f32.mrf.mxu0  ;;  %v9681_v14 = vld [vmem:[%s15871_s2 + $0xcf0] sm:$0xf0] }
 0x4ec   :  { %v4985_v24 = vadd.f32 %v4984_v6, %v12918_v58  ;;  %v5033_v39 = vpop.f32.mrf.mxu1  ;;  %v10065_v2 = vld [vmem:[%s15871_s2 + $0xff0] sm:$0xf0] }
 0x4ed   :  { %v13125_v46 = vadd.f32 %v5128_v31, %v5080_v38  ;;  %v9684_v31 = vor.u32 %v10625_v50, %v9681_v14  ;;  %v10068_v6 = vor.u32 %v10721_v51, %v10065_v2  ;;  %v9809_v50 = vld [vmem:[%s15871_s2 + $0xdf0] sm:$0xf0] }
 0x4ee   :  { %v5034_v53 = vadd.f32 %v5033_v39, %v4985_v24  ;;  %5179 = vmatmul.bf16.gmra.mxu0 %v16252_v4  ;;  %5228 = vmatmul.bf16.gmra.mxu1 %v16253_v33  ;;  %v10657_v33 = vld [vmem:[%s15871_s2 + $0xde4] sm:$0xf]  ;;  %v16257_v4 = vld [vmem:[#allocation63_spill] sm:$0xff] }
 0x4ef   :  { %5277 = vmatmul.bf16.gmra.mxu2 %v16254_v19  ;;  %5533 = vmatpush.bf16.msrb.mxu0 %v9684_v31 }
 0x4f0   :  { %5326 = vmatmul.bf16.gmra.mxu3 %v16255_v59 }
 0x4f1   :  { %5680 = vmatpush.bf16.msrb.mxu3 %v10068_v6 }
 0x4f2   :  { %v5082_v38 = vpop.f32.mrf.mxu2 }
 0x4f3   :  { %v5083_v24 = vadd.f32 %v5082_v38, %v5034_v53  ;;  %v5131_v39 = vpop.f32.mrf.mxu3  ;;  %v4986_v59 = vpop.f32.mrf.mxu0  ;;  %v9812_v53 = vor.u32 %v10657_v33, %v9809_v50  ;;  %v10685_v33 = vld [vmem:[%s15871_s2 + $0xec4] sm:$0xf] }
 0x4f4   :  { %v4987_v32 = vadd.f32 %v4986_v59, %v12918_v58  ;;  %v5035_v10 = vpop.f32.mrf.mxu1 }
 0x4f5   :  { %v13150_v19 = vadd.f32 %v5131_v39, %v5083_v24  ;;  %5582 = vmatpush.bf16.msrb.mxu1 %v9812_v53  ;;  %v16256_v39 = vld [vmem:[#allocation62_spill] sm:$0xff]  ;;  %v10717_v53 = vld [vmem:[%s15871_s2 + $0xfc4] sm:$0xf] }
 0x4f6   :  { %v5036_v14 = vadd.f32 %v5035_v10, %v4987_v32  ;;  %v9921_v32 = vld [vmem:[%s15871_s2 + $0xed0] sm:$0xf0]  ;;  %v10621_v10 = vld [vmem:[%s15871_s2 + $0xcc4] sm:$0xf] }
 0x4f7   :  { %v9924_v50 = vor.u32 %v10685_v33, %v9921_v32 }
 0x4f9   :  { %5632 = vmatpush.bf16.msrb.mxu2 %v9924_v50 }
 0x4fa   :  { %v5084_v51 = vpop.f32.mrf.mxu2 }
 0x4fb   :  { %v5085_v30 = vadd.f32 %v5084_v51, %v5036_v14  ;;  %v5133_v2 = vpop.f32.mrf.mxu3  ;;  %v4989_v59 = vpop.f32.mrf.mxu0  ;;  %v9665_v14 = vld [vmem:[%s15871_s2 + $0xcd0] sm:$0xf0] }
 0x4fc   :  { %v4990_v38 = vadd.f32 %v4989_v59, %v12918_v58  ;;  %v5038_v31 = vpop.f32.mrf.mxu1  ;;  %v10049_v51 = vld [vmem:[%s15871_s2 + $0xfd0] sm:$0xf0] }
 0x4fd   :  { %v13159_v6 = vadd.f32 %v5133_v2, %v5085_v30  ;;  %v9668_v2 = vor.u32 %v10621_v10, %v9665_v14  ;;  %v10052_v59 = vor.u32 %v10717_v53, %v10049_v51  ;;  %v9793_v10 = vld [vmem:[%s15871_s2 + $0xdd0] sm:$0xf0] }
 0x4fe   :  { %v5039_v24 = vadd.f32 %v5038_v31, %v4990_v38  ;;  %5184 = vmatmul.bf16.gmra.mxu0 %v16256_v39  ;;  %5233 = vmatmul.bf16.gmra.mxu1 %v16257_v4  ;;  %v10653_v4 = vld [vmem:[%s15871_s2 + $0xdc4] sm:$0xf]  ;;  %v16262_v39 = vld [vmem:[#allocation68_spill] sm:$0xff] }
 0x4ff   :  { %5282 = vmatmul.bf16.gmra.mxu2 %v16258_v40  ;;  %5534 = vmatpush.bf16.msrb.mxu0 %v9668_v2 }
 0x500   :  { %5331 = vmatmul.bf16.gmra.mxu3 %v16259_v1 }
 0x501   :  { %5681 = vmatpush.bf16.msrb.mxu3 %v10052_v59 }
 0x502   :  { %v5087_v30 = vpop.f32.mrf.mxu2 }
 0x503   :  { %v5088_v38 = vadd.f32 %v5087_v30, %v5039_v24  ;;  %v5136_v31 = vpop.f32.mrf.mxu3  ;;  %v4991_v1 = vpop.f32.mrf.mxu0  ;;  %v9796_v24 = vor.u32 %v10653_v4, %v9793_v10  ;;  %v10681_v4 = vld [vmem:[%s15871_s2 + $0xea4] sm:$0xf]  ;;  %v9649_v10 = vld [vmem:[%s15871_s2 + $0xcb0] sm:$0xf0] }
 0x504   :  { %v4992_v33 = vadd.f32 %v4991_v1, %v12918_v58  ;;  %v5040_v32 = vpop.f32.mrf.mxu1 }
 0x505   :  { %v13184_v40 = vadd.f32 %v5136_v31, %v5088_v38  ;;  %5583 = vmatpush.bf16.msrb.mxu1 %v9796_v24  ;;  %v16260_v38 = vld [vmem:[#allocation66_spill] sm:$0xff]  ;;  %v16261_v31 = vld [vmem:[#allocation67_spill] sm:$0xff] }
 0x506   :  { %v5041_v14 = vadd.f32 %v5040_v32, %v4992_v33  ;;  %v10617_v33 = vld [vmem:[%s15871_s2 + $0xca4] sm:$0xf]  ;;  %v10033_v24 = vld [vmem:[%s15871_s2 + $0xfb0] sm:$0xf0] }
 0x50a   :  { %v5089_v53 = vpop.f32.mrf.mxu2 }
 0x50b   :  { %v5090_v50 = vadd.f32 %v5089_v53, %v5041_v14  ;;  %v5138_v51 = vpop.f32.mrf.mxu3  ;;  %v5150_v1 = vpop.f32.mrf.mxu0  ;;  %v10713_v14 = vld [vmem:[%s15871_s2 + $0xfa4] sm:$0xf] }
 0x50c   :  { %v5151_v58 = vadd.f32 %v5150_v1, %v12946_v62  ;;  %v5199_v30 = vpop.f32.mrf.mxu1  ;;  %v9905_v62 = vld [vmem:[%s15871_s2 + $0xeb0] sm:$0xf0] }
 0x50d   :  { %v13193_v2 = vadd.f32 %v5138_v51, %v5090_v50  ;;  %v9908_v32 = vor.u32 %v10681_v4, %v9905_v62  ;;  %v9652_v50 = vor.u32 %v10617_v33, %v9649_v10  ;;  %v10036_v51 = vor.u32 %v10713_v14, %v10033_v24  ;;  %v9777_v33 = vld [vmem:[%s15871_s2 + $0xdb0] sm:$0xf0] }
 0x50e   :  { %v5200_v59 = vadd.f32 %v5199_v30, %v5151_v58  ;;  %5345 = vmatmul.bf16.vlgmr.msra.gmra.mxu0 %v11266_v44  ;;  %5394 = vmatmul.bf16.vlgmr.msra.gmra.mxu1 %v16260_v38  ;;  %v16265_v38 = vld [vmem:[#allocation71_spill] sm:$0xff] }
 0x50f   :  { %5443 = vmatmul.bf16.vlgmr.msra.gmra.mxu2 %v16261_v31  ;;  %5535 = vmatpush.bf16.msrb.mxu0 %v9652_v50  ;;  %v10649_v31 = vld [vmem:[%s15871_s2 + $0xda4] sm:$0xf] }
 0x510   :  { %5492 = vmatmul.bf16.vlgmr.msra.gmra.mxu3 %v16262_v39  ;;  %5633 = vmatpush.bf16.msrb.mxu2 %v9908_v32 }
 0x511   :  { %5682 = vmatpush.bf16.msrb.mxu3 %v10036_v51 }
 0x512   :  { %v5248_v53 = vpop.f32.mrf.mxu2 }
 0x513   :  { %v5249_v1 = vadd.f32 %v5248_v53, %v5200_v59  ;;  %v5297_v58 = vpop.f32.mrf.mxu3  ;;  %v5152_v30 = vpop.f32.mrf.mxu0  ;;  %v9780_v59 = vor.u32 %v10649_v31, %v9777_v33  ;;  %v10677_v31 = vld [vmem:[%s15871_s2 + $0xe84] sm:$0xf]  ;;  %v9633_v33 = vld [vmem:[%s15871_s2 + $0xc90] sm:$0xf0] }
 0x514   :  { %v5153_v4 = vadd.f32 %v5152_v30, %v12955_v15  ;;  %v5201_v62 = vpop.f32.mrf.mxu1  ;;  %v16264_v30 = vld [vmem:[#allocation70_spill] sm:$0xff] }
 0x515   :  { %v13218_v39 = vadd.f32 %v5297_v58, %v5249_v1  ;;  %5584 = vmatpush.bf16.msrb.mxu1 %v9780_v59  ;;  %v16263_v58 = vld [vmem:[#allocation69_spill] sm:$0xff]  ;;  %v10017_v59 = vld [vmem:[%s15871_s2 + $0xf90] sm:$0xf0] }
 0x516   :  { %v5202_v10 = vadd.f32 %v5201_v62, %v5153_v4  ;;  %v10613_v4 = vld [vmem:[%s15871_s2 + $0xc84] sm:$0xf] }
 0x51a   :  { %v5250_v14 = vpop.f32.mrf.mxu2 }
 0x51b   :  { %v5251_v32 = vadd.f32 %v5250_v14, %v5202_v10  ;;  %v5299_v24 = vpop.f32.mrf.mxu3  ;;  %v5155_v15 = vpop.f32.mrf.mxu0  ;;  %v10709_v10 = vld [vmem:[%s15871_s2 + $0xf84] sm:$0xf] }
 0x51c   :  { %v5156_v53 = vadd.f32 %v5155_v15, %v12980_v47  ;;  %v5204_v50 = vpop.f32.mrf.mxu1  ;;  %v9889_v47 = vld [vmem:[%s15871_s2 + $0xe90] sm:$0xf0] }
 0x51d   :  { %v13227_v51 = vadd.f32 %v5299_v24, %v5251_v32  ;;  %v9892_v62 = vor.u32 %v10677_v31, %v9889_v47  ;;  %v9636_v32 = vor.u32 %v10613_v4, %v9633_v33  ;;  %v10020_v24 = vor.u32 %v10709_v10, %v10017_v59  ;;  %v9761_v4 = vld [vmem:[%s15871_s2 + $0xd90] sm:$0xf0] }
 0x51e   :  { %v5205_v1 = vadd.f32 %v5204_v50, %v5156_v53  ;;  %5350 = vmatmul.bf16.gmra.mxu0 %v11306_v56  ;;  %5399 = vmatmul.bf16.gmra.mxu1 %v16263_v58  ;;  %v16268_v58 = vld [vmem:[#allocation75_spill] sm:$0xff] }
 0x51f   :  { %5448 = vmatmul.bf16.gmra.mxu2 %v16264_v30  ;;  %5536 = vmatpush.bf16.msrb.mxu0 %v9636_v32  ;;  %v10645_v30 = vld [vmem:[%s15871_s2 + $0xd84] sm:$0xf] }
 0x520   :  { %5497 = vmatmul.bf16.gmra.mxu3 %v16265_v38  ;;  %5634 = vmatpush.bf16.msrb.mxu2 %v9892_v62 }
 0x521   :  { %5683 = vmatpush.bf16.msrb.mxu3 %v10020_v24 }
 0x522   :  { %v5253_v14 = vpop.f32.mrf.mxu2 }
 0x523   :  { %v5254_v15 = vadd.f32 %v5253_v14, %v5205_v1  ;;  %v5302_v53 = vpop.f32.mrf.mxu3  ;;  %v5157_v50 = vpop.f32.mrf.mxu0  ;;  %v9764_v1 = vor.u32 %v10645_v30, %v9761_v4  ;;  %v10673_v30 = vld [vmem:[%s15871_s2 + $0xe64] sm:$0xf]  ;;  %v9617_v4 = vld [vmem:[%s15871_s2 + $0xc70] sm:$0xf0] }
 0x524   :  { %v5158_v31 = vadd.f32 %v5157_v50, %v12989_v36  ;;  %v5206_v47 = vpop.f32.mrf.mxu1  ;;  %v16267_v50 = vld [vmem:[#allocation74_spill] sm:$0xff] }
 0x525   :  { %v13252_v38 = vadd.f32 %v5302_v53, %v5254_v15  ;;  %5585 = vmatpush.bf16.msrb.mxu1 %v9764_v1  ;;  %v16266_v53 = vld [vmem:[#allocation73_spill] sm:$0xff]  ;;  %v10001_v1 = vld [vmem:[%s15871_s2 + $0xf70] sm:$0xf0] }
 0x526   :  { %v5207_v33 = vadd.f32 %v5206_v47, %v5158_v31  ;;  %v10609_v31 = vld [vmem:[%s15871_s2 + $0xc64] sm:$0xf] }
 0x52a   :  { %v5255_v10 = vpop.f32.mrf.mxu2 }
 0x52b   :  { %v5256_v62 = vadd.f32 %v5255_v10, %v5207_v33  ;;  %v5304_v59 = vpop.f32.mrf.mxu3  ;;  %v5160_v36 = vpop.f32.mrf.mxu0  ;;  %v10705_v33 = vld [vmem:[%s15871_s2 + $0xf64] sm:$0xf] }
 0x52c   :  { %v5161_v14 = vadd.f32 %v5160_v36, %v13014_v28  ;;  %v5209_v32 = vpop.f32.mrf.mxu1  ;;  %v9873_v28 = vld [vmem:[%s15871_s2 + $0xe70] sm:$0xf0] }
 0x52d   :  { %v13261_v24 = vadd.f32 %v5304_v59, %v5256_v62  ;;  %v9876_v47 = vor.u32 %v10673_v30, %v9873_v28  ;;  %v9620_v62 = vor.u32 %v10609_v31, %v9617_v4  ;;  %v10004_v59 = vor.u32 %v10705_v33, %v10001_v1  ;;  %v9745_v31 = vld [vmem:[%s15871_s2 + $0xd70] sm:$0xf0] }
 0x52e   :  { %v5210_v15 = vadd.f32 %v5209_v32, %v5161_v14  ;;  %5355 = vmatmul.bf16.gmra.mxu0 %v11346_v20  ;;  %5404 = vmatmul.bf16.gmra.mxu1 %v16266_v53  ;;  %v16271_v53 = vld [vmem:[#allocation79_spill] sm:$0xff] }
 0x52f   :  { %5453 = vmatmul.bf16.gmra.mxu2 %v16267_v50  ;;  %5537 = vmatpush.bf16.msrb.mxu0 %v9620_v62  ;;  %v10641_v50 = vld [vmem:[%s15871_s2 + $0xd64] sm:$0xf] }
 0x530   :  { %5502 = vmatmul.bf16.gmra.mxu3 %v16268_v58  ;;  %5635 = vmatpush.bf16.msrb.mxu2 %v9876_v47 }
 0x531   :  { %5684 = vmatpush.bf16.msrb.mxu3 %v10004_v59 }
 0x532   :  { %v5258_v10 = vpop.f32.mrf.mxu2 }
 0x533   :  { %v5259_v36 = vadd.f32 %v5258_v10, %v5210_v15  ;;  %v5307_v14 = vpop.f32.mrf.mxu3  ;;  %v5162_v32 = vpop.f32.mrf.mxu0  ;;  %v9748_v15 = vor.u32 %v10641_v50, %v9745_v31  ;;  %v10669_v50 = vld [vmem:[%s15871_s2 + $0xe44] sm:$0xf]  ;;  %v9601_v31 = vld [vmem:[%s15871_s2 + $0xc50] sm:$0xf0] }
 0x534   :  { %v5163_v30 = vadd.f32 %v5162_v32, %v13023_v9  ;;  %v5211_v28 = vpop.f32.mrf.mxu1  ;;  %v16270_v32 = vld [vmem:[#allocation78_spill] sm:$0xff] }
 0x535   :  { %v13286_v58 = vadd.f32 %v5307_v14, %v5259_v36  ;;  %5586 = vmatpush.bf16.msrb.mxu1 %v9748_v15  ;;  %v16269_v14 = vld [vmem:[#allocation77_spill] sm:$0xff]  ;;  %v9985_v15 = vld [vmem:[%s15871_s2 + $0xf50] sm:$0xf0] }
 0x536   :  { %v5212_v4 = vadd.f32 %v5211_v28, %v5163_v30  ;;  %v10605_v30 = vld [vmem:[%s15871_s2 + $0xc44] sm:$0xf] }
 0x53a   :  { %v5260_v33 = vpop.f32.mrf.mxu2 }
 0x53b   :  { %v5261_v47 = vadd.f32 %v5260_v33, %v5212_v4  ;;  %v5309_v1 = vpop.f32.mrf.mxu3  ;;  %v5165_v9 = vpop.f32.mrf.mxu0  ;;  %v10701_v4 = vld [vmem:[%s15871_s2 + $0xf44] sm:$0xf] }
 0x53c   :  { %v5166_v10 = vadd.f32 %v5165_v9, %v13048_v41  ;;  %v5214_v62 = vpop.f32.mrf.mxu1  ;;  %v9857_v41 = vld [vmem:[%s15871_s2 + $0xe50] sm:$0xf0] }
 0x53d   :  { %v13295_v59 = vadd.f32 %v5309_v1, %v5261_v47  ;;  %v9860_v28 = vor.u32 %v10669_v50, %v9857_v41  ;;  %v9604_v47 = vor.u32 %v10605_v30, %v9601_v31  ;;  %v9988_v1 = vor.u32 %v10701_v4, %v9985_v15  ;;  %v9729_v30 = vld [vmem:[%s15871_s2 + $0xd50] sm:$0xf0] }
 0x53e   :  { %v5215_v36 = vadd.f32 %v5214_v62, %v5166_v10  ;;  %5360 = vmatmul.bf16.gmra.mxu0 %v11386_v12  ;;  %5409 = vmatmul.bf16.gmra.mxu1 %v16269_v14  ;;  %v16274_v14 = vld [vmem:[#allocation82_spill] sm:$0xff]  ;;  %v16275_v12 = vld [vmem:[#allocation83_spill] sm:$0xff] }
 0x53f   :  { %5458 = vmatmul.bf16.gmra.mxu2 %v16270_v32  ;;  %5538 = vmatpush.bf16.msrb.mxu0 %v9604_v47  ;;  %v10637_v32 = vld [vmem:[%s15871_s2 + $0xd44] sm:$0xf] }
 0x540   :  { %5507 = vmatmul.bf16.gmra.mxu3 %v16271_v53  ;;  %5636 = vmatpush.bf16.msrb.mxu2 %v9860_v28 }
 0x541   :  { %5685 = vmatpush.bf16.msrb.mxu3 %v9988_v1 }
 0x542   :  { %v5263_v33 = vpop.f32.mrf.mxu2 }
 0x543   :  { %v5264_v9 = vadd.f32 %v5263_v33, %v5215_v36  ;;  %v5312_v10 = vpop.f32.mrf.mxu3  ;;  %v5167_v62 = vpop.f32.mrf.mxu0  ;;  %v9732_v36 = vor.u32 %v10637_v32, %v9729_v30  ;;  %v10665_v32 = vld [vmem:[%s15871_s2 + $0xe24] sm:$0xf]  ;;  %v9585_v30 = vld [vmem:[%s15871_s2 + $0xc30] sm:$0xf0] }
 0x544   :  { %v5168_v50 = vadd.f32 %v5167_v62, %v13057_v49  ;;  %v5216_v41 = vpop.f32.mrf.mxu1  ;;  %v16273_v62 = vld [vmem:[#allocation81_spill] sm:$0xff] }
 0x545   :  { %v13320_v53 = vadd.f32 %v5312_v10, %v5264_v9  ;;  %5587 = vmatpush.bf16.msrb.mxu1 %v9732_v36  ;;  %v16272_v10 = vld [vmem:[#allocation80_spill] sm:$0xff]  ;;  %v9969_v36 = vld [vmem:[%s15871_s2 + $0xf30] sm:$0xf0] }
 0x546   :  { %v5217_v31 = vadd.f32 %v5216_v41, %v5168_v50  ;;  %v10601_v50 = vld [vmem:[%s15871_s2 + $0xc24] sm:$0xf] }
 0x54a   :  { %v5265_v4 = vpop.f32.mrf.mxu2 }
 0x54b   :  { %v5266_v28 = vadd.f32 %v5265_v4, %v5217_v31  ;;  %v5314_v15 = vpop.f32.mrf.mxu3  ;;  %v5170_v49 = vpop.f32.mrf.mxu0  ;;  %v10697_v31 = vld [vmem:[%s15871_s2 + $0xf24] sm:$0xf] }
 0x54c   :  { %v5171_v33 = vadd.f32 %v5170_v49, %v13082_v54  ;;  %v5219_v47 = vpop.f32.mrf.mxu1  ;;  %v9841_v54 = vld [vmem:[%s15871_s2 + $0xe30] sm:$0xf0] }
 0x54d   :  { %v13329_v1 = vadd.f32 %v5314_v15, %v5266_v28  ;;  %v9844_v41 = vor.u32 %v10665_v32, %v9841_v54  ;;  %v9588_v28 = vor.u32 %v10601_v50, %v9585_v30  ;;  %v9972_v15 = vor.u32 %v10697_v31, %v9969_v36  ;;  %v9713_v50 = vld [vmem:[%s15871_s2 + $0xd30] sm:$0xf0] }
 0x54e   :  { %v5220_v9 = vadd.f32 %v5219_v47, %v5171_v33  ;;  %5365 = vmatmul.bf16.gmra.mxu0 %v16272_v10  ;;  %5414 = vmatmul.bf16.gmra.mxu1 %v16273_v62  ;;  %v16278_v62 = vld [vmem:[#allocation86_spill] sm:$0xff]  ;;  %v16279_v10 = vld [vmem:[#allocation87_spill] sm:$0xff] }
 0x54f   :  { %5463 = vmatmul.bf16.gmra.mxu2 %v16274_v14  ;;  %5539 = vmatpush.bf16.msrb.mxu0 %v9588_v28  ;;  %v10633_v14 = vld [vmem:[%s15871_s2 + $0xd24] sm:$0xf] }
 0x550   :  { %5512 = vmatmul.bf16.gmra.mxu3 %v16275_v12  ;;  %5637 = vmatpush.bf16.msrb.mxu2 %v9844_v41 }
 0x551   :  { %5686 = vmatpush.bf16.msrb.mxu3 %v9972_v15 }
 0x552   :  { %v5268_v4 = vpop.f32.mrf.mxu2 }
 0x553   :  { %v5269_v49 = vadd.f32 %v5268_v4, %v5220_v9  ;;  %v5317_v33 = vpop.f32.mrf.mxu3  ;;  %v5172_v47 = vpop.f32.mrf.mxu0  ;;  %v9716_v9 = vor.u32 %v10633_v14, %v9713_v50  ;;  %v10661_v14 = vld [vmem:[%s15871_s2 + $0xe04] sm:$0xf]  ;;  %v9569_v50 = vld [vmem:[%s15871_s2 + $0xc10] sm:$0xf0] }
 0x554   :  { %v5173_v32 = vadd.f32 %v5172_v47, %v13091_v42  ;;  %v5221_v54 = vpop.f32.mrf.mxu1  ;;  %v16277_v47 = vld [vmem:[#allocation85_spill] sm:$0xff] }
 0x555   :  { %v13354_v12 = vadd.f32 %v5317_v33, %v5269_v49  ;;  %5588 = vmatpush.bf16.msrb.mxu1 %v9716_v9  ;;  %v16276_v33 = vld [vmem:[#allocation84_spill] sm:$0xff]  ;;  %v9953_v9 = vld [vmem:[%s15871_s2 + $0xf10] sm:$0xf0] }
 0x556   :  { %v5222_v30 = vadd.f32 %v5221_v54, %v5173_v32  ;;  %v10597_v32 = vld [vmem:[%s15871_s2 + $0xc04] sm:$0xf] }
 0x55a   :  { %v5270_v31 = vpop.f32.mrf.mxu2 }
 0x55b   :  { %v5271_v41 = vadd.f32 %v5270_v31, %v5222_v30  ;;  %v5319_v36 = vpop.f32.mrf.mxu3  ;;  %v5175_v42 = vpop.f32.mrf.mxu0  ;;  %v10693_v30 = vld [vmem:[%s15871_s2 + $0xf04] sm:$0xf] }
 0x55c   :  { %v5176_v4 = vadd.f32 %v5175_v42, %v13116_v60  ;;  %v5224_v28 = vpop.f32.mrf.mxu1  ;;  %v9825_v60 = vld [vmem:[%s15871_s2 + $0xe10] sm:$0xf0] }
 0x55d   :  { %v13363_v15 = vadd.f32 %v5319_v36, %v5271_v41  ;;  %v9828_v54 = vor.u32 %v10661_v14, %v9825_v60  ;;  %v9572_v41 = vor.u32 %v10597_v32, %v9569_v50  ;;  %v9956_v36 = vor.u32 %v10693_v30, %v9953_v9  ;;  %v9697_v32 = vld [vmem:[%s15871_s2 + $0xd10] sm:$0xf0] }
 0x55e   :  { %v5225_v49 = vadd.f32 %v5224_v28, %v5176_v4  ;;  %5370 = vmatmul.bf16.gmra.mxu0 %v16276_v33  ;;  %5419 = vmatmul.bf16.gmra.mxu1 %v16277_v47 }
 0x55f   :  { %5468 = vmatmul.bf16.gmra.mxu2 %v16278_v62  ;;  %5540 = vmatpush.bf16.msrb.mxu0 %v9572_v41  ;;  %v10629_v62 = vld [vmem:[%s15871_s2 + $0xd04] sm:$0xf] }
 0x560   :  { %5517 = vmatmul.bf16.gmra.mxu3 %v16279_v10  ;;  %5638 = vmatpush.bf16.msrb.mxu2 %v9828_v54 }
 0x561   :  { %5687 = vmatpush.bf16.msrb.mxu3 %v9956_v36 }
 0x562   :  { %v5273_v31 = vpop.f32.mrf.mxu2 }
 0x563   :  { %v5274_v42 = vadd.f32 %v5273_v31, %v5225_v49  ;;  %v5322_v4 = vpop.f32.mrf.mxu3  ;;  %v5177_v28 = vpop.f32.mrf.mxu0  ;;  %v9700_v49 = vor.u32 %v10629_v62, %v9697_v32  ;;  %v8407_v62 = vld [vmem:[%s15871_s2 + $0x2e8] sm:$0xf]  ;;  %v10244_v32 = vld [vmem:[%s15871_s2 + $0xf4] sm:$0xf0] }
 0x564   :  { %v5178_v14 = vadd.f32 %v5177_v28, %v13125_v46  ;;  %v5226_v60 = vpop.f32.mrf.mxu1  ;;  %v16281_v28 = vld [vmem:[#allocation91_spill] sm:$0xff] }
 0x565   :  { %v13388_v10 = vadd.f32 %v5322_v4, %v5274_v42  ;;  %5589 = vmatpush.bf16.msrb.mxu1 %v9700_v49  ;;  %v16280_v4 = vld [vmem:[#allocation90_spill] sm:$0xff]  ;;  %v10340_v49 = vld [vmem:[%s15871_s2 + $0x3f4] sm:$0xf0] }
 0x566   :  { %v5227_v50 = vadd.f32 %v5226_v60, %v5178_v14  ;;  %v8151_v14 = vld [vmem:[%s15871_s2 + $0xe8] sm:$0xf] }
 0x56a   :  { %v5275_v30 = vpop.f32.mrf.mxu2 }
 0x56b   :  { %v5276_v54 = vadd.f32 %v5275_v30, %v5227_v50  ;;  %v5324_v9 = vpop.f32.mrf.mxu3  ;;  %v5180_v46 = vpop.f32.mrf.mxu0  ;;  %v8535_v50 = vld [vmem:[%s15871_s2 + $0x3e8] sm:$0xf] }
 0x56c   :  { %v5181_v31 = vadd.f32 %v5180_v46, %v13150_v19  ;;  %v5229_v41 = vpop.f32.mrf.mxu1  ;;  %v10308_v19 = vld [vmem:[%s15871_s2 + $0x2f4] sm:$0xf0] }
 0x56d   :  { %v13397_v36 = vadd.f32 %v5324_v9, %v5276_v54  ;;  %v8408_v60 = vor.u32 %v10308_v19, %v8407_v62  ;;  %v8152_v54 = vor.u32 %v10244_v32, %v8151_v14  ;;  %v8536_v9 = vor.u32 %v10340_v49, %v8535_v50  ;;  %v10276_v14 = vld [vmem:[%s15871_s2 + $0x1f4] sm:$0xf0] }
 0x56e   :  { %v5230_v42 = vadd.f32 %v5229_v41, %v5181_v31  ;;  %5375 = vmatmul.bf16.gmra.mxu0 %v16175_v27  ;;  %5424 = vmatmul.bf16.gmra.mxu1 %v16176_v13 }
 0x56f   :  { %5473 = vmatmul.bf16.gmra.mxu2 %v16280_v4  ;;  %5729 = vmatpush.bf16.msra.mxu0 %v8152_v54  ;;  %v8279_v4 = vld [vmem:[%s15871_s2 + $0x1e8] sm:$0xf] }
 0x570   :  { %5522 = vmatmul.bf16.gmra.mxu3 %v16281_v28  ;;  %5827 = vmatpush.bf16.msra.mxu2 %v8408_v60 }
 0x571   :  { %5876 = vmatpush.bf16.msra.mxu3 %v8536_v9 }
 0x572   :  { %v5278_v30 = vpop.f32.mrf.mxu2 }
 0x573   :  { %v5279_v46 = vadd.f32 %v5278_v30, %v5230_v42  ;;  %v5327_v31 = vpop.f32.mrf.mxu3  ;;  %v5182_v41 = vpop.f32.mrf.mxu0  ;;  %v8280_v42 = vor.u32 %v10276_v14, %v8279_v4  ;;  %v8391_v4 = vld [vmem:[%s15871_s2 + $0x2c8] sm:$0xf]  ;;  %v10336_v14 = vld [vmem:[%s15871_s2 + $0x3d4] sm:$0xf0] }
 0x574   :  { %v5183_v62 = vadd.f32 %v5182_v41, %v13159_v6  ;;  %v5231_v19 = vpop.f32.mrf.mxu1 }
 0x575   :  { %v13422_v28 = vadd.f32 %v5327_v31, %v5279_v46  ;;  %5778 = vmatpush.bf16.msra.mxu1 %v8280_v42  ;;  %v8135_v31 = vld [vmem:[%s15871_s2 + $0xc8] sm:$0xf] }
 0x576   :  { %v5232_v32 = vadd.f32 %v5231_v19, %v5183_v62  ;;  %v10240_v62 = vld [vmem:[%s15871_s2 + $0xd4] sm:$0xf0]  ;;  %v8519_v19 = vld [vmem:[%s15871_s2 + $0x3c8] sm:$0xf] }
 0x577   :  { %v8136_v42 = vor.u32 %v10240_v62, %v8135_v31  ;;  %v10272_v31 = vld [vmem:[%s15871_s2 + $0x1d4] sm:$0xf0] }
 0x579   :  { %5730 = vmatpush.bf16.msra.mxu0 %v8136_v42 }
 0x57a   :  { %v5280_v50 = vpop.f32.mrf.mxu2 }
 0x57b   :  { %v5281_v60 = vadd.f32 %v5280_v50, %v5232_v32  ;;  %v5329_v49 = vpop.f32.mrf.mxu3  ;;  %v5185_v6 = vpop.f32.mrf.mxu0  ;;  %v8520_v50 = vor.u32 %v10336_v14, %v8519_v19 }
 0x57c   :  { %v5186_v30 = vadd.f32 %v5185_v6, %v13184_v40  ;;  %v5234_v54 = vpop.f32.mrf.mxu1  ;;  %v10304_v40 = vld [vmem:[%s15871_s2 + $0x2d4] sm:$0xf0] }
 0x57d   :  { %v13431_v9 = vadd.f32 %v5329_v49, %v5281_v60  ;;  %v8392_v41 = vor.u32 %v10304_v40, %v8391_v4  ;;  %5877 = vmatpush.bf16.msra.mxu3 %v8520_v50  ;;  %v8263_v40 = vld [vmem:[%s15871_s2 + $0x1c8] sm:$0xf] }
 0x57e   :  { %v5235_v46 = vadd.f32 %v5234_v54, %v5186_v30  ;;  %5380 = vmatmul.bf16.gmra.mxu0 %v11544_v8  ;;  %5429 = vmatmul.bf16.gmra.mxu1 %v11546_v35 }
 0x57f   :  { %5478 = vmatmul.bf16.gmra.mxu2 %v11548_v0 }
 0x580   :  { %5527 = vmatmul.bf16.gmra.mxu3 %v11550_v29  ;;  %5828 = vmatpush.bf16.msra.mxu2 %v8392_v41 }
 0x582   :  { %v5283_v32 = vpop.f32.mrf.mxu2 }
 0x583   :  { %v5284_v60 = vadd.f32 %v5283_v32, %v5235_v46  ;;  %v5332_v49 = vpop.f32.mrf.mxu3  ;;  %v5187_v6 = vpop.f32.mrf.mxu0  ;;  %v8264_v46 = vor.u32 %v10272_v31, %v8263_v40  ;;  %v8503_v40 = vld [vmem:[%s15871_s2 + $0x3a8] sm:$0xf]  ;;  %v10332_v31 = vld [vmem:[%s15871_s2 + $0x3b4] sm:$0xf0] }
 0x584   :  { %v5188_v30 = vadd.f32 %v5187_v6, %v13193_v2  ;;  %v5236_v54 = vpop.f32.mrf.mxu1  ;;  %v8119_v6 = vld [vmem:[%s15871_s2 + $0xa8] sm:$0xf] }
 0x585   :  { %v13456_v4 = vadd.f32 %v5332_v49, %v5284_v60  ;;  %5779 = vmatpush.bf16.msra.mxu1 %v8264_v46  ;;  %v8375_v49 = vld [vmem:[%s15871_s2 + $0x2a8] sm:$0xf] }
 0x586   :  { %v5237_v62 = vadd.f32 %v5236_v54, %v5188_v30  ;;  %v10236_v54 = vld [vmem:[%s15871_s2 + $0xb4] sm:$0xf0] }
 0x587   :  { %v8120_v46 = vor.u32 %v10236_v54, %v8119_v6  ;;  %v10268_v6 = vld [vmem:[%s15871_s2 + $0x1b4] sm:$0xf0] }
 0x589   :  { %5731 = vmatpush.bf16.msra.mxu0 %v8120_v46 }
 0x58a   :  { %v5285_v19 = vpop.f32.mrf.mxu2 }
 0x58b   :  { %v5286_v41 = vadd.f32 %v5285_v19, %v5237_v62  ;;  %v5334_v14 = vpop.f32.mrf.mxu3  ;;  %v5346_v2 = vpop.f32.mrf.mxu0  ;;  %v8504_v19 = vor.u32 %v10332_v31, %v8503_v40 }
 0x58c   :  { %v5347_v32 = vadd.f32 %v5346_v2, %v13218_v39  ;;  %v5395_v42 = vpop.f32.mrf.mxu1  ;;  %v10300_v39 = vld [vmem:[%s15871_s2 + $0x2b4] sm:$0xf0] }
 0x58d   :  { %v13465_v50 = vadd.f32 %v5334_v14, %v5286_v41  ;;  %v8376_v30 = vor.u32 %v10300_v39, %v8375_v49  ;;  %5878 = vmatpush.bf16.msra.mxu3 %v8504_v19  ;;  %v8247_v39 = vld [vmem:[%s15871_s2 + $0x1a8] sm:$0xf] }
 0x58e   :  { %v5396_v60 = vadd.f32 %v5395_v42, %v5347_v32  ;;  %5541 = vmatmul.bf16.vlgmr.msrb.gmra.mxu0 %v11580_v7  ;;  %5590 = vmatmul.bf16.vlgmr.msrb.gmra.mxu1 %v11582_v43 }
 0x58f   :  { %5639 = vmatmul.bf16.vlgmr.msrb.gmra.mxu2 %v11584_v61 }
 0x590   :  { %5688 = vmatmul.bf16.vlgmr.msrb.gmra.mxu3 %v11586_v11  ;;  %5829 = vmatpush.bf16.msra.mxu2 %v8376_v30 }
 0x592   :  { %v5444_v62 = vpop.f32.mrf.mxu2 }
 0x593   :  { %v5445_v41 = vadd.f32 %v5444_v62, %v5396_v60  ;;  %v5493_v14 = vpop.f32.mrf.mxu3  ;;  %v5348_v2 = vpop.f32.mrf.mxu0  ;;  %v8248_v60 = vor.u32 %v10268_v6, %v8247_v39  ;;  %v8487_v39 = vld [vmem:[%s15871_s2 + $0x388] sm:$0xf]  ;;  %v10328_v6 = vld [vmem:[%s15871_s2 + $0x394] sm:$0xf0] }
 0x594   :  { %v5349_v32 = vadd.f32 %v5348_v2, %v13227_v51  ;;  %v5397_v42 = vpop.f32.mrf.mxu1  ;;  %v8103_v2 = vld [vmem:[%s15871_s2 + $0x88] sm:$0xf] }
 0x595   :  { %v13490_v49 = vadd.f32 %v5493_v14, %v5445_v41  ;;  %5780 = vmatpush.bf16.msra.mxu1 %v8248_v60  ;;  %v8359_v14 = vld [vmem:[%s15871_s2 + $0x288] sm:$0xf] }
 0x596   :  { %v5398_v54 = vadd.f32 %v5397_v42, %v5349_v32  ;;  %v10232_v42 = vld [vmem:[%s15871_s2 + $0x94] sm:$0xf0] }
 0x597   :  { %v8104_v60 = vor.u32 %v10232_v42, %v8103_v2  ;;  %v10264_v2 = vld [vmem:[%s15871_s2 + $0x194] sm:$0xf0] }
 0x599   :  { %5732 = vmatpush.bf16.msra.mxu0 %v8104_v60 }
 0x59a   :  { %v5446_v40 = vpop.f32.mrf.mxu2 }
 0x59b   :  { %v5447_v30 = vadd.f32 %v5446_v40, %v5398_v54  ;;  %v5495_v31 = vpop.f32.mrf.mxu3  ;;  %v5351_v51 = vpop.f32.mrf.mxu0  ;;  %v8488_v40 = vor.u32 %v10328_v6, %v8487_v39 }
 0x59c   :  { %v5352_v62 = vadd.f32 %v5351_v51, %v13252_v38  ;;  %v5400_v46 = vpop.f32.mrf.mxu1  ;;  %v10296_v38 = vld [vmem:[%s15871_s2 + $0x294] sm:$0xf0] }
 0x59d   :  { %v13499_v19 = vadd.f32 %v5495_v31, %v5447_v30  ;;  %v8360_v32 = vor.u32 %v10296_v38, %v8359_v14  ;;  %5879 = vmatpush.bf16.msra.mxu3 %v8488_v40  ;;  %v8231_v38 = vld [vmem:[%s15871_s2 + $0x188] sm:$0xf] }
 0x59e   :  { %v5401_v41 = vadd.f32 %v5400_v46, %v5352_v62  ;;  %5546 = vmatmul.bf16.gmra.mxu0 %v11616_v48  ;;  %5595 = vmatmul.bf16.gmra.mxu1 %v11618_v55 }
 0x59f   :  { %5644 = vmatmul.bf16.gmra.mxu2 %v11620_v17 }
 0x5a0   :  { %5693 = vmatmul.bf16.gmra.mxu3 %v11622_v25  ;;  %5830 = vmatpush.bf16.msra.mxu2 %v8360_v32 }
 0x5a2   :  { %v5449_v54 = vpop.f32.mrf.mxu2 }
 0x5a3   :  { %v5450_v30 = vadd.f32 %v5449_v54, %v5401_v41  ;;  %v5498_v31 = vpop.f32.mrf.mxu3  ;;  %v5353_v51 = vpop.f32.mrf.mxu0  ;;  %v8232_v41 = vor.u32 %v10264_v2, %v8231_v38  ;;  %v8471_v38 = vld [vmem:[%s15871_s2 + $0x368] sm:$0xf]  ;;  %v10324_v2 = vld [vmem:[%s15871_s2 + $0x374] sm:$0xf0] }
 0x5a4   :  { %v5354_v62 = vadd.f32 %v5353_v51, %v13261_v24  ;;  %v5402_v46 = vpop.f32.mrf.mxu1  ;;  %v8087_v51 = vld [vmem:[%s15871_s2 + $0x68] sm:$0xf] }
 0x5a5   :  { %v13524_v14 = vadd.f32 %v5498_v31, %v5450_v30  ;;  %5781 = vmatpush.bf16.msra.mxu1 %v8232_v41  ;;  %v8343_v31 = vld [vmem:[%s15871_s2 + $0x268] sm:$0xf] }
 0x5a6   :  { %v5403_v42 = vadd.f32 %v5402_v46, %v5354_v62  ;;  %v10228_v46 = vld [vmem:[%s15871_s2 + $0x74] sm:$0xf0] }
 0x5a7   :  { %v8088_v41 = vor.u32 %v10228_v46, %v8087_v51  ;;  %v10260_v51 = vld [vmem:[%s15871_s2 + $0x174] sm:$0xf0] }
 0x5a9   :  { %5733 = vmatpush.bf16.msra.mxu0 %v8088_v41 }
 0x5aa   :  { %v5451_v39 = vpop.f32.mrf.mxu2 }
 0x5ab   :  { %v5452_v32 = vadd.f32 %v5451_v39, %v5403_v42  ;;  %v5500_v6 = vpop.f32.mrf.mxu3  ;;  %v5356_v24 = vpop.f32.mrf.mxu0  ;;  %v8472_v39 = vor.u32 %v10324_v2, %v8471_v38 }
 0x5ac   :  { %v5357_v54 = vadd.f32 %v5356_v24, %v13286_v58  ;;  %v5405_v60 = vpop.f32.mrf.mxu1  ;;  %v10292_v58 = vld [vmem:[%s15871_s2 + $0x274] sm:$0xf0] }
 0x5ad   :  { %v13533_v40 = vadd.f32 %v5500_v6, %v5452_v32  ;;  %v8344_v62 = vor.u32 %v10292_v58, %v8343_v31  ;;  %5880 = vmatpush.bf16.msra.mxu3 %v8472_v39  ;;  %v8215_v58 = vld [vmem:[%s15871_s2 + $0x168] sm:$0xf] }
 0x5ae   :  { %v5406_v30 = vadd.f32 %v5405_v60, %v5357_v54  ;;  %5551 = vmatmul.bf16.gmra.mxu0 %v11652_v57  ;;  %5600 = vmatmul.bf16.gmra.mxu1 %v11654_v3 }
 0x5af   :  { %5649 = vmatmul.bf16.gmra.mxu2 %v11656_v26 }
 0x5b0   :  { %5698 = vmatmul.bf16.gmra.mxu3 %v11658_v52  ;;  %5831 = vmatpush.bf16.msra.mxu2 %v8344_v62 }
 0x5b2   :  { %v5454_v42 = vpop.f32.mrf.mxu2 }
 0x5b3   :  { %v5455_v32 = vadd.f32 %v5454_v42, %v5406_v30  ;;  %v5503_v6 = vpop.f32.mrf.mxu3  ;;  %v5358_v24 = vpop.f32.mrf.mxu0  ;;  %v8216_v30 = vor.u32 %v10260_v51, %v8215_v58  ;;  %v8455_v58 = vld [vmem:[%s15871_s2 + $0x348] sm:$0xf]  ;;  %v10320_v51 = vld [vmem:[%s15871_s2 + $0x354] sm:$0xf0] }
 0x5b4   :  { %v5359_v54 = vadd.f32 %v5358_v24, %v13295_v59  ;;  %v5407_v60 = vpop.f32.mrf.mxu1  ;;  %v8071_v24 = vld [vmem:[%s15871_s2 + $0x48] sm:$0xf] }
 0x5b5   :  { %v13558_v31 = vadd.f32 %v5503_v6, %v5455_v32  ;;  %5782 = vmatpush.bf16.msra.mxu1 %v8216_v30  ;;  %v8327_v6 = vld [vmem:[%s15871_s2 + $0x248] sm:$0xf] }
 0x5b6   :  { %v5408_v46 = vadd.f32 %v5407_v60, %v5359_v54  ;;  %v10224_v60 = vld [vmem:[%s15871_s2 + $0x54] sm:$0xf0] }
 0x5b7   :  { %v8072_v30 = vor.u32 %v10224_v60, %v8071_v24  ;;  %v10256_v24 = vld [vmem:[%s15871_s2 + $0x154] sm:$0xf0] }
 0x5b9   :  { %5734 = vmatpush.bf16.msra.mxu0 %v8072_v30 }
 0x5ba   :  { %v5456_v38 = vpop.f32.mrf.mxu2 }
 0x5bb   :  { %v5457_v62 = vadd.f32 %v5456_v38, %v5408_v46  ;;  %v5505_v2 = vpop.f32.mrf.mxu3  ;;  %v5361_v59 = vpop.f32.mrf.mxu0  ;;  %v8456_v38 = vor.u32 %v10320_v51, %v8455_v58 }
 0x5bc   :  { %v5362_v42 = vadd.f32 %v5361_v59, %v13320_v53  ;;  %v5410_v41 = vpop.f32.mrf.mxu1  ;;  %v10288_v53 = vld [vmem:[%s15871_s2 + $0x254] sm:$0xf0] }
 0x5bd   :  { %v13567_v39 = vadd.f32 %v5505_v2, %v5457_v62  ;;  %v8328_v54 = vor.u32 %v10288_v53, %v8327_v6  ;;  %5881 = vmatpush.bf16.msra.mxu3 %v8456_v38  ;;  %v8199_v53 = vld [vmem:[%s15871_s2 + $0x148] sm:$0xf] }
 0x5be   :  { %v5411_v32 = vadd.f32 %v5410_v41, %v5362_v42  ;;  %5556 = vmatmul.bf16.gmra.mxu0 %v11688_v5  ;;  %5605 = vmatmul.bf16.gmra.mxu1 %v11690_v16 }
 0x5bf   :  { %5654 = vmatmul.bf16.gmra.mxu2 %v11692_v63 }
 0x5c0   :  { %5703 = vmatmul.bf16.gmra.mxu3 %v11694_v22  ;;  %5832 = vmatpush.bf16.msra.mxu2 %v8328_v54 }
 0x5c2   :  { %v5459_v46 = vpop.f32.mrf.mxu2 }
 0x5c3   :  { %v5460_v62 = vadd.f32 %v5459_v46, %v5411_v32  ;;  %v5508_v2 = vpop.f32.mrf.mxu3  ;;  %v5363_v59 = vpop.f32.mrf.mxu0  ;;  %v8200_v32 = vor.u32 %v10256_v24, %v8199_v53  ;;  %v8439_v53 = vld [vmem:[%s15871_s2 + $0x328] sm:$0xf]  ;;  %v10316_v24 = vld [vmem:[%s15871_s2 + $0x334] sm:$0xf0] }
 0x5c4   :  { %v5364_v42 = vadd.f32 %v5363_v59, %v13329_v1  ;;  %v5412_v41 = vpop.f32.mrf.mxu1  ;;  %v8055_v59 = vld [vmem:[%s15871_s2 + $0x28] sm:$0xf] }
 0x5c5   :  { %v13592_v6 = vadd.f32 %v5508_v2, %v5460_v62  ;;  %5783 = vmatpush.bf16.msra.mxu1 %v8200_v32  ;;  %v8311_v2 = vld [vmem:[%s15871_s2 + $0x228] sm:$0xf] }
 0x5c6   :  { %v5413_v60 = vadd.f32 %v5412_v41, %v5364_v42  ;;  %v10220_v41 = vld [vmem:[%s15871_s2 + $0x34] sm:$0xf0] }
 0x5c7   :  { %v8056_v32 = vor.u32 %v10220_v41, %v8055_v59  ;;  %v10252_v59 = vld [vmem:[%s15871_s2 + $0x134] sm:$0xf0] }
 0x5c9   :  { %5735 = vmatpush.bf16.msra.mxu0 %v8056_v32 }
 0x5ca   :  { %v5461_v58 = vpop.f32.mrf.mxu2 }
 0x5cb   :  { %v5462_v54 = vadd.f32 %v5461_v58, %v5413_v60  ;;  %v5510_v51 = vpop.f32.mrf.mxu3  ;;  %v5366_v1 = vpop.f32.mrf.mxu0  ;;  %v8440_v58 = vor.u32 %v10316_v24, %v8439_v53 }
 0x5cc   :  { %v5367_v46 = vadd.f32 %v5366_v1, %v13354_v12  ;;  %v5415_v30 = vpop.f32.mrf.mxu1  ;;  %v10284_v12 = vld [vmem:[%s15871_s2 + $0x234] sm:$0xf0] }
 0x5cd   :  { %v13601_v38 = vadd.f32 %v5510_v51, %v5462_v54  ;;  %v8312_v42 = vor.u32 %v10284_v12, %v8311_v2  ;;  %5882 = vmatpush.bf16.msra.mxu3 %v8440_v58  ;;  %v8183_v12 = vld [vmem:[%s15871_s2 + $0x128] sm:$0xf] }
 0x5ce   :  { %v5416_v62 = vadd.f32 %v5415_v30, %v5367_v46  ;;  %5561 = vmatmul.bf16.gmra.mxu0 %v11724_v18  ;;  %5610 = vmatmul.bf16.gmra.mxu1 %v11726_v34 }
 0x5cf   :  { %5659 = vmatmul.bf16.gmra.mxu2 %v11728_v45 }
 0x5d0   :  { %5708 = vmatmul.bf16.gmra.mxu3 %v11730_v23  ;;  %5833 = vmatpush.bf16.msra.mxu2 %v8312_v42  ;;  %v16284_v23 = vld [vmem:[#allocation98_spill] sm:$0xff] }
 0x5d2   :  { %v5464_v60 = vpop.f32.mrf.mxu2 }
 0x5d3   :  { %v5465_v54 = vadd.f32 %v5464_v60, %v5416_v62  ;;  %v5513_v51 = vpop.f32.mrf.mxu3  ;;  %v5368_v1 = vpop.f32.mrf.mxu0  ;;  %v8184_v62 = vor.u32 %v10252_v59, %v8183_v12  ;;  %v10216_v59 = vld [vmem:[%s15871_s2 + $0x14] sm:$0xf0] }
 0x5d4   :  { %v5369_v46 = vadd.f32 %v5368_v1, %v13363_v15  ;;  %v5417_v30 = vpop.f32.mrf.mxu1  ;;  %v16283_v1 = vld [vmem:[#allocation97_spill] sm:$0xff] }
 0x5d5   :  { %v13626_v2 = vadd.f32 %v5513_v51, %v5465_v54  ;;  %5784 = vmatpush.bf16.msra.mxu1 %v8184_v62  ;;  %v16282_v51 = vld [vmem:[#allocation96_spill] sm:$0xff] }
 0x5d6   :  { %v5418_v41 = vadd.f32 %v5417_v30, %v5369_v46  ;;  %v8295_v46 = vld [vmem:[%s15871_s2 + $0x208] sm:$0xf]  ;;  %v10312_v62 = vld [vmem:[%s15871_s2 + $0x314] sm:$0xf0] }
 0x5d7   :  { %v8039_v30 = vld [vmem:[%s15871_s2 + $0x8] sm:$0xf] }
 0x5da   :  { %v5466_v53 = vpop.f32.mrf.mxu2 }
 0x5db   :  { %v5467_v42 = vadd.f32 %v5466_v53, %v5418_v41  ;;  %v5515_v24 = vpop.f32.mrf.mxu3  ;;  %v5371_v15 = vpop.f32.mrf.mxu0  ;;  %v8423_v41 = vld [vmem:[%s15871_s2 + $0x308] sm:$0xf] }
 0x5dc   :  { %v5372_v60 = vadd.f32 %v5371_v15, %v13388_v10  ;;  %v5420_v32 = vpop.f32.mrf.mxu1  ;;  %v10280_v10 = vld [vmem:[%s15871_s2 + $0x214] sm:$0xf0] }
 0x5dd   :  { %v13635_v58 = vadd.f32 %v5515_v24, %v5467_v42  ;;  %v8296_v12 = vor.u32 %v10280_v10, %v8295_v46  ;;  %v8040_v42 = vor.u32 %v10216_v59, %v8039_v30  ;;  %v8424_v24 = vor.u32 %v10312_v62, %v8423_v41  ;;  %v10248_v30 = vld [vmem:[%s15871_s2 + $0x114] sm:$0xf0] }
 0x5de   :  { %v5421_v54 = vadd.f32 %v5420_v32, %v5372_v60  ;;  %5566 = vmatmul.bf16.gmra.mxu0 %v11760_v37  ;;  %5615 = vmatmul.bf16.gmra.mxu1 %v16282_v51  ;;  %v16287_v51 = vld [vmem:[#allocation101_spill] sm:$0xff]  ;;  %v16288_v37 = vld [vmem:[#allocation102_spill] sm:$0xff] }
 0x5df   :  { %5664 = vmatmul.bf16.gmra.mxu2 %v16283_v1  ;;  %5736 = vmatpush.bf16.msra.mxu0 %v8040_v42  ;;  %v8167_v1 = vld [vmem:[%s15871_s2 + $0x108] sm:$0xf] }
 0x5e0   :  { %5713 = vmatmul.bf16.gmra.mxu3 %v16284_v23  ;;  %5834 = vmatpush.bf16.msra.mxu2 %v8296_v12 }
 0x5e1   :  { %5883 = vmatpush.bf16.msra.mxu3 %v8424_v24 }
 0x5e2   :  { %v5469_v53 = vpop.f32.mrf.mxu2 }
 0x5e3   :  { %v5470_v15 = vadd.f32 %v5469_v53, %v5421_v54  ;;  %v5518_v60 = vpop.f32.mrf.mxu3  ;;  %v5373_v32 = vpop.f32.mrf.mxu0  ;;  %v8168_v54 = vor.u32 %v10248_v30, %v8167_v1  ;;  %v8919_v1 = vld [vmem:[%s15871_s2 + $0x6e8] sm:$0xf]  ;;  %v10372_v30 = vld [vmem:[%s15871_s2 + $0x4f4] sm:$0xf0] }
 0x5e4   :  { %v5374_v46 = vadd.f32 %v5373_v32, %v13397_v36  ;;  %v5422_v10 = vpop.f32.mrf.mxu1  ;;  %v16286_v32 = vld [vmem:[#allocation100_spill] sm:$0xff] }
 0x5e5   :  { %v13660_v23 = vadd.f32 %v5518_v60, %v5470_v15  ;;  %5785 = vmatpush.bf16.msra.mxu1 %v8168_v54  ;;  %v16285_v60 = vld [vmem:[#allocation99_spill] sm:$0xff]  ;;  %v10468_v54 = vld [vmem:[%s15871_s2 + $0x7f4] sm:$0xf0] }
 0x5e6   :  { %v5423_v59 = vadd.f32 %v5422_v10, %v5374_v46  ;;  %v8663_v46 = vld [vmem:[%s15871_s2 + $0x4e8] sm:$0xf] }
 0x5ea   :  { %v5471_v41 = vpop.f32.mrf.mxu2 }
 0x5eb   :  { %v5472_v12 = vadd.f32 %v5471_v41, %v5423_v59  ;;  %v5520_v62 = vpop.f32.mrf.mxu3  ;;  %v5376_v36 = vpop.f32.mrf.mxu0  ;;  %v9047_v59 = vld [vmem:[%s15871_s2 + $0x7e8] sm:$0xf] }
 0x5ec   :  { %v5377_v53 = vadd.f32 %v5376_v36, %v13422_v28  ;;  %v5425_v42 = vpop.f32.mrf.mxu1  ;;  %v10436_v28 = vld [vmem:[%s15871_s2 + $0x6f4] sm:$0xf0] }
 0x5ed   :  { %v13669_v24 = vadd.f32 %v5520_v62, %v5472_v12  ;;  %v8920_v10 = vor.u32 %v10436_v28, %v8919_v1  ;;  %v8664_v12 = vor.u32 %v10372_v30, %v8663_v46  ;;  %v9048_v62 = vor.u32 %v10468_v54, %v9047_v59  ;;  %v10404_v46 = vld [vmem:[%s15871_s2 + $0x5f4] sm:$0xf0] }
 0x5ee   :  { %v5426_v15 = vadd.f32 %v5425_v42, %v5377_v53  ;;  %5571 = vmatmul.bf16.gmra.mxu0 %v16285_v60  ;;  %5620 = vmatmul.bf16.gmra.mxu1 %v16286_v32  ;;  %v8791_v32 = vld [vmem:[%s15871_s2 + $0x5e8] sm:$0xf] }
 0x5ef   :  { %5669 = vmatmul.bf16.gmra.mxu2 %v16287_v51  ;;  %5925 = vmatpush.bf16.msrb.mxu0 %v8664_v12 }
 0x5f0   :  { %5718 = vmatmul.bf16.gmra.mxu3 %v16288_v37  ;;  %6023 = vmatpush.bf16.msrb.mxu2 %v8920_v10 }
 0x5f1   :  { %6072 = vmatpush.bf16.msrb.mxu3 %v9048_v62 }
 0x5f2   :  { %v5474_v41 = vpop.f32.mrf.mxu2 }
 0x5f3   :  { %v5475_v36 = vadd.f32 %v5474_v41, %v5426_v15  ;;  %v5523_v53 = vpop.f32.mrf.mxu3  ;;  %v5378_v42 = vpop.f32.mrf.mxu0  ;;  %v8792_v15 = vor.u32 %v10404_v46, %v8791_v32  ;;  %v8647_v32 = vld [vmem:[%s15871_s2 + $0x4c8] sm:$0xf] }
 0x5f4   :  { %v5379_v1 = vadd.f32 %v5378_v42, %v13431_v9  ;;  %v5427_v28 = vpop.f32.mrf.mxu1  ;;  %v16291_v42 = vld [vmem:[#allocation105_spill] sm:$0xff] }
 0x5f5   :  { %v13694_v37 = vadd.f32 %v5523_v53, %v5475_v36  ;;  %5974 = vmatpush.bf16.msrb.mxu1 %v8792_v15  ;;  %v16289_v36 = vld [vmem:[#allocation103_spill] sm:$0xff]  ;;  %v16290_v53 = vld [vmem:[#allocation104_spill] sm:$0xff] }
 0x5f6   :  { %v5428_v51 = vadd.f32 %v5427_v28, %v5379_v1  ;;  %v16292_v1 = vld [vmem:[#allocation106_spill] sm:$0xff]  ;;  %v10368_v15 = vld [vmem:[%s15871_s2 + $0x4d4] sm:$0xf0] }
 0x5fa   :  { %v5476_v30 = vpop.f32.mrf.mxu2 }
 0x5fb   :  { %v5477_v10 = vadd.f32 %v5476_v30, %v5428_v51  ;;  %v5525_v59 = vpop.f32.mrf.mxu3  ;;  %v5381_v9 = vpop.f32.mrf.mxu0  ;;  %v8903_v51 = vld [vmem:[%s15871_s2 + $0x6c8] sm:$0xf] }
 0x5fc   :  { %v5382_v54 = vadd.f32 %v5381_v9, %v13456_v4  ;;  %v5430_v41 = vpop.f32.mrf.mxu1  ;;  %v10432_v4 = vld [vmem:[%s15871_s2 + $0x6d4] sm:$0xf0]  ;;  %v9031_v30 = vld [vmem:[%s15871_s2 + $0x7c8] sm:$0xf] }
 0x5fd   :  { %v13703_v12 = vadd.f32 %v5525_v59, %v5477_v10  ;;  %v8904_v46 = vor.u32 %v10432_v4, %v8903_v51  ;;  %v10464_v10 = vld [vmem:[%s15871_s2 + $0x7d4] sm:$0xf0] }
 0x5fe   :  { %v5431_v62 = vadd.f32 %v5430_v41, %v5382_v54  ;;  %5576 = vmatmul.bf16.gmra.mxu0 %v16289_v36  ;;  %5625 = vmatmul.bf16.gmra.mxu1 %v16290_v53  ;;  %v8648_v41 = vor.u32 %v10368_v15, %v8647_v32  ;;  %v8775_v36 = vld [vmem:[%s15871_s2 + $0x5c8] sm:$0xf] }
 0x5ff   :  { %5674 = vmatmul.bf16.gmra.mxu2 %v16291_v42 }
 0x600   :  { %5723 = vmatmul.bf16.gmra.mxu3 %v16292_v1  ;;  %v9032_v1 = vor.u32 %v10464_v10, %v9031_v30  ;;  %6024 = vmatpush.bf16.msrb.mxu2 %v8904_v46 }
 0x601   :  { %5926 = vmatpush.bf16.msrb.mxu0 %v8648_v41  ;;  %v16296_v41 = vld [vmem:[#allocation5_spill] sm:$0xff] }
 0x602   :  { %v5479_v28 = vpop.f32.mrf.mxu2  ;;  %6073 = vmatpush.bf16.msrb.mxu3 %v9032_v1  ;;  %v16293_v1 = vld [vmem:[#allocation2_spill] sm:$0xff] }
 0x603   :  { %v5480_v59 = vadd.f32 %v5479_v28, %v5431_v62  ;;  %v5528_v9 = vpop.f32.mrf.mxu3  ;;  %v5383_v54 = vpop.f32.mrf.mxu0  ;;  %v10400_v62 = vld [vmem:[%s15871_s2 + $0x5d4] sm:$0xf0] }
 0x604   :  { %v5384_v42 = vadd.f32 %v5383_v54, %v13465_v50  ;;  %v5432_v51 = vpop.f32.mrf.mxu1  ;;  %v8776_v28 = vor.u32 %v10400_v62, %v8775_v36  ;;  %v16295_v54 = vld [vmem:[#allocation4_spill] sm:$0xff]  ;;  %v8887_v36 = vld [vmem:[%s15871_s2 + $0x6a8] sm:$0xf] }
 0x605   :  { %v13728_v4 = vadd.f32 %v5528_v9, %v5480_v59  ;;  %v16294_v9 = vld [vmem:[#allocation3_spill] sm:$0xff]  ;;  %v10364_v62 = vld [vmem:[%s15871_s2 + $0x4b4] sm:$0xf0] }
 0x606   :  { %v5433_v53 = vadd.f32 %v5432_v51, %v5384_v42  ;;  %5975 = vmatpush.bf16.msrb.mxu1 %v8776_v28  ;;  %v9015_v28 = vld [vmem:[%s15871_s2 + $0x7a8] sm:$0xf] }
 0x60a   :  { %v5481_v32 = vpop.f32.mrf.mxu2 }
 0x60b   :  { %v5482_v15 = vadd.f32 %v5481_v32, %v5433_v53  ;;  %v5530_v50 = vpop.f32.mrf.mxu3  ;;  %v5542_v30 = vpop.f32.mrf.mxu0  ;;  %v8631_v53 = vld [vmem:[%s15871_s2 + $0x4a8] sm:$0xf]  ;;  %v10460_v32 = vld [vmem:[%s15871_s2 + $0x7b4] sm:$0xf0] }
 0x60c   :  { %v5543_v46 = vadd.f32 %v5542_v30, %v13490_v49  ;;  %v5591_v10 = vpop.f32.mrf.mxu1  ;;  %v10428_v49 = vld [vmem:[%s15871_s2 + $0x6b4] sm:$0xf0]  ;;  %v9016_v30 = vor.u32 %v10460_v32, %v9015_v28 }
 0x60d   :  { %v13737_v59 = vadd.f32 %v5530_v50, %v5482_v15  ;;  %v8888_v51 = vor.u32 %v10428_v49, %v8887_v36  ;;  %v8632_v50 = vor.u32 %v10364_v62, %v8631_v53  ;;  %v10396_v53 = vld [vmem:[%s15871_s2 + $0x5b4] sm:$0xf0] }
 0x60e   :  { %v5592_v42 = vadd.f32 %v5591_v10, %v5543_v46  ;;  %5737 = vmatmul.bf16.vlgmr.msra.gmra.mxu0 %v16293_v1  ;;  %5786 = vmatmul.bf16.vlgmr.msra.gmra.mxu1 %v16294_v9  ;;  %v8759_v1 = vld [vmem:[%s15871_s2 + $0x5a8] sm:$0xf] }
 0x60f   :  { %5835 = vmatmul.bf16.vlgmr.msra.gmra.mxu2 %v16295_v54  ;;  %5927 = vmatpush.bf16.msrb.mxu0 %v8632_v50  ;;  %v8760_v62 = vor.u32 %v10396_v53, %v8759_v1  ;;  %v8871_v1 = vld [vmem:[%s15871_s2 + $0x688] sm:$0xf] }
 0x610   :  { %5884 = vmatmul.bf16.vlgmr.msra.gmra.mxu3 %v16296_v41  ;;  %6025 = vmatpush.bf16.msrb.mxu2 %v8888_v51 }
 0x611   :  { %6074 = vmatpush.bf16.msrb.mxu3 %v9016_v30  ;;  %5976 = vmatpush.bf16.msrb.mxu1 %v8760_v62  ;;  %v16297_v30 = vld [vmem:[#allocation7_spill] sm:$0xff]  ;;  %v10360_v62 = vld [vmem:[%s15871_s2 + $0x494] sm:$0xf0] }
 0x612   :  { %v5640_v15 = vpop.f32.mrf.mxu2 }
 0x613   :  { %v5641_v46 = vadd.f32 %v5640_v15, %v5592_v42  ;;  %v5689_v10 = vpop.f32.mrf.mxu3  ;;  %v5544_v41 = vpop.f32.mrf.mxu0 }
 0x614   :  { %v5545_v36 = vadd.f32 %v5544_v41, %v13499_v19  ;;  %v5593_v49 = vpop.f32.mrf.mxu1 }
 0x615   :  { %v5690_v54 = vadd.f32 %v5689_v10, %v5641_v46 }
 0x616   :  { %v5594_v9 = vadd.f32 %v5593_v49, %v5545_v36  ;;  %v16298_v36 = vld [vmem:[#allocation8_spill] sm:$0xff]  ;;  %v16299_v49 = vld [vmem:[#allocation9_spill] sm:$0xff] }
 0x617   :  { %v7298_v46 = vmax.f32 %v5690_v54, 0.0 }
 0x61a   :  { %v5642_v42 = vpop.f32.mrf.mxu2 }
 0x61b   :  { %v5643_v28 = vadd.f32 %v5642_v42, %v5594_v9  ;;  %v5691_v51 = vpop.f32.mrf.mxu3  ;;  %v5547_v32 = vpop.f32.mrf.mxu0  ;;  %v8615_v9 = vld [vmem:[%s15871_s2 + $0x488] sm:$0xf] }
 0x61c   :  { %v5548_v19 = vadd.f32 %v5547_v32, %v13524_v14  ;;  %v5596_v41 = vpop.f32.mrf.mxu1  ;;  %v10424_v14 = vld [vmem:[%s15871_s2 + $0x694] sm:$0xf0]  ;;  %v8999_v42 = vld [vmem:[%s15871_s2 + $0x788] sm:$0xf]  ;;  %v8616_v32 = vor.u32 %v10360_v62, %v8615_v9 }
 0x61d   :  { %v5692_v15 = vadd.f32 %v5691_v51, %v5643_v28  ;;  %v8872_v54 = vor.u32 %v10424_v14, %v8871_v1  ;;  %v10456_v28 = vld [vmem:[%s15871_s2 + $0x794] sm:$0xf0] }
 0x61e   :  { %v5597_v50 = vadd.f32 %v5596_v41, %v5548_v19  ;;  %5742 = vmatmul.bf16.gmra.mxu0 %v16192_v21  ;;  %5791 = vmatmul.bf16.gmra.mxu1 %v16297_v30  ;;  %v9000_v19 = vor.u32 %v10456_v28, %v8999_v42  ;;  %v10392_v9 = vld [vmem:[%s15871_s2 + $0x594] sm:$0xf0]  ;;  %v16363_v30 = vld [vmem:[#allocation65_spill] sm:$0xff] }
 0x61f   :  { %v7302_v10 = vmax.f32 %v5692_v15, 0.0  ;;  %5840 = vmatmul.bf16.gmra.mxu2 %v16298_v36  ;;  %5928 = vmatpush.bf16.msrb.mxu0 %v8616_v32  ;;  %v16304_v36 = vld [vmem:[#allocation13_spill] sm:$0xff] }
 0x620   :  { %5889 = vmatmul.bf16.gmra.mxu3 %v16299_v49  ;;  %6026 = vmatpush.bf16.msrb.mxu2 %v8872_v54  ;;  %v8743_v49 = vld [vmem:[%s15871_s2 + $0x588] sm:$0xf] }
 0x621   :  { %v13782_v53 = vpack.c.bf16 %v7302_v10, %v7298_v46  ;;  %6075 = vmatpush.bf16.msrb.mxu3 %v9000_v19  ;;  %v8744_v62 = vor.u32 %v10392_v9, %v8743_v49  ;;  %v8855_v49 = vld [vmem:[%s15871_s2 + $0x668] sm:$0xf] }
 0x622   :  { %v5645_v51 = vpop.f32.mrf.mxu2 }
 0x623   :  { %16300 = vst [vmem:[#allocation84_spill] sm:$0xff] %v13782_v53  ;;  %v5646_v41 = vadd.f32 %v5645_v51, %v5597_v50  ;;  %v5694_v15 = vpop.f32.mrf.mxu3  ;;  %v5549_v46 = vpop.f32.mrf.mxu0  ;;  %5977 = vmatpush.bf16.msrb.mxu1 %v8744_v62  ;;  %v8983_v62 = vld [vmem:[%s15871_s2 + $0x768] sm:$0xf] }
 0x624   :  { %v5550_v10 = vadd.f32 %v5549_v46, %v13533_v40  ;;  %v5598_v1 = vpop.f32.mrf.mxu1 }
 0x625   :  { %v5695_v14 = vadd.f32 %v5694_v15, %v5646_v41  ;;  %v16301_v41 = vld [vmem:[#allocation10_spill] sm:$0xff]  ;;  %v16302_v15 = vld [vmem:[#allocation11_spill] sm:$0xff] }
 0x626   :  { %v5599_v53 = vadd.f32 %v5598_v1, %v5550_v10  ;;  %v16303_v1 = vld [vmem:[#allocation12_spill] sm:$0xff] }
 0x627   :  { %v7306_v46 = vmax.f32 %v5695_v14, 0.0  ;;  %v10356_v14 = vld [vmem:[%s15871_s2 + $0x474] sm:$0xf0] }
 0x62a   :  { %v5647_v50 = vpop.f32.mrf.mxu2 }
 0x62b   :  { %v5648_v42 = vadd.f32 %v5647_v50, %v5599_v53  ;;  %v5696_v54 = vpop.f32.mrf.mxu3  ;;  %v5552_v28 = vpop.f32.mrf.mxu0  ;;  %v8599_v53 = vld [vmem:[%s15871_s2 + $0x468] sm:$0xf]  ;;  %v10452_v50 = vld [vmem:[%s15871_s2 + $0x774] sm:$0xf0] }
 0x62c   :  { %v5553_v40 = vadd.f32 %v5552_v28, %v13558_v31  ;;  %v5601_v51 = vpop.f32.mrf.mxu1  ;;  %v10420_v31 = vld [vmem:[%s15871_s2 + $0x674] sm:$0xf0]  ;;  %v8600_v28 = vor.u32 %v10356_v14, %v8599_v53 }
 0x62d   :  { %v5697_v32 = vadd.f32 %v5696_v54, %v5648_v42  ;;  %v8856_v9 = vor.u32 %v10420_v31, %v8855_v49 }
 0x62e   :  { %v5602_v19 = vadd.f32 %v5601_v51, %v5553_v40  ;;  %5747 = vmatmul.bf16.gmra.mxu0 %v16301_v41  ;;  %5796 = vmatmul.bf16.gmra.mxu1 %v16302_v15  ;;  %v8984_v40 = vor.u32 %v10452_v50, %v8983_v62  ;;  %v8727_v41 = vld [vmem:[%s15871_s2 + $0x568] sm:$0xf] }
 0x62f   :  { %v7310_v10 = vmax.f32 %v5697_v32, 0.0  ;;  %5845 = vmatmul.bf16.gmra.mxu2 %v16303_v1  ;;  %5929 = vmatpush.bf16.msrb.mxu0 %v8600_v28  ;;  %v16307_v28 = vld [vmem:[#allocation15_spill] sm:$0xff] }
 0x630   :  { %5894 = vmatmul.bf16.gmra.mxu3 %v16304_v36  ;;  %6027 = vmatpush.bf16.msrb.mxu2 %v8856_v9 }
 0x631   :  { %v13823_v42 = vpack.c.bf16 %v7310_v10, %v7306_v46  ;;  %6076 = vmatpush.bf16.msrb.mxu3 %v8984_v40  ;;  %v10388_v46 = vld [vmem:[%s15871_s2 + $0x574] sm:$0xf0] }
 0x632   :  { %v5650_v54 = vpop.f32.mrf.mxu2  ;;  %v8728_v10 = vor.u32 %v10388_v46, %v8727_v41  ;;  %v8839_v41 = vld [vmem:[%s15871_s2 + $0x648] sm:$0xf] }
 0x633   :  { %16305 = vst [vmem:[#allocation85_spill] sm:$0xff] %v13823_v42  ;;  %v5651_v51 = vadd.f32 %v5650_v54, %v5602_v19  ;;  %v5699_v32 = vpop.f32.mrf.mxu3  ;;  %v5554_v49 = vpop.f32.mrf.mxu0  ;;  %v8967_v46 = vld [vmem:[%s15871_s2 + $0x748] sm:$0xf] }
 0x634   :  { %v5555_v31 = vadd.f32 %v5554_v49, %v13567_v39  ;;  %v5603_v36 = vpop.f32.mrf.mxu1  ;;  %5978 = vmatpush.bf16.msrb.mxu1 %v8728_v10  ;;  %v16309_v49 = vld [vmem:[#allocation17_spill] sm:$0xff]  ;;  %v10448_v10 = vld [vmem:[%s15871_s2 + $0x754] sm:$0xf0] }
 0x635   :  { %v5700_v1 = vadd.f32 %v5699_v32, %v5651_v51  ;;  %v16308_v32 = vld [vmem:[#allocation16_spill] sm:$0xff] }
 0x636   :  { %v5604_v15 = vadd.f32 %v5603_v36, %v5555_v31  ;;  %v16306_v36 = vld [vmem:[#allocation14_spill] sm:$0xff] }
 0x637   :  { %v7314_v40 = vmax.f32 %v5700_v1, 0.0  ;;  %v10352_v1 = vld [vmem:[%s15871_s2 + $0x454] sm:$0xf0] }
 0x63a   :  { %v5652_v19 = vpop.f32.mrf.mxu2 }
 0x63b   :  { %v5653_v53 = vadd.f32 %v5652_v19, %v5604_v15  ;;  %v5701_v9 = vpop.f32.mrf.mxu3  ;;  %v5557_v14 = vpop.f32.mrf.mxu0  ;;  %v8583_v15 = vld [vmem:[%s15871_s2 + $0x448] sm:$0xf] }
 0x63c   :  { %v5558_v39 = vadd.f32 %v5557_v14, %v13592_v6  ;;  %v5606_v62 = vpop.f32.mrf.mxu1  ;;  %v10416_v6 = vld [vmem:[%s15871_s2 + $0x654] sm:$0xf0]  ;;  %v8968_v14 = vor.u32 %v10448_v10, %v8967_v46 }
 0x63d   :  { %v5702_v50 = vadd.f32 %v5701_v9, %v5653_v53  ;;  %v8840_v31 = vor.u32 %v10416_v6, %v8839_v41  ;;  %v8584_v9 = vor.u32 %v10352_v1, %v8583_v15 }
 0x63e   :  { %v5607_v54 = vadd.f32 %v5606_v62, %v5558_v39  ;;  %5752 = vmatmul.bf16.gmra.mxu0 %v16306_v36  ;;  %5801 = vmatmul.bf16.gmra.mxu1 %v16307_v28  ;;  %v16359_v28 = vld [vmem:[#allocation61_spill] sm:$0xff]  ;;  %v16362_v36 = vld [vmem:[#allocation64_spill] sm:$0xff] }
 0x63f   :  { %v7318_v51 = vmax.f32 %v5702_v50, 0.0  ;;  %5850 = vmatmul.bf16.gmra.mxu2 %v16308_v32  ;;  %5930 = vmatpush.bf16.msrb.mxu0 %v8584_v9  ;;  %v8711_v32 = vld [vmem:[%s15871_s2 + $0x548] sm:$0xf] }
 0x640   :  { %5899 = vmatmul.bf16.gmra.mxu3 %v16309_v49  ;;  %6028 = vmatpush.bf16.msrb.mxu2 %v8840_v31  ;;  %v16311_v9 = vld [vmem:[#allocation18_spill] sm:$0xff] }
 0x641   :  { %v13855_v19 = vpack.c.bf16 %v7318_v51, %v7314_v40  ;;  %6077 = vmatpush.bf16.msrb.mxu3 %v8968_v14  ;;  %v10384_v40 = vld [vmem:[%s15871_s2 + $0x554] sm:$0xf0]  ;;  %v16312_v14 = vld [vmem:[#allocation19_spill] sm:$0xff] }
 0x642   :  { %v5655_v53 = vpop.f32.mrf.mxu2  ;;  %v8712_v51 = vor.u32 %v10384_v40, %v8711_v32  ;;  %v8823_v32 = vld [vmem:[%s15871_s2 + $0x628] sm:$0xf] }
 0x643   :  { %16310 = vst [vmem:[#allocation99_spill] sm:$0xff] %v13855_v19  ;;  %v5656_v39 = vadd.f32 %v5655_v53, %v5607_v54  ;;  %v5704_v62 = vpop.f32.mrf.mxu3  ;;  %v5559_v50 = vpop.f32.mrf.mxu0  ;;  %v8951_v40 = vld [vmem:[%s15871_s2 + $0x728] sm:$0xf] }
 0x644   :  { %v5560_v41 = vadd.f32 %v5559_v50, %v13601_v38  ;;  %v5608_v6 = vpop.f32.mrf.mxu1  ;;  %5979 = vmatpush.bf16.msrb.mxu1 %v8712_v51  ;;  %v16313_v50 = vld [vmem:[#allocation20_spill] sm:$0xff] }
 0x645   :  { %v5705_v42 = vadd.f32 %v5704_v62, %v5656_v39  ;;  %v10444_v51 = vld [vmem:[%s15871_s2 + $0x734] sm:$0xf0] }
 0x646   :  { %v5609_v49 = vadd.f32 %v5608_v6, %v5560_v41  ;;  %v16314_v41 = vld [vmem:[#allocation21_spill] sm:$0xff] }
 0x647   :  { %v7322_v39 = vmax.f32 %v5705_v42, 0.0  ;;  %v10348_v42 = vld [vmem:[%s15871_s2 + $0x434] sm:$0xf0] }
 0x64a   :  { %v5657_v54 = vpop.f32.mrf.mxu2 }
 0x64b   :  { %v5658_v15 = vadd.f32 %v5657_v54, %v5609_v49  ;;  %v5706_v31 = vpop.f32.mrf.mxu3  ;;  %v5562_v1 = vpop.f32.mrf.mxu0  ;;  %v8567_v49 = vld [vmem:[%s15871_s2 + $0x428] sm:$0xf] }
 0x64c   :  { %v5563_v38 = vadd.f32 %v5562_v1, %v13626_v2  ;;  %v5611_v46 = vpop.f32.mrf.mxu1  ;;  %v10412_v2 = vld [vmem:[%s15871_s2 + $0x634] sm:$0xf0]  ;;  %v8952_v1 = vor.u32 %v10444_v51, %v8951_v40 }
 0x64d   :  { %v5707_v10 = vadd.f32 %v5706_v31, %v5658_v15  ;;  %v8824_v6 = vor.u32 %v10412_v2, %v8823_v32  ;;  %v8568_v31 = vor.u32 %v10348_v42, %v8567_v49 }
 0x64e   :  { %v5612_v53 = vadd.f32 %v5611_v46, %v5563_v38  ;;  %5757 = vmatmul.bf16.gmra.mxu0 %v16311_v9  ;;  %5806 = vmatmul.bf16.gmra.mxu1 %v16312_v14  ;;  %v16355_v14 = vld [vmem:[#allocation57_spill] sm:$0xff]  ;;  %v16358_v9 = vld [vmem:[#allocation60_spill] sm:$0xff] }
 0x64f   :  { %v7326_v62 = vmax.f32 %v5707_v10, 0.0  ;;  %5855 = vmatmul.bf16.gmra.mxu2 %v16313_v50  ;;  %5931 = vmatpush.bf16.msrb.mxu0 %v8568_v31  ;;  %v8695_v50 = vld [vmem:[%s15871_s2 + $0x528] sm:$0xf] }
 0x650   :  { %5904 = vmatmul.bf16.gmra.mxu3 %v16314_v41  ;;  %6029 = vmatpush.bf16.msrb.mxu2 %v8824_v6  ;;  %v16316_v31 = vld [vmem:[#allocation22_spill] sm:$0xff] }
 0x651   :  { %v13887_v54 = vpack.c.bf16 %v7326_v62, %v7322_v39  ;;  %6078 = vmatpush.bf16.msrb.mxu3 %v8952_v1  ;;  %v10380_v39 = vld [vmem:[%s15871_s2 + $0x534] sm:$0xf0]  ;;  %v16317_v1 = vld [vmem:[#allocation23_spill] sm:$0xff] }
 0x652   :  { %v5660_v15 = vpop.f32.mrf.mxu2  ;;  %v8696_v62 = vor.u32 %v10380_v39, %v8695_v50  ;;  %v8807_v50 = vld [vmem:[%s15871_s2 + $0x608] sm:$0xf] }
 0x653   :  { %16315 = vst [vmem:[#allocation112_spill] sm:$0xff] %v13887_v54  ;;  %v5661_v38 = vadd.f32 %v5660_v15, %v5612_v53  ;;  %v5709_v46 = vpop.f32.mrf.mxu3  ;;  %v5564_v10 = vpop.f32.mrf.mxu0  ;;  %v8935_v39 = vld [vmem:[%s15871_s2 + $0x708] sm:$0xf] }
 0x654   :  { %v5565_v32 = vadd.f32 %v5564_v10, %v13635_v58  ;;  %v5613_v2 = vpop.f32.mrf.mxu1  ;;  %5980 = vmatpush.bf16.msrb.mxu1 %v8696_v62  ;;  %v16318_v10 = vld [vmem:[#allocation24_spill] sm:$0xff] }
 0x655   :  { %v5710_v19 = vadd.f32 %v5709_v46, %v5661_v38  ;;  %v10440_v62 = vld [vmem:[%s15871_s2 + $0x714] sm:$0xf0] }
 0x656   :  { %v5614_v41 = vadd.f32 %v5613_v2, %v5565_v32  ;;  %v16319_v32 = vld [vmem:[#allocation25_spill] sm:$0xff] }
 0x657   :  { %v7330_v38 = vmax.f32 %v5710_v19, 0.0  ;;  %v10344_v19 = vld [vmem:[%s15871_s2 + $0x414] sm:$0xf0] }
 0x65a   :  { %v5662_v53 = vpop.f32.mrf.mxu2 }
 0x65b   :  { %v5663_v49 = vadd.f32 %v5662_v53, %v5614_v41  ;;  %v5711_v6 = vpop.f32.mrf.mxu3  ;;  %v5567_v42 = vpop.f32.mrf.mxu0  ;;  %v8551_v41 = vld [vmem:[%s15871_s2 + $0x408] sm:$0xf] }
 0x65c   :  { %v5568_v58 = vadd.f32 %v5567_v42, %v13660_v23  ;;  %v5616_v40 = vpop.f32.mrf.mxu1  ;;  %v10408_v23 = vld [vmem:[%s15871_s2 + $0x614] sm:$0xf0]  ;;  %v8936_v42 = vor.u32 %v10440_v62, %v8935_v39 }
 0x65d   :  { %v5712_v51 = vadd.f32 %v5711_v6, %v5663_v49  ;;  %v8808_v2 = vor.u32 %v10408_v23, %v8807_v50  ;;  %v8552_v6 = vor.u32 %v10344_v19, %v8551_v41 }
 0x65e   :  { %v5617_v15 = vadd.f32 %v5616_v40, %v5568_v58  ;;  %5762 = vmatmul.bf16.gmra.mxu0 %v16316_v31  ;;  %5811 = vmatmul.bf16.gmra.mxu1 %v16317_v1  ;;  %v16351_v1 = vld [vmem:[#allocation53_spill] sm:$0xff]  ;;  %v16354_v31 = vld [vmem:[#allocation56_spill] sm:$0xff] }
 0x65f   :  { %v7334_v46 = vmax.f32 %v5712_v51, 0.0  ;;  %5860 = vmatmul.bf16.gmra.mxu2 %v16318_v10  ;;  %5932 = vmatpush.bf16.msrb.mxu0 %v8552_v6  ;;  %v8679_v10 = vld [vmem:[%s15871_s2 + $0x508] sm:$0xf] }
 0x660   :  { %5909 = vmatmul.bf16.gmra.mxu3 %v16319_v32  ;;  %6030 = vmatpush.bf16.msrb.mxu2 %v8808_v2  ;;  %v16321_v6 = vld [vmem:[#allocation26_spill] sm:$0xff] }
 0x661   :  { %v13919_v53 = vpack.c.bf16 %v7334_v46, %v7330_v38  ;;  %6079 = vmatpush.bf16.msrb.mxu3 %v8936_v42  ;;  %v10376_v38 = vld [vmem:[%s15871_s2 + $0x514] sm:$0xf0]  ;;  %v16322_v42 = vld [vmem:[#allocation27_spill] sm:$0xff] }
 0x662   :  { %v5665_v49 = vpop.f32.mrf.mxu2  ;;  %v8680_v46 = vor.u32 %v10376_v38, %v8679_v10  ;;  %v9431_v10 = vld [vmem:[%s15871_s2 + $0xae8] sm:$0xf] }
 0x663   :  { %16320 = vst [vmem:[#allocation113_spill] sm:$0xff] %v13919_v53  ;;  %v5666_v58 = vadd.f32 %v5665_v49, %v5617_v15  ;;  %v5714_v40 = vpop.f32.mrf.mxu3  ;;  %v5569_v51 = vpop.f32.mrf.mxu0  ;;  %v9559_v38 = vld [vmem:[%s15871_s2 + $0xbe8] sm:$0xf] }
 0x664   :  { %v5570_v50 = vadd.f32 %v5569_v51, %v13669_v24  ;;  %v5618_v23 = vpop.f32.mrf.mxu1  ;;  %5981 = vmatpush.bf16.msrb.mxu1 %v8680_v46  ;;  %v16323_v51 = vld [vmem:[#allocation28_spill] sm:$0xff] }
 0x665   :  { %v5715_v54 = vadd.f32 %v5714_v40, %v5666_v58  ;;  %v10596_v46 = vld [vmem:[%s15871_s2 + $0xbf4] sm:$0xf0] }
 0x666   :  { %v5619_v32 = vadd.f32 %v5618_v23, %v5570_v50  ;;  %v16324_v50 = vld [vmem:[#allocation29_spill] sm:$0xff] }
 0x667   :  { %v7338_v58 = vmax.f32 %v5715_v54, 0.0  ;;  %v10500_v54 = vld [vmem:[%s15871_s2 + $0x8f4] sm:$0xf0] }
 0x66a   :  { %v5667_v15 = vpop.f32.mrf.mxu2 }
 0x66b   :  { %v5668_v41 = vadd.f32 %v5667_v15, %v5619_v32  ;;  %v5716_v2 = vpop.f32.mrf.mxu3  ;;  %v5572_v19 = vpop.f32.mrf.mxu0  ;;  %v9175_v32 = vld [vmem:[%s15871_s2 + $0x8e8] sm:$0xf] }
 0x66c   :  { %v5573_v24 = vadd.f32 %v5572_v19, %v13694_v37  ;;  %v5621_v39 = vpop.f32.mrf.mxu1  ;;  %v10564_v37 = vld [vmem:[%s15871_s2 + $0xaf4] sm:$0xf0]  ;;  %v9560_v19 = vor.u32 %v10596_v46, %v9559_v38 }
 0x66d   :  { %v5717_v62 = vadd.f32 %v5716_v2, %v5668_v41  ;;  %v9432_v23 = vor.u32 %v10564_v37, %v9431_v10  ;;  %v9176_v2 = vor.u32 %v10500_v54, %v9175_v32 }
 0x66e   :  { %v5622_v49 = vadd.f32 %v5621_v39, %v5573_v24  ;;  %5767 = vmatmul.bf16.gmra.mxu0 %v16321_v6  ;;  %5816 = vmatmul.bf16.gmra.mxu1 %v16322_v42  ;;  %v16347_v42 = vld [vmem:[#allocation49_spill] sm:$0xff]  ;;  %v16350_v6 = vld [vmem:[#allocation52_spill] sm:$0xff] }
 0x66f   :  { %v7342_v40 = vmax.f32 %v5717_v62, 0.0  ;;  %5865 = vmatmul.bf16.gmra.mxu2 %v16323_v51  ;;  %6121 = vmatpush.bf16.msra.mxu0 %v9176_v2  ;;  %v16346_v51 = vld [vmem:[#allocation48_spill] sm:$0xff] }
 0x670   :  { %5914 = vmatmul.bf16.gmra.mxu3 %v16324_v50  ;;  %6219 = vmatpush.bf16.msra.mxu2 %v9432_v23  ;;  %v9303_v50 = vld [vmem:[%s15871_s2 + $0x9e8] sm:$0xf] }
 0x671   :  { %v13951_v15 = vpack.c.bf16 %v7342_v40, %v7338_v58  ;;  %6268 = vmatpush.bf16.msra.mxu3 %v9560_v19  ;;  %v10532_v58 = vld [vmem:[%s15871_s2 + $0x9f4] sm:$0xf0]  ;;  %v16326_v19 = vld [vmem:[#allocation30_spill] sm:$0xff] }
 0x672   :  { %v5670_v41 = vpop.f32.mrf.mxu2  ;;  %v9304_v32 = vor.u32 %v10532_v58, %v9303_v50  ;;  %v9415_v50 = vld [vmem:[%s15871_s2 + $0xac8] sm:$0xf] }
 0x673   :  { %16325 = vst [vmem:[#allocation114_spill] sm:$0xff] %v13951_v15  ;;  %v5671_v24 = vadd.f32 %v5670_v41, %v5622_v49  ;;  %v5719_v39 = vpop.f32.mrf.mxu3  ;;  %v5574_v62 = vpop.f32.mrf.mxu0  ;;  %v16328_v15 = vld [vmem:[#allocation32_spill] sm:$0xff] }
 0x674   :  { %v5575_v10 = vadd.f32 %v5574_v62, %v13703_v12  ;;  %v5623_v37 = vpop.f32.mrf.mxu1  ;;  %6170 = vmatpush.bf16.msra.mxu1 %v9304_v32  ;;  %v10592_v32 = vld [vmem:[%s15871_s2 + $0xbd4] sm:$0xf0] }
 0x675   :  { %v5720_v53 = vadd.f32 %v5719_v39, %v5671_v24  ;;  %v16327_v24 = vld [vmem:[#allocation31_spill] sm:$0xff] }
 0x676   :  { %v5624_v40 = vadd.f32 %v5623_v37, %v5575_v10  ;;  %v16329_v10 = vld [vmem:[#allocation33_spill] sm:$0xff]  ;;  %v9159_v37 = vld [vmem:[%s15871_s2 + $0x8c8] sm:$0xf] }
 0x677   :  { %v7346_v39 = vmax.f32 %v5720_v53, 0.0  ;;  %v10496_v53 = vld [vmem:[%s15871_s2 + $0x8d4] sm:$0xf0] }
 0x67a   :  { %v5672_v49 = vpop.f32.mrf.mxu2 }
 0x67b   :  { %v5673_v54 = vadd.f32 %v5672_v49, %v5624_v40  ;;  %v5721_v23 = vpop.f32.mrf.mxu3  ;;  %v5577_v38 = vpop.f32.mrf.mxu0  ;;  %v9543_v40 = vld [vmem:[%s15871_s2 + $0xbc8] sm:$0xf] }
 0x67c   :  { %v5578_v12 = vadd.f32 %v5577_v38, %v13728_v4  ;;  %v5626_v46 = vpop.f32.mrf.mxu1  ;;  %v10560_v4 = vld [vmem:[%s15871_s2 + $0xad4] sm:$0xf0]  ;;  %v9544_v38 = vor.u32 %v10592_v32, %v9543_v40 }
 0x67d   :  { %v5722_v41 = vadd.f32 %v5721_v23, %v5673_v54  ;;  %v9416_v58 = vor.u32 %v10560_v4, %v9415_v50  ;;  %v9160_v23 = vor.u32 %v10496_v53, %v9159_v37 }
 0x67e   :  { %v5627_v2 = vadd.f32 %v5626_v46, %v5578_v12  ;;  %5772 = vmatmul.bf16.gmra.mxu0 %v16326_v19  ;;  %5821 = vmatmul.bf16.gmra.mxu1 %v16327_v24  ;;  %v16342_v24 = vld [vmem:[#allocation44_spill] sm:$0xff]  ;;  %v16343_v19 = vld [vmem:[#allocation45_spill] sm:$0xff] }
 0x67f   :  { %v7350_v62 = vmax.f32 %v5722_v41, 0.0  ;;  %5870 = vmatmul.bf16.gmra.mxu2 %v16328_v15  ;;  %6122 = vmatpush.bf16.msra.mxu0 %v9160_v23  ;;  %v9287_v15 = vld [vmem:[%s15871_s2 + $0x9c8] sm:$0xf] }
 0x680   :  { %5919 = vmatmul.bf16.gmra.mxu3 %v16329_v10  ;;  %6220 = vmatpush.bf16.msra.mxu2 %v9416_v58 }
 0x681   :  { %v13983_v49 = vpack.c.bf16 %v7350_v62, %v7346_v39  ;;  %6269 = vmatpush.bf16.msra.mxu3 %v9544_v38  ;;  %v10528_v39 = vld [vmem:[%s15871_s2 + $0x9d4] sm:$0xf0] }
 0x682   :  { %v5675_v54 = vpop.f32.mrf.mxu2  ;;  %v9288_v37 = vor.u32 %v10528_v39, %v9287_v15  ;;  %v16334_v39 = vld [vmem:[#allocation37_spill] sm:$0xff] }
 0x683   :  { %16330 = vst [vmem:[#allocation115_spill] sm:$0xff] %v13983_v49  ;;  %v5676_v12 = vadd.f32 %v5675_v54, %v5627_v2  ;;  %v5724_v46 = vpop.f32.mrf.mxu3  ;;  %v5579_v41 = vpop.f32.mrf.mxu0  ;;  %v10761_v2 = vld [vmem:[%s15872_s3] sm:$0xf] }
 0x684   :  { %v5580_v50 = vadd.f32 %v5579_v41, %v13737_v59  ;;  %v5628_v4 = vpop.f32.mrf.mxu1  ;;  %v13995_v58 = vperm.slane %v10761_v2, 2  ;;  %6171 = vmatpush.bf16.msra.mxu1 %v9288_v37  ;;  %v16332_v41 = vld [vmem:[#allocation35_spill] sm:$0xff]  ;;  %v10556_v37 = vld [vmem:[%s15871_s2 + $0xab4] sm:$0xf0]  ;;  %v9143_v2 = vld [vmem:[%s15871_s2 + $0x8a8] sm:$0xf] }
 0x685   :  { %v5725_v10 = vadd.f32 %v5724_v46, %v5676_v12  ;;  %v16331_v46 = vld [vmem:[#allocation34_spill] sm:$0xff] }
 0x686   :  { %v5629_v62 = vadd.f32 %v5628_v4, %v5580_v50  ;;  %v16333_v4 = vld [vmem:[#allocation36_spill] sm:$0xff] }
 0x687   :  { %v7354_v15 = vmax.f32 %v5725_v10, 0.0  ;;  %v10492_v10 = vld [vmem:[%s15871_s2 + $0x8b4] sm:$0xf0] }
 0x68a   :  { %v5677_v59 = vpop.f32.mrf.mxu2 }
 0x68b   :  { %v5678_v53 = vadd.f32 %v5677_v59, %v5629_v62  ;;  %v5726_v40 = vpop.f32.mrf.mxu3  ;;  %v5738_v32 = vpop.f32.mrf.mxu0  ;;  %v9399_v62 = vld [vmem:[%s15871_s2 + $0xaa8] sm:$0xf] }
 0x68c   :  { %v5739_v54 = vadd.f32 %v5738_v32, %v13995_v58  ;;  %v5787_v23 = vpop.f32.mrf.mxu1  ;;  %v9400_v59 = vor.u32 %v10556_v37, %v9399_v62 }
 0x68d   :  { %v5727_v38 = vadd.f32 %v5726_v40, %v5678_v53  ;;  %v9527_v53 = vld [vmem:[%s15871_s2 + $0xba8] sm:$0xf]  ;;  %v10588_v40 = vld [vmem:[%s15871_s2 + $0xbb4] sm:$0xf0] }
 0x68e   :  { %v5788_v12 = vadd.f32 %v5787_v23, %v5739_v54  ;;  %5933 = vmatmul.bf16.vlgmr.msrb.gmra.mxu0 %v16331_v46  ;;  %5982 = vmatmul.bf16.vlgmr.msrb.gmra.mxu1 %v16332_v41  ;;  %v9144_v23 = vor.u32 %v10492_v10, %v9143_v2  ;;  %v9271_v46 = vld [vmem:[%s15871_s2 + $0x9a8] sm:$0xf] }
 0x68f   :  { %v7358_v50 = vmax.f32 %v5727_v38, 0.0  ;;  %6031 = vmatmul.bf16.vlgmr.msrb.gmra.mxu2 %v16333_v4  ;;  %v9528_v38 = vor.u32 %v10588_v40, %v9527_v53 }
 0x690   :  { %6080 = vmatmul.bf16.vlgmr.msrb.gmra.mxu3 %v16334_v39  ;;  %6221 = vmatpush.bf16.msra.mxu2 %v9400_v59 }
 0x691   :  { %v14020_v32 = vpack.c.bf16 %v7358_v50, %v7354_v15  ;;  %6123 = vmatpush.bf16.msra.mxu0 %v9144_v23  ;;  %6270 = vmatpush.bf16.msra.mxu3 %v9528_v38  ;;  %v10524_v15 = vld [vmem:[%s15871_s2 + $0x9b4] sm:$0xf0]  ;;  %v16336_v23 = vld [vmem:[#allocation38_spill] sm:$0xff]  ;;  %v16337_v38 = vld [vmem:[#allocation39_spill] sm:$0xff] }
 0x692   :  { %v5836_v54 = vpop.f32.mrf.mxu2 }
 0x693   :  { %16335 = vst [vmem:[#allocation116_spill] sm:$0xff] %v14020_v32  ;;  %v5837_v49 = vadd.f32 %v5836_v54, %v5788_v12  ;;  %v5885_v39 = vpop.f32.mrf.mxu3  ;;  %v5740_v62 = vpop.f32.mrf.mxu0  ;;  %v9272_v12 = vor.u32 %v10524_v15, %v9271_v46  ;;  %v16339_v32 = vld [vmem:[#allocation41_spill] sm:$0xff]  ;;  %v9383_v46 = vld [vmem:[%s15871_s2 + $0xa88] sm:$0xf] }
 0x694   :  { %v5741_v37 = vadd.f32 %v5740_v62, %v13995_v58  ;;  %v5789_v4 = vpop.f32.mrf.mxu1  ;;  %v16338_v62 = vld [vmem:[#allocation40_spill] sm:$0xff] }
 0x695   :  { %v14023_v41 = vadd.f32 %v5885_v39, %v5837_v49  ;;  %6172 = vmatpush.bf16.msra.mxu1 %v9272_v12  ;;  %v9511_v12 = vld [vmem:[%s15871_s2 + $0xb88] sm:$0xf] }
 0x696   :  { %v5790_v50 = vadd.f32 %v5789_v4, %v5741_v37  ;;  %v10552_v4 = vld [vmem:[%s15871_s2 + $0xa94] sm:$0xf0]  ;;  %v9127_v37 = vld [vmem:[%s15871_s2 + $0x888] sm:$0xf] }
 0x697   :  { %v9384_v15 = vor.u32 %v10552_v4, %v9383_v46 }
 0x699   :  { %6222 = vmatpush.bf16.msra.mxu2 %v9384_v15 }
 0x69a   :  { %v5838_v2 = vpop.f32.mrf.mxu2 }
 0x69b   :  { %v5839_v59 = vadd.f32 %v5838_v2, %v5790_v50  ;;  %v5887_v10 = vpop.f32.mrf.mxu3  ;;  %v5743_v53 = vpop.f32.mrf.mxu0  ;;  %v10488_v50 = vld [vmem:[%s15871_s2 + $0x894] sm:$0xf0] }
 0x69c   :  { %v5744_v40 = vadd.f32 %v5743_v53, %v13995_v58  ;;  %v5792_v54 = vpop.f32.mrf.mxu1  ;;  %v10584_v2 = vld [vmem:[%s15871_s2 + $0xb94] sm:$0xf0] }
 0x69d   :  { %v14032_v49 = vadd.f32 %v5887_v10, %v5839_v59  ;;  %v9128_v10 = vor.u32 %v10488_v50, %v9127_v37  ;;  %v9512_v53 = vor.u32 %v10584_v2, %v9511_v12  ;;  %v10520_v37 = vld [vmem:[%s15871_s2 + $0x994] sm:$0xf0] }
 0x69e   :  { %v5793_v39 = vadd.f32 %v5792_v54, %v5744_v40  ;;  %5938 = vmatmul.bf16.gmra.mxu0 %v16336_v23  ;;  %5987 = vmatmul.bf16.gmra.mxu1 %v16337_v38  ;;  %v9255_v38 = vld [vmem:[%s15871_s2 + $0x988] sm:$0xf]  ;;  %v16341_v23 = vld [vmem:[#allocation43_spill] sm:$0xff] }
 0x69f   :  { %6036 = vmatmul.bf16.gmra.mxu2 %v16338_v62  ;;  %6124 = vmatpush.bf16.msra.mxu0 %v9128_v10 }
 0x6a0   :  { %6085 = vmatmul.bf16.gmra.mxu3 %v16339_v32 }
 0x6a1   :  { %6271 = vmatpush.bf16.msra.mxu3 %v9512_v53 }
 0x6a2   :  { %v5841_v59 = vpop.f32.mrf.mxu2 }
 0x6a3   :  { %v5842_v40 = vadd.f32 %v5841_v59, %v5793_v39  ;;  %v5890_v54 = vpop.f32.mrf.mxu3  ;;  %v5745_v32 = vpop.f32.mrf.mxu0  ;;  %v9256_v39 = vor.u32 %v10520_v37, %v9255_v38  ;;  %v9367_v38 = vld [vmem:[%s15871_s2 + $0xa68] sm:$0xf] }
 0x6a4   :  { %v5746_v46 = vadd.f32 %v5745_v32, %v13995_v58  ;;  %v5794_v4 = vpop.f32.mrf.mxu1 }
 0x6a5   :  { %v14057_v62 = vadd.f32 %v5890_v54, %v5842_v40  ;;  %6173 = vmatpush.bf16.msra.mxu1 %v9256_v39  ;;  %v16340_v54 = vld [vmem:[#allocation42_spill] sm:$0xff] }
 0x6a6   :  { %v5795_v50 = vadd.f32 %v5794_v4, %v5746_v46  ;;  %v10548_v46 = vld [vmem:[%s15871_s2 + $0xa74] sm:$0xf0]  ;;  %v9111_v4 = vld [vmem:[%s15871_s2 + $0x868] sm:$0xf] }
 0x6a7   :  { %v9368_v37 = vor.u32 %v10548_v46, %v9367_v38  ;;  %v9495_v39 = vld [vmem:[%s15871_s2 + $0xb68] sm:$0xf] }
 0x6a9   :  { %6223 = vmatpush.bf16.msra.mxu2 %v9368_v37 }
 0x6aa   :  { %v5843_v12 = vpop.f32.mrf.mxu2 }
 0x6ab   :  { %v5844_v15 = vadd.f32 %v5843_v12, %v5795_v50  ;;  %v5892_v2 = vpop.f32.mrf.mxu3  ;;  %v5748_v32 = vpop.f32.mrf.mxu0  ;;  %v10484_v50 = vld [vmem:[%s15871_s2 + $0x874] sm:$0xf0] }
 0x6ac   :  { %v5749_v59 = vadd.f32 %v5748_v32, %v13995_v58  ;;  %v5797_v10 = vpop.f32.mrf.mxu1  ;;  %v10580_v12 = vld [vmem:[%s15871_s2 + $0xb74] sm:$0xf0] }
 0x6ad   :  { %v14066_v53 = vadd.f32 %v5892_v2, %v5844_v15  ;;  %v9112_v2 = vor.u32 %v10484_v50, %v9111_v4  ;;  %v9496_v32 = vor.u32 %v10580_v12, %v9495_v39  ;;  %v10516_v4 = vld [vmem:[%s15871_s2 + $0x974] sm:$0xf0] }
 0x6ae   :  { %v5798_v40 = vadd.f32 %v5797_v10, %v5749_v59  ;;  %5943 = vmatmul.bf16.gmra.mxu0 %v16340_v54  ;;  %5992 = vmatmul.bf16.gmra.mxu1 %v16341_v23  ;;  %v9239_v23 = vld [vmem:[%s15871_s2 + $0x968] sm:$0xf]  ;;  %v16345_v54 = vld [vmem:[#allocation47_spill] sm:$0xff] }
 0x6af   :  { %6041 = vmatmul.bf16.gmra.mxu2 %v16342_v24  ;;  %6125 = vmatpush.bf16.msra.mxu0 %v9112_v2 }
 0x6b0   :  { %6090 = vmatmul.bf16.gmra.mxu3 %v16343_v19 }
 0x6b1   :  { %6272 = vmatpush.bf16.msra.mxu3 %v9496_v32 }
 0x6b2   :  { %v5846_v15 = vpop.f32.mrf.mxu2 }
 0x6b3   :  { %v5847_v59 = vadd.f32 %v5846_v15, %v5798_v40  ;;  %v5895_v10 = vpop.f32.mrf.mxu3  ;;  %v5750_v19 = vpop.f32.mrf.mxu0  ;;  %v9240_v40 = vor.u32 %v10516_v4, %v9239_v23  ;;  %v9351_v23 = vld [vmem:[%s15871_s2 + $0xa48] sm:$0xf] }
 0x6b4   :  { %v5751_v38 = vadd.f32 %v5750_v19, %v13995_v58  ;;  %v5799_v46 = vpop.f32.mrf.mxu1 }
 0x6b5   :  { %v14091_v24 = vadd.f32 %v5895_v10, %v5847_v59  ;;  %6174 = vmatpush.bf16.msra.mxu1 %v9240_v40  ;;  %v16344_v10 = vld [vmem:[#allocation46_spill] sm:$0xff] }
 0x6b6   :  { %v5800_v50 = vadd.f32 %v5799_v46, %v5751_v38  ;;  %v10544_v38 = vld [vmem:[%s15871_s2 + $0xa54] sm:$0xf0]  ;;  %v9095_v46 = vld [vmem:[%s15871_s2 + $0x848] sm:$0xf] }
 0x6b7   :  { %v9352_v4 = vor.u32 %v10544_v38, %v9351_v23  ;;  %v9479_v40 = vld [vmem:[%s15871_s2 + $0xb48] sm:$0xf] }
 0x6b9   :  { %6224 = vmatpush.bf16.msra.mxu2 %v9352_v4 }
 0x6ba   :  { %v5848_v39 = vpop.f32.mrf.mxu2 }
 0x6bb   :  { %v5849_v37 = vadd.f32 %v5848_v39, %v5800_v50  ;;  %v5897_v12 = vpop.f32.mrf.mxu3  ;;  %v5753_v19 = vpop.f32.mrf.mxu0  ;;  %v10480_v50 = vld [vmem:[%s15871_s2 + $0x854] sm:$0xf0] }
 0x6bc   :  { %v5754_v15 = vadd.f32 %v5753_v19, %v13995_v58  ;;  %v5802_v2 = vpop.f32.mrf.mxu1  ;;  %v10576_v39 = vld [vmem:[%s15871_s2 + $0xb54] sm:$0xf0] }
 0x6bd   :  { %v14100_v32 = vadd.f32 %v5897_v12, %v5849_v37  ;;  %v9096_v12 = vor.u32 %v10480_v50, %v9095_v46  ;;  %v9480_v19 = vor.u32 %v10576_v39, %v9479_v40  ;;  %v10512_v46 = vld [vmem:[%s15871_s2 + $0x954] sm:$0xf0] }
 0x6be   :  { %v5803_v59 = vadd.f32 %v5802_v2, %v5754_v15  ;;  %5948 = vmatmul.bf16.gmra.mxu0 %v16344_v10  ;;  %5997 = vmatmul.bf16.gmra.mxu1 %v16345_v54  ;;  %v9223_v54 = vld [vmem:[%s15871_s2 + $0x948] sm:$0xf]  ;;  %v16349_v10 = vld [vmem:[#allocation51_spill] sm:$0xff] }
 0x6bf   :  { %6046 = vmatmul.bf16.gmra.mxu2 %v16346_v51  ;;  %6126 = vmatpush.bf16.msra.mxu0 %v9096_v12 }
 0x6c0   :  { %6095 = vmatmul.bf16.gmra.mxu3 %v16347_v42 }
 0x6c1   :  { %6273 = vmatpush.bf16.msra.mxu3 %v9480_v19 }
 0x6c2   :  { %v5851_v37 = vpop.f32.mrf.mxu2 }
 0x6c3   :  { %v5852_v15 = vadd.f32 %v5851_v37, %v5803_v59  ;;  %v5900_v2 = vpop.f32.mrf.mxu3  ;;  %v5755_v42 = vpop.f32.mrf.mxu0  ;;  %v9224_v59 = vor.u32 %v10512_v46, %v9223_v54  ;;  %v9335_v54 = vld [vmem:[%s15871_s2 + $0xa28] sm:$0xf] }
 0x6c4   :  { %v5756_v23 = vadd.f32 %v5755_v42, %v13995_v58  ;;  %v5804_v38 = vpop.f32.mrf.mxu1 }
 0x6c5   :  { %v14125_v51 = vadd.f32 %v5900_v2, %v5852_v15  ;;  %6175 = vmatpush.bf16.msra.mxu1 %v9224_v59  ;;  %v16348_v2 = vld [vmem:[#allocation50_spill] sm:$0xff] }
 0x6c6   :  { %v5805_v50 = vadd.f32 %v5804_v38, %v5756_v23  ;;  %v10540_v23 = vld [vmem:[%s15871_s2 + $0xa34] sm:$0xf0]  ;;  %v9079_v38 = vld [vmem:[%s15871_s2 + $0x828] sm:$0xf] }
 0x6c7   :  { %v9336_v46 = vor.u32 %v10540_v23, %v9335_v54  ;;  %v9463_v59 = vld [vmem:[%s15871_s2 + $0xb28] sm:$0xf] }
 0x6c9   :  { %6225 = vmatpush.bf16.msra.mxu2 %v9336_v46 }
 0x6ca   :  { %v5853_v40 = vpop.f32.mrf.mxu2 }
 0x6cb   :  { %v5854_v4 = vadd.f32 %v5853_v40, %v5805_v50  ;;  %v5902_v39 = vpop.f32.mrf.mxu3  ;;  %v5758_v42 = vpop.f32.mrf.mxu0  ;;  %v10476_v50 = vld [vmem:[%s15871_s2 + $0x834] sm:$0xf0] }
 0x6cc   :  { %v5759_v37 = vadd.f32 %v5758_v42, %v13995_v58  ;;  %v5807_v12 = vpop.f32.mrf.mxu1  ;;  %v10572_v40 = vld [vmem:[%s15871_s2 + $0xb34] sm:$0xf0] }
 0x6cd   :  { %v14134_v19 = vadd.f32 %v5902_v39, %v5854_v4  ;;  %v9080_v39 = vor.u32 %v10476_v50, %v9079_v38  ;;  %v9464_v42 = vor.u32 %v10572_v40, %v9463_v59  ;;  %v10508_v38 = vld [vmem:[%s15871_s2 + $0x934] sm:$0xf0] }
 0x6ce   :  { %v5808_v15 = vadd.f32 %v5807_v12, %v5759_v37  ;;  %5953 = vmatmul.bf16.gmra.mxu0 %v16348_v2  ;;  %6002 = vmatmul.bf16.gmra.mxu1 %v16349_v10  ;;  %v9207_v10 = vld [vmem:[%s15871_s2 + $0x928] sm:$0xf]  ;;  %v16353_v2 = vld [vmem:[#allocation55_spill] sm:$0xff] }
 0x6cf   :  { %6051 = vmatmul.bf16.gmra.mxu2 %v16350_v6  ;;  %6127 = vmatpush.bf16.msra.mxu0 %v9080_v39 }
 0x6d0   :  { %6100 = vmatmul.bf16.gmra.mxu3 %v16351_v1 }
 0x6d1   :  { %6274 = vmatpush.bf16.msra.mxu3 %v9464_v42 }
 0x6d2   :  { %v5856_v4 = vpop.f32.mrf.mxu2 }
 0x6d3   :  { %v5857_v37 = vadd.f32 %v5856_v4, %v5808_v15  ;;  %v5905_v12 = vpop.f32.mrf.mxu3  ;;  %v5760_v1 = vpop.f32.mrf.mxu0  ;;  %v9208_v15 = vor.u32 %v10508_v38, %v9207_v10  ;;  %v9319_v10 = vld [vmem:[%s15871_s2 + $0xa08] sm:$0xf] }
 0x6d4   :  { %v5761_v54 = vadd.f32 %v5760_v1, %v13995_v58  ;;  %v5809_v23 = vpop.f32.mrf.mxu1 }
 0x6d5   :  { %v14159_v6 = vadd.f32 %v5905_v12, %v5857_v37  ;;  %6176 = vmatpush.bf16.msra.mxu1 %v9208_v15  ;;  %v16352_v12 = vld [vmem:[#allocation54_spill] sm:$0xff] }
 0x6d6   :  { %v5810_v50 = vadd.f32 %v5809_v23, %v5761_v54  ;;  %v10536_v54 = vld [vmem:[%s15871_s2 + $0xa14] sm:$0xf0]  ;;  %v9063_v23 = vld [vmem:[%s15871_s2 + $0x808] sm:$0xf] }
 0x6d7   :  { %v9320_v38 = vor.u32 %v10536_v54, %v9319_v10  ;;  %v9447_v15 = vld [vmem:[%s15871_s2 + $0xb08] sm:$0xf] }
 0x6d9   :  { %6226 = vmatpush.bf16.msra.mxu2 %v9320_v38 }
 0x6da   :  { %v5858_v59 = vpop.f32.mrf.mxu2 }
 0x6db   :  { %v5859_v46 = vadd.f32 %v5858_v59, %v5810_v50  ;;  %v5907_v40 = vpop.f32.mrf.mxu3  ;;  %v5763_v1 = vpop.f32.mrf.mxu0  ;;  %v10472_v50 = vld [vmem:[%s15871_s2 + $0x814] sm:$0xf0] }
 0x6dc   :  { %v5764_v4 = vadd.f32 %v5763_v1, %v13995_v58  ;;  %v5812_v39 = vpop.f32.mrf.mxu1  ;;  %v10568_v59 = vld [vmem:[%s15871_s2 + $0xb14] sm:$0xf0] }
 0x6dd   :  { %v14168_v42 = vadd.f32 %v5907_v40, %v5859_v46  ;;  %v9064_v40 = vor.u32 %v10472_v50, %v9063_v23  ;;  %v9448_v1 = vor.u32 %v10568_v59, %v9447_v15  ;;  %v10504_v23 = vld [vmem:[%s15871_s2 + $0x914] sm:$0xf0] }
 0x6de   :  { %v5813_v37 = vadd.f32 %v5812_v39, %v5764_v4  ;;  %5958 = vmatmul.bf16.gmra.mxu0 %v16352_v12  ;;  %6007 = vmatmul.bf16.gmra.mxu1 %v16353_v2  ;;  %v9191_v2 = vld [vmem:[%s15871_s2 + $0x908] sm:$0xf]  ;;  %v16357_v12 = vld [vmem:[#allocation59_spill] sm:$0xff] }
 0x6df   :  { %6056 = vmatmul.bf16.gmra.mxu2 %v16354_v31  ;;  %6128 = vmatpush.bf16.msra.mxu0 %v9064_v40 }
 0x6e0   :  { %6105 = vmatmul.bf16.gmra.mxu3 %v16355_v14 }
 0x6e1   :  { %6275 = vmatpush.bf16.msra.mxu3 %v9448_v1 }
 0x6e2   :  { %v5861_v46 = vpop.f32.mrf.mxu2 }
 0x6e3   :  { %v5862_v4 = vadd.f32 %v5861_v46, %v5813_v37  ;;  %v5910_v39 = vpop.f32.mrf.mxu3  ;;  %v5765_v14 = vpop.f32.mrf.mxu0  ;;  %v9192_v37 = vor.u32 %v10504_v23, %v9191_v2  ;;  %v9943_v2 = vld [vmem:[%s15871_s2 + $0xee8] sm:$0xf] }
 0x6e4   :  { %v5766_v10 = vadd.f32 %v5765_v14, %v13995_v58  ;;  %v5814_v54 = vpop.f32.mrf.mxu1 }
 0x6e5   :  { %v14193_v31 = vadd.f32 %v5910_v39, %v5862_v4  ;;  %6177 = vmatpush.bf16.msra.mxu1 %v9192_v37  ;;  %v16356_v39 = vld [vmem:[#allocation58_spill] sm:$0xff] }
 0x6e6   :  { %v5815_v50 = vadd.f32 %v5814_v54, %v5766_v10  ;;  %v10692_v10 = vld [vmem:[%s15871_s2 + $0xef4] sm:$0xf0]  ;;  %v9687_v54 = vld [vmem:[%s15871_s2 + $0xce8] sm:$0xf] }
 0x6e7   :  { %v9944_v23 = vor.u32 %v10692_v10, %v9943_v2  ;;  %v10071_v37 = vld [vmem:[%s15871_s2 + $0xfe8] sm:$0xf] }
 0x6e9   :  { %6415 = vmatpush.bf16.msrb.mxu2 %v9944_v23 }
 0x6ea   :  { %v5863_v15 = vpop.f32.mrf.mxu2 }
 0x6eb   :  { %v5864_v38 = vadd.f32 %v5863_v15, %v5815_v50  ;;  %v5912_v59 = vpop.f32.mrf.mxu3  ;;  %v5768_v14 = vpop.f32.mrf.mxu0  ;;  %v10628_v50 = vld [vmem:[%s15871_s2 + $0xcf4] sm:$0xf0] }
 0x6ec   :  { %v5769_v46 = vadd.f32 %v5768_v14, %v13995_v58  ;;  %v5817_v40 = vpop.f32.mrf.mxu1  ;;  %v10724_v15 = vld [vmem:[%s15871_s2 + $0xff4] sm:$0xf0] }
 0x6ed   :  { %v14202_v1 = vadd.f32 %v5912_v59, %v5864_v38  ;;  %v9688_v59 = vor.u32 %v10628_v50, %v9687_v54  ;;  %v10072_v14 = vor.u32 %v10724_v15, %v10071_v37  ;;  %v10660_v54 = vld [vmem:[%s15871_s2 + $0xdf4] sm:$0xf0] }
 0x6ee   :  { %v5818_v4 = vadd.f32 %v5817_v40, %v5769_v46  ;;  %5963 = vmatmul.bf16.gmra.mxu0 %v16356_v39  ;;  %6012 = vmatmul.bf16.gmra.mxu1 %v16357_v12  ;;  %v9815_v12 = vld [vmem:[%s15871_s2 + $0xde8] sm:$0xf]  ;;  %v16361_v39 = vld [vmem:[#allocation63_spill] sm:$0xff] }
 0x6ef   :  { %6061 = vmatmul.bf16.gmra.mxu2 %v16358_v9  ;;  %6317 = vmatpush.bf16.msrb.mxu0 %v9688_v59 }
 0x6f0   :  { %6110 = vmatmul.bf16.gmra.mxu3 %v16359_v28 }
 0x6f1   :  { %6464 = vmatpush.bf16.msrb.mxu3 %v10072_v14 }
 0x6f2   :  { %v5866_v38 = vpop.f32.mrf.mxu2 }
 0x6f3   :  { %v5867_v46 = vadd.f32 %v5866_v38, %v5818_v4  ;;  %v5915_v40 = vpop.f32.mrf.mxu3  ;;  %v5770_v28 = vpop.f32.mrf.mxu0  ;;  %v9816_v4 = vor.u32 %v10660_v54, %v9815_v12  ;;  %v9927_v12 = vld [vmem:[%s15871_s2 + $0xec8] sm:$0xf] }
 0x6f4   :  { %v5771_v2 = vadd.f32 %v5770_v28, %v13995_v58  ;;  %v5819_v10 = vpop.f32.mrf.mxu1 }
 0x6f5   :  { %v14227_v9 = vadd.f32 %v5915_v40, %v5867_v46  ;;  %6366 = vmatpush.bf16.msrb.mxu1 %v9816_v4  ;;  %v16360_v40 = vld [vmem:[#allocation62_spill] sm:$0xff] }
 0x6f6   :  { %v5820_v50 = vadd.f32 %v5819_v10, %v5771_v2  ;;  %v10688_v2 = vld [vmem:[%s15871_s2 + $0xed4] sm:$0xf0]  ;;  %v9671_v10 = vld [vmem:[%s15871_s2 + $0xcc8] sm:$0xf] }
 0x6f7   :  { %v9928_v54 = vor.u32 %v10688_v2, %v9927_v12  ;;  %v10055_v4 = vld [vmem:[%s15871_s2 + $0xfc8] sm:$0xf] }
 0x6f9   :  { %6416 = vmatpush.bf16.msrb.mxu2 %v9928_v54 }
 0x6fa   :  { %v5868_v37 = vpop.f32.mrf.mxu2 }
 0x6fb   :  { %v5869_v23 = vadd.f32 %v5868_v37, %v5820_v50  ;;  %v5917_v15 = vpop.f32.mrf.mxu3  ;;  %v5773_v28 = vpop.f32.mrf.mxu0  ;;  %v10624_v50 = vld [vmem:[%s15871_s2 + $0xcd4] sm:$0xf0] }
 0x6fc   :  { %v5774_v38 = vadd.f32 %v5773_v28, %v13995_v58  ;;  %v5822_v59 = vpop.f32.mrf.mxu1  ;;  %v10720_v37 = vld [vmem:[%s15871_s2 + $0xfd4] sm:$0xf0] }
 0x6fd   :  { %v14236_v14 = vadd.f32 %v5917_v15, %v5869_v23  ;;  %v9672_v15 = vor.u32 %v10624_v50, %v9671_v10  ;;  %v10056_v28 = vor.u32 %v10720_v37, %v10055_v4  ;;  %v10656_v10 = vld [vmem:[%s15871_s2 + $0xdd4] sm:$0xf0] }
 0x6fe   :  { %v5823_v46 = vadd.f32 %v5822_v59, %v5774_v38  ;;  %5968 = vmatmul.bf16.gmra.mxu0 %v16360_v40  ;;  %6017 = vmatmul.bf16.gmra.mxu1 %v16361_v39  ;;  %v9799_v39 = vld [vmem:[%s15871_s2 + $0xdc8] sm:$0xf]  ;;  %v16366_v40 = vld [vmem:[#allocation68_spill] sm:$0xff] }
 0x6ff   :  { %6066 = vmatmul.bf16.gmra.mxu2 %v16362_v36  ;;  %6318 = vmatpush.bf16.msrb.mxu0 %v9672_v15 }
 0x700   :  { %6115 = vmatmul.bf16.gmra.mxu3 %v16363_v30 }
 0x701   :  { %6465 = vmatpush.bf16.msrb.mxu3 %v10056_v28 }
 0x702   :  { %v5871_v23 = vpop.f32.mrf.mxu2 }
 0x703   :  { %v5872_v38 = vadd.f32 %v5871_v23, %v5823_v46  ;;  %v5920_v59 = vpop.f32.mrf.mxu3  ;;  %v5775_v30 = vpop.f32.mrf.mxu0  ;;  %v9800_v46 = vor.u32 %v10656_v10, %v9799_v39  ;;  %v9911_v39 = vld [vmem:[%s15871_s2 + $0xea8] sm:$0xf]  ;;  %v10620_v10 = vld [vmem:[%s15871_s2 + $0xcb4] sm:$0xf0] }
 0x704   :  { %v5776_v12 = vadd.f32 %v5775_v30, %v13995_v58  ;;  %v5824_v2 = vpop.f32.mrf.mxu1 }
 0x705   :  { %v14261_v36 = vadd.f32 %v5920_v59, %v5872_v38  ;;  %6367 = vmatpush.bf16.msrb.mxu1 %v9800_v46  ;;  %v16364_v38 = vld [vmem:[#allocation66_spill] sm:$0xff]  ;;  %v16365_v59 = vld [vmem:[#allocation67_spill] sm:$0xff]  ;;  %v10716_v46 = vld [vmem:[%s15871_s2 + $0xfb4] sm:$0xf0] }
 0x706   :  { %v5825_v50 = vadd.f32 %v5824_v2, %v5776_v12  ;;  %v9655_v12 = vld [vmem:[%s15871_s2 + $0xca8] sm:$0xf] }
 0x70a   :  { %v5873_v4 = vpop.f32.mrf.mxu2 }
 0x70b   :  { %v5874_v54 = vadd.f32 %v5873_v4, %v5825_v50  ;;  %v5922_v37 = vpop.f32.mrf.mxu3  ;;  %v5934_v30 = vpop.f32.mrf.mxu0  ;;  %v10039_v50 = vld [vmem:[%s15871_s2 + $0xfa8] sm:$0xf] }
 0x70c   :  { %v5935_v58 = vadd.f32 %v5934_v30, %v14023_v41  ;;  %v5983_v23 = vpop.f32.mrf.mxu1  ;;  %v10684_v41 = vld [vmem:[%s15871_s2 + $0xeb4] sm:$0xf0] }
 0x70d   :  { %v14270_v15 = vadd.f32 %v5922_v37, %v5874_v54  ;;  %v9912_v2 = vor.u32 %v10684_v41, %v9911_v39  ;;  %v9656_v54 = vor.u32 %v10620_v10, %v9655_v12  ;;  %v10040_v37 = vor.u32 %v10716_v46, %v10039_v50  ;;  %v10652_v12 = vld [vmem:[%s15871_s2 + $0xdb4] sm:$0xf0] }
 0x70e   :  { %v5984_v28 = vadd.f32 %v5983_v23, %v5935_v58  ;;  %6129 = vmatmul.bf16.vlgmr.msra.gmra.mxu0 %v11266_v44  ;;  %6178 = vmatmul.bf16.vlgmr.msra.gmra.mxu1 %v16364_v38  ;;  %v16369_v38 = vld [vmem:[#allocation71_spill] sm:$0xff] }
 0x70f   :  { %6227 = vmatmul.bf16.vlgmr.msra.gmra.mxu2 %v16365_v59  ;;  %6319 = vmatpush.bf16.msrb.mxu0 %v9656_v54  ;;  %v9783_v59 = vld [vmem:[%s15871_s2 + $0xda8] sm:$0xf] }
 0x710   :  { %6276 = vmatmul.bf16.vlgmr.msra.gmra.mxu3 %v16366_v40  ;;  %6417 = vmatpush.bf16.msrb.mxu2 %v9912_v2 }
 0x711   :  { %6466 = vmatpush.bf16.msrb.mxu3 %v10040_v37 }
 0x712   :  { %v6032_v4 = vpop.f32.mrf.mxu2 }
 0x713   :  { %v6033_v30 = vadd.f32 %v6032_v4, %v5984_v28  ;;  %v6081_v58 = vpop.f32.mrf.mxu3  ;;  %v5936_v23 = vpop.f32.mrf.mxu0  ;;  %v9784_v28 = vor.u32 %v10652_v12, %v9783_v59  ;;  %v9895_v59 = vld [vmem:[%s15871_s2 + $0xe88] sm:$0xf]  ;;  %v10616_v12 = vld [vmem:[%s15871_s2 + $0xc94] sm:$0xf0] }
 0x714   :  { %v5937_v39 = vadd.f32 %v5936_v23, %v14032_v49  ;;  %v5985_v41 = vpop.f32.mrf.mxu1  ;;  %v16368_v23 = vld [vmem:[#allocation70_spill] sm:$0xff] }
 0x715   :  { %v14295_v40 = vadd.f32 %v6081_v58, %v6033_v30  ;;  %6368 = vmatpush.bf16.msrb.mxu1 %v9784_v28  ;;  %v16367_v58 = vld [vmem:[#allocation69_spill] sm:$0xff]  ;;  %v10712_v28 = vld [vmem:[%s15871_s2 + $0xf94] sm:$0xf0] }
 0x716   :  { %v5986_v10 = vadd.f32 %v5985_v41, %v5937_v39  ;;  %v9639_v39 = vld [vmem:[%s15871_s2 + $0xc88] sm:$0xf] }
 0x71a   :  { %v6034_v50 = vpop.f32.mrf.mxu2 }
 0x71b   :  { %v6035_v2 = vadd.f32 %v6034_v50, %v5986_v10  ;;  %v6083_v46 = vpop.f32.mrf.mxu3  ;;  %v5939_v49 = vpop.f32.mrf.mxu0  ;;  %v10023_v10 = vld [vmem:[%s15871_s2 + $0xf88] sm:$0xf] }
 0x71c   :  { %v5940_v4 = vadd.f32 %v5939_v49, %v14057_v62  ;;  %v5988_v54 = vpop.f32.mrf.mxu1  ;;  %v10680_v62 = vld [vmem:[%s15871_s2 + $0xe94] sm:$0xf0] }
 0x71d   :  { %v14304_v37 = vadd.f32 %v6083_v46, %v6035_v2  ;;  %v9896_v41 = vor.u32 %v10680_v62, %v9895_v59  ;;  %v9640_v2 = vor.u32 %v10616_v12, %v9639_v39  ;;  %v10024_v46 = vor.u32 %v10712_v28, %v10023_v10  ;;  %v10648_v39 = vld [vmem:[%s15871_s2 + $0xd94] sm:$0xf0] }
 0x71e   :  { %v5989_v30 = vadd.f32 %v5988_v54, %v5940_v4  ;;  %6134 = vmatmul.bf16.gmra.mxu0 %v11306_v56  ;;  %6183 = vmatmul.bf16.gmra.mxu1 %v16367_v58  ;;  %v16372_v58 = vld [vmem:[#allocation75_spill] sm:$0xff] }
 0x71f   :  { %6232 = vmatmul.bf16.gmra.mxu2 %v16368_v23  ;;  %6320 = vmatpush.bf16.msrb.mxu0 %v9640_v2  ;;  %v9767_v23 = vld [vmem:[%s15871_s2 + $0xd88] sm:$0xf] }
 0x720   :  { %6281 = vmatmul.bf16.gmra.mxu3 %v16369_v38  ;;  %6418 = vmatpush.bf16.msrb.mxu2 %v9896_v41 }
 0x721   :  { %6467 = vmatpush.bf16.msrb.mxu3 %v10024_v46 }
 0x722   :  { %v6037_v50 = vpop.f32.mrf.mxu2 }
 0x723   :  { %v6038_v49 = vadd.f32 %v6037_v50, %v5989_v30  ;;  %v6086_v4 = vpop.f32.mrf.mxu3  ;;  %v5941_v54 = vpop.f32.mrf.mxu0  ;;  %v9768_v30 = vor.u32 %v10648_v39, %v9767_v23  ;;  %v9879_v23 = vld [vmem:[%s15871_s2 + $0xe68] sm:$0xf]  ;;  %v10612_v39 = vld [vmem:[%s15871_s2 + $0xc74] sm:$0xf0] }
 0x724   :  { %v5942_v59 = vadd.f32 %v5941_v54, %v14066_v53  ;;  %v5990_v62 = vpop.f32.mrf.mxu1  ;;  %v16371_v54 = vld [vmem:[#allocation74_spill] sm:$0xff] }
 0x725   :  { %v14329_v38 = vadd.f32 %v6086_v4, %v6038_v49  ;;  %6369 = vmatpush.bf16.msrb.mxu1 %v9768_v30  ;;  %v16370_v4 = vld [vmem:[#allocation73_spill] sm:$0xff]  ;;  %v10708_v30 = vld [vmem:[%s15871_s2 + $0xf74] sm:$0xf0] }
 0x726   :  { %v5991_v12 = vadd.f32 %v5990_v62, %v5942_v59  ;;  %v9623_v59 = vld [vmem:[%s15871_s2 + $0xc68] sm:$0xf] }
 0x72a   :  { %v6039_v10 = vpop.f32.mrf.mxu2 }
 0x72b   :  { %v6040_v41 = vadd.f32 %v6039_v10, %v5991_v12  ;;  %v6088_v28 = vpop.f32.mrf.mxu3  ;;  %v5944_v53 = vpop.f32.mrf.mxu0  ;;  %v10007_v12 = vld [vmem:[%s15871_s2 + $0xf68] sm:$0xf] }
 0x72c   :  { %v5945_v50 = vadd.f32 %v5944_v53, %v14091_v24  ;;  %v5993_v2 = vpop.f32.mrf.mxu1  ;;  %v10676_v24 = vld [vmem:[%s15871_s2 + $0xe74] sm:$0xf0] }
 0x72d   :  { %v14338_v46 = vadd.f32 %v6088_v28, %v6040_v41  ;;  %v9880_v62 = vor.u32 %v10676_v24, %v9879_v23  ;;  %v9624_v41 = vor.u32 %v10612_v39, %v9623_v59  ;;  %v10008_v28 = vor.u32 %v10708_v30, %v10007_v12  ;;  %v10644_v59 = vld [vmem:[%s15871_s2 + $0xd74] sm:$0xf0] }
 0x72e   :  { %v5994_v49 = vadd.f32 %v5993_v2, %v5945_v50  ;;  %6139 = vmatmul.bf16.gmra.mxu0 %v11346_v20  ;;  %6188 = vmatmul.bf16.gmra.mxu1 %v16370_v4  ;;  %v16375_v4 = vld [vmem:[#allocation78_spill] sm:$0xff]  ;;  %v16376_v20 = vld [vmem:[#allocation79_spill] sm:$0xff] }
 0x72f   :  { %6237 = vmatmul.bf16.gmra.mxu2 %v16371_v54  ;;  %6321 = vmatpush.bf16.msrb.mxu0 %v9624_v41  ;;  %v9751_v54 = vld [vmem:[%s15871_s2 + $0xd68] sm:$0xf] }
 0x730   :  { %6286 = vmatmul.bf16.gmra.mxu3 %v16372_v58  ;;  %6419 = vmatpush.bf16.msrb.mxu2 %v9880_v62 }
 0x731   :  { %6468 = vmatpush.bf16.msrb.mxu3 %v10008_v28 }
 0x732   :  { %v6042_v10 = vpop.f32.mrf.mxu2 }
 0x733   :  { %v6043_v53 = vadd.f32 %v6042_v10, %v5994_v49  ;;  %v6091_v50 = vpop.f32.mrf.mxu3  ;;  %v5946_v2 = vpop.f32.mrf.mxu0  ;;  %v9752_v49 = vor.u32 %v10644_v59, %v9751_v54  ;;  %v9863_v54 = vld [vmem:[%s15871_s2 + $0xe48] sm:$0xf]  ;;  %v10608_v59 = vld [vmem:[%s15871_s2 + $0xc54] sm:$0xf0] }
 0x734   :  { %v5947_v23 = vadd.f32 %v5946_v2, %v14100_v32  ;;  %v5995_v24 = vpop.f32.mrf.mxu1  ;;  %v16374_v2 = vld [vmem:[#allocation77_spill] sm:$0xff] }
 0x735   :  { %v14363_v58 = vadd.f32 %v6091_v50, %v6043_v53  ;;  %6370 = vmatpush.bf16.msrb.mxu1 %v9752_v49  ;;  %v16373_v50 = vld [vmem:[#allocation76_spill] sm:$0xff] }
 0x736   :  { %v5996_v39 = vadd.f32 %v5995_v24, %v5947_v23  ;;  %v9607_v23 = vld [vmem:[%s15871_s2 + $0xc48] sm:$0xf]  ;;  %v10704_v49 = vld [vmem:[%s15871_s2 + $0xf54] sm:$0xf0] }
 0x73a   :  { %v6044_v12 = vpop.f32.mrf.mxu2 }
 0x73b   :  { %v6045_v62 = vadd.f32 %v6044_v12, %v5996_v39  ;;  %v6093_v30 = vpop.f32.mrf.mxu3  ;;  %v5949_v32 = vpop.f32.mrf.mxu0  ;;  %v9991_v39 = vld [vmem:[%s15871_s2 + $0xf48] sm:$0xf] }
 0x73c   :  { %v5950_v10 = vadd.f32 %v5949_v32, %v14125_v51  ;;  %v5998_v41 = vpop.f32.mrf.mxu1  ;;  %v10672_v51 = vld [vmem:[%s15871_s2 + $0xe54] sm:$0xf0] }
 0x73d   :  { %v14372_v28 = vadd.f32 %v6093_v30, %v6045_v62  ;;  %v9864_v24 = vor.u32 %v10672_v51, %v9863_v54  ;;  %v9608_v62 = vor.u32 %v10608_v59, %v9607_v23  ;;  %v9992_v30 = vor.u32 %v10704_v49, %v9991_v39  ;;  %v10640_v23 = vld [vmem:[%s15871_s2 + $0xd54] sm:$0xf0] }
 0x73e   :  { %v5999_v53 = vadd.f32 %v5998_v41, %v5950_v10  ;;  %6144 = vmatmul.bf16.gmra.mxu0 %v16373_v50  ;;  %6193 = vmatmul.bf16.gmra.mxu1 %v16374_v2  ;;  %v16379_v2 = vld [vmem:[#allocation82_spill] sm:$0xff]  ;;  %v16380_v50 = vld [vmem:[#allocation83_spill] sm:$0xff] }
 0x73f   :  { %6242 = vmatmul.bf16.gmra.mxu2 %v16375_v4  ;;  %6322 = vmatpush.bf16.msrb.mxu0 %v9608_v62  ;;  %v9735_v4 = vld [vmem:[%s15871_s2 + $0xd48] sm:$0xf] }
 0x740   :  { %6291 = vmatmul.bf16.gmra.mxu3 %v16376_v20  ;;  %6420 = vmatpush.bf16.msrb.mxu2 %v9864_v24 }
 0x741   :  { %6469 = vmatpush.bf16.msrb.mxu3 %v9992_v30 }
 0x742   :  { %v6047_v12 = vpop.f32.mrf.mxu2 }
 0x743   :  { %v6048_v32 = vadd.f32 %v6047_v12, %v5999_v53  ;;  %v6096_v10 = vpop.f32.mrf.mxu3  ;;  %v5951_v41 = vpop.f32.mrf.mxu0  ;;  %v9736_v53 = vor.u32 %v10640_v23, %v9735_v4  ;;  %v9847_v4 = vld [vmem:[%s15871_s2 + $0xe28] sm:$0xf]  ;;  %v10604_v23 = vld [vmem:[%s15871_s2 + $0xc34] sm:$0xf0] }
 0x744   :  { %v5952_v54 = vadd.f32 %v5951_v41, %v14134_v19  ;;  %v6000_v51 = vpop.f32.mrf.mxu1  ;;  %v16378_v41 = vld [vmem:[#allocation81_spill] sm:$0xff] }
 0x745   :  { %v14397_v20 = vadd.f32 %v6096_v10, %v6048_v32  ;;  %6371 = vmatpush.bf16.msrb.mxu1 %v9736_v53  ;;  %v16377_v10 = vld [vmem:[#allocation80_spill] sm:$0xff] }
 0x746   :  { %v6001_v59 = vadd.f32 %v6000_v51, %v5952_v54  ;;  %v9591_v54 = vld [vmem:[%s15871_s2 + $0xc28] sm:$0xf]  ;;  %v10700_v53 = vld [vmem:[%s15871_s2 + $0xf34] sm:$0xf0] }
 0x74a   :  { %v6049_v39 = vpop.f32.mrf.mxu2 }
 0x74b   :  { %v6050_v24 = vadd.f32 %v6049_v39, %v6001_v59  ;;  %v6098_v49 = vpop.f32.mrf.mxu3  ;;  %v5954_v19 = vpop.f32.mrf.mxu0  ;;  %v9975_v59 = vld [vmem:[%s15871_s2 + $0xf28] sm:$0xf] }
 0x74c   :  { %v5955_v12 = vadd.f32 %v5954_v19, %v14159_v6  ;;  %v6003_v62 = vpop.f32.mrf.mxu1  ;;  %v10668_v6 = vld [vmem:[%s15871_s2 + $0xe34] sm:$0xf0] }
 0x74d   :  { %v14406_v30 = vadd.f32 %v6098_v49, %v6050_v24  ;;  %v9848_v51 = vor.u32 %v10668_v6, %v9847_v4  ;;  %v9592_v24 = vor.u32 %v10604_v23, %v9591_v54  ;;  %v9976_v49 = vor.u32 %v10700_v53, %v9975_v59  ;;  %v10636_v54 = vld [vmem:[%s15871_s2 + $0xd34] sm:$0xf0] }
 0x74e   :  { %v6004_v32 = vadd.f32 %v6003_v62, %v5955_v12  ;;  %6149 = vmatmul.bf16.gmra.mxu0 %v16377_v10  ;;  %6198 = vmatmul.bf16.gmra.mxu1 %v16378_v41 }
 0x74f   :  { %6247 = vmatmul.bf16.gmra.mxu2 %v16379_v2  ;;  %6323 = vmatpush.bf16.msrb.mxu0 %v9592_v24  ;;  %v9719_v2 = vld [vmem:[%s15871_s2 + $0xd28] sm:$0xf] }
 0x750   :  { %6296 = vmatmul.bf16.gmra.mxu3 %v16380_v50  ;;  %6421 = vmatpush.bf16.msrb.mxu2 %v9848_v51 }
 0x751   :  { %6470 = vmatpush.bf16.msrb.mxu3 %v9976_v49 }
 0x752   :  { %v6052_v39 = vpop.f32.mrf.mxu2 }
 0x753   :  { %v6053_v19 = vadd.f32 %v6052_v39, %v6004_v32  ;;  %v6101_v12 = vpop.f32.mrf.mxu3  ;;  %v5956_v62 = vpop.f32.mrf.mxu0  ;;  %v9720_v32 = vor.u32 %v10636_v54, %v9719_v2  ;;  %v9831_v2 = vld [vmem:[%s15871_s2 + $0xe08] sm:$0xf]  ;;  %v10600_v54 = vld [vmem:[%s15871_s2 + $0xc14] sm:$0xf0] }
 0x754   :  { %v5957_v4 = vadd.f32 %v5956_v62, %v14168_v42  ;;  %v6005_v6 = vpop.f32.mrf.mxu1  ;;  %v16382_v62 = vld [vmem:[#allocation87_spill] sm:$0xff] }
 0x755   :  { %v14431_v50 = vadd.f32 %v6101_v12, %v6053_v19  ;;  %6372 = vmatpush.bf16.msrb.mxu1 %v9720_v32  ;;  %v16381_v12 = vld [vmem:[#allocation86_spill] sm:$0xff]  ;;  %v10696_v32 = vld [vmem:[%s15871_s2 + $0xf14] sm:$0xf0] }
 0x756   :  { %v6006_v23 = vadd.f32 %v6005_v6, %v5957_v4  ;;  %v9575_v4 = vld [vmem:[%s15871_s2 + $0xc08] sm:$0xf] }
 0x75a   :  { %v6054_v59 = vpop.f32.mrf.mxu2 }
 0x75b   :  { %v6055_v51 = vadd.f32 %v6054_v59, %v6006_v23  ;;  %v6103_v53 = vpop.f32.mrf.mxu3  ;;  %v5959_v42 = vpop.f32.mrf.mxu0  ;;  %v9959_v23 = vld [vmem:[%s15871_s2 + $0xf08] sm:$0xf] }
 0x75c   :  { %v5960_v39 = vadd.f32 %v5959_v42, %v14193_v31  ;;  %v6008_v24 = vpop.f32.mrf.mxu1  ;;  %v10664_v31 = vld [vmem:[%s15871_s2 + $0xe14] sm:$0xf0] }
 0x75d   :  { %v14440_v49 = vadd.f32 %v6103_v53, %v6055_v51  ;;  %v9832_v6 = vor.u32 %v10664_v31, %v9831_v2  ;;  %v9576_v51 = vor.u32 %v10600_v54, %v9575_v4  ;;  %v9960_v53 = vor.u32 %v10696_v32, %v9959_v23  ;;  %v10632_v4 = vld [vmem:[%s15871_s2 + $0xd14] sm:$0xf0] }
 0x75e   :  { %v6009_v19 = vadd.f32 %v6008_v24, %v5960_v39  ;;  %6154 = vmatmul.bf16.gmra.mxu0 %v16276_v33  ;;  %6203 = vmatmul.bf16.gmra.mxu1 %v16277_v47 }
 0x75f   :  { %6252 = vmatmul.bf16.gmra.mxu2 %v16381_v12  ;;  %6324 = vmatpush.bf16.msrb.mxu0 %v9576_v51  ;;  %v9703_v12 = vld [vmem:[%s15871_s2 + $0xd08] sm:$0xf] }
 0x760   :  { %6301 = vmatmul.bf16.gmra.mxu3 %v16382_v62  ;;  %6422 = vmatpush.bf16.msrb.mxu2 %v9832_v6 }
 0x761   :  { %6471 = vmatpush.bf16.msrb.mxu3 %v9960_v53 }
 0x762   :  { %v6057_v59 = vpop.f32.mrf.mxu2 }
 0x763   :  { %v6058_v42 = vadd.f32 %v6057_v59, %v6009_v19  ;;  %v6106_v39 = vpop.f32.mrf.mxu3  ;;  %v5961_v24 = vpop.f32.mrf.mxu0  ;;  %v9704_v19 = vor.u32 %v10632_v4, %v9703_v12  ;;  %v10306_v12 = vld [vmem:[%s15871_s2 + $0x2ec] sm:$0xf]  ;;  %v8153_v4 = vld [vmem:[%s15871_s2 + $0xf8] sm:$0xf0] }
 0x764   :  { %v5962_v2 = vadd.f32 %v5961_v24, %v14202_v1  ;;  %v6010_v31 = vpop.f32.mrf.mxu1  ;;  %v16384_v24 = vld [vmem:[#allocation91_spill] sm:$0xff] }
 0x765   :  { %v14465_v62 = vadd.f32 %v6106_v39, %v6058_v42  ;;  %6373 = vmatpush.bf16.msrb.mxu1 %v9704_v19  ;;  %v16383_v39 = vld [vmem:[#allocation90_spill] sm:$0xff]  ;;  %v8537_v19 = vld [vmem:[%s15871_s2 + $0x3f8] sm:$0xf0] }
 0x766   :  { %v6011_v54 = vadd.f32 %v6010_v31, %v5962_v2  ;;  %v10242_v2 = vld [vmem:[%s15871_s2 + $0xec] sm:$0xf] }
 0x76a   :  { %v6059_v23 = vpop.f32.mrf.mxu2 }
 0x76b   :  { %v6060_v6 = vadd.f32 %v6059_v23, %v6011_v54  ;;  %v6108_v32 = vpop.f32.mrf.mxu3  ;;  %v5964_v1 = vpop.f32.mrf.mxu0  ;;  %v10338_v54 = vld [vmem:[%s15871_s2 + $0x3ec] sm:$0xf] }
 0x76c   :  { %v5965_v59 = vadd.f32 %v5964_v1, %v14227_v9  ;;  %v6013_v51 = vpop.f32.mrf.mxu1  ;;  %v8409_v9 = vld [vmem:[%s15871_s2 + $0x2f8] sm:$0xf0] }
 0x76d   :  { %v14474_v53 = vadd.f32 %v6108_v32, %v6060_v6  ;;  %v8412_v31 = vor.u32 %v10306_v12, %v8409_v9  ;;  %v8156_v6 = vor.u32 %v10242_v2, %v8153_v4  ;;  %v8540_v32 = vor.u32 %v10338_v54, %v8537_v19  ;;  %v8281_v2 = vld [vmem:[%s15871_s2 + $0x1f8] sm:$0xf0] }
 0x76e   :  { %v6014_v42 = vadd.f32 %v6013_v51, %v5965_v59  ;;  %6159 = vmatmul.bf16.gmra.mxu0 %v16175_v27  ;;  %6208 = vmatmul.bf16.gmra.mxu1 %v16176_v13 }
 0x76f   :  { %6257 = vmatmul.bf16.gmra.mxu2 %v16383_v39  ;;  %6513 = vmatpush.bf16.msra.mxu0 %v8156_v6  ;;  %v10274_v39 = vld [vmem:[%s15871_s2 + $0x1ec] sm:$0xf] }
 0x770   :  { %6306 = vmatmul.bf16.gmra.mxu3 %v16384_v24  ;;  %6611 = vmatpush.bf16.msra.mxu2 %v8412_v31 }
 0x771   :  { %6660 = vmatpush.bf16.msra.mxu3 %v8540_v32 }
 0x772   :  { %v6062_v23 = vpop.f32.mrf.mxu2 }
 0x773   :  { %v6063_v1 = vadd.f32 %v6062_v23, %v6014_v42  ;;  %v6111_v59 = vpop.f32.mrf.mxu3  ;;  %v5966_v51 = vpop.f32.mrf.mxu0  ;;  %v8284_v42 = vor.u32 %v10274_v39, %v8281_v2  ;;  %v10302_v39 = vld [vmem:[%s15871_s2 + $0x2cc] sm:$0xf]  ;;  %v8521_v2 = vld [vmem:[%s15871_s2 + $0x3d8] sm:$0xf0] }
 0x774   :  { %v5967_v12 = vadd.f32 %v5966_v51, %v14236_v14  ;;  %v6015_v9 = vpop.f32.mrf.mxu1 }
 0x775   :  { %v14499_v24 = vadd.f32 %v6111_v59, %v6063_v1  ;;  %6562 = vmatpush.bf16.msra.mxu1 %v8284_v42  ;;  %v10238_v59 = vld [vmem:[%s15871_s2 + $0xcc] sm:$0xf] }
 0x776   :  { %v6016_v4 = vadd.f32 %v6015_v9, %v5967_v12  ;;  %v8137_v12 = vld [vmem:[%s15871_s2 + $0xd8] sm:$0xf0]  ;;  %v10334_v9 = vld [vmem:[%s15871_s2 + $0x3cc] sm:$0xf] }
 0x777   :  { %v8140_v42 = vor.u32 %v10238_v59, %v8137_v12  ;;  %v8265_v59 = vld [vmem:[%s15871_s2 + $0x1d8] sm:$0xf0] }
 0x779   :  { %6514 = vmatpush.bf16.msra.mxu0 %v8140_v42 }
 0x77a   :  { %v6064_v54 = vpop.f32.mrf.mxu2 }
 0x77b   :  { %v6065_v31 = vadd.f32 %v6064_v54, %v6016_v4  ;;  %v6113_v19 = vpop.f32.mrf.mxu3  ;;  %v5969_v14 = vpop.f32.mrf.mxu0  ;;  %v8524_v54 = vor.u32 %v10334_v9, %v8521_v2 }
 0x77c   :  { %v5970_v23 = vadd.f32 %v5969_v14, %v14261_v36  ;;  %v6018_v6 = vpop.f32.mrf.mxu1  ;;  %v8393_v36 = vld [vmem:[%s15871_s2 + $0x2d8] sm:$0xf0] }
 0x77d   :  { %v14508_v32 = vadd.f32 %v6113_v19, %v6065_v31  ;;  %v8396_v51 = vor.u32 %v10302_v39, %v8393_v36  ;;  %6661 = vmatpush.bf16.msra.mxu3 %v8524_v54  ;;  %v10270_v36 = vld [vmem:[%s15871_s2 + $0x1cc] sm:$0xf] }
 0x77e   :  { %v6019_v1 = vadd.f32 %v6018_v6, %v5970_v23  ;;  %6164 = vmatmul.bf16.gmra.mxu0 %v11544_v8  ;;  %6213 = vmatmul.bf16.gmra.mxu1 %v11546_v35 }
 0x77f   :  { %6262 = vmatmul.bf16.gmra.mxu2 %v11548_v0 }
 0x780   :  { %6311 = vmatmul.bf16.gmra.mxu3 %v11550_v29  ;;  %6612 = vmatpush.bf16.msra.mxu2 %v8396_v51 }
 0x782   :  { %v6067_v4 = vpop.f32.mrf.mxu2 }
 0x783   :  { %v6068_v31 = vadd.f32 %v6067_v4, %v6019_v1  ;;  %v6116_v19 = vpop.f32.mrf.mxu3  ;;  %v5971_v14 = vpop.f32.mrf.mxu0  ;;  %v8268_v1 = vor.u32 %v10270_v36, %v8265_v59  ;;  %v10330_v36 = vld [vmem:[%s15871_s2 + $0x3ac] sm:$0xf]  ;;  %v8505_v59 = vld [vmem:[%s15871_s2 + $0x3b8] sm:$0xf0] }
 0x784   :  { %v5972_v23 = vadd.f32 %v5971_v14, %v14270_v15  ;;  %v6020_v6 = vpop.f32.mrf.mxu1  ;;  %v10234_v14 = vld [vmem:[%s15871_s2 + $0xac] sm:$0xf] }
 0x785   :  { %v14533_v39 = vadd.f32 %v6116_v19, %v6068_v31  ;;  %6563 = vmatpush.bf16.msra.mxu1 %v8268_v1  ;;  %v10298_v19 = vld [vmem:[%s15871_s2 + $0x2ac] sm:$0xf] }
 0x786   :  { %v6021_v12 = vadd.f32 %v6020_v6, %v5972_v23  ;;  %v8121_v6 = vld [vmem:[%s15871_s2 + $0xb8] sm:$0xf0] }
 0x787   :  { %v8124_v1 = vor.u32 %v10234_v14, %v8121_v6  ;;  %v8249_v14 = vld [vmem:[%s15871_s2 + $0x1b8] sm:$0xf0] }
 0x789   :  { %6515 = vmatpush.bf16.msra.mxu0 %v8124_v1 }
 0x78a   :  { %v6069_v9 = vpop.f32.mrf.mxu2 }
 0x78b   :  { %v6070_v51 = vadd.f32 %v6069_v9, %v6021_v12  ;;  %v6118_v2 = vpop.f32.mrf.mxu3  ;;  %v6130_v15 = vpop.f32.mrf.mxu0  ;;  %v8508_v9 = vor.u32 %v10330_v36, %v8505_v59 }
 0x78c   :  { %v6131_v4 = vadd.f32 %v6130_v15, %v14295_v40  ;;  %v6179_v42 = vpop.f32.mrf.mxu1  ;;  %v8377_v40 = vld [vmem:[%s15871_s2 + $0x2b8] sm:$0xf0] }
 0x78d   :  { %v14542_v54 = vadd.f32 %v6118_v2, %v6070_v51  ;;  %v8380_v23 = vor.u32 %v10298_v19, %v8377_v40  ;;  %6662 = vmatpush.bf16.msra.mxu3 %v8508_v9  ;;  %v10266_v40 = vld [vmem:[%s15871_s2 + $0x1ac] sm:$0xf] }
 0x78e   :  { %v6180_v31 = vadd.f32 %v6179_v42, %v6131_v4  ;;  %6325 = vmatmul.bf16.vlgmr.msrb.gmra.mxu0 %v11580_v7  ;;  %6374 = vmatmul.bf16.vlgmr.msrb.gmra.mxu1 %v11582_v43 }
 0x78f   :  { %6423 = vmatmul.bf16.vlgmr.msrb.gmra.mxu2 %v11584_v61 }
 0x790   :  { %6472 = vmatmul.bf16.vlgmr.msrb.gmra.mxu3 %v11586_v11  ;;  %6613 = vmatpush.bf16.msra.mxu2 %v8380_v23 }
 0x792   :  { %v6228_v12 = vpop.f32.mrf.mxu2 }
 0x793   :  { %v6229_v51 = vadd.f32 %v6228_v12, %v6180_v31  ;;  %v6277_v2 = vpop.f32.mrf.mxu3  ;;  %v6132_v15 = vpop.f32.mrf.mxu0  ;;  %v8252_v31 = vor.u32 %v10266_v40, %v8249_v14  ;;  %v10326_v40 = vld [vmem:[%s15871_s2 + $0x38c] sm:$0xf]  ;;  %v8489_v14 = vld [vmem:[%s15871_s2 + $0x398] sm:$0xf0] }
 0x794   :  { %v6133_v4 = vadd.f32 %v6132_v15, %v14304_v37  ;;  %v6181_v42 = vpop.f32.mrf.mxu1  ;;  %v10230_v15 = vld [vmem:[%s15871_s2 + $0x8c] sm:$0xf] }
 0x795   :  { %v14567_v19 = vadd.f32 %v6277_v2, %v6229_v51  ;;  %6564 = vmatpush.bf16.msra.mxu1 %v8252_v31  ;;  %v10294_v2 = vld [vmem:[%s15871_s2 + $0x28c] sm:$0xf] }
 0x796   :  { %v6182_v6 = vadd.f32 %v6181_v42, %v6133_v4  ;;  %v8105_v42 = vld [vmem:[%s15871_s2 + $0x98] sm:$0xf0] }
 0x797   :  { %v8108_v31 = vor.u32 %v10230_v15, %v8105_v42  ;;  %v8233_v15 = vld [vmem:[%s15871_s2 + $0x198] sm:$0xf0] }
 0x799   :  { %6516 = vmatpush.bf16.msra.mxu0 %v8108_v31 }
 0x79a   :  { %v6230_v36 = vpop.f32.mrf.mxu2 }
 0x79b   :  { %v6231_v23 = vadd.f32 %v6230_v36, %v6182_v6  ;;  %v6279_v59 = vpop.f32.mrf.mxu3  ;;  %v6135_v37 = vpop.f32.mrf.mxu0  ;;  %v8492_v36 = vor.u32 %v10326_v40, %v8489_v14 }
 0x79c   :  { %v6136_v12 = vadd.f32 %v6135_v37, %v14329_v38  ;;  %v6184_v1 = vpop.f32.mrf.mxu1  ;;  %v8361_v38 = vld [vmem:[%s15871_s2 + $0x298] sm:$0xf0] }
 0x79d   :  { %v14576_v9 = vadd.f32 %v6279_v59, %v6231_v23  ;;  %v8364_v4 = vor.u32 %v10294_v2, %v8361_v38  ;;  %6663 = vmatpush.bf16.msra.mxu3 %v8492_v36  ;;  %v10262_v38 = vld [vmem:[%s15871_s2 + $0x18c] sm:$0xf] }
 0x79e   :  { %v6185_v51 = vadd.f32 %v6184_v1, %v6136_v12  ;;  %6330 = vmatmul.bf16.gmra.mxu0 %v11616_v48  ;;  %6379 = vmatmul.bf16.gmra.mxu1 %v11618_v55 }
 0x79f   :  { %6428 = vmatmul.bf16.gmra.mxu2 %v11620_v17 }
 0x7a0   :  { %6477 = vmatmul.bf16.gmra.mxu3 %v11622_v25  ;;  %6614 = vmatpush.bf16.msra.mxu2 %v8364_v4 }
 0x7a2   :  { %v6233_v6 = vpop.f32.mrf.mxu2 }
 0x7a3   :  { %v6234_v23 = vadd.f32 %v6233_v6, %v6185_v51  ;;  %v6282_v59 = vpop.f32.mrf.mxu3  ;;  %v6137_v37 = vpop.f32.mrf.mxu0  ;;  %v8236_v51 = vor.u32 %v10262_v38, %v8233_v15  ;;  %v10322_v38 = vld [vmem:[%s15871_s2 + $0x36c] sm:$0xf]  ;;  %v8473_v15 = vld [vmem:[%s15871_s2 + $0x378] sm:$0xf0] }
 0x7a4   :  { %v6138_v12 = vadd.f32 %v6137_v37, %v14338_v46  ;;  %v6186_v1 = vpop.f32.mrf.mxu1  ;;  %v10226_v37 = vld [vmem:[%s15871_s2 + $0x6c] sm:$0xf] }
 0x7a5   :  { %v14601_v2 = vadd.f32 %v6282_v59, %v6234_v23  ;;  %6565 = vmatpush.bf16.msra.mxu1 %v8236_v51  ;;  %v10290_v59 = vld [vmem:[%s15871_s2 + $0x26c] sm:$0xf] }
 0x7a6   :  { %v6187_v42 = vadd.f32 %v6186_v1, %v6138_v12  ;;  %v8089_v1 = vld [vmem:[%s15871_s2 + $0x78] sm:$0xf0] }
 0x7a7   :  { %v8092_v51 = vor.u32 %v10226_v37, %v8089_v1  ;;  %v8217_v37 = vld [vmem:[%s15871_s2 + $0x178] sm:$0xf0] }
 0x7a9   :  { %6517 = vmatpush.bf16.msra.mxu0 %v8092_v51 }
 0x7aa   :  { %v6235_v40 = vpop.f32.mrf.mxu2 }
 0x7ab   :  { %v6236_v4 = vadd.f32 %v6235_v40, %v6187_v42  ;;  %v6284_v14 = vpop.f32.mrf.mxu3  ;;  %v6140_v46 = vpop.f32.mrf.mxu0  ;;  %v8476_v40 = vor.u32 %v10322_v38, %v8473_v15 }
 0x7ac   :  { %v6141_v6 = vadd.f32 %v6140_v46, %v14363_v58  ;;  %v6189_v31 = vpop.f32.mrf.mxu1  ;;  %v8345_v58 = vld [vmem:[%s15871_s2 + $0x278] sm:$0xf0] }
 0x7ad   :  { %v14610_v36 = vadd.f32 %v6284_v14, %v6236_v4  ;;  %v8348_v12 = vor.u32 %v10290_v59, %v8345_v58  ;;  %6664 = vmatpush.bf16.msra.mxu3 %v8476_v40  ;;  %v10258_v58 = vld [vmem:[%s15871_s2 + $0x16c] sm:$0xf] }
 0x7ae   :  { %v6190_v23 = vadd.f32 %v6189_v31, %v6141_v6  ;;  %6335 = vmatmul.bf16.gmra.mxu0 %v11652_v57  ;;  %6384 = vmatmul.bf16.gmra.mxu1 %v11654_v3 }
 0x7af   :  { %6433 = vmatmul.bf16.gmra.mxu2 %v11656_v26 }
 0x7b0   :  { %6482 = vmatmul.bf16.gmra.mxu3 %v11658_v52  ;;  %6615 = vmatpush.bf16.msra.mxu2 %v8348_v12 }
 0x7b2   :  { %v6238_v42 = vpop.f32.mrf.mxu2 }
 0x7b3   :  { %v6239_v4 = vadd.f32 %v6238_v42, %v6190_v23  ;;  %v6287_v14 = vpop.f32.mrf.mxu3  ;;  %v6142_v46 = vpop.f32.mrf.mxu0  ;;  %v8220_v23 = vor.u32 %v10258_v58, %v8217_v37  ;;  %v10318_v58 = vld [vmem:[%s15871_s2 + $0x34c] sm:$0xf]  ;;  %v8457_v37 = vld [vmem:[%s15871_s2 + $0x358] sm:$0xf0] }
 0x7b4   :  { %v6143_v6 = vadd.f32 %v6142_v46, %v14372_v28  ;;  %v6191_v31 = vpop.f32.mrf.mxu1  ;;  %v10222_v46 = vld [vmem:[%s15871_s2 + $0x4c] sm:$0xf] }
 0x7b5   :  { %v14635_v59 = vadd.f32 %v6287_v14, %v6239_v4  ;;  %6566 = vmatpush.bf16.msra.mxu1 %v8220_v23  ;;  %v10286_v14 = vld [vmem:[%s15871_s2 + $0x24c] sm:$0xf] }
 0x7b6   :  { %v6192_v1 = vadd.f32 %v6191_v31, %v6143_v6  ;;  %v8073_v31 = vld [vmem:[%s15871_s2 + $0x58] sm:$0xf0] }
 0x7b7   :  { %v8076_v23 = vor.u32 %v10222_v46, %v8073_v31  ;;  %v8201_v46 = vld [vmem:[%s15871_s2 + $0x158] sm:$0xf0] }
 0x7b9   :  { %6518 = vmatpush.bf16.msra.mxu0 %v8076_v23 }
 0x7ba   :  { %v6240_v38 = vpop.f32.mrf.mxu2 }
 0x7bb   :  { %v6241_v12 = vadd.f32 %v6240_v38, %v6192_v1  ;;  %v6289_v15 = vpop.f32.mrf.mxu3  ;;  %v6145_v28 = vpop.f32.mrf.mxu0  ;;  %v8460_v38 = vor.u32 %v10318_v58, %v8457_v37 }
 0x7bc   :  { %v6146_v42 = vadd.f32 %v6145_v28, %v14397_v20  ;;  %v6194_v51 = vpop.f32.mrf.mxu1  ;;  %v8329_v20 = vld [vmem:[%s15871_s2 + $0x258] sm:$0xf0] }
 0x7bd   :  { %v14644_v40 = vadd.f32 %v6289_v15, %v6241_v12  ;;  %v8332_v6 = vor.u32 %v10286_v14, %v8329_v20  ;;  %6665 = vmatpush.bf16.msra.mxu3 %v8460_v38  ;;  %v10254_v20 = vld [vmem:[%s15871_s2 + $0x14c] sm:$0xf] }
 0x7be   :  { %v6195_v4 = vadd.f32 %v6194_v51, %v6146_v42  ;;  %6340 = vmatmul.bf16.gmra.mxu0 %v11688_v5  ;;  %6389 = vmatmul.bf16.gmra.mxu1 %v11690_v16 }
 0x7bf   :  { %6438 = vmatmul.bf16.gmra.mxu2 %v11692_v63 }
 0x7c0   :  { %6487 = vmatmul.bf16.gmra.mxu3 %v11694_v22  ;;  %6616 = vmatpush.bf16.msra.mxu2 %v8332_v6 }
 0x7c2   :  { %v6243_v1 = vpop.f32.mrf.mxu2 }
 0x7c3   :  { %v6244_v12 = vadd.f32 %v6243_v1, %v6195_v4  ;;  %v6292_v15 = vpop.f32.mrf.mxu3  ;;  %v6147_v28 = vpop.f32.mrf.mxu0  ;;  %v8204_v4 = vor.u32 %v10254_v20, %v8201_v46  ;;  %v8057_v20 = vld [vmem:[%s15871_s2 + $0x38] sm:$0xf0]  ;;  %v10314_v46 = vld [vmem:[%s15871_s2 + $0x32c] sm:$0xf] }
 0x7c4   :  { %v6148_v42 = vadd.f32 %v6147_v28, %v14406_v30  ;;  %v6196_v51 = vpop.f32.mrf.mxu1  ;;  %v10282_v28 = vld [vmem:[%s15871_s2 + $0x22c] sm:$0xf] }
 0x7c5   :  { %v14669_v14 = vadd.f32 %v6292_v15, %v6244_v12  ;;  %6567 = vmatpush.bf16.msra.mxu1 %v8204_v4  ;;  %v16385_v15 = vld [vmem:[#allocation94_spill] sm:$0xff] }
 0x7c6   :  { %v6197_v31 = vadd.f32 %v6196_v51, %v6148_v42  ;;  %v10218_v42 = vld [vmem:[%s15871_s2 + $0x2c] sm:$0xf] }
 0x7ca   :  { %v6245_v58 = vpop.f32.mrf.mxu2 }
 0x7cb   :  { %v6246_v6 = vadd.f32 %v6245_v58, %v6197_v31  ;;  %v6294_v37 = vpop.f32.mrf.mxu3  ;;  %v6150_v30 = vpop.f32.mrf.mxu0  ;;  %v8441_v31 = vld [vmem:[%s15871_s2 + $0x338] sm:$0xf0]  ;;  %v8060_v58 = vor.u32 %v10218_v42, %v8057_v20 }
 0x7cc   :  { %v6151_v1 = vadd.f32 %v6150_v30, %v14431_v50  ;;  %v6199_v23 = vpop.f32.mrf.mxu1  ;;  %v8313_v50 = vld [vmem:[%s15871_s2 + $0x238] sm:$0xf0] }
 0x7cd   :  { %v14678_v38 = vadd.f32 %v6294_v37, %v6246_v6  ;;  %v8316_v51 = vor.u32 %v10282_v28, %v8313_v50  ;;  %v8444_v6 = vor.u32 %v10314_v46, %v8441_v31  ;;  %6519 = vmatpush.bf16.msra.mxu0 %v8060_v58  ;;  %v8185_v42 = vld [vmem:[%s15871_s2 + $0x138] sm:$0xf0] }
 0x7ce   :  { %v6200_v12 = vadd.f32 %v6199_v23, %v6151_v1  ;;  %6345 = vmatmul.bf16.gmra.mxu0 %v11724_v18  ;;  %6394 = vmatmul.bf16.gmra.mxu1 %v11726_v34  ;;  %v16389_v34 = vld [vmem:[#allocation98_spill] sm:$0xff] }
 0x7cf   :  { %6443 = vmatmul.bf16.gmra.mxu2 %v11728_v45  ;;  %6666 = vmatpush.bf16.msra.mxu3 %v8444_v6  ;;  %v16388_v45 = vld [vmem:[#allocation97_spill] sm:$0xff] }
 0x7d0   :  { %6492 = vmatmul.bf16.gmra.mxu3 %v16385_v15  ;;  %6617 = vmatpush.bf16.msra.mxu2 %v8316_v51  ;;  %v10250_v15 = vld [vmem:[%s15871_s2 + $0x12c] sm:$0xf] }
 0x7d2   :  { %v6248_v4 = vpop.f32.mrf.mxu2 }
 0x7d3   :  { %v6249_v37 = vadd.f32 %v6248_v4, %v6200_v12  ;;  %v6297_v30 = vpop.f32.mrf.mxu3  ;;  %v6152_v1 = vpop.f32.mrf.mxu0  ;;  %v8188_v12 = vor.u32 %v10250_v15, %v8185_v42  ;;  %v10278_v15 = vld [vmem:[%s15871_s2 + $0x20c] sm:$0xf]  ;;  %v8041_v42 = vld [vmem:[%s15871_s2 + $0x18] sm:$0xf0] }
 0x7d4   :  { %v6153_v23 = vadd.f32 %v6152_v1, %v14440_v49  ;;  %v6201_v28 = vpop.f32.mrf.mxu1  ;;  %v16387_v1 = vld [vmem:[#allocation96_spill] sm:$0xff] }
 0x7d5   :  { %v14703_v50 = vadd.f32 %v6297_v30, %v6249_v37  ;;  %6568 = vmatpush.bf16.msra.mxu1 %v8188_v12  ;;  %v16386_v30 = vld [vmem:[#allocation95_spill] sm:$0xff]  ;;  %v8425_v12 = vld [vmem:[%s15871_s2 + $0x318] sm:$0xf0] }
 0x7d6   :  { %v6202_v20 = vadd.f32 %v6201_v28, %v6153_v23  ;;  %v10214_v23 = vld [vmem:[%s15871_s2 + $0xc] sm:$0xf] }
 0x7da   :  { %v6250_v46 = vpop.f32.mrf.mxu2 }
 0x7db   :  { %v6251_v51 = vadd.f32 %v6250_v46, %v6202_v20  ;;  %v6299_v31 = vpop.f32.mrf.mxu3  ;;  %v6155_v49 = vpop.f32.mrf.mxu0  ;;  %v10310_v20 = vld [vmem:[%s15871_s2 + $0x30c] sm:$0xf] }
 0x7dc   :  { %v6156_v4 = vadd.f32 %v6155_v49, %v14465_v62  ;;  %v6204_v58 = vpop.f32.mrf.mxu1  ;;  %v8297_v62 = vld [vmem:[%s15871_s2 + $0x218] sm:$0xf0] }
 0x7dd   :  { %v14712_v6 = vadd.f32 %v6299_v31, %v6251_v51  ;;  %v8300_v28 = vor.u32 %v10278_v15, %v8297_v62  ;;  %v8044_v51 = vor.u32 %v10214_v23, %v8041_v42  ;;  %v8428_v31 = vor.u32 %v10310_v20, %v8425_v12  ;;  %v8169_v23 = vld [vmem:[%s15871_s2 + $0x118] sm:$0xf0] }
 0x7de   :  { %v6205_v37 = vadd.f32 %v6204_v58, %v6156_v4  ;;  %6350 = vmatmul.bf16.gmra.mxu0 %v16386_v30  ;;  %6399 = vmatmul.bf16.gmra.mxu1 %v16387_v1  ;;  %v16392_v1 = vld [vmem:[#allocation102_spill] sm:$0xff] }
 0x7df   :  { %6448 = vmatmul.bf16.gmra.mxu2 %v16388_v45  ;;  %6520 = vmatpush.bf16.msra.mxu0 %v8044_v51  ;;  %v10246_v45 = vld [vmem:[%s15871_s2 + $0x10c] sm:$0xf] }
 0x7e0   :  { %6497 = vmatmul.bf16.gmra.mxu3 %v16389_v34  ;;  %6618 = vmatpush.bf16.msra.mxu2 %v8300_v28 }
 0x7e1   :  { %6667 = vmatpush.bf16.msra.mxu3 %v8428_v31 }
 0x7e2   :  { %v6253_v46 = vpop.f32.mrf.mxu2 }
 0x7e3   :  { %v6254_v49 = vadd.f32 %v6253_v46, %v6205_v37  ;;  %v6302_v4 = vpop.f32.mrf.mxu3  ;;  %v6157_v58 = vpop.f32.mrf.mxu0  ;;  %v8172_v37 = vor.u32 %v10246_v45, %v8169_v23  ;;  %v10434_v45 = vld [vmem:[%s15871_s2 + $0x6ec] sm:$0xf]  ;;  %v8665_v23 = vld [vmem:[%s15871_s2 + $0x4f8] sm:$0xf0] }
 0x7e4   :  { %v6158_v15 = vadd.f32 %v6157_v58, %v14474_v53  ;;  %v6206_v62 = vpop.f32.mrf.mxu1  ;;  %v16391_v58 = vld [vmem:[#allocation101_spill] sm:$0xff] }
 0x7e5   :  { %v14737_v34 = vadd.f32 %v6302_v4, %v6254_v49  ;;  %6569 = vmatpush.bf16.msra.mxu1 %v8172_v37  ;;  %v16390_v4 = vld [vmem:[#allocation100_spill] sm:$0xff] }
 0x7e6   :  { %v6207_v42 = vadd.f32 %v6206_v62, %v6158_v15  ;;  %v10370_v15 = vld [vmem:[%s15871_s2 + $0x4ec] sm:$0xf]  ;;  %v9049_v37 = vld [vmem:[%s15871_s2 + $0x7f8] sm:$0xf0] }
 0x7ea   :  { %v6255_v20 = vpop.f32.mrf.mxu2 }
 0x7eb   :  { %v6256_v28 = vadd.f32 %v6255_v20, %v6207_v42  ;;  %v6304_v12 = vpop.f32.mrf.mxu3  ;;  %v6160_v53 = vpop.f32.mrf.mxu0  ;;  %v10466_v42 = vld [vmem:[%s15871_s2 + $0x7ec] sm:$0xf] }
 0x7ec   :  { %v6161_v46 = vadd.f32 %v6160_v53, %v14499_v24  ;;  %v6209_v51 = vpop.f32.mrf.mxu1  ;;  %v8921_v24 = vld [vmem:[%s15871_s2 + $0x6f8] sm:$0xf0] }
 0x7ed   :  { %v14746_v31 = vadd.f32 %v6304_v12, %v6256_v28  ;;  %v8924_v62 = vor.u32 %v10434_v45, %v8921_v24  ;;  %v8668_v28 = vor.u32 %v10370_v15, %v8665_v23  ;;  %v9052_v12 = vor.u32 %v10466_v42, %v9049_v37  ;;  %v8793_v15 = vld [vmem:[%s15871_s2 + $0x5f8] sm:$0xf0] }
 0x7ee   :  { %v6210_v49 = vadd.f32 %v6209_v51, %v6161_v46  ;;  %6355 = vmatmul.bf16.gmra.mxu0 %v16285_v60  ;;  %6404 = vmatmul.bf16.gmra.mxu1 %v16390_v4  ;;  %v10402_v4 = vld [vmem:[%s15871_s2 + $0x5ec] sm:$0xf] }
 0x7ef   :  { %6453 = vmatmul.bf16.gmra.mxu2 %v16391_v58  ;;  %6709 = vmatpush.bf16.msrb.mxu0 %v8668_v28 }
 0x7f0   :  { %6502 = vmatmul.bf16.gmra.mxu3 %v16392_v1  ;;  %6807 = vmatpush.bf16.msrb.mxu2 %v8924_v62 }
 0x7f1   :  { %6856 = vmatpush.bf16.msrb.mxu3 %v9052_v12 }
 0x7f2   :  { %v6258_v20 = vpop.f32.mrf.mxu2 }
 0x7f3   :  { %v6259_v53 = vadd.f32 %v6258_v20, %v6210_v49  ;;  %v6307_v46 = vpop.f32.mrf.mxu3  ;;  %v6162_v51 = vpop.f32.mrf.mxu0  ;;  %v8796_v49 = vor.u32 %v10402_v4, %v8793_v15  ;;  %v10430_v4 = vld [vmem:[%s15871_s2 + $0x6cc] sm:$0xf] }
 0x7f4   :  { %v6163_v45 = vadd.f32 %v6162_v51, %v14508_v32  ;;  %v6211_v24 = vpop.f32.mrf.mxu1  ;;  %v16395_v51 = vld [vmem:[#allocation105_spill] sm:$0xff] }
 0x7f5   :  { %v14771_v1 = vadd.f32 %v6307_v46, %v6259_v53  ;;  %6758 = vmatpush.bf16.msrb.mxu1 %v8796_v49  ;;  %v16393_v53 = vld [vmem:[#allocation103_spill] sm:$0xff]  ;;  %v16394_v46 = vld [vmem:[#allocation104_spill] sm:$0xff] }
 0x7f6   :  { %v6212_v58 = vadd.f32 %v6211_v24, %v6163_v45  ;;  %v16396_v45 = vld [vmem:[#allocation106_spill] sm:$0xff]  ;;  %v8649_v49 = vld [vmem:[%s15871_s2 + $0x4d8] sm:$0xf0] }
 0x7fa   :  { %v6260_v23 = vpop.f32.mrf.mxu2 }
 0x7fb   :  { %v6261_v62 = vadd.f32 %v6260_v23, %v6212_v58  ;;  %v6309_v42 = vpop.f32.mrf.mxu3  ;;  %v6165_v32 = vpop.f32.mrf.mxu0  ;;  %v10366_v58 = vld [vmem:[%s15871_s2 + $0x4cc] sm:$0xf] }
 0x7fc   :  { %v6166_v37 = vadd.f32 %v6165_v32, %v14533_v39  ;;  %v6214_v20 = vpop.f32.mrf.mxu1  ;;  %v8905_v39 = vld [vmem:[%s15871_s2 + $0x6d8] sm:$0xf0]  ;;  %v10462_v23 = vld [vmem:[%s15871_s2 + $0x7cc] sm:$0xf] }
 0x7fd   :  { %v14780_v28 = vadd.f32 %v6309_v42, %v6261_v62  ;;  %v8908_v15 = vor.u32 %v10430_v4, %v8905_v39  ;;  %v9033_v62 = vld [vmem:[%s15871_s2 + $0x7d8] sm:$0xf0] }
 0x7fe   :  { %v6215_v12 = vadd.f32 %v6214_v20, %v6166_v37  ;;  %6360 = vmatmul.bf16.gmra.mxu0 %v16393_v53  ;;  %6409 = vmatmul.bf16.gmra.mxu1 %v16394_v46  ;;  %v8652_v20 = vor.u32 %v10366_v58, %v8649_v49  ;;  %v10398_v53 = vld [vmem:[%s15871_s2 + $0x5cc] sm:$0xf] }
 0x7ff   :  { %6458 = vmatmul.bf16.gmra.mxu2 %v16395_v51 }
 0x800   :  { %6507 = vmatmul.bf16.gmra.mxu3 %v16396_v45  ;;  %v9036_v45 = vor.u32 %v10462_v23, %v9033_v62  ;;  %6808 = vmatpush.bf16.msrb.mxu2 %v8908_v15 }
 0x801   :  { %6710 = vmatpush.bf16.msrb.mxu0 %v8652_v20  ;;  %v16400_v20 = vld [vmem:[#allocation5_spill] sm:$0xff] }
 0x802   :  { %v6263_v24 = vpop.f32.mrf.mxu2  ;;  %6857 = vmatpush.bf16.msrb.mxu3 %v9036_v45  ;;  %v16397_v45 = vld [vmem:[#allocation2_spill] sm:$0xff] }
 0x803   :  { %v6264_v42 = vadd.f32 %v6263_v24, %v6215_v12  ;;  %v6312_v32 = vpop.f32.mrf.mxu3  ;;  %v6167_v37 = vpop.f32.mrf.mxu0  ;;  %v8777_v12 = vld [vmem:[%s15871_s2 + $0x5d8] sm:$0xf0] }
 0x804   :  { %v6168_v51 = vadd.f32 %v6167_v37, %v14542_v54  ;;  %v6216_v4 = vpop.f32.mrf.mxu1  ;;  %v8780_v24 = vor.u32 %v10398_v53, %v8777_v12  ;;  %v16399_v37 = vld [vmem:[#allocation4_spill] sm:$0xff]  ;;  %v10426_v53 = vld [vmem:[%s15871_s2 + $0x6ac] sm:$0xf] }
 0x805   :  { %v14805_v39 = vadd.f32 %v6312_v32, %v6264_v42  ;;  %v16398_v32 = vld [vmem:[#allocation3_spill] sm:$0xff]  ;;  %v8633_v12 = vld [vmem:[%s15871_s2 + $0x4b8] sm:$0xf0] }
 0x806   :  { %v6217_v46 = vadd.f32 %v6216_v4, %v6168_v51  ;;  %6759 = vmatpush.bf16.msrb.mxu1 %v8780_v24  ;;  %v10458_v24 = vld [vmem:[%s15871_s2 + $0x7ac] sm:$0xf] }
 0x80a   :  { %v6265_v58 = vpop.f32.mrf.mxu2 }
 0x80b   :  { %v6266_v49 = vadd.f32 %v6265_v58, %v6217_v46  ;;  %v6314_v54 = vpop.f32.mrf.mxu3  ;;  %v6326_v23 = vpop.f32.mrf.mxu0  ;;  %v10362_v46 = vld [vmem:[%s15871_s2 + $0x4ac] sm:$0xf]  ;;  %v9017_v58 = vld [vmem:[%s15871_s2 + $0x7b8] sm:$0xf0] }
 0x80c   :  { %v6327_v15 = vadd.f32 %v6326_v23, %v14567_v19  ;;  %v6375_v62 = vpop.f32.mrf.mxu1  ;;  %v8889_v19 = vld [vmem:[%s15871_s2 + $0x6b8] sm:$0xf0]  ;;  %v9020_v23 = vor.u32 %v10458_v24, %v9017_v58 }
 0x80d   :  { %v14814_v42 = vadd.f32 %v6314_v54, %v6266_v49  ;;  %v8892_v4 = vor.u32 %v10426_v53, %v8889_v19  ;;  %v8636_v54 = vor.u32 %v10362_v46, %v8633_v12  ;;  %v10394_v19 = vld [vmem:[%s15871_s2 + $0x5ac] sm:$0xf]  ;;  %v8761_v46 = vld [vmem:[%s15871_s2 + $0x5b8] sm:$0xf0] }
 0x80e   :  { %v6376_v51 = vadd.f32 %v6375_v62, %v6327_v15  ;;  %6521 = vmatmul.bf16.vlgmr.msra.gmra.mxu0 %v16397_v45  ;;  %6570 = vmatmul.bf16.vlgmr.msra.gmra.mxu1 %v16398_v32  ;;  %v8764_v12 = vor.u32 %v10394_v19, %v8761_v46  ;;  %v8617_v46 = vld [vmem:[%s15871_s2 + $0x498] sm:$0xf0] }
 0x80f   :  { %6619 = vmatmul.bf16.vlgmr.msra.gmra.mxu2 %v16399_v37  ;;  %6711 = vmatpush.bf16.msrb.mxu0 %v8636_v54 }
 0x810   :  { %6668 = vmatmul.bf16.vlgmr.msra.gmra.mxu3 %v16400_v20  ;;  %6809 = vmatpush.bf16.msrb.mxu2 %v8892_v4 }
 0x811   :  { %6858 = vmatpush.bf16.msrb.mxu3 %v9020_v23  ;;  %6760 = vmatpush.bf16.msrb.mxu1 %v8764_v12  ;;  %v10454_v12 = vld [vmem:[%s15871_s2 + $0x78c] sm:$0xf] }
 0x812   :  { %v6424_v49 = vpop.f32.mrf.mxu2 }
 0x813   :  { %v6425_v15 = vadd.f32 %v6424_v49, %v6376_v51  ;;  %v6473_v62 = vpop.f32.mrf.mxu3  ;;  %v6328_v45 = vpop.f32.mrf.mxu0 }
 0x814   :  { %v6329_v32 = vadd.f32 %v6328_v45, %v14576_v9  ;;  %v6377_v37 = vpop.f32.mrf.mxu1 }
 0x815   :  { %v6474_v20 = vadd.f32 %v6473_v62, %v6425_v15  ;;  %v16401_v15 = vld [vmem:[#allocation7_spill] sm:$0xff] }
 0x816   :  { %v6378_v53 = vadd.f32 %v6377_v37, %v6329_v32  ;;  %v16402_v32 = vld [vmem:[#allocation8_spill] sm:$0xff]  ;;  %v16403_v37 = vld [vmem:[#allocation9_spill] sm:$0xff] }
 0x817   :  { %v7299_v62 = vmax.f32 %v6474_v20, 0.0 }
 0x81a   :  { %v6426_v51 = vpop.f32.mrf.mxu2 }
 0x81b   :  { %v6427_v24 = vadd.f32 %v6426_v51, %v6378_v53  ;;  %v6475_v4 = vpop.f32.mrf.mxu3  ;;  %v6331_v58 = vpop.f32.mrf.mxu0  ;;  %v10422_v53 = vld [vmem:[%s15871_s2 + $0x68c] sm:$0xf]  ;;  %v9001_v51 = vld [vmem:[%s15871_s2 + $0x798] sm:$0xf0] }
 0x81c   :  { %v6332_v9 = vadd.f32 %v6331_v58, %v14601_v2  ;;  %v6380_v49 = vpop.f32.mrf.mxu1  ;;  %v8873_v2 = vld [vmem:[%s15871_s2 + $0x698] sm:$0xf0]  ;;  %v9004_v58 = vor.u32 %v10454_v12, %v9001_v51 }
 0x81d   :  { %v6476_v54 = vadd.f32 %v6475_v4, %v6427_v24  ;;  %v8876_v20 = vor.u32 %v10422_v53, %v8873_v2  ;;  %v8745_v53 = vld [vmem:[%s15871_s2 + $0x598] sm:$0xf0] }
 0x81e   :  { %v6381_v23 = vadd.f32 %v6380_v49, %v6332_v9  ;;  %6526 = vmatmul.bf16.gmra.mxu0 %v16192_v21  ;;  %6575 = vmatmul.bf16.gmra.mxu1 %v16401_v15  ;;  %v10358_v21 = vld [vmem:[%s15871_s2 + $0x48c] sm:$0xf] }
 0x81f   :  { %v7303_v45 = vmax.f32 %v6476_v54, 0.0  ;;  %6624 = vmatmul.bf16.gmra.mxu2 %v16402_v32  ;;  %v8620_v4 = vor.u32 %v10358_v21, %v8617_v46  ;;  %6859 = vmatpush.bf16.msrb.mxu3 %v9004_v58  ;;  %v16405_v58 = vld [vmem:[#allocation11_spill] sm:$0xff] }
 0x820   :  { %6673 = vmatmul.bf16.gmra.mxu3 %v16403_v37  ;;  %6810 = vmatpush.bf16.msrb.mxu2 %v8876_v20  ;;  %v10390_v37 = vld [vmem:[%s15871_s2 + $0x58c] sm:$0xf] }
 0x821   :  { %v14859_v19 = vpack.c.bf16 %v7303_v45, %v7299_v62  ;;  %6712 = vmatpush.bf16.msrb.mxu0 %v8620_v4  ;;  %v8748_v2 = vor.u32 %v10390_v37, %v8745_v53  ;;  %v16404_v4 = vld [vmem:[#allocation10_spill] sm:$0xff] }
 0x822   :  { %v6429_v24 = vpop.f32.mrf.mxu2  ;;  %v10450_v53 = vld [vmem:[%s15871_s2 + $0x76c] sm:$0xf] }
 0x823   :  { %v6430_v9 = vadd.f32 %v6429_v24, %v6381_v23  ;;  %v6478_v49 = vpop.f32.mrf.mxu3  ;;  %v6333_v54 = vpop.f32.mrf.mxu0  ;;  %6761 = vmatpush.bf16.msrb.mxu1 %v8748_v2  ;;  %v8985_v2 = vld [vmem:[%s15871_s2 + $0x778] sm:$0xf0] }
 0x824   :  { %v6334_v15 = vadd.f32 %v6333_v54, %v14610_v36  ;;  %v6382_v62 = vpop.f32.mrf.mxu1  ;;  %v16406_v54 = vld [vmem:[#allocation12_spill] sm:$0xff] }
 0x825   :  { %v6479_v45 = vadd.f32 %v6478_v49, %v6430_v9 }
 0x826   :  { %v6383_v32 = vadd.f32 %v6382_v62, %v6334_v15  ;;  %v16407_v15 = vld [vmem:[#allocation13_spill] sm:$0xff]  ;;  %v10418_v62 = vld [vmem:[%s15871_s2 + $0x66c] sm:$0xf] }
 0x827   :  { %v7307_v9 = vmax.f32 %v6479_v45, 0.0  ;;  %v8601_v45 = vld [vmem:[%s15871_s2 + $0x478] sm:$0xf0] }
 0x82a   :  { %v6431_v23 = vpop.f32.mrf.mxu2 }
 0x82b   :  { %v6432_v21 = vadd.f32 %v6431_v23, %v6383_v32  ;;  %v6480_v20 = vpop.f32.mrf.mxu3  ;;  %v6336_v46 = vpop.f32.mrf.mxu0  ;;  %v10354_v32 = vld [vmem:[%s15871_s2 + $0x46c] sm:$0xf] }
 0x82c   :  { %v6337_v36 = vadd.f32 %v6336_v46, %v14635_v59  ;;  %v6385_v12 = vpop.f32.mrf.mxu1  ;;  %v8857_v59 = vld [vmem:[%s15871_s2 + $0x678] sm:$0xf0]  ;;  %v8988_v46 = vor.u32 %v10450_v53, %v8985_v2 }
 0x82d   :  { %v6481_v51 = vadd.f32 %v6480_v20, %v6432_v21  ;;  %v8860_v37 = vor.u32 %v10418_v62, %v8857_v59  ;;  %v8604_v20 = vor.u32 %v10354_v32, %v8601_v45  ;;  %v10386_v62 = vld [vmem:[%s15871_s2 + $0x56c] sm:$0xf] }
 0x82e   :  { %v6386_v24 = vadd.f32 %v6385_v12, %v6337_v36  ;;  %6531 = vmatmul.bf16.gmra.mxu0 %v16404_v4  ;;  %6580 = vmatmul.bf16.gmra.mxu1 %v16405_v58 }
 0x82f   :  { %v7311_v49 = vmax.f32 %v6481_v51, 0.0  ;;  %6629 = vmatmul.bf16.gmra.mxu2 %v16406_v54  ;;  %6713 = vmatpush.bf16.msrb.mxu0 %v8604_v20  ;;  %v16410_v20 = vld [vmem:[#allocation15_spill] sm:$0xff] }
 0x830   :  { %6678 = vmatmul.bf16.gmra.mxu3 %v16407_v15  ;;  %6811 = vmatpush.bf16.msrb.mxu2 %v8860_v37 }
 0x831   :  { %v14900_v23 = vpack.c.bf16 %v7311_v49, %v7307_v9  ;;  %6860 = vmatpush.bf16.msrb.mxu3 %v8988_v46  ;;  %v8729_v9 = vld [vmem:[%s15871_s2 + $0x578] sm:$0xf0] }
 0x832   :  { %v6434_v21 = vpop.f32.mrf.mxu2  ;;  %v8732_v49 = vor.u32 %v10386_v62, %v8729_v9  ;;  %v10446_v62 = vld [vmem:[%s15871_s2 + $0x74c] sm:$0xf]  ;;  %v8969_v9 = vld [vmem:[%s15871_s2 + $0x758] sm:$0xf0] }
 0x833   :  { %16408 = vst [vmem:[#allocation80_spill] sm:$0xff] %v14900_v23  ;;  %v6435_v36 = vadd.f32 %v6434_v21, %v6386_v24  ;;  %v6483_v12 = vpop.f32.mrf.mxu3  ;;  %v6338_v51 = vpop.f32.mrf.mxu0  ;;  %v16409_v21 = vld [vmem:[#allocation14_spill] sm:$0xff]  ;;  %v16466_v23 = vld [vmem:[#allocation65_spill] sm:$0xff] }
 0x834   :  { %v6339_v4 = vadd.f32 %v6338_v51, %v14644_v40  ;;  %v6387_v58 = vpop.f32.mrf.mxu1  ;;  %6762 = vmatpush.bf16.msrb.mxu1 %v8732_v49  ;;  %v16412_v51 = vld [vmem:[#allocation17_spill] sm:$0xff] }
 0x835   :  { %v6484_v54 = vadd.f32 %v6483_v12, %v6435_v36  ;;  %v16411_v12 = vld [vmem:[#allocation16_spill] sm:$0xff] }
 0x836   :  { %v6388_v15 = vadd.f32 %v6387_v58, %v6339_v4  ;;  %v10414_v4 = vld [vmem:[%s15871_s2 + $0x64c] sm:$0xf] }
 0x837   :  { %v7315_v46 = vmax.f32 %v6484_v54, 0.0  ;;  %v10350_v58 = vld [vmem:[%s15871_s2 + $0x44c] sm:$0xf]  ;;  %v8585_v54 = vld [vmem:[%s15871_s2 + $0x458] sm:$0xf0] }
 0x83a   :  { %v6436_v24 = vpop.f32.mrf.mxu2 }
 0x83b   :  { %v6437_v59 = vadd.f32 %v6436_v24, %v6388_v15  ;;  %v6485_v32 = vpop.f32.mrf.mxu3  ;;  %v6341_v37 = vpop.f32.mrf.mxu0 }
 0x83c   :  { %v6342_v40 = vadd.f32 %v6341_v37, %v14669_v14  ;;  %v6390_v45 = vpop.f32.mrf.mxu1  ;;  %v8841_v14 = vld [vmem:[%s15871_s2 + $0x658] sm:$0xf0] }
 0x83d   :  { %v6486_v53 = vadd.f32 %v6485_v32, %v6437_v59  ;;  %v8844_v15 = vor.u32 %v10414_v4, %v8841_v14  ;;  %v8588_v59 = vor.u32 %v10350_v58, %v8585_v54  ;;  %v8972_v32 = vor.u32 %v10446_v62, %v8969_v9  ;;  %v16414_v9 = vld [vmem:[#allocation18_spill] sm:$0xff] }
 0x83e   :  { %v6391_v2 = vadd.f32 %v6390_v45, %v6342_v40  ;;  %6536 = vmatmul.bf16.gmra.mxu0 %v16409_v21  ;;  %6585 = vmatmul.bf16.gmra.mxu1 %v16410_v20 }
 0x83f   :  { %v7319_v36 = vmax.f32 %v6486_v53, 0.0  ;;  %6634 = vmatmul.bf16.gmra.mxu2 %v16411_v12  ;;  %6714 = vmatpush.bf16.msrb.mxu0 %v8588_v59 }
 0x840   :  { %6683 = vmatmul.bf16.gmra.mxu3 %v16412_v51  ;;  %6812 = vmatpush.bf16.msrb.mxu2 %v8844_v15  ;;  %v10382_v51 = vld [vmem:[%s15871_s2 + $0x54c] sm:$0xf] }
 0x841   :  { %v14932_v49 = vpack.c.bf16 %v7319_v36, %v7315_v46  ;;  %6861 = vmatpush.bf16.msrb.mxu3 %v8972_v32  ;;  %v8713_v46 = vld [vmem:[%s15871_s2 + $0x558] sm:$0xf0] }
 0x842   :  { %v6439_v24 = vpop.f32.mrf.mxu2  ;;  %v8716_v36 = vor.u32 %v10382_v51, %v8713_v46  ;;  %v8953_v51 = vld [vmem:[%s15871_s2 + $0x738] sm:$0xf0] }
 0x843   :  { %16413 = vst [vmem:[#allocation81_spill] sm:$0xff] %v14932_v49  ;;  %v6440_v37 = vadd.f32 %v6439_v24, %v6391_v2  ;;  %v6488_v40 = vpop.f32.mrf.mxu3  ;;  %v6343_v45 = vpop.f32.mrf.mxu0  ;;  %v16415_v24 = vld [vmem:[#allocation19_spill] sm:$0xff]  ;;  %v16465_v49 = vld [vmem:[#allocation64_spill] sm:$0xff] }
 0x844   :  { %v6344_v53 = vadd.f32 %v6343_v45, %v14678_v38  ;;  %v6392_v21 = vpop.f32.mrf.mxu1  ;;  %6763 = vmatpush.bf16.msrb.mxu1 %v8716_v36  ;;  %v10410_v45 = vld [vmem:[%s15871_s2 + $0x62c] sm:$0xf] }
 0x845   :  { %v6489_v20 = vadd.f32 %v6488_v40, %v6440_v37  ;;  %v16416_v37 = vld [vmem:[#allocation20_spill] sm:$0xff]  ;;  %v16417_v40 = vld [vmem:[#allocation21_spill] sm:$0xff] }
 0x846   :  { %v6393_v12 = vadd.f32 %v6392_v21, %v6344_v53  ;;  %v10346_v53 = vld [vmem:[%s15871_s2 + $0x42c] sm:$0xf] }
 0x847   :  { %v7323_v59 = vmax.f32 %v6489_v20, 0.0  ;;  %v8569_v20 = vld [vmem:[%s15871_s2 + $0x438] sm:$0xf0] }
 0x84a   :  { %v6441_v2 = vpop.f32.mrf.mxu2 }
 0x84b   :  { %v6442_v4 = vadd.f32 %v6441_v2, %v6393_v12  ;;  %v6490_v14 = vpop.f32.mrf.mxu3  ;;  %v6346_v58 = vpop.f32.mrf.mxu0  ;;  %v10442_v12 = vld [vmem:[%s15871_s2 + $0x72c] sm:$0xf]  ;;  %v8572_v2 = vor.u32 %v10346_v53, %v8569_v20 }
 0x84c   :  { %v6347_v38 = vadd.f32 %v6346_v58, %v14703_v50  ;;  %v6395_v15 = vpop.f32.mrf.mxu1  ;;  %v8825_v50 = vld [vmem:[%s15871_s2 + $0x638] sm:$0xf0] }
 0x84d   :  { %v6491_v54 = vadd.f32 %v6490_v14, %v6442_v4  ;;  %v8828_v21 = vor.u32 %v10410_v45, %v8825_v50  ;;  %v8956_v4 = vor.u32 %v10442_v12, %v8953_v51  ;;  %6715 = vmatpush.bf16.msrb.mxu0 %v8572_v2  ;;  %v16419_v12 = vld [vmem:[#allocation22_spill] sm:$0xff]  ;;  %v16420_v51 = vld [vmem:[#allocation23_spill] sm:$0xff] }
 0x84e   :  { %v6396_v62 = vadd.f32 %v6395_v15, %v6347_v38  ;;  %6541 = vmatmul.bf16.gmra.mxu0 %v16414_v9  ;;  %6590 = vmatmul.bf16.gmra.mxu1 %v16415_v24 }
 0x84f   :  { %v7327_v32 = vmax.f32 %v6491_v54, 0.0  ;;  %6639 = vmatmul.bf16.gmra.mxu2 %v16416_v37  ;;  %6862 = vmatpush.bf16.msrb.mxu3 %v8956_v4  ;;  %v10378_v37 = vld [vmem:[%s15871_s2 + $0x52c] sm:$0xf]  ;;  %v16421_v4 = vld [vmem:[#allocation24_spill] sm:$0xff] }
 0x850   :  { %6688 = vmatmul.bf16.gmra.mxu3 %v16417_v40  ;;  %6813 = vmatpush.bf16.msrb.mxu2 %v8828_v21 }
 0x851   :  { %v14964_v46 = vpack.c.bf16 %v7327_v32, %v7323_v59  ;;  %v8697_v59 = vld [vmem:[%s15871_s2 + $0x538] sm:$0xf0] }
 0x852   :  { %v6444_v36 = vpop.f32.mrf.mxu2  ;;  %v8700_v32 = vor.u32 %v10378_v37, %v8697_v59 }
 0x853   :  { %16418 = vst [vmem:[#allocation95_spill] sm:$0xff] %v14964_v46  ;;  %v6445_v14 = vadd.f32 %v6444_v36, %v6396_v62  ;;  %v6493_v58 = vpop.f32.mrf.mxu3  ;;  %v6348_v38 = vpop.f32.mrf.mxu0  ;;  %v16462_v46 = vld [vmem:[#allocation61_spill] sm:$0xff] }
 0x854   :  { %v6349_v15 = vadd.f32 %v6348_v38, %v14712_v6  ;;  %v6397_v54 = vpop.f32.mrf.mxu1  ;;  %6764 = vmatpush.bf16.msrb.mxu1 %v8700_v32  ;;  %v10342_v38 = vld [vmem:[%s15871_s2 + $0x40c] sm:$0xf] }
 0x855   :  { %v6494_v9 = vadd.f32 %v6493_v58, %v6445_v14  ;;  %v16422_v14 = vld [vmem:[#allocation25_spill] sm:$0xff]  ;;  %v10406_v58 = vld [vmem:[%s15871_s2 + $0x60c] sm:$0xf] }
 0x856   :  { %v6398_v24 = vadd.f32 %v6397_v54, %v6349_v15  ;;  %v8553_v54 = vld [vmem:[%s15871_s2 + $0x418] sm:$0xf0] }
 0x857   :  { %v7331_v36 = vmax.f32 %v6494_v9, 0.0  ;;  %v10438_v9 = vld [vmem:[%s15871_s2 + $0x70c] sm:$0xf]  ;;  %v8556_v32 = vor.u32 %v10342_v38, %v8553_v54 }
 0x858   :  { %v16424_v54 = vld [vmem:[#allocation26_spill] sm:$0xff] }
 0x859   :  { %6716 = vmatpush.bf16.msrb.mxu0 %v8556_v32  ;;  %v16426_v32 = vld [vmem:[#allocation28_spill] sm:$0xff] }
 0x85a   :  { %v6446_v62 = vpop.f32.mrf.mxu2 }
 0x85b   :  { %v6447_v40 = vadd.f32 %v6446_v62, %v6398_v24  ;;  %v6495_v45 = vpop.f32.mrf.mxu3  ;;  %v6351_v50 = vpop.f32.mrf.mxu0  ;;  %v8937_v24 = vld [vmem:[%s15871_s2 + $0x718] sm:$0xf0] }
 0x85c   :  { %v6352_v6 = vadd.f32 %v6351_v50, %v14737_v34  ;;  %v6400_v53 = vpop.f32.mrf.mxu1  ;;  %v8809_v34 = vld [vmem:[%s15871_s2 + $0x618] sm:$0xf0]  ;;  %v8940_v62 = vor.u32 %v10438_v9, %v8937_v24  ;;  %v16425_v9 = vld [vmem:[#allocation27_spill] sm:$0xff] }
 0x85d   :  { %v6496_v21 = vadd.f32 %v6495_v45, %v6447_v40  ;;  %v8812_v15 = vor.u32 %v10406_v58, %v8809_v34 }
 0x85e   :  { %v6401_v20 = vadd.f32 %v6400_v53, %v6352_v6  ;;  %6546 = vmatmul.bf16.gmra.mxu0 %v16419_v12  ;;  %6595 = vmatmul.bf16.gmra.mxu1 %v16420_v51  ;;  %v10374_v51 = vld [vmem:[%s15871_s2 + $0x50c] sm:$0xf] }
 0x85f   :  { %v7335_v2 = vmax.f32 %v6496_v21, 0.0  ;;  %6644 = vmatmul.bf16.gmra.mxu2 %v16421_v4  ;;  %6863 = vmatpush.bf16.msrb.mxu3 %v8940_v62  ;;  %v16427_v62 = vld [vmem:[#allocation29_spill] sm:$0xff] }
 0x860   :  { %6693 = vmatmul.bf16.gmra.mxu3 %v16422_v14  ;;  %6814 = vmatpush.bf16.msrb.mxu2 %v8812_v15 }
 0x861   :  { %v14996_v37 = vpack.c.bf16 %v7335_v2, %v7331_v36  ;;  %v8681_v36 = vld [vmem:[%s15871_s2 + $0x518] sm:$0xf0] }
 0x862   :  { %v6449_v59 = vpop.f32.mrf.mxu2  ;;  %v8684_v2 = vor.u32 %v10374_v51, %v8681_v36 }
 0x863   :  { %16423 = vst [vmem:[#allocation2_spill] sm:$0xff] %v14996_v37  ;;  %v6450_v40 = vadd.f32 %v6449_v59, %v6401_v20  ;;  %v6498_v45 = vpop.f32.mrf.mxu3  ;;  %v6353_v50 = vpop.f32.mrf.mxu0  ;;  %v16461_v37 = vld [vmem:[#allocation60_spill] sm:$0xff] }
 0x864   :  { %v6354_v6 = vadd.f32 %v6353_v50, %v14746_v31  ;;  %v6402_v53 = vpop.f32.mrf.mxu1  ;;  %6765 = vmatpush.bf16.msrb.mxu1 %v8684_v2 }
 0x865   :  { %v6499_v21 = vadd.f32 %v6498_v45, %v6450_v40  ;;  %v10562_v40 = vld [vmem:[%s15871_s2 + $0xaec] sm:$0xf] }
 0x866   :  { %v6403_v12 = vadd.f32 %v6402_v53, %v6354_v6  ;;  %v10498_v45 = vld [vmem:[%s15871_s2 + $0x8ec] sm:$0xf]  ;;  %v9177_v6 = vld [vmem:[%s15871_s2 + $0x8f8] sm:$0xf0] }
 0x867   :  { %v7339_v24 = vmax.f32 %v6499_v21, 0.0  ;;  %v10594_v53 = vld [vmem:[%s15871_s2 + $0xbec] sm:$0xf]  ;;  %v9561_v21 = vld [vmem:[%s15871_s2 + $0xbf8] sm:$0xf0]  ;;  %v9180_v36 = vor.u32 %v10498_v45, %v9177_v6  ;;  %v16430_v6 = vld [vmem:[#allocation31_spill] sm:$0xff] }
 0x868   :  { %v9564_v2 = vor.u32 %v10594_v53, %v9561_v21 }
 0x869   :  { %6905 = vmatpush.bf16.msra.mxu0 %v9180_v36  ;;  %v16432_v36 = vld [vmem:[#allocation33_spill] sm:$0xff] }
 0x86a   :  { %v6451_v20 = vpop.f32.mrf.mxu2  ;;  %7052 = vmatpush.bf16.msra.mxu3 %v9564_v2  ;;  %v10558_v2 = vld [vmem:[%s15871_s2 + $0xacc] sm:$0xf] }
 0x86b   :  { %v6452_v4 = vadd.f32 %v6451_v20, %v6403_v12  ;;  %v6500_v14 = vpop.f32.mrf.mxu3  ;;  %v6356_v58 = vpop.f32.mrf.mxu0 }
 0x86c   :  { %v6357_v31 = vadd.f32 %v6356_v58, %v14771_v1  ;;  %v6405_v34 = vpop.f32.mrf.mxu1  ;;  %v9433_v1 = vld [vmem:[%s15871_s2 + $0xaf8] sm:$0xf0] }
 0x86d   :  { %v6501_v38 = vadd.f32 %v6500_v14, %v6452_v4  ;;  %v9436_v50 = vor.u32 %v10562_v40, %v9433_v1 }
 0x86e   :  { %v6406_v15 = vadd.f32 %v6405_v34, %v6357_v31  ;;  %6551 = vmatmul.bf16.gmra.mxu0 %v16424_v54  ;;  %6600 = vmatmul.bf16.gmra.mxu1 %v16425_v9  ;;  %v9305_v54 = vld [vmem:[%s15871_s2 + $0x9f8] sm:$0xf0] }
 0x86f   :  { %v7343_v59 = vmax.f32 %v6501_v38, 0.0  ;;  %6649 = vmatmul.bf16.gmra.mxu2 %v16426_v32  ;;  %v10530_v38 = vld [vmem:[%s15871_s2 + $0x9ec] sm:$0xf] }
 0x870   :  { %6698 = vmatmul.bf16.gmra.mxu3 %v16427_v62  ;;  %7003 = vmatpush.bf16.msra.mxu2 %v9436_v50  ;;  %v16429_v50 = vld [vmem:[#allocation30_spill] sm:$0xff] }
 0x871   :  { %v15028_v12 = vpack.c.bf16 %v7343_v59, %v7339_v24  ;;  %v9308_v24 = vor.u32 %v10530_v38, %v9305_v54 }
 0x872   :  { %v6454_v51 = vpop.f32.mrf.mxu2 }
 0x873   :  { %16428 = vst [vmem:[#allocation3_spill] sm:$0xff] %v15028_v12  ;;  %v6455_v20 = vadd.f32 %v6454_v51, %v6406_v15  ;;  %v6503_v4 = vpop.f32.mrf.mxu3  ;;  %v6358_v14 = vpop.f32.mrf.mxu0  ;;  %6954 = vmatpush.bf16.msra.mxu1 %v9308_v24  ;;  %v16431_v51 = vld [vmem:[#allocation32_spill] sm:$0xff]  ;;  %v16458_v12 = vld [vmem:[#allocation57_spill] sm:$0xff] }
 0x874   :  { %v6359_v58 = vadd.f32 %v6358_v14, %v14780_v28  ;;  %v6407_v31 = vpop.f32.mrf.mxu1  ;;  %v9161_v14 = vld [vmem:[%s15871_s2 + $0x8d8] sm:$0xf0] }
 0x875   :  { %v6504_v34 = vadd.f32 %v6503_v4, %v6455_v20  ;;  %v10494_v20 = vld [vmem:[%s15871_s2 + $0x8cc] sm:$0xf] }
 0x876   :  { %v6408_v9 = vadd.f32 %v6407_v31, %v6359_v58  ;;  %v10590_v58 = vld [vmem:[%s15871_s2 + $0xbcc] sm:$0xf]  ;;  %v9545_v31 = vld [vmem:[%s15871_s2 + $0xbd8] sm:$0xf0]  ;;  %v9164_v54 = vor.u32 %v10494_v20, %v9161_v14 }
 0x877   :  { %v7347_v53 = vmax.f32 %v6504_v34, 0.0  ;;  %v16434_v14 = vld [vmem:[#allocation34_spill] sm:$0xff] }
 0x878   :  { %6906 = vmatpush.bf16.msra.mxu0 %v9164_v54  ;;  %v16436_v54 = vld [vmem:[#allocation36_spill] sm:$0xff] }
 0x87a   :  { %v6456_v15 = vpop.f32.mrf.mxu2 }
 0x87b   :  { %v6457_v59 = vadd.f32 %v6456_v15, %v6408_v9  ;;  %v6505_v32 = vpop.f32.mrf.mxu3  ;;  %v6361_v62 = vpop.f32.mrf.mxu0  ;;  %v9548_v9 = vor.u32 %v10590_v58, %v9545_v31  ;;  %v16435_v58 = vld [vmem:[#allocation35_spill] sm:$0xff] }
 0x87c   :  { %v6362_v28 = vadd.f32 %v6361_v62, %v14805_v39  ;;  %v6410_v40 = vpop.f32.mrf.mxu1  ;;  %v9417_v39 = vld [vmem:[%s15871_s2 + $0xad8] sm:$0xf0] }
 0x87d   :  { %v6506_v1 = vadd.f32 %v6505_v32, %v6457_v59  ;;  %v9420_v4 = vor.u32 %v10558_v2, %v9417_v39  ;;  %7053 = vmatpush.bf16.msra.mxu3 %v9548_v9  ;;  %v16437_v9 = vld [vmem:[#allocation37_spill] sm:$0xff] }
 0x87e   :  { %v6411_v45 = vadd.f32 %v6410_v40, %v6362_v28  ;;  %6556 = vmatmul.bf16.gmra.mxu0 %v16429_v50  ;;  %6605 = vmatmul.bf16.gmra.mxu1 %v16430_v6  ;;  %v10526_v40 = vld [vmem:[%s15871_s2 + $0x9cc] sm:$0xf] }
 0x87f   :  { %v7351_v21 = vmax.f32 %v6506_v1, 0.0  ;;  %6654 = vmatmul.bf16.gmra.mxu2 %v16431_v51  ;;  %v9289_v1 = vld [vmem:[%s15871_s2 + $0x9d8] sm:$0xf0] }
 0x880   :  { %6703 = vmatmul.bf16.gmra.mxu3 %v16432_v36  ;;  %7004 = vmatpush.bf16.msra.mxu2 %v9420_v4  ;;  %v9292_v6 = vor.u32 %v10526_v40, %v9289_v1  ;;  %v9529_v40 = vld [vmem:[%s15871_s2 + $0xbb8] sm:$0xf0] }
 0x881   :  { %v15060_v34 = vpack.c.bf16 %v7351_v21, %v7347_v53 }
 0x882   :  { %v6459_v38 = vpop.f32.mrf.mxu2  ;;  %6955 = vmatpush.bf16.msra.mxu1 %v9292_v6 }
 0x883   :  { %16433 = vst [vmem:[#allocation4_spill] sm:$0xff] %v15060_v34  ;;  %v6460_v24 = vadd.f32 %v6459_v38, %v6411_v45  ;;  %v6508_v15 = vpop.f32.mrf.mxu3  ;;  %v6363_v59 = vpop.f32.mrf.mxu0  ;;  %v10762_v45 = vld [vmem:[%s15872_s3] sm:$0xf]  ;;  %v16457_v34 = vld [vmem:[#allocation56_spill] sm:$0xff] }
 0x884   :  { %v6364_v32 = vadd.f32 %v6363_v59, %v14814_v42  ;;  %v6412_v62 = vpop.f32.mrf.mxu1  ;;  %v15072_v53 = vperm.slane %v10762_v45, 3  ;;  %v10490_v59 = vld [vmem:[%s15871_s2 + $0x8ac] sm:$0xf] }
 0x885   :  { %v6509_v28 = vadd.f32 %v6508_v15, %v6460_v24  ;;  %v10554_v24 = vld [vmem:[%s15871_s2 + $0xaac] sm:$0xf]  ;;  %v9401_v15 = vld [vmem:[%s15871_s2 + $0xab8] sm:$0xf0] }
 0x886   :  { %v6413_v50 = vadd.f32 %v6412_v62, %v6364_v32  ;;  %v9404_v32 = vor.u32 %v10554_v24, %v9401_v15  ;;  %v9145_v62 = vld [vmem:[%s15871_s2 + $0x8b8] sm:$0xf0] }
 0x887   :  { %v7355_v31 = vmax.f32 %v6509_v28, 0.0  ;;  %v10586_v28 = vld [vmem:[%s15871_s2 + $0xbac] sm:$0xf]  ;;  %v9148_v6 = vor.u32 %v10490_v59, %v9145_v62 }
 0x888   :  { %v9532_v45 = vor.u32 %v10586_v28, %v9529_v40  ;;  %7005 = vmatpush.bf16.msra.mxu2 %v9404_v32  ;;  %v16439_v62 = vld [vmem:[#allocation38_spill] sm:$0xff]  ;;  %v16440_v28 = vld [vmem:[#allocation39_spill] sm:$0xff]  ;;  %v16441_v40 = vld [vmem:[#allocation40_spill] sm:$0xff] }
 0x889   :  { %6907 = vmatpush.bf16.msra.mxu0 %v9148_v6  ;;  %v10550_v6 = vld [vmem:[%s15871_s2 + $0xa8c] sm:$0xf] }
 0x88a   :  { %v6461_v42 = vpop.f32.mrf.mxu2  ;;  %7054 = vmatpush.bf16.msra.mxu3 %v9532_v45  ;;  %v9385_v45 = vld [vmem:[%s15871_s2 + $0xa98] sm:$0xf0] }
 0x88b   :  { %v6462_v21 = vadd.f32 %v6461_v42, %v6413_v50  ;;  %v6510_v51 = vpop.f32.mrf.mxu3  ;;  %v6522_v36 = vpop.f32.mrf.mxu0 }
 0x88c   :  { %v6523_v2 = vadd.f32 %v6522_v36, %v15072_v53  ;;  %v6571_v39 = vpop.f32.mrf.mxu1 }
 0x88d   :  { %v6511_v20 = vadd.f32 %v6510_v51, %v6462_v21 }
 0x88e   :  { %v6572_v4 = vadd.f32 %v6571_v39, %v6523_v2  ;;  %6717 = vmatmul.bf16.vlgmr.msrb.gmra.mxu0 %v16434_v14  ;;  %6766 = vmatmul.bf16.vlgmr.msrb.gmra.mxu1 %v16435_v58  ;;  %v9273_v14 = vld [vmem:[%s15871_s2 + $0x9b8] sm:$0xf0] }
 0x88f   :  { %v7359_v38 = vmax.f32 %v6511_v20, 0.0  ;;  %6815 = vmatmul.bf16.vlgmr.msrb.gmra.mxu2 %v16436_v54  ;;  %v10522_v20 = vld [vmem:[%s15871_s2 + $0x9ac] sm:$0xf] }
 0x890   :  { %6864 = vmatmul.bf16.vlgmr.msrb.gmra.mxu3 %v16437_v9 }
 0x891   :  { %v15097_v1 = vpack.c.bf16 %v7359_v38, %v7355_v31 }
 0x892   :  { %v6620_v50 = vpop.f32.mrf.mxu2 }
 0x893   :  { %16438 = vst [vmem:[#allocation5_spill] sm:$0xff] %v15097_v1  ;;  %v6621_v42 = vadd.f32 %v6620_v50, %v6572_v4  ;;  %v6669_v21 = vpop.f32.mrf.mxu3  ;;  %v6524_v51 = vpop.f32.mrf.mxu0  ;;  %v9276_v4 = vor.u32 %v10522_v20, %v9273_v14  ;;  %v16442_v50 = vld [vmem:[#allocation41_spill] sm:$0xff] }
 0x894   :  { %v6525_v36 = vadd.f32 %v6524_v51, %v15072_v53  ;;  %v6573_v2 = vpop.f32.mrf.mxu1  ;;  %v9129_v51 = vld [vmem:[%s15871_s2 + $0x898] sm:$0xf0]  ;;  %v16454_v1 = vld [vmem:[#allocation53_spill] sm:$0xff] }
 0x895   :  { %v15100_v39 = vadd.f32 %v6669_v21, %v6621_v42  ;;  %6956 = vmatpush.bf16.msra.mxu1 %v9276_v4  ;;  %v10486_v42 = vld [vmem:[%s15871_s2 + $0x88c] sm:$0xf]  ;;  %v9388_v21 = vor.u32 %v10550_v6, %v9385_v45 }
 0x896   :  { %v6574_v58 = vadd.f32 %v6573_v2, %v6525_v36  ;;  %v10582_v36 = vld [vmem:[%s15871_s2 + $0xb8c] sm:$0xf]  ;;  %v9513_v2 = vld [vmem:[%s15871_s2 + $0xb98] sm:$0xf0]  ;;  %v9132_v14 = vor.u32 %v10486_v42, %v9129_v51 }
 0x897   :  { %7006 = vmatpush.bf16.msra.mxu2 %v9388_v21 }
 0x898   :  { %6908 = vmatpush.bf16.msra.mxu0 %v9132_v14  ;;  %v16445_v14 = vld [vmem:[#allocation44_spill] sm:$0xff] }
 0x89a   :  { %v6622_v31 = vpop.f32.mrf.mxu2 }
 0x89b   :  { %v6623_v38 = vadd.f32 %v6622_v31, %v6574_v58  ;;  %v6671_v54 = vpop.f32.mrf.mxu3  ;;  %v6527_v9 = vpop.f32.mrf.mxu0  ;;  %v9516_v58 = vor.u32 %v10582_v36, %v9513_v2  ;;  %v16443_v2 = vld [vmem:[#allocation42_spill] sm:$0xff] }
 0x89c   :  { %v6528_v24 = vadd.f32 %v6527_v9, %v15072_v53  ;;  %v6576_v15 = vpop.f32.mrf.mxu1 }
 0x89d   :  { %v15109_v59 = vadd.f32 %v6671_v54, %v6623_v38  ;;  %7055 = vmatpush.bf16.msra.mxu3 %v9516_v58  ;;  %v16446_v58 = vld [vmem:[#allocation45_spill] sm:$0xff] }
 0x89e   :  { %v6577_v32 = vadd.f32 %v6576_v15, %v6528_v24  ;;  %6722 = vmatmul.bf16.gmra.mxu0 %v16439_v62  ;;  %6771 = vmatmul.bf16.gmra.mxu1 %v16440_v28  ;;  %v10518_v15 = vld [vmem:[%s15871_s2 + $0x98c] sm:$0xf]  ;;  %v9257_v62 = vld [vmem:[%s15871_s2 + $0x998] sm:$0xf0] }
 0x89f   :  { %6820 = vmatmul.bf16.gmra.mxu2 %v16441_v40 }
 0x8a0   :  { %6869 = vmatmul.bf16.gmra.mxu3 %v16442_v50 }
 0x8a2   :  { %v6625_v20 = vpop.f32.mrf.mxu2 }
 0x8a3   :  { %v6626_v4 = vadd.f32 %v6625_v20, %v6577_v32  ;;  %v6674_v31 = vpop.f32.mrf.mxu3  ;;  %v6529_v38 = vpop.f32.mrf.mxu0  ;;  %v9260_v32 = vor.u32 %v10518_v15, %v9257_v62  ;;  %v16444_v20 = vld [vmem:[#allocation43_spill] sm:$0xff]  ;;  %v10578_v15 = vld [vmem:[%s15871_s2 + $0xb6c] sm:$0xf]  ;;  %v9497_v62 = vld [vmem:[%s15871_s2 + $0xb78] sm:$0xf0] }
 0x8a4   :  { %v6530_v54 = vadd.f32 %v6529_v38, %v15072_v53  ;;  %v6578_v9 = vpop.f32.mrf.mxu1  ;;  %v10482_v38 = vld [vmem:[%s15871_s2 + $0x86c] sm:$0xf] }
 0x8a5   :  { %v15134_v24 = vadd.f32 %v6674_v31, %v6626_v4  ;;  %6957 = vmatpush.bf16.msra.mxu1 %v9260_v32  ;;  %v10546_v4 = vld [vmem:[%s15871_s2 + $0xa6c] sm:$0xf]  ;;  %v9369_v31 = vld [vmem:[%s15871_s2 + $0xa78] sm:$0xf0] }
 0x8a6   :  { %v6579_v28 = vadd.f32 %v6578_v9, %v6530_v54  ;;  %v9372_v54 = vor.u32 %v10546_v4, %v9369_v31  ;;  %v9113_v9 = vld [vmem:[%s15871_s2 + $0x878] sm:$0xf0] }
 0x8a7   :  { %v9116_v32 = vor.u32 %v10482_v38, %v9113_v9 }
 0x8a8   :  { %7007 = vmatpush.bf16.msra.mxu2 %v9372_v54 }
 0x8a9   :  { %6909 = vmatpush.bf16.msra.mxu0 %v9116_v32  ;;  %v16447_v32 = vld [vmem:[#allocation46_spill] sm:$0xff] }
 0x8aa   :  { %v6627_v40 = vpop.f32.mrf.mxu2 }
 0x8ab   :  { %v6628_v50 = vadd.f32 %v6627_v40, %v6579_v28  ;;  %v6676_v6 = vpop.f32.mrf.mxu3  ;;  %v6532_v45 = vpop.f32.mrf.mxu0  ;;  %v9500_v40 = vor.u32 %v10578_v15, %v9497_v62 }
 0x8ac   :  { %v6533_v42 = vadd.f32 %v6532_v45, %v15072_v53  ;;  %v6581_v21 = vpop.f32.mrf.mxu1 }
 0x8ad   :  { %v15143_v51 = vadd.f32 %v6676_v6, %v6628_v50  ;;  %7056 = vmatpush.bf16.msra.mxu3 %v9500_v40  ;;  %v16448_v40 = vld [vmem:[#allocation47_spill] sm:$0xff] }
 0x8ae   :  { %v6582_v36 = vadd.f32 %v6581_v21, %v6533_v42  ;;  %6727 = vmatmul.bf16.gmra.mxu0 %v16443_v2  ;;  %6776 = vmatmul.bf16.gmra.mxu1 %v16444_v20  ;;  %v10514_v20 = vld [vmem:[%s15871_s2 + $0x96c] sm:$0xf] }
 0x8af   :  { %6825 = vmatmul.bf16.gmra.mxu2 %v16445_v14  ;;  %v9241_v14 = vld [vmem:[%s15871_s2 + $0x978] sm:$0xf0] }
 0x8b0   :  { %6874 = vmatmul.bf16.gmra.mxu3 %v16446_v58 }
 0x8b2   :  { %v6630_v28 = vpop.f32.mrf.mxu2 }
 0x8b3   :  { %v6631_v50 = vadd.f32 %v6630_v28, %v6582_v36  ;;  %v6679_v6 = vpop.f32.mrf.mxu3  ;;  %v6534_v45 = vpop.f32.mrf.mxu0  ;;  %v9244_v36 = vor.u32 %v10514_v20, %v9241_v14  ;;  %v9097_v14 = vld [vmem:[%s15871_s2 + $0x858] sm:$0xf0] }
 0x8b4   :  { %v6535_v42 = vadd.f32 %v6534_v45, %v15072_v53  ;;  %v6583_v21 = vpop.f32.mrf.mxu1  ;;  %v10542_v45 = vld [vmem:[%s15871_s2 + $0xa4c] sm:$0xf] }
 0x8b5   :  { %v15168_v2 = vadd.f32 %v6679_v6, %v6631_v50  ;;  %6958 = vmatpush.bf16.msra.mxu1 %v9244_v36  ;;  %v16449_v50 = vld [vmem:[#allocation48_spill] sm:$0xff]  ;;  %v16450_v6 = vld [vmem:[#allocation49_spill] sm:$0xff] }
 0x8b6   :  { %v6584_v58 = vadd.f32 %v6583_v21, %v6535_v42  ;;  %v9353_v42 = vld [vmem:[%s15871_s2 + $0xa58] sm:$0xf0]  ;;  %v10478_v21 = vld [vmem:[%s15871_s2 + $0x84c] sm:$0xf] }
 0x8b7   :  { %v9356_v20 = vor.u32 %v10542_v45, %v9353_v42  ;;  %v9481_v36 = vld [vmem:[%s15871_s2 + $0xb58] sm:$0xf0] }
 0x8b8   :  { %v9225_v45 = vld [vmem:[%s15871_s2 + $0x958] sm:$0xf0] }
 0x8b9   :  { %7008 = vmatpush.bf16.msra.mxu2 %v9356_v20 }
 0x8ba   :  { %v6632_v4 = vpop.f32.mrf.mxu2 }
 0x8bb   :  { %v6633_v31 = vadd.f32 %v6632_v4, %v6584_v58  ;;  %v6681_v38 = vpop.f32.mrf.mxu3  ;;  %v6537_v54 = vpop.f32.mrf.mxu0  ;;  %v10574_v58 = vld [vmem:[%s15871_s2 + $0xb4c] sm:$0xf] }
 0x8bc   :  { %v6538_v9 = vadd.f32 %v6537_v54, %v15072_v53  ;;  %v6586_v15 = vpop.f32.mrf.mxu1 }
 0x8bd   :  { %v15177_v62 = vadd.f32 %v6681_v38, %v6633_v31  ;;  %v9100_v31 = vor.u32 %v10478_v21, %v9097_v14  ;;  %v9484_v38 = vor.u32 %v10574_v58, %v9481_v36 }
 0x8be   :  { %v6587_v28 = vadd.f32 %v6586_v15, %v6538_v9  ;;  %6732 = vmatmul.bf16.gmra.mxu0 %v16447_v32  ;;  %6781 = vmatmul.bf16.gmra.mxu1 %v16448_v40 }
 0x8bf   :  { %6830 = vmatmul.bf16.gmra.mxu2 %v16449_v50  ;;  %6910 = vmatpush.bf16.msra.mxu0 %v9100_v31 }
 0x8c0   :  { %6879 = vmatmul.bf16.gmra.mxu3 %v16450_v6  ;;  %v10510_v6 = vld [vmem:[%s15871_s2 + $0x94c] sm:$0xf] }
 0x8c1   :  { %7057 = vmatpush.bf16.msra.mxu3 %v9484_v38 }
 0x8c2   :  { %v6635_v4 = vpop.f32.mrf.mxu2 }
 0x8c3   :  { %v6636_v54 = vadd.f32 %v6635_v4, %v6587_v28  ;;  %v6684_v9 = vpop.f32.mrf.mxu3  ;;  %v6539_v15 = vpop.f32.mrf.mxu0  ;;  %v9228_v28 = vor.u32 %v10510_v6, %v9225_v45  ;;  %v10474_v6 = vld [vmem:[%s15871_s2 + $0x82c] sm:$0xf] }
 0x8c4   :  { %v6540_v32 = vadd.f32 %v6539_v15, %v15072_v53  ;;  %v6588_v40 = vpop.f32.mrf.mxu1  ;;  %v16453_v15 = vld [vmem:[#allocation52_spill] sm:$0xff] }
 0x8c5   :  { %v15202_v50 = vadd.f32 %v6684_v9, %v6636_v54  ;;  %6959 = vmatpush.bf16.msra.mxu1 %v9228_v28  ;;  %v16451_v54 = vld [vmem:[#allocation50_spill] sm:$0xff]  ;;  %v16452_v9 = vld [vmem:[#allocation51_spill] sm:$0xff]  ;;  %v9465_v28 = vld [vmem:[%s15871_s2 + $0xb38] sm:$0xf0] }
 0x8c6   :  { %v6589_v42 = vadd.f32 %v6588_v40, %v6540_v32  ;;  %v10538_v32 = vld [vmem:[%s15871_s2 + $0xa2c] sm:$0xf]  ;;  %v9337_v40 = vld [vmem:[%s15871_s2 + $0xa38] sm:$0xf0] }
 0x8c7   :  { %v9340_v45 = vor.u32 %v10538_v32, %v9337_v40  ;;  %v10506_v32 = vld [vmem:[%s15871_s2 + $0x92c] sm:$0xf]  ;;  %v9209_v40 = vld [vmem:[%s15871_s2 + $0x938] sm:$0xf0] }
 0x8c9   :  { %7009 = vmatpush.bf16.msra.mxu2 %v9340_v45 }
 0x8ca   :  { %v6637_v21 = vpop.f32.mrf.mxu2 }
 0x8cb   :  { %v6638_v20 = vadd.f32 %v6637_v21, %v6589_v42  ;;  %v6686_v14 = vpop.f32.mrf.mxu3  ;;  %v6542_v58 = vpop.f32.mrf.mxu0  ;;  %v9081_v42 = vld [vmem:[%s15871_s2 + $0x838] sm:$0xf0] }
 0x8cc   :  { %v6543_v36 = vadd.f32 %v6542_v58, %v15072_v53  ;;  %v6591_v4 = vpop.f32.mrf.mxu1 }
 0x8cd   :  { %v15211_v31 = vadd.f32 %v6686_v14, %v6638_v20  ;;  %v9084_v20 = vor.u32 %v10474_v6, %v9081_v42 }
 0x8ce   :  { %v6592_v38 = vadd.f32 %v6591_v4, %v6543_v36  ;;  %6737 = vmatmul.bf16.gmra.mxu0 %v16451_v54  ;;  %6786 = vmatmul.bf16.gmra.mxu1 %v16452_v9 }
 0x8cf   :  { %6835 = vmatmul.bf16.gmra.mxu2 %v16453_v15  ;;  %6911 = vmatpush.bf16.msra.mxu0 %v9084_v20 }
 0x8d0   :  { %6884 = vmatmul.bf16.gmra.mxu3 %v16454_v1  ;;  %v10570_v1 = vld [vmem:[%s15871_s2 + $0xb2c] sm:$0xf] }
 0x8d1   :  { %v9468_v14 = vor.u32 %v10570_v1, %v9465_v28 }
 0x8d2   :  { %v6640_v21 = vpop.f32.mrf.mxu2 }
 0x8d3   :  { %v6641_v58 = vadd.f32 %v6640_v21, %v6592_v38  ;;  %v6689_v36 = vpop.f32.mrf.mxu3  ;;  %v6544_v4 = vpop.f32.mrf.mxu0  ;;  %7058 = vmatpush.bf16.msra.mxu3 %v9468_v14  ;;  %v9212_v38 = vor.u32 %v10506_v32, %v9209_v40  ;;  %v10470_v32 = vld [vmem:[%s15871_s2 + $0x80c] sm:$0xf] }
 0x8d4   :  { %v6545_v54 = vadd.f32 %v6544_v4, %v15072_v53  ;;  %v6593_v9 = vpop.f32.mrf.mxu1  ;;  %v16456_v4 = vld [vmem:[#allocation55_spill] sm:$0xff] }
 0x8d5   :  { %v15236_v15 = vadd.f32 %v6689_v36, %v6641_v58  ;;  %6960 = vmatpush.bf16.msra.mxu1 %v9212_v38  ;;  %v16455_v36 = vld [vmem:[#allocation54_spill] sm:$0xff] }
 0x8d6   :  { %v6594_v6 = vadd.f32 %v6593_v9, %v6545_v54  ;;  %v10534_v54 = vld [vmem:[%s15871_s2 + $0xa0c] sm:$0xf]  ;;  %v9321_v9 = vld [vmem:[%s15871_s2 + $0xa18] sm:$0xf0] }
 0x8d7   :  { %v9324_v40 = vor.u32 %v10534_v54, %v9321_v9  ;;  %v10502_v54 = vld [vmem:[%s15871_s2 + $0x90c] sm:$0xf]  ;;  %v9193_v9 = vld [vmem:[%s15871_s2 + $0x918] sm:$0xf0] }
 0x8d9   :  { %7010 = vmatpush.bf16.msra.mxu2 %v9324_v40 }
 0x8da   :  { %v6642_v42 = vpop.f32.mrf.mxu2 }
 0x8db   :  { %v6643_v45 = vadd.f32 %v6642_v42, %v6594_v6  ;;  %v6691_v1 = vpop.f32.mrf.mxu3  ;;  %v6547_v28 = vpop.f32.mrf.mxu0  ;;  %v9065_v6 = vld [vmem:[%s15871_s2 + $0x818] sm:$0xf0] }
 0x8dc   :  { %v6548_v21 = vadd.f32 %v6547_v28, %v15072_v53  ;;  %v6596_v20 = vpop.f32.mrf.mxu1  ;;  %v9068_v42 = vor.u32 %v10470_v32, %v9065_v6 }
 0x8dd   :  { %v15245_v14 = vadd.f32 %v6691_v1, %v6643_v45 }
 0x8de   :  { %v6597_v58 = vadd.f32 %v6596_v20, %v6548_v21  ;;  %6742 = vmatmul.bf16.gmra.mxu0 %v16455_v36  ;;  %6791 = vmatmul.bf16.gmra.mxu1 %v16456_v4 }
 0x8df   :  { %6840 = vmatmul.bf16.gmra.mxu2 %v16457_v34  ;;  %v9449_v34 = vld [vmem:[%s15871_s2 + $0xb18] sm:$0xf0]  ;;  %6912 = vmatpush.bf16.msra.mxu0 %v9068_v42 }
 0x8e0   :  { %6889 = vmatmul.bf16.gmra.mxu3 %v16458_v12  ;;  %v10566_v12 = vld [vmem:[%s15871_s2 + $0xb0c] sm:$0xf] }
 0x8e1   :  { %v9452_v45 = vor.u32 %v10566_v12, %v9449_v34 }
 0x8e2   :  { %v6645_v38 = vpop.f32.mrf.mxu2 }
 0x8e3   :  { %v6646_v1 = vadd.f32 %v6645_v38, %v6597_v58  ;;  %v6694_v28 = vpop.f32.mrf.mxu3  ;;  %v6549_v21 = vpop.f32.mrf.mxu0  ;;  %7059 = vmatpush.bf16.msra.mxu3 %v9452_v45  ;;  %v9196_v58 = vor.u32 %v10502_v54, %v9193_v9  ;;  %v10626_v54 = vld [vmem:[%s15871_s2 + $0xcec] sm:$0xf] }
 0x8e4   :  { %v6550_v20 = vadd.f32 %v6549_v21, %v15072_v53  ;;  %v6598_v36 = vpop.f32.mrf.mxu1  ;;  %v16460_v21 = vld [vmem:[#allocation59_spill] sm:$0xff] }
 0x8e5   :  { %v15270_v4 = vadd.f32 %v6694_v28, %v6646_v1  ;;  %6961 = vmatpush.bf16.msra.mxu1 %v9196_v58  ;;  %v16459_v28 = vld [vmem:[#allocation58_spill] sm:$0xff] }
 0x8e6   :  { %v6599_v32 = vadd.f32 %v6598_v36, %v6550_v20  ;;  %v10690_v20 = vld [vmem:[%s15871_s2 + $0xeec] sm:$0xf]  ;;  %v9945_v36 = vld [vmem:[%s15871_s2 + $0xef8] sm:$0xf0] }
 0x8e7   :  { %v9948_v9 = vor.u32 %v10690_v20, %v9945_v36  ;;  %v10658_v20 = vld [vmem:[%s15871_s2 + $0xdec] sm:$0xf]  ;;  %v9817_v36 = vld [vmem:[%s15871_s2 + $0xdf8] sm:$0xf0] }
 0x8e9   :  { %7199 = vmatpush.bf16.msrb.mxu2 %v9948_v9 }
 0x8ea   :  { %v6647_v6 = vpop.f32.mrf.mxu2 }
 0x8eb   :  { %v6648_v40 = vadd.f32 %v6647_v6, %v6599_v32  ;;  %v6696_v12 = vpop.f32.mrf.mxu3  ;;  %v6552_v34 = vpop.f32.mrf.mxu0  ;;  %v9689_v32 = vld [vmem:[%s15871_s2 + $0xcf8] sm:$0xf0] }
 0x8ec   :  { %v6553_v38 = vadd.f32 %v6552_v34, %v15072_v53  ;;  %v6601_v42 = vpop.f32.mrf.mxu1  ;;  %v9692_v6 = vor.u32 %v10626_v54, %v9689_v32 }
 0x8ed   :  { %v15279_v45 = vadd.f32 %v6696_v12, %v6648_v40 }
 0x8ee   :  { %v6602_v1 = vadd.f32 %v6601_v42, %v6553_v38  ;;  %6747 = vmatmul.bf16.gmra.mxu0 %v16459_v28  ;;  %6796 = vmatmul.bf16.gmra.mxu1 %v16460_v21 }
 0x8ef   :  { %6845 = vmatmul.bf16.gmra.mxu2 %v16461_v37  ;;  %v10073_v37 = vld [vmem:[%s15871_s2 + $0xff8] sm:$0xf0]  ;;  %7101 = vmatpush.bf16.msrb.mxu0 %v9692_v6 }
 0x8f0   :  { %6894 = vmatmul.bf16.gmra.mxu3 %v16462_v46  ;;  %v10722_v46 = vld [vmem:[%s15871_s2 + $0xfec] sm:$0xf] }
 0x8f1   :  { %v10076_v40 = vor.u32 %v10722_v46, %v10073_v37 }
 0x8f2   :  { %v6650_v58 = vpop.f32.mrf.mxu2 }
 0x8f3   :  { %v6651_v12 = vadd.f32 %v6650_v58, %v6602_v1  ;;  %v6699_v34 = vpop.f32.mrf.mxu3  ;;  %v6554_v38 = vpop.f32.mrf.mxu0  ;;  %7248 = vmatpush.bf16.msrb.mxu3 %v10076_v40  ;;  %v9820_v1 = vor.u32 %v10658_v20, %v9817_v36  ;;  %v10622_v20 = vld [vmem:[%s15871_s2 + $0xccc] sm:$0xf] }
 0x8f4   :  { %v6555_v42 = vadd.f32 %v6554_v38, %v15072_v53  ;;  %v6603_v28 = vpop.f32.mrf.mxu1  ;;  %v16464_v38 = vld [vmem:[#allocation63_spill] sm:$0xff] }
 0x8f5   :  { %v15304_v21 = vadd.f32 %v6699_v34, %v6651_v12  ;;  %7150 = vmatpush.bf16.msrb.mxu1 %v9820_v1  ;;  %v16463_v34 = vld [vmem:[#allocation62_spill] sm:$0xff] }
 0x8f6   :  { %v6604_v54 = vadd.f32 %v6603_v28, %v6555_v42  ;;  %v10686_v42 = vld [vmem:[%s15871_s2 + $0xecc] sm:$0xf]  ;;  %v9929_v28 = vld [vmem:[%s15871_s2 + $0xed8] sm:$0xf0] }
 0x8f7   :  { %v9932_v36 = vor.u32 %v10686_v42, %v9929_v28  ;;  %v10654_v42 = vld [vmem:[%s15871_s2 + $0xdcc] sm:$0xf]  ;;  %v9801_v28 = vld [vmem:[%s15871_s2 + $0xdd8] sm:$0xf0] }
 0x8f9   :  { %7200 = vmatpush.bf16.msrb.mxu2 %v9932_v36 }
 0x8fa   :  { %v6652_v32 = vpop.f32.mrf.mxu2 }
 0x8fb   :  { %v6653_v9 = vadd.f32 %v6652_v32, %v6604_v54  ;;  %v6701_v46 = vpop.f32.mrf.mxu3  ;;  %v6557_v37 = vpop.f32.mrf.mxu0  ;;  %v9673_v54 = vld [vmem:[%s15871_s2 + $0xcd8] sm:$0xf0] }
 0x8fc   :  { %v6558_v58 = vadd.f32 %v6557_v37, %v15072_v53  ;;  %v6606_v6 = vpop.f32.mrf.mxu1  ;;  %v9676_v32 = vor.u32 %v10622_v20, %v9673_v54 }
 0x8fd   :  { %v15313_v40 = vadd.f32 %v6701_v46, %v6653_v9 }
 0x8fe   :  { %v6607_v12 = vadd.f32 %v6606_v6, %v6558_v58  ;;  %6752 = vmatmul.bf16.gmra.mxu0 %v16463_v34  ;;  %6801 = vmatmul.bf16.gmra.mxu1 %v16464_v38 }
 0x8ff   :  { %6850 = vmatmul.bf16.gmra.mxu2 %v16465_v49  ;;  %v10057_v49 = vld [vmem:[%s15871_s2 + $0xfd8] sm:$0xf0]  ;;  %7102 = vmatpush.bf16.msrb.mxu0 %v9676_v32 }
 0x900   :  { %6899 = vmatmul.bf16.gmra.mxu3 %v16466_v23  ;;  %v10718_v23 = vld [vmem:[%s15871_s2 + $0xfcc] sm:$0xf] }
 0x901   :  { %v10060_v9 = vor.u32 %v10718_v23, %v10057_v49 }
 0x902   :  { %v6655_v1 = vpop.f32.mrf.mxu2 }
 0x903   :  { %v6656_v46 = vadd.f32 %v6655_v1, %v6607_v12  ;;  %v6704_v37 = vpop.f32.mrf.mxu3  ;;  %v6559_v58 = vpop.f32.mrf.mxu0  ;;  %7249 = vmatpush.bf16.msrb.mxu3 %v10060_v9  ;;  %v9804_v12 = vor.u32 %v10654_v42, %v9801_v28  ;;  %v10714_v28 = vld [vmem:[%s15871_s2 + $0xfac] sm:$0xf] }
 0x904   :  { %v6560_v6 = vadd.f32 %v6559_v58, %v15072_v53  ;;  %v6608_v34 = vpop.f32.mrf.mxu1  ;;  %v16469_v58 = vld [vmem:[#allocation68_spill] sm:$0xff] }
 0x905   :  { %v15338_v38 = vadd.f32 %v6704_v37, %v6656_v46  ;;  %7151 = vmatpush.bf16.msrb.mxu1 %v9804_v12  ;;  %v16467_v46 = vld [vmem:[#allocation66_spill] sm:$0xff]  ;;  %v16468_v37 = vld [vmem:[#allocation67_spill] sm:$0xff] }
 0x906   :  { %v6609_v20 = vadd.f32 %v6608_v34, %v6560_v6  ;;  %v10682_v6 = vld [vmem:[%s15871_s2 + $0xeac] sm:$0xf] }
 0x907   :  { %v10618_v34 = vld [vmem:[%s15871_s2 + $0xcac] sm:$0xf] }
 0x90a   :  { %v6657_v54 = vpop.f32.mrf.mxu2 }
 0x90b   :  { %v6658_v36 = vadd.f32 %v6657_v54, %v6609_v20  ;;  %v6706_v23 = vpop.f32.mrf.mxu3  ;;  %v6718_v53 = vpop.f32.mrf.mxu0  ;;  %v10041_v20 = vld [vmem:[%s15871_s2 + $0xfb8] sm:$0xf0] }
 0x90c   :  { %v6719_v49 = vadd.f32 %v6718_v53, %v15100_v39  ;;  %v6767_v1 = vpop.f32.mrf.mxu1  ;;  %v9913_v39 = vld [vmem:[%s15871_s2 + $0xeb8] sm:$0xf0] }
 0x90d   :  { %v15347_v32 = vadd.f32 %v6706_v23, %v6658_v36  ;;  %v9916_v42 = vor.u32 %v10682_v6, %v9913_v39  ;;  %v10044_v36 = vor.u32 %v10714_v28, %v10041_v20  ;;  %v9785_v6 = vld [vmem:[%s15871_s2 + $0xdb8] sm:$0xf0] }
 0x90e   :  { %v6768_v9 = vadd.f32 %v6767_v1, %v6719_v49  ;;  %6913 = vmatmul.bf16.vlgmr.msra.gmra.mxu0 %v11266_v44  ;;  %6962 = vmatmul.bf16.vlgmr.msra.gmra.mxu1 %v16467_v46  ;;  %v9657_v44 = vld [vmem:[%s15871_s2 + $0xcb8] sm:$0xf0] }
 0x90f   :  { %7011 = vmatmul.bf16.vlgmr.msra.gmra.mxu2 %v16468_v37  ;;  %v9660_v54 = vor.u32 %v10618_v34, %v9657_v44  ;;  %7250 = vmatpush.bf16.msrb.mxu3 %v10044_v36  ;;  %v16470_v36 = vld [vmem:[#allocation69_spill] sm:$0xff] }
 0x910   :  { %7060 = vmatmul.bf16.vlgmr.msra.gmra.mxu3 %v16469_v58  ;;  %7201 = vmatpush.bf16.msrb.mxu2 %v9916_v42  ;;  %v10650_v58 = vld [vmem:[%s15871_s2 + $0xdac] sm:$0xf] }
 0x911   :  { %7103 = vmatpush.bf16.msrb.mxu0 %v9660_v54 }
 0x912   :  { %v6816_v12 = vpop.f32.mrf.mxu2 }
 0x913   :  { %v6817_v23 = vadd.f32 %v6816_v12, %v6768_v9  ;;  %v6865_v53 = vpop.f32.mrf.mxu3  ;;  %v6720_v49 = vpop.f32.mrf.mxu0  ;;  %v9788_v9 = vor.u32 %v10650_v58, %v9785_v6  ;;  %v10710_v58 = vld [vmem:[%s15871_s2 + $0xf8c] sm:$0xf]  ;;  %v10025_v6 = vld [vmem:[%s15871_s2 + $0xf98] sm:$0xf0] }
 0x914   :  { %v6721_v1 = vadd.f32 %v6720_v49, %v15109_v59  ;;  %v6769_v46 = vpop.f32.mrf.mxu1  ;;  %v10678_v49 = vld [vmem:[%s15871_s2 + $0xe8c] sm:$0xf] }
 0x915   :  { %v15372_v37 = vadd.f32 %v6865_v53, %v6817_v23  ;;  %7152 = vmatpush.bf16.msrb.mxu1 %v9788_v9  ;;  %v16471_v23 = vld [vmem:[#allocation70_spill] sm:$0xff]  ;;  %v16472_v53 = vld [vmem:[#allocation71_spill] sm:$0xff] }
 0x916   :  { %v6770_v39 = vadd.f32 %v6769_v46, %v6721_v1  ;;  %v10614_v1 = vld [vmem:[%s15871_s2 + $0xc8c] sm:$0xf] }
 0x91a   :  { %v6818_v34 = vpop.f32.mrf.mxu2 }
 0x91b   :  { %v6819_v42 = vadd.f32 %v6818_v34, %v6770_v39  ;;  %v6867_v44 = vpop.f32.mrf.mxu3  ;;  %v6723_v59 = vpop.f32.mrf.mxu0  ;;  %v10028_v34 = vor.u32 %v10710_v58, %v10025_v6 }
 0x91c   :  { %v6724_v28 = vadd.f32 %v6723_v59, %v15134_v24  ;;  %v6772_v20 = vpop.f32.mrf.mxu1  ;;  %v9897_v24 = vld [vmem:[%s15871_s2 + $0xe98] sm:$0xf0] }
 0x91d   :  { %v15381_v12 = vadd.f32 %v6867_v44, %v6819_v42  ;;  %v9900_v46 = vor.u32 %v10678_v49, %v9897_v24  ;;  %7251 = vmatpush.bf16.msrb.mxu3 %v10028_v34  ;;  %v16474_v34 = vld [vmem:[#allocation73_spill] sm:$0xff] }
 0x91e   :  { %v6773_v54 = vadd.f32 %v6772_v20, %v6724_v28  ;;  %6918 = vmatmul.bf16.gmra.mxu0 %v11306_v56  ;;  %6967 = vmatmul.bf16.gmra.mxu1 %v16470_v36  ;;  %v9641_v56 = vld [vmem:[%s15871_s2 + $0xc98] sm:$0xf0] }
 0x91f   :  { %7016 = vmatmul.bf16.gmra.mxu2 %v16471_v23  ;;  %v9644_v9 = vor.u32 %v10614_v1, %v9641_v56  ;;  %v10646_v23 = vld [vmem:[%s15871_s2 + $0xd8c] sm:$0xf] }
 0x920   :  { %7065 = vmatmul.bf16.gmra.mxu3 %v16472_v53  ;;  %7202 = vmatpush.bf16.msrb.mxu2 %v9900_v46  ;;  %v9769_v53 = vld [vmem:[%s15871_s2 + $0xd98] sm:$0xf0] }
 0x921   :  { %7104 = vmatpush.bf16.msrb.mxu0 %v9644_v9  ;;  %v16473_v9 = vld [vmem:[#allocation72_spill] sm:$0xff] }
 0x922   :  { %v6821_v39 = vpop.f32.mrf.mxu2 }
 0x923   :  { %v6822_v42 = vadd.f32 %v6821_v39, %v6773_v54  ;;  %v6870_v44 = vpop.f32.mrf.mxu3  ;;  %v6725_v59 = vpop.f32.mrf.mxu0  ;;  %v9772_v54 = vor.u32 %v10646_v23, %v9769_v53  ;;  %v9625_v23 = vld [vmem:[%s15871_s2 + $0xc78] sm:$0xf0]  ;;  %v10706_v53 = vld [vmem:[%s15871_s2 + $0xf6c] sm:$0xf] }
 0x924   :  { %v6726_v28 = vadd.f32 %v6725_v59, %v15143_v51  ;;  %v6774_v20 = vpop.f32.mrf.mxu1  ;;  %v10674_v59 = vld [vmem:[%s15871_s2 + $0xe6c] sm:$0xf] }
 0x925   :  { %v15406_v36 = vadd.f32 %v6870_v44, %v6822_v42  ;;  %7153 = vmatpush.bf16.msrb.mxu1 %v9772_v54  ;;  %v16475_v42 = vld [vmem:[#allocation74_spill] sm:$0xff]  ;;  %v16476_v44 = vld [vmem:[#allocation75_spill] sm:$0xff] }
 0x926   :  { %v6775_v49 = vadd.f32 %v6774_v20, %v6726_v28  ;;  %v10610_v28 = vld [vmem:[%s15871_s2 + $0xc6c] sm:$0xf] }
 0x92a   :  { %v6823_v24 = vpop.f32.mrf.mxu2 }
 0x92b   :  { %v6824_v1 = vadd.f32 %v6823_v24, %v6775_v49  ;;  %v6872_v46 = vpop.f32.mrf.mxu3  ;;  %v6728_v51 = vpop.f32.mrf.mxu0  ;;  %v10009_v49 = vld [vmem:[%s15871_s2 + $0xf78] sm:$0xf0]  ;;  %v9628_v24 = vor.u32 %v10610_v28, %v9625_v23 }
 0x92c   :  { %v6729_v56 = vadd.f32 %v6728_v51, %v15168_v2  ;;  %v6777_v58 = vpop.f32.mrf.mxu1  ;;  %v9881_v2 = vld [vmem:[%s15871_s2 + $0xe78] sm:$0xf0] }
 0x92d   :  { %v15415_v6 = vadd.f32 %v6872_v46, %v6824_v1  ;;  %v9884_v20 = vor.u32 %v10674_v59, %v9881_v2  ;;  %v10012_v1 = vor.u32 %v10706_v53, %v10009_v49  ;;  %7105 = vmatpush.bf16.msrb.mxu0 %v9628_v24  ;;  %v16477_v24 = vld [vmem:[#allocation76_spill] sm:$0xff] }
 0x92e   :  { %v6778_v39 = vadd.f32 %v6777_v58, %v6729_v56  ;;  %6923 = vmatmul.bf16.gmra.mxu0 %v16473_v9  ;;  %6972 = vmatmul.bf16.gmra.mxu1 %v16474_v34 }
 0x92f   :  { %7021 = vmatmul.bf16.gmra.mxu2 %v16475_v42  ;;  %7252 = vmatpush.bf16.msrb.mxu3 %v10012_v1  ;;  %v10642_v42 = vld [vmem:[%s15871_s2 + $0xd6c] sm:$0xf]  ;;  %v16478_v1 = vld [vmem:[#allocation77_spill] sm:$0xff] }
 0x930   :  { %7070 = vmatmul.bf16.gmra.mxu3 %v16476_v44  ;;  %7203 = vmatpush.bf16.msrb.mxu2 %v9884_v20  ;;  %v9753_v44 = vld [vmem:[%s15871_s2 + $0xd78] sm:$0xf0] }
 0x932   :  { %v6826_v54 = vpop.f32.mrf.mxu2 }
 0x933   :  { %v6827_v46 = vadd.f32 %v6826_v54, %v6778_v39  ;;  %v6875_v51 = vpop.f32.mrf.mxu3  ;;  %v6730_v56 = vpop.f32.mrf.mxu0  ;;  %v9756_v39 = vor.u32 %v10642_v42, %v9753_v44  ;;  %v9609_v42 = vld [vmem:[%s15871_s2 + $0xc58] sm:$0xf0]  ;;  %v10702_v44 = vld [vmem:[%s15871_s2 + $0xf4c] sm:$0xf] }
 0x934   :  { %v6731_v58 = vadd.f32 %v6730_v56, %v15177_v62  ;;  %v6779_v9 = vpop.f32.mrf.mxu1  ;;  %v10670_v56 = vld [vmem:[%s15871_s2 + $0xe4c] sm:$0xf] }
 0x935   :  { %v15440_v34 = vadd.f32 %v6875_v51, %v6827_v46  ;;  %7154 = vmatpush.bf16.msrb.mxu1 %v9756_v39  ;;  %v16479_v46 = vld [vmem:[#allocation78_spill] sm:$0xff]  ;;  %v16480_v51 = vld [vmem:[#allocation79_spill] sm:$0xff] }
 0x936   :  { %v6780_v59 = vadd.f32 %v6779_v9, %v6731_v58  ;;  %v10606_v58 = vld [vmem:[%s15871_s2 + $0xc4c] sm:$0xf] }
 0x93a   :  { %v6828_v2 = vpop.f32.mrf.mxu2 }
 0x93b   :  { %v6829_v28 = vadd.f32 %v6828_v2, %v6780_v59  ;;  %v6877_v20 = vpop.f32.mrf.mxu3  ;;  %v6733_v62 = vpop.f32.mrf.mxu0  ;;  %v9993_v59 = vld [vmem:[%s15871_s2 + $0xf58] sm:$0xf0]  ;;  %v9612_v2 = vor.u32 %v10606_v58, %v9609_v42 }
 0x93c   :  { %v6734_v23 = vadd.f32 %v6733_v62, %v15202_v50  ;;  %v6782_v53 = vpop.f32.mrf.mxu1  ;;  %v9865_v50 = vld [vmem:[%s15871_s2 + $0xe58] sm:$0xf0] }
 0x93d   :  { %v15449_v49 = vadd.f32 %v6877_v20, %v6829_v28  ;;  %v9868_v9 = vor.u32 %v10670_v56, %v9865_v50  ;;  %v9996_v28 = vor.u32 %v10702_v44, %v9993_v59  ;;  %7106 = vmatpush.bf16.msrb.mxu0 %v9612_v2  ;;  %v16481_v2 = vld [vmem:[#allocation82_spill] sm:$0xff] }
 0x93e   :  { %v6783_v54 = vadd.f32 %v6782_v53, %v6734_v23  ;;  %6928 = vmatmul.bf16.gmra.mxu0 %v16477_v24  ;;  %6977 = vmatmul.bf16.gmra.mxu1 %v16478_v1 }
 0x93f   :  { %7026 = vmatmul.bf16.gmra.mxu2 %v16479_v46  ;;  %7253 = vmatpush.bf16.msrb.mxu3 %v9996_v28  ;;  %v10638_v46 = vld [vmem:[%s15871_s2 + $0xd4c] sm:$0xf]  ;;  %v16482_v28 = vld [vmem:[#allocation83_spill] sm:$0xff] }
 0x940   :  { %7075 = vmatmul.bf16.gmra.mxu3 %v16480_v51  ;;  %7204 = vmatpush.bf16.msrb.mxu2 %v9868_v9  ;;  %v9737_v51 = vld [vmem:[%s15871_s2 + $0xd58] sm:$0xf0] }
 0x942   :  { %v6831_v39 = vpop.f32.mrf.mxu2 }
 0x943   :  { %v6832_v20 = vadd.f32 %v6831_v39, %v6783_v54  ;;  %v6880_v62 = vpop.f32.mrf.mxu3  ;;  %v6735_v23 = vpop.f32.mrf.mxu0  ;;  %v9740_v54 = vor.u32 %v10638_v46, %v9737_v51 }
 0x944   :  { %v6736_v53 = vadd.f32 %v6735_v23, %v15211_v31  ;;  %v6784_v24 = vpop.f32.mrf.mxu1 }
 0x945   :  { %v15474_v1 = vadd.f32 %v6880_v62, %v6832_v20  ;;  %7155 = vmatpush.bf16.msrb.mxu1 %v9740_v54  ;;  %v10666_v20 = vld [vmem:[%s15871_s2 + $0xe2c] sm:$0xf] }
 0x946   :  { %v6785_v56 = vadd.f32 %v6784_v24, %v6736_v53  ;;  %v10602_v62 = vld [vmem:[%s15871_s2 + $0xc2c] sm:$0xf]  ;;  %v9977_v53 = vld [vmem:[%s15871_s2 + $0xf38] sm:$0xf0] }
 0x94a   :  { %v6833_v50 = vpop.f32.mrf.mxu2 }
 0x94b   :  { %v6834_v58 = vadd.f32 %v6833_v50, %v6785_v56  ;;  %v6882_v9 = vpop.f32.mrf.mxu3  ;;  %v6738_v31 = vpop.f32.mrf.mxu0 }
 0x94c   :  { %v6739_v42 = vadd.f32 %v6738_v31, %v15236_v15  ;;  %v6787_v44 = vpop.f32.mrf.mxu1  ;;  %v9849_v15 = vld [vmem:[%s15871_s2 + $0xe38] sm:$0xf0] }
 0x94d   :  { %v15483_v59 = vadd.f32 %v6882_v9, %v6834_v58  ;;  %v9852_v23 = vor.u32 %v10666_v20, %v9849_v15 }
 0x94e   :  { %v6788_v39 = vadd.f32 %v6787_v44, %v6739_v42  ;;  %6933 = vmatmul.bf16.gmra.mxu0 %v16377_v10  ;;  %6982 = vmatmul.bf16.gmra.mxu1 %v16378_v41  ;;  %v9593_v10 = vld [vmem:[%s15871_s2 + $0xc38] sm:$0xf0]  ;;  %v10698_v41 = vld [vmem:[%s15871_s2 + $0xf2c] sm:$0xf] }
 0x94f   :  { %7031 = vmatmul.bf16.gmra.mxu2 %v16481_v2  ;;  %v9596_v46 = vor.u32 %v10602_v62, %v9593_v10  ;;  %v9980_v51 = vor.u32 %v10698_v41, %v9977_v53  ;;  %v10634_v42 = vld [vmem:[%s15871_s2 + $0xd2c] sm:$0xf]  ;;  %v9721_v44 = vld [vmem:[%s15871_s2 + $0xd38] sm:$0xf0] }
 0x950   :  { %7080 = vmatmul.bf16.gmra.mxu3 %v16482_v28  ;;  %7205 = vmatpush.bf16.msrb.mxu2 %v9852_v23  ;;  %v16483_v53 = vld [vmem:[#allocation86_spill] sm:$0xff] }
 0x951   :  { %7107 = vmatpush.bf16.msrb.mxu0 %v9596_v46  ;;  %7254 = vmatpush.bf16.msrb.mxu3 %v9980_v51  ;;  %v10662_v46 = vld [vmem:[%s15871_s2 + $0xe0c] sm:$0xf] }
 0x952   :  { %v6836_v24 = vpop.f32.mrf.mxu2  ;;  %v10598_v51 = vld [vmem:[%s15871_s2 + $0xc0c] sm:$0xf] }
 0x953   :  { %v6837_v56 = vadd.f32 %v6836_v24, %v6788_v39  ;;  %v6885_v54 = vpop.f32.mrf.mxu3  ;;  %v6740_v50 = vpop.f32.mrf.mxu0  ;;  %v9724_v39 = vor.u32 %v10634_v42, %v9721_v44  ;;  %v16484_v24 = vld [vmem:[#allocation87_spill] sm:$0xff] }
 0x954   :  { %v6741_v58 = vadd.f32 %v6740_v50, %v15245_v14  ;;  %v6789_v9 = vpop.f32.mrf.mxu1 }
 0x955   :  { %v15508_v31 = vadd.f32 %v6885_v54, %v6837_v56  ;;  %7156 = vmatpush.bf16.msrb.mxu1 %v9724_v39  ;;  %v9961_v54 = vld [vmem:[%s15871_s2 + $0xf18] sm:$0xf0] }
 0x956   :  { %v6790_v2 = vadd.f32 %v6789_v9, %v6741_v58 }
 0x95a   :  { %v6838_v28 = vpop.f32.mrf.mxu2 }
 0x95b   :  { %v6839_v20 = vadd.f32 %v6838_v28, %v6790_v2  ;;  %v6887_v15 = vpop.f32.mrf.mxu3  ;;  %v6743_v14 = vpop.f32.mrf.mxu0 }
 0x95c   :  { %v6744_v62 = vadd.f32 %v6743_v14, %v15270_v4  ;;  %v6792_v23 = vpop.f32.mrf.mxu1  ;;  %v9833_v4 = vld [vmem:[%s15871_s2 + $0xe18] sm:$0xf0] }
 0x95d   :  { %v15517_v10 = vadd.f32 %v6887_v15, %v6839_v20  ;;  %v9836_v56 = vor.u32 %v10662_v46, %v9833_v4  ;;  %v10630_v15 = vld [vmem:[%s15871_s2 + $0xd0c] sm:$0xf]  ;;  %v9705_v14 = vld [vmem:[%s15871_s2 + $0xd18] sm:$0xf0] }
 0x95e   :  { %v6793_v41 = vadd.f32 %v6792_v23, %v6744_v62  ;;  %6938 = vmatmul.bf16.gmra.mxu0 %v16276_v33  ;;  %6987 = vmatmul.bf16.gmra.mxu1 %v16277_v47  ;;  %v9577_v33 = vld [vmem:[%s15871_s2 + $0xc18] sm:$0xf0]  ;;  %v10694_v47 = vld [vmem:[%s15871_s2 + $0xf0c] sm:$0xf]  ;;  %v9708_v23 = vor.u32 %v10630_v15, %v9705_v14 }
 0x95f   :  { %7036 = vmatmul.bf16.gmra.mxu2 %v16483_v53  ;;  %v9580_v58 = vor.u32 %v10598_v51, %v9577_v33  ;;  %v9964_v9 = vor.u32 %v10694_v47, %v9961_v54  ;;  %v16485_v33 = vld [vmem:[#allocation90_spill] sm:$0xff]  ;;  %v16486_v47 = vld [vmem:[#allocation91_spill] sm:$0xff] }
 0x960   :  { %7085 = vmatmul.bf16.gmra.mxu3 %v16484_v24  ;;  %7206 = vmatpush.bf16.msrb.mxu2 %v9836_v56 }
 0x961   :  { %7108 = vmatpush.bf16.msrb.mxu0 %v9580_v58  ;;  %7255 = vmatpush.bf16.msrb.mxu3 %v9964_v9 }
 0x962   :  { %v6841_v50 = vpop.f32.mrf.mxu2  ;;  %7157 = vmatpush.bf16.msrb.mxu1 %v9708_v23 }
 0x963   :  { %v6842_v42 = vadd.f32 %v6841_v50, %v6793_v41  ;;  %v6890_v44 = vpop.f32.mrf.mxu3  ;;  %v6745_v2 = vpop.f32.mrf.mxu0 }
 0x964   :  { %v6746_v39 = vadd.f32 %v6745_v2, %v15279_v45  ;;  %v6794_v28 = vpop.f32.mrf.mxu1 }
 0x965   :  { %v15542_v20 = vadd.f32 %v6890_v44, %v6842_v42 }
 0x966   :  { %v6795_v62 = vadd.f32 %v6794_v28, %v6746_v39 }
 0x96a   :  { %v6843_v41 = vpop.f32.mrf.mxu2 }
 0x96b   :  { %v6844_v53 = vadd.f32 %v6843_v41, %v6795_v62  ;;  %v6892_v24 = vpop.f32.mrf.mxu3  ;;  %v6748_v45 = vpop.f32.mrf.mxu0 }
 0x96c   :  { %v6749_v46 = vadd.f32 %v6748_v45, %v15304_v21  ;;  %v6797_v4 = vpop.f32.mrf.mxu1 }
 0x96d   :  { %v15551_v51 = vadd.f32 %v6892_v24, %v6844_v53 }
 0x96e   :  { %v6798_v56 = vadd.f32 %v6797_v4, %v6749_v46  ;;  %6943 = vmatmul.bf16.gmra.mxu0 %v16175_v27  ;;  %6992 = vmatmul.bf16.gmra.mxu1 %v16176_v13 }
 0x96f   :  { %7041 = vmatmul.bf16.gmra.mxu2 %v16485_v33 }
 0x970   :  { %7090 = vmatmul.bf16.gmra.mxu3 %v16486_v47 }
 0x972   :  { %v6846_v54 = vpop.f32.mrf.mxu2 }
 0x973   :  { %v6847_v50 = vadd.f32 %v6846_v54, %v6798_v56  ;;  %v6895_v58 = vpop.f32.mrf.mxu3  ;;  %v6750_v9 = vpop.f32.mrf.mxu0 }
 0x974   :  { %v6751_v42 = vadd.f32 %v6750_v9, %v15313_v40  ;;  %v6799_v44 = vpop.f32.mrf.mxu1  ;;  %v10748_v40 = vld [vmem:[%s15873_s4 + $0xb8] sm:$0xff] }
 0x975   :  { %v15558_v21 = vadd.f32 %v6895_v58, %v6847_v50  ;;  %7751 = vmatpush.bf16.msra.mxu2 %v10748_v40 }
 0x976   :  { %v6800_v2 = vadd.f32 %v6799_v44, %v6751_v42  ;;  %v10747_v42 = vld [vmem:[%s15873_s4 + $0xb0] sm:$0xff] }
 0x979   :  { %7752 = vmatpush.bf16.msra.mxu2 %v10747_v42  ;;  %v10745_v42 = vld [vmem:[%s15873_s4 + $0xa0] sm:$0xff] }
 0x97a   :  { %v6848_v39 = vpop.f32.mrf.mxu2 }
 0x97b   :  { %v6849_v28 = vadd.f32 %v6848_v39, %v6800_v2  ;;  %v6897_v15 = vpop.f32.mrf.mxu3  ;;  %v6753_v27 = vpop.f32.mrf.mxu0 }
 0x97c   :  { %v6754_v13 = vadd.f32 %v6753_v27, %v15338_v38  ;;  %v6802_v14 = vpop.f32.mrf.mxu1 }
 0x97d   :  { %v15561_v62 = vadd.f32 %v6897_v15, %v6849_v28 }
 0x97e   :  { %v6803_v23 = vadd.f32 %v6802_v14, %v6754_v13  ;;  %6948 = vmatmul.bf16.gmra.mxu0 %v11544_v8  ;;  %6997 = vmatmul.bf16.gmra.mxu1 %v11546_v35  ;;  %v10732_v35 = vld [vmem:[%s15873_s4 + $0x38] sm:$0xff] }
 0x97f   :  { %7046 = vmatmul.bf16.gmra.mxu2 %v11548_v0  ;;  %v10756_v8 = vld [vmem:[%s15873_s4 + $0xf8] sm:$0xff]  ;;  %7653 = vmatpush.bf16.msra.mxu0 %v10732_v35 }
 0x980   :  { %7095 = vmatmul.bf16.gmra.mxu3 %v11550_v29  ;;  %v10740_v29 = vld [vmem:[%s15873_s4 + $0x78] sm:$0xff] }
 0x981   :  { %7800 = vmatpush.bf16.msra.mxu3 %v10756_v8  ;;  %7702 = vmatpush.bf16.msra.mxu1 %v10740_v29 }
 0x982   :  { %v6851_v41 = vpop.f32.mrf.mxu2 }
 0x983   :  { %v6852_v53 = vadd.f32 %v6851_v41, %v6803_v23  ;;  %v6900_v38 = vpop.f32.mrf.mxu3  ;;  %v6755_v24 = vpop.f32.mrf.mxu0 }
 0x984   :  { %v6756_v45 = vadd.f32 %v6755_v24, %v15347_v32  ;;  %v6804_v46 = vpop.f32.mrf.mxu1  ;;  %v10746_v24 = vld [vmem:[%s15873_s4 + $0xa8] sm:$0xff] }
 0x985   :  { %v15571_v4 = vadd.f32 %v6900_v38, %v6852_v53  ;;  %7753 = vmatpush.bf16.msra.mxu2 %v10746_v24 }
 0x986   :  { %v6805_v0 = vadd.f32 %v6804_v46, %v6756_v45 }
 0x989   :  { %7754 = vmatpush.bf16.msra.mxu2 %v10745_v42 }
 0x98a   :  { %v6853_v32 = vpop.f32.mrf.mxu2 }
 0x98b   :  { %v6854_v56 = vadd.f32 %v6853_v32, %v6805_v0  ;;  %v6902_v33 = vpop.f32.mrf.mxu3  ;;  %v6914_v47 = vpop.f32.mrf.mxu0 }
 0x98c   :  { %v6915_v54 = vadd.f32 %v6914_v47, %v15372_v37  ;;  %v6963_v50 = vpop.f32.mrf.mxu1 }
 0x98d   :  { %v15583_v58 = vadd.f32 %v6902_v33, %v6854_v56 }
 0x98e   :  { %v6964_v9 = vadd.f32 %v6963_v50, %v6915_v54  ;;  %7109 = vmatmul.bf16.vlgmr.msrb.gmra.mxu0 %v11580_v7  ;;  %7158 = vmatmul.bf16.vlgmr.msrb.gmra.mxu1 %v11582_v43  ;;  %v10731_v43 = vld [vmem:[%s15873_s4 + $0x30] sm:$0xff] }
 0x98f   :  { %7207 = vmatmul.bf16.vlgmr.msrb.gmra.mxu2 %v11584_v61  ;;  %v10755_v7 = vld [vmem:[%s15873_s4 + $0xf0] sm:$0xff]  ;;  %7654 = vmatpush.bf16.msra.mxu0 %v10731_v43 }
 0x990   :  { %7256 = vmatmul.bf16.vlgmr.msrb.gmra.mxu3 %v11586_v11  ;;  %v10739_v11 = vld [vmem:[%s15873_s4 + $0x70] sm:$0xff] }
 0x991   :  { %7801 = vmatpush.bf16.msra.mxu3 %v10755_v7  ;;  %7703 = vmatpush.bf16.msra.mxu1 %v10739_v11 }
 0x992   :  { %v7012_v44 = vpop.f32.mrf.mxu2 }
 0x993   :  { %v7013_v2 = vadd.f32 %v7012_v44, %v6964_v9  ;;  %v7061_v37 = vpop.f32.mrf.mxu3  ;;  %v6916_v39 = vpop.f32.mrf.mxu0 }
 0x994   :  { %v6917_v28 = vadd.f32 %v6916_v39, %v15381_v12  ;;  %v6965_v15 = vpop.f32.mrf.mxu1 }
 0x995   :  { %v15593_v27 = vadd.f32 %v7061_v37, %v7013_v2 }
 0x996   :  { %v6966_v61 = vadd.f32 %v6965_v15, %v6917_v28 }
 0x99a   :  { %v7014_v12 = vpop.f32.mrf.mxu2 }
 0x99b   :  { %v7015_v13 = vadd.f32 %v7014_v12, %v6966_v61  ;;  %v7063_v14 = vpop.f32.mrf.mxu3  ;;  %v6919_v23 = vpop.f32.mrf.mxu0 }
 0x99c   :  { %v6920_v40 = vadd.f32 %v6919_v23, %v15406_v36  ;;  %v6968_v41 = vpop.f32.mrf.mxu1  ;;  %v10744_v23 = vld [vmem:[%s15873_s4 + $0x98] sm:$0xff] }
 0x99d   :  { %v15605_v53 = vadd.f32 %v7063_v14, %v7015_v13  ;;  %7755 = vmatpush.bf16.msra.mxu2 %v10744_v23 }
 0x99e   :  { %v6969_v38 = vadd.f32 %v6968_v41, %v6920_v40  ;;  %7114 = vmatmul.bf16.gmra.mxu0 %v11616_v48  ;;  %7163 = vmatmul.bf16.gmra.mxu1 %v11618_v55  ;;  %v10730_v55 = vld [vmem:[%s15873_s4 + $0x28] sm:$0xff] }
 0x99f   :  { %7212 = vmatmul.bf16.gmra.mxu2 %v11620_v17  ;;  %v10754_v48 = vld [vmem:[%s15873_s4 + $0xe8] sm:$0xff]  ;;  %7655 = vmatpush.bf16.msra.mxu0 %v10730_v55 }
 0x9a0   :  { %7261 = vmatmul.bf16.gmra.mxu3 %v11622_v25  ;;  %v10738_v25 = vld [vmem:[%s15873_s4 + $0x68] sm:$0xff] }
 0x9a1   :  { %7802 = vmatpush.bf16.msra.mxu3 %v10754_v48  ;;  %7704 = vmatpush.bf16.msra.mxu1 %v10738_v25  ;;  %v16487_v25 = vld [vmem:[#allocation92_spill] sm:$0xff] }
 0x9a2   :  { %v7017_v45 = vpop.f32.mrf.mxu2 }
 0x9a3   :  { %v7018_v46 = vadd.f32 %v7017_v45, %v6969_v38  ;;  %v7066_v36 = vpop.f32.mrf.mxu3  ;;  %v6921_v35 = vpop.f32.mrf.mxu0 }
 0x9a4   :  { %v6922_v8 = vadd.f32 %v6921_v35, %v15415_v6  ;;  %v6970_v0 = vpop.f32.mrf.mxu1 }
 0x9a5   :  { %v15615_v29 = vadd.f32 %v7066_v36, %v7018_v46 }
 0x9a6   :  { %v6971_v17 = vadd.f32 %v6970_v0, %v6922_v8 }
 0x9aa   :  { %v7019_v6 = vpop.f32.mrf.mxu2 }
 0x9ab   :  { %v7020_v32 = vadd.f32 %v7019_v6, %v6971_v17  ;;  %v7068_v56 = vpop.f32.mrf.mxu3  ;;  %v6924_v33 = vpop.f32.mrf.mxu0  ;;  %v16488_v6 = vld [vmem:[#allocation93_spill] sm:$0xff] }
 0x9ac   :  { %v6925_v47 = vadd.f32 %v6924_v33, %v15440_v34  ;;  %v6973_v54 = vpop.f32.mrf.mxu1 }
 0x9ad   :  { %v15627_v50 = vadd.f32 %v7068_v56, %v7020_v32  ;;  %v16489_v32 = vld [vmem:[#allocation94_spill] sm:$0xff]  ;;  %v10743_v56 = vld [vmem:[%s15873_s4 + $0x90] sm:$0xff] }
 0x9ae   :  { %v6974_v9 = vadd.f32 %v6973_v54, %v6925_v47  ;;  %7119 = vmatmul.bf16.gmra.mxu0 %v11652_v57  ;;  %7168 = vmatmul.bf16.gmra.mxu1 %v11654_v3  ;;  %v10729_v3 = vld [vmem:[%s15873_s4 + $0x20] sm:$0xff] }
 0x9af   :  { %7217 = vmatmul.bf16.gmra.mxu2 %v11656_v26  ;;  %v10753_v57 = vld [vmem:[%s15873_s4 + $0xe0] sm:$0xff]  ;;  %7656 = vmatpush.bf16.msra.mxu0 %v10729_v3 }
 0x9b0   :  { %7266 = vmatmul.bf16.gmra.mxu3 %v11658_v52  ;;  %v10737_v52 = vld [vmem:[%s15873_s4 + $0x60] sm:$0xff]  ;;  %7756 = vmatpush.bf16.msra.mxu2 %v10743_v56 }
 0x9b1   :  { %7803 = vmatpush.bf16.msra.mxu3 %v10753_v57  ;;  %7705 = vmatpush.bf16.msra.mxu1 %v10737_v52 }
 0x9b2   :  { %v7022_v44 = vpop.f32.mrf.mxu2 }
 0x9b3   :  { %v7023_v2 = vadd.f32 %v7022_v44, %v6974_v9  ;;  %v7071_v34 = vpop.f32.mrf.mxu3  ;;  %v6926_v37 = vpop.f32.mrf.mxu0 }
 0x9b4   :  { %v6927_v39 = vadd.f32 %v6926_v37, %v15449_v49  ;;  %v6975_v28 = vpop.f32.mrf.mxu1  ;;  %v10735_v37 = vld [vmem:[%s15873_s4 + $0x50] sm:$0xff] }
 0x9b5   :  { %v15637_v15 = vadd.f32 %v7071_v34, %v7023_v2  ;;  %v10751_v2 = vld [vmem:[%s15873_s4 + $0xd0] sm:$0xff] }
 0x9b6   :  { %v6976_v26 = vadd.f32 %v6975_v28, %v6927_v39 }
 0x9ba   :  { %v7024_v49 = vpop.f32.mrf.mxu2 }
 0x9bb   :  { %v7025_v43 = vadd.f32 %v7024_v49, %v6976_v26  ;;  %v7073_v7 = vpop.f32.mrf.mxu3  ;;  %v6929_v61 = vpop.f32.mrf.mxu0  ;;  %v16490_v49 = vld [vmem:[#allocation96_spill] sm:$0xff] }
 0x9bc   :  { %v6930_v11 = vadd.f32 %v6929_v61, %v15474_v1  ;;  %v6978_v12 = vpop.f32.mrf.mxu1  ;;  %v10742_v61 = vld [vmem:[%s15873_s4 + $0x88] sm:$0xff] }
 0x9bd   :  { %v15649_v13 = vadd.f32 %v7073_v7, %v7025_v43  ;;  %v16491_v43 = vld [vmem:[#allocation97_spill] sm:$0xff]  ;;  %v16492_v7 = vld [vmem:[#allocation98_spill] sm:$0xff]  ;;  %7757 = vmatpush.bf16.msra.mxu2 %v10742_v61 }
 0x9be   :  { %v6979_v14 = vadd.f32 %v6978_v12, %v6930_v11  ;;  %7124 = vmatmul.bf16.gmra.mxu0 %v11688_v5  ;;  %7173 = vmatmul.bf16.gmra.mxu1 %v11690_v16  ;;  %v10728_v16 = vld [vmem:[%s15873_s4 + $0x18] sm:$0xff] }
 0x9bf   :  { %7222 = vmatmul.bf16.gmra.mxu2 %v11692_v63  ;;  %v10752_v5 = vld [vmem:[%s15873_s4 + $0xd8] sm:$0xff]  ;;  %7657 = vmatpush.bf16.msra.mxu0 %v10728_v16 }
 0x9c0   :  { %7271 = vmatmul.bf16.gmra.mxu3 %v11694_v22  ;;  %v10736_v22 = vld [vmem:[%s15873_s4 + $0x58] sm:$0xff] }
 0x9c1   :  { %7804 = vmatpush.bf16.msra.mxu3 %v10752_v5  ;;  %7706 = vmatpush.bf16.msra.mxu1 %v10736_v22  ;;  %v10733_v22 = vld [vmem:[%s15873_s4 + $0x40] sm:$0xff] }
 0x9c2   :  { %v7027_v40 = vpop.f32.mrf.mxu2 }
 0x9c3   :  { %v7028_v41 = vadd.f32 %v7027_v40, %v6979_v14  ;;  %v7076_v1 = vpop.f32.mrf.mxu3  ;;  %v6931_v38 = vpop.f32.mrf.mxu0 }
 0x9c4   :  { %v6932_v24 = vadd.f32 %v6931_v38, %v15483_v59  ;;  %v6980_v45 = vpop.f32.mrf.mxu1 }
 0x9c5   :  { %v15659_v46 = vadd.f32 %v7076_v1, %v7028_v41  ;;  %7805 = vmatpush.bf16.msra.mxu3 %v10751_v2  ;;  %7707 = vmatpush.bf16.msra.mxu1 %v10735_v37  ;;  %v10750_v1 = vld [vmem:[%s15873_s4 + $0xc8] sm:$0xff] }
 0x9c6   :  { %v6981_v63 = vadd.f32 %v6980_v45, %v6932_v24  ;;  %v10734_v24 = vld [vmem:[%s15873_s4 + $0x48] sm:$0xff] }
 0x9c9   :  { %7806 = vmatpush.bf16.msra.mxu3 %v10750_v1  ;;  %7708 = vmatpush.bf16.msra.mxu1 %v10734_v24  ;;  %v16501_v1 = vld [vmem:[#allocation84_spill] sm:$0xff] }
 0x9ca   :  { %v7029_v59 = vpop.f32.mrf.mxu2 }
 0x9cb   :  { %v7030_v36 = vadd.f32 %v7029_v59, %v6981_v63  ;;  %v7078_v35 = vpop.f32.mrf.mxu3  ;;  %v6934_v8 = vpop.f32.mrf.mxu0  ;;  %v10725_v63 = vld [vmem:[%s15873_s4] sm:$0xff] }
 0x9cc   :  { %v6935_v0 = vadd.f32 %v6934_v8, %v15508_v31  ;;  %v6983_v55 = vpop.f32.mrf.mxu1 }
 0x9cd   :  { %v15671_v48 = vadd.f32 %v7078_v35, %v7030_v36  ;;  %v10741_v35 = vld [vmem:[%s15873_s4 + $0x80] sm:$0xff]  ;;  %7709 = vmatpush.bf16.msra.mxu1 %v10733_v22 }
 0x9ce   :  { %v6984_v17 = vadd.f32 %v6983_v55, %v6935_v0  ;;  %7129 = vmatmul.bf16.gmra.mxu0 %v11724_v18  ;;  %7178 = vmatmul.bf16.gmra.mxu1 %v16487_v25  ;;  %v10727_v18 = vld [vmem:[%s15873_s4 + $0x10] sm:$0xff]  ;;  %v16493_v0 = vld [vmem:[#allocation100_spill] sm:$0xff]  ;;  %v16494_v55 = vld [vmem:[#allocation101_spill] sm:$0xff] }
 0x9cf   :  { %7227 = vmatmul.bf16.gmra.mxu2 %v16488_v6  ;;  %7658 = vmatpush.bf16.msra.mxu0 %v10727_v18 }
 0x9d0   :  { %7276 = vmatmul.bf16.gmra.mxu3 %v16489_v32  ;;  %7758 = vmatpush.bf16.msra.mxu2 %v10741_v35 }
 0x9d2   :  { %v7032_v33 = vpop.f32.mrf.mxu2 }
 0x9d3   :  { %v7033_v47 = vadd.f32 %v7032_v33, %v6984_v17  ;;  %v7081_v31 = vpop.f32.mrf.mxu3  ;;  %v6936_v54 = vpop.f32.mrf.mxu0  ;;  %v16495_v17 = vld [vmem:[#allocation102_spill] sm:$0xff] }
 0x9d4   :  { %v6937_v9 = vadd.f32 %v6936_v54, %v15517_v10  ;;  %v6985_v42 = vpop.f32.mrf.mxu1 }
 0x9d5   :  { %v15681_v44 = vadd.f32 %v7081_v31, %v7033_v47 }
 0x9d6   :  { %v6986_v34 = vadd.f32 %v6985_v42, %v6937_v9 }
 0x9da   :  { %v7034_v10 = vpop.f32.mrf.mxu2 }
 0x9db   :  { %v15692_v39 = vadd.f32 %v7034_v10, %v6986_v34  ;;  %v15694_v28 = vpop.f32.mrf.mxu3  ;;  %v6939_v3 = vpop.f32.mrf.mxu0  ;;  %v16497_v10 = vld [vmem:[#allocation104_spill] sm:$0xff] }
 0x9dc   :  { %v6940_v57 = vadd.f32 %v6939_v3, %v15542_v20  ;;  %v6988_v26 = vpop.f32.mrf.mxu1  ;;  %v16498_v3 = vld [vmem:[#allocation105_spill] sm:$0xff] }
 0x9de   :  { %v6989_v52 = vadd.f32 %v6988_v26, %v6940_v57  ;;  %7134 = vmatmul.bf16.gmra.mxu0 %v16386_v30  ;;  %7183 = vmatmul.bf16.gmra.mxu1 %v16490_v49  ;;  %v10726_v30 = vld [vmem:[%s15873_s4 + $0x8] sm:$0xff] }
 0x9df   :  { %7232 = vmatmul.bf16.gmra.mxu2 %v16491_v43  ;;  %7659 = vmatpush.bf16.msra.mxu0 %v10726_v30  ;;  %v16499_v57 = vld [vmem:[#allocation106_spill] sm:$0xff]  ;;  %v16500_v30 = vld [vmem:[#allocation88_spill] sm:$0xff] }
 0x9e0   :  { %7281 = vmatmul.bf16.gmra.mxu3 %v16492_v7 }
 0x9e2   :  { %v7037_v11 = vpop.f32.mrf.mxu2 }
 0x9e3   :  { %v7038_v12 = vadd.f32 %v7037_v11, %v6989_v52  ;;  %v7086_v14 = vpop.f32.mrf.mxu3  ;;  %v6941_v23 = vpop.f32.mrf.mxu0  ;;  %7660 = vmatpush.bf16.msra.mxu0 %v10725_v63 }
 0x9e4   :  { %v6942_v20 = vadd.f32 %v6941_v23, %v15551_v51  ;;  %v6990_v40 = vpop.f32.mrf.mxu1 }
 0x9e5   :  { %v15705_v41 = vadd.f32 %v7086_v14, %v7038_v12 }
 0x9e6   :  { %v6991_v38 = vadd.f32 %v6990_v40, %v6942_v20 }
 0x9ea   :  { %v7039_v51 = vpop.f32.mrf.mxu2 }
 0x9eb   :  { %v15716_v45 = vadd.f32 %v7039_v51, %v6991_v38  ;;  %v15718_v16 = vpop.f32.mrf.mxu3  ;;  %v6944_v5 = vpop.f32.mrf.mxu0 }
 0x9ec   :  { %v6945_v59 = vadd.f32 %v6944_v5, %v15558_v21  ;;  %v6993_v36 = vpop.f32.mrf.mxu1 }
 0x9ee   :  { %v6994_v8 = vadd.f32 %v6993_v36, %v6945_v59  ;;  %7139 = vmatmul.bf16.gmra.mxu0 %v16285_v60  ;;  %7188 = vmatmul.bf16.gmra.mxu1 %v16493_v0  ;;  %v10749_v60 = vld [vmem:[%s15873_s4 + $0xc0] sm:$0xff] }
 0x9ef   :  { %7237 = vmatmul.bf16.gmra.mxu2 %v16494_v55  ;;  %7807 = vmatpush.bf16.msra.mxu3 %v10749_v60 }
 0x9f0   :  { %7286 = vmatmul.bf16.gmra.mxu3 %v16495_v17 }
 0x9f2   :  { %v7042_v25 = vpop.f32.mrf.mxu2 }
 0x9f3   :  { %v7043_v6 = vadd.f32 %v7042_v25, %v6994_v8  ;;  %v7091_v21 = vpop.f32.mrf.mxu3  ;;  %v6946_v32 = vpop.f32.mrf.mxu0 }
 0x9f4   :  { %v6947_v56 = vadd.f32 %v6946_v32, %v15561_v62  ;;  %v6995_v33 = vpop.f32.mrf.mxu1  ;;  %v16496_v62 = vld [vmem:[#allocation103_spill] sm:$0xff] }
 0x9f5   :  { %v15735_v47 = vadd.f32 %v7091_v21, %v7043_v6  ;;  %v16502_v21 = vld [vmem:[#allocation89_spill] sm:$0xff] }
 0x9f6   :  { %v6996_v31 = vadd.f32 %v6995_v33, %v6947_v56  ;;  %v16504_v56 = vld [vmem:[#allocation80_spill] sm:$0xff] }
 0x9fa   :  { %v7044_v54 = vpop.f32.mrf.mxu2 }
 0x9fb   :  { %v15740_v9 = vadd.f32 %v7044_v54, %v6996_v31  ;;  %v15742_v42 = vpop.f32.mrf.mxu3  ;;  %v6949_v18 = vpop.f32.mrf.mxu0 }
 0x9fc   :  { %v6950_v2 = vadd.f32 %v6949_v18, %v15571_v4  ;;  %v6998_v34 = vpop.f32.mrf.mxu1 }
 0x9fe   :  { %v6999_v37 = vadd.f32 %v6998_v34, %v6950_v2  ;;  %7144 = vmatmul.bf16.gmra.mxu0 %v16496_v62  ;;  %7193 = vmatmul.bf16.gmra.mxu1 %v16497_v10 }
 0x9ff   :  { %7242 = vmatmul.bf16.gmra.mxu2 %v16498_v3 }
 0xa00   :  { %7291 = vmatmul.bf16.gmra.mxu3 %v16499_v57 }
 0xa02   :  { %v7047_v26 = vpop.f32.mrf.mxu2 }
 0xa03   :  { %v7048_v52 = vadd.f32 %v7047_v26, %v6999_v37  ;;  %v7096_v49 = vpop.f32.mrf.mxu3  ;;  %v6951_v43 = vpop.f32.mrf.mxu0 }
 0xa04   :  { %v6952_v7 = vadd.f32 %v6951_v43, %v15583_v58  ;;  %v7000_v61 = vpop.f32.mrf.mxu1 }
 0xa05   :  { %v15750_v11 = vadd.f32 %v7096_v49, %v7048_v52 }
 0xa06   :  { %v7001_v4 = vadd.f32 %v7000_v61, %v6952_v7  ;;  %v16505_v7 = vld [vmem:[#allocation6_spill] sm:$0xff] }
 0xa0a   :  { %v7049_v12 = vpop.f32.mrf.mxu2 }
 0xa0b   :  { %v15752_v14 = vadd.f32 %v7049_v12, %v7001_v4  ;;  %v15754_v23 = vpop.f32.mrf.mxu3  ;;  %v7110_v20 = vpop.f32.mrf.mxu0  ;;  %v16507_v12 = vld [vmem:[#allocation81_spill] sm:$0xff] }
 0xa0c   :  { %v7159_v40 = vpop.f32.mrf.mxu1  ;;  %v7111_v38 = vadd.f32 %v7110_v20, %v15593_v27 }
 0xa0e   :  { %7661 = vmatmul.bf16.vlgmr.msra.gmra.mxu0 %v16500_v30  ;;  %7710 = vmatmul.bf16.vlgmr.msra.gmra.mxu1 %v16501_v1  ;;  %v7160_v63 = vadd.f32 %v7159_v40, %v7111_v38 }
 0xa0f   :  { %7759 = vmatmul.bf16.vlgmr.msra.gmra.mxu2 %v14859_v19  ;;  %v16503_v19 = vld [vmem:[#allocation85_spill] sm:$0xff] }
 0xa12   :  { %v7208_v58 = vpop.f32.mrf.mxu2 }
 0xa13   :  { %v7257_v24 = vpop.f32.mrf.mxu3  ;;  %v7112_v51 = vpop.f32.mrf.mxu0  ;;  %v7209_v59 = vadd.f32 %v7208_v58, %v7160_v63 }
 0xa14   :  { %v7161_v5 = vpop.f32.mrf.mxu1  ;;  %v7113_v22 = vadd.f32 %v7112_v51, %v15605_v53 }
 0xa15   :  { %v7258_v8 = vadd.f32 %v7257_v24, %v7209_v59 }
 0xa16   :  { %v7162_v36 = vadd.f32 %v7161_v5, %v7113_v22 }
 0xa17   :  { %v7300_v27 = vmax.f32 %v7258_v8, 0.0 }
 0xa1a   :  { %v7210_v35 = vpop.f32.mrf.mxu2 }
 0xa1b   :  { %v7211_v0 = vadd.f32 %v7210_v35, %v7162_v36  ;;  %v7259_v55 = vpop.f32.mrf.mxu3  ;;  %v7115_v17 = vpop.f32.mrf.mxu0 }
 0xa1c   :  { %v7164_v25 = vpop.f32.mrf.mxu1  ;;  %v7116_v53 = vadd.f32 %v7115_v17, %v15615_v29  ;;  %v16506_v29 = vld [vmem:[#allocation99_spill] sm:$0xff] }
 0xa1d   :  { %v7260_v6 = vadd.f32 %v7259_v55, %v7211_v0  ;;  %v16508_v55 = vld [vmem:[#allocation107_spill] sm:$0xff] }
 0xa1e   :  { %7666 = vmatmul.bf16.gmra.mxu0 %v16502_v21  ;;  %7715 = vmatmul.bf16.gmra.mxu1 %v16503_v19  ;;  %v7165_v2 = vadd.f32 %v7164_v25, %v7116_v53 }
 0xa1f   :  { %v7304_v32 = vmax.f32 %v7260_v6, 0.0  ;;  %7764 = vmatmul.bf16.gmra.mxu2 %v16504_v56  ;;  %v16510_v6 = vld [vmem:[#allocation95_spill] sm:$0xff] }
 0xa21   :  { %v7364_v33 = vpack.c.bf16 %v7304_v32, %v7300_v27 }
 0xa22   :  { %v7213_v31 = vpop.f32.mrf.mxu2 }
 0xa23   :  { %v7262_v60 = vpop.f32.mrf.mxu3  ;;  %7808 = vmatmul.bf16.vlgmr.msra.gmra.mxu3 %v7364_v33  ;;  %v7117_v54 = vpop.f32.mrf.mxu0  ;;  %v7214_v37 = vadd.f32 %v7213_v31, %v7165_v2 }
 0xa24   :  { %v7166_v18 = vpop.f32.mrf.mxu1  ;;  %v7118_v34 = vadd.f32 %v7117_v54, %v15627_v50 }
 0xa25   :  { %v7263_v3 = vadd.f32 %v7262_v60, %v7214_v37 }
 0xa26   :  { %v7167_v62 = vadd.f32 %v7166_v18, %v7118_v34 }
 0xa27   :  { %v7308_v61 = vmax.f32 %v7263_v3, 0.0  ;;  %v16511_v3 = vld [vmem:[#allocation108_spill] sm:$0xff] }
 0xa2a   :  { %v7215_v10 = vpop.f32.mrf.mxu2 }
 0xa2b   :  { %v7216_v57 = vadd.f32 %v7215_v10, %v7167_v62  ;;  %v7264_v26 = vpop.f32.mrf.mxu3  ;;  %v7120_v52 = vpop.f32.mrf.mxu0 }
 0xa2c   :  { %v7169_v49 = vpop.f32.mrf.mxu1  ;;  %v7121_v20 = vadd.f32 %v7120_v52, %v15637_v15  ;;  %v16509_v15 = vld [vmem:[#allocation112_spill] sm:$0xff]  ;;  %v16513_v52 = vld [vmem:[#allocation2_spill] sm:$0xff] }
 0xa2d   :  { %v7265_v43 = vadd.f32 %v7264_v26, %v7216_v57 }
 0xa2e   :  { %7671 = vmatmul.bf16.gmra.mxu0 %v16505_v7  ;;  %7720 = vmatmul.bf16.gmra.mxu1 %v16506_v29  ;;  %v7170_v58 = vadd.f32 %v7169_v49, %v7121_v20  ;;  %v7084_v7 = vadd.f32 %v15694_v28, %v15692_v39 }
 0xa2f   :  { %v7312_v4 = vmax.f32 %v7265_v43, 0.0  ;;  %7769 = vmatmul.bf16.gmra.mxu2 %v16507_v12 }
 0xa31   :  { %v7368_v50 = vpack.c.bf16 %v7312_v4, %v7308_v61 }
 0xa32   :  { %v7218_v40 = vpop.f32.mrf.mxu2 }
 0xa33   :  { %v7267_v30 = vpop.f32.mrf.mxu3  ;;  %7813 = vmatmul.bf16.gmra.mxu3 %v7368_v50  ;;  %v7122_v1 = vpop.f32.mrf.mxu0  ;;  %v7219_v51 = vadd.f32 %v7218_v40, %v7170_v58 }
 0xa34   :  { %v7171_v38 = vpop.f32.mrf.mxu1  ;;  %v7123_v24 = vadd.f32 %v7122_v1, %v15649_v13 }
 0xa35   :  { %v7268_v22 = vadd.f32 %v7267_v30, %v7219_v51 }
 0xa36   :  { %v7172_v5 = vadd.f32 %v7171_v38, %v7123_v24 }
 0xa37   :  { %v7316_v17 = vmax.f32 %v7268_v22, 0.0  ;;  %v16516_v22 = vld [vmem:[#allocation3_spill] sm:$0xff] }
 0xa3a   :  { %v7220_v63 = vpop.f32.mrf.mxu2 }
 0xa3b   :  { %v7221_v59 = vadd.f32 %v7220_v63, %v7172_v5  ;;  %v7269_v36 = vpop.f32.mrf.mxu3  ;;  %v7125_v35 = vpop.f32.mrf.mxu0  ;;  %v16514_v5 = vld [vmem:[#allocation109_spill] sm:$0xff]  ;;  %v16515_v63 = vld [vmem:[#allocation114_spill] sm:$0xff] }
 0xa3c   :  { %v7174_v8 = vpop.f32.mrf.mxu1  ;;  %v7126_v21 = vadd.f32 %v7125_v35, %v15659_v46  ;;  %v16512_v46 = vld [vmem:[#allocation113_spill] sm:$0xff] }
 0xa3d   :  { %v7270_v0 = vadd.f32 %v7269_v36, %v7221_v59 }
 0xa3e   :  { %7676 = vmatmul.bf16.gmra.mxu0 %v16508_v55  ;;  %7725 = vmatmul.bf16.gmra.mxu1 %v16509_v15  ;;  %v7175_v33 = vadd.f32 %v7174_v8, %v7126_v21  ;;  %v7089_v8 = vadd.f32 %v15718_v16, %v15716_v45 }
 0xa3f   :  { %v7320_v25 = vmax.f32 %v7270_v0, 0.0  ;;  %7774 = vmatmul.bf16.gmra.mxu2 %v16510_v6 }
 0xa41   :  { %v7372_v13 = vpack.c.bf16 %v7320_v25, %v7316_v17 }
 0xa42   :  { %v7223_v19 = vpop.f32.mrf.mxu2 }
 0xa43   :  { %v7272_v27 = vpop.f32.mrf.mxu3  ;;  %7818 = vmatmul.bf16.gmra.mxu3 %v7372_v13  ;;  %v7127_v32 = vpop.f32.mrf.mxu0  ;;  %v7224_v31 = vadd.f32 %v7223_v19, %v7175_v33 }
 0xa44   :  { %v7176_v56 = vpop.f32.mrf.mxu1  ;;  %v7128_v53 = vadd.f32 %v7127_v32, %v15671_v48 }
 0xa45   :  { %v7273_v18 = vadd.f32 %v7272_v27, %v7224_v31  ;;  %v16518_v31 = vld [vmem:[#allocation115_spill] sm:$0xff] }
 0xa46   :  { %v7177_v60 = vadd.f32 %v7176_v56, %v7128_v53 }
 0xa47   :  { %v7324_v57 = vmax.f32 %v7273_v18, 0.0 }
 0xa4a   :  { %v7225_v54 = vpop.f32.mrf.mxu2 }
 0xa4b   :  { %v7226_v2 = vadd.f32 %v7225_v54, %v7177_v60  ;;  %v7274_v34 = vpop.f32.mrf.mxu3  ;;  %v7130_v37 = vpop.f32.mrf.mxu0  ;;  %v16519_v60 = vld [vmem:[#allocation4_spill] sm:$0xff] }
 0xa4c   :  { %v7179_v62 = vpop.f32.mrf.mxu1  ;;  %v7131_v49 = vadd.f32 %v7130_v37, %v15681_v44 }
 0xa4d   :  { %v7275_v10 = vadd.f32 %v7274_v34, %v7226_v2  ;;  %v7094_v34 = vadd.f32 %v15742_v42, %v15740_v9 }
 0xa4e   :  { %7681 = vmatmul.bf16.gmra.mxu0 %v16511_v3  ;;  %7730 = vmatmul.bf16.gmra.mxu1 %v16512_v46  ;;  %v7180_v12 = vadd.f32 %v7179_v62, %v7131_v49 }
 0xa4f   :  { %v7328_v26 = vmax.f32 %v7275_v10, 0.0  ;;  %7779 = vmatmul.bf16.gmra.mxu2 %v16513_v52 }
 0xa51   :  { %v7376_v48 = vpack.c.bf16 %v7328_v26, %v7324_v57 }
 0xa52   :  { %v7228_v43 = vpop.f32.mrf.mxu2 }
 0xa53   :  { %v7277_v29 = vpop.f32.mrf.mxu3  ;;  %7823 = vmatmul.bf16.gmra.mxu3 %v7376_v48  ;;  %v7132_v61 = vpop.f32.mrf.mxu0  ;;  %v7229_v50 = vadd.f32 %v7228_v43, %v7180_v12  ;;  %v16522_v12 = vld [vmem:[#allocation5_spill] sm:$0xff] }
 0xa54   :  { %v7181_v4 = vpop.f32.mrf.mxu1  ;;  %v7133_v20 = vadd.f32 %v7132_v61, %v7084_v7 }
 0xa55   :  { %v7278_v1 = vadd.f32 %v7277_v29, %v7229_v50 }
 0xa56   :  { %v7182_v40 = vadd.f32 %v7181_v4, %v7133_v20  ;;  %v16521_v4 = vld [vmem:[#allocation116_spill] sm:$0xff] }
 0xa57   :  { %v7332_v39 = vmax.f32 %v7278_v1, 0.0 }
 0xa5a   :  { %v7230_v30 = vpop.f32.mrf.mxu2 }
 0xa5b   :  { %v7231_v38 = vadd.f32 %v7230_v30, %v7182_v40  ;;  %v7279_v58 = vpop.f32.mrf.mxu3  ;;  %v7135_v24 = vpop.f32.mrf.mxu0  ;;  %v7099_v30 = vadd.f32 %v15754_v23, %v15752_v14 }
 0xa5c   :  { %v7184_v51 = vpop.f32.mrf.mxu1  ;;  %v7136_v36 = vadd.f32 %v7135_v24, %v15705_v41  ;;  %v16517_v41 = vld [vmem:[#allocation110_spill] sm:$0xff] }
 0xa5d   :  { %v7280_v44 = vadd.f32 %v7279_v58, %v7231_v38 }
 0xa5e   :  { %7686 = vmatmul.bf16.gmra.mxu0 %v16514_v5  ;;  %7735 = vmatmul.bf16.gmra.mxu1 %v16515_v63  ;;  %v7185_v17 = vadd.f32 %v7184_v51, %v7136_v36 }
 0xa5f   :  { %v7336_v28 = vmax.f32 %v7280_v44, 0.0  ;;  %7784 = vmatmul.bf16.gmra.mxu2 %v16516_v22 }
 0xa61   :  { %v7380_v59 = vpack.c.bf16 %v7336_v28, %v7332_v39 }
 0xa62   :  { %v7233_v35 = vpop.f32.mrf.mxu2 }
 0xa63   :  { %v7282_v0 = vpop.f32.mrf.mxu3  ;;  %7828 = vmatmul.bf16.gmra.mxu3 %v7380_v59  ;;  %v7137_v55 = vpop.f32.mrf.mxu0  ;;  %v7234_v6 = vadd.f32 %v7233_v35, %v7185_v17  ;;  %v15803_v17 = vld [vmem:[%s15874_s5] ss:$0 sm:$0xff] }
 0xa64   :  { %v7186_v15 = vpop.f32.mrf.mxu1  ;;  %v7138_v25 = vadd.f32 %v7137_v55, %v7089_v8 }
 0xa65   :  { %v7283_v19 = vadd.f32 %v7282_v0, %v7234_v6 }
 0xa66   :  { %v7187_v21 = vadd.f32 %v7186_v15, %v7138_v25 }
 0xa67   :  { %v7340_v45 = vmax.f32 %v7283_v19, 0.0 }
 0xa6a   :  { %v7235_v13 = vpop.f32.mrf.mxu2 }
 0xa6b   :  { %v7236_v27 = vadd.f32 %v7235_v13, %v7187_v21  ;;  %v7284_v32 = vpop.f32.mrf.mxu3  ;;  %v7140_v56 = vpop.f32.mrf.mxu0 }
 0xa6c   :  { %v7189_v33 = vpop.f32.mrf.mxu1  ;;  %v7141_v18 = vadd.f32 %v7140_v56, %v15735_v47  ;;  %v16520_v47 = vld [vmem:[#allocation111_spill] sm:$0xff] }
 0xa6d   :  { %v7285_v53 = vadd.f32 %v7284_v32, %v7236_v27 }
 0xa6e   :  { %7691 = vmatmul.bf16.gmra.mxu0 %v16517_v41  ;;  %7740 = vmatmul.bf16.gmra.mxu1 %v16518_v31  ;;  %v7190_v3 = vadd.f32 %v7189_v33, %v7141_v18 }
 0xa6f   :  { %v7344_v16 = vmax.f32 %v7285_v53, 0.0  ;;  %7789 = vmatmul.bf16.gmra.mxu2 %v16519_v60 }
 0xa71   :  { %v7384_v54 = vpack.c.bf16 %v7344_v16, %v7340_v45 }
 0xa72   :  { %v7238_v2 = vpop.f32.mrf.mxu2 }
 0xa73   :  { %v7287_v37 = vpop.f32.mrf.mxu3  ;;  %7833 = vmatmul.bf16.gmra.mxu3 %v7384_v54  ;;  %v7142_v62 = vpop.f32.mrf.mxu0  ;;  %v7239_v57 = vadd.f32 %v7238_v2, %v7190_v3 }
 0xa74   :  { %v7191_v10 = vpop.f32.mrf.mxu1  ;;  %v7143_v46 = vadd.f32 %v7142_v62, %v7094_v34 }
 0xa75   :  { %v7288_v49 = vadd.f32 %v7287_v37, %v7239_v57 }
 0xa76   :  { %v7192_v26 = vadd.f32 %v7191_v10, %v7143_v46 }
 0xa77   :  { %v7348_v9 = vmax.f32 %v7288_v49, 0.0 }
 0xa7a   :  { %v7240_v52 = vpop.f32.mrf.mxu2 }
 0xa7b   :  { %v7241_v48 = vadd.f32 %v7240_v52, %v7192_v26  ;;  %v7289_v43 = vpop.f32.mrf.mxu3  ;;  %v7145_v7 = vpop.f32.mrf.mxu0 }
 0xa7c   :  { %v7194_v29 = vpop.f32.mrf.mxu1  ;;  %v7146_v50 = vadd.f32 %v7145_v7, %v15750_v11 }
 0xa7d   :  { %v7290_v61 = vadd.f32 %v7289_v43, %v7241_v48 }
 0xa7e   :  { %7696 = vmatmul.bf16.gmra.mxu0 %v16520_v47  ;;  %7745 = vmatmul.bf16.gmra.mxu1 %v16521_v4  ;;  %v7195_v24 = vadd.f32 %v7194_v29, %v7146_v50 }
 0xa7f   :  { %v7352_v42 = vmax.f32 %v7290_v61, 0.0  ;;  %7794 = vmatmul.bf16.gmra.mxu2 %v16522_v12 }
 0xa81   :  { %v7388_v20 = vpack.c.bf16 %v7352_v42, %v7348_v9 }
 0xa82   :  { %v7243_v40 = vpop.f32.mrf.mxu2 }
 0xa83   :  { %v7292_v1 = vpop.f32.mrf.mxu3  ;;  %7838 = vmatmul.bf16.gmra.mxu3 %v7388_v20  ;;  %v7147_v38 = vpop.f32.mrf.mxu0  ;;  %v7244_v44 = vadd.f32 %v7243_v40, %v7195_v24 }
 0xa84   :  { %v7196_v58 = vpop.f32.mrf.mxu1  ;;  %v7148_v51 = vadd.f32 %v7147_v38, %v7099_v30 }
 0xa85   :  { %v7293_v39 = vadd.f32 %v7292_v1, %v7244_v44 }
 0xa86   :  { %v7197_v5 = vadd.f32 %v7196_v58, %v7148_v51 }
 0xa87   :  { %v7356_v11 = vmax.f32 %v7293_v39, 0.0 }
 0xa8a   :  { %v7245_v63 = vpop.f32.mrf.mxu2 }
 0xa8b   :  { %v7246_v28 = vadd.f32 %v7245_v63, %v7197_v5  ;;  %v7662_v22 = vpop.f32.mrf.mxu0  ;;  %v7294_v59 = vpop.f32.mrf.mxu3 }
 0xa8c   :  { %v7711_v36 = vpop.f32.mrf.mxu1  ;;  %v7663_v21 = vadd.f32 %v15803_v17, %v7662_v22 }
 0xa8d   :  { %v7295_v35 = vadd.f32 %v7294_v59, %v7246_v28 }
 0xa8e   :  { %v7712_v19 = vadd.f32 %v7711_v36, %v7663_v21 }
 0xa8f   :  { %v7360_v8 = vmax.f32 %v7295_v35, 0.0 }
 0xa91   :  { %v7392_v0 = vpack.c.bf16 %v7360_v8, %v7356_v11 }
 0xa92   :  { %v7760_v55 = vpop.f32.mrf.mxu2 }
 0xa93   :  { %7843 = vmatmul.bf16.gmra.mxu3 %v7392_v0  ;;  %v7664_v14 = vpop.f32.mrf.mxu0  ;;  %v7761_v56 = vadd.f32 %v7760_v55, %v7712_v19 }
 0xa94   :  { %v7713_v23 = vpop.f32.mrf.mxu1  ;;  %v7665_v53 = vadd.f32 %v15803_v17, %v7664_v14 }
 0xa96   :  { %v7714_v45 = vadd.f32 %v7713_v23, %v7665_v53 }
 0xa9a   :  { %v7762_v15 = vpop.f32.mrf.mxu2 }
 0xa9b   :  { %v7667_v25 = vpop.f32.mrf.mxu0  ;;  %v7763_v54 = vadd.f32 %v7762_v15, %v7714_v45 }
 0xa9c   :  { %v7716_v6 = vpop.f32.mrf.mxu1  ;;  %v7668_v2 = vadd.f32 %v15803_v17, %v7667_v25 }
 0xa9e   :  { %v7717_v62 = vadd.f32 %v7716_v6, %v7668_v2 }
 0xaa2   :  { %v7765_v13 = vpop.f32.mrf.mxu2 }
 0xaa3   :  { %v7669_v27 = vpop.f32.mrf.mxu0  ;;  %v7766_v3 = vadd.f32 %v7765_v13, %v7717_v62 }
 0xaa4   :  { %v7718_v32 = vpop.f32.mrf.mxu1  ;;  %v7670_v26 = vadd.f32 %v15803_v17, %v7669_v27 }
 0xaa6   :  { %v7809_v33 = vpop.f32.mrf.mxu3  ;;  %v7719_v48 = vadd.f32 %v7718_v32, %v7670_v26 }
 0xaa7   :  { %v7810_v41 = vadd.f32 %v7809_v33, %v7761_v56 }
 0xaa9   :  { %7849 = vst [vmem:[%s15875_s6] sm:$0xff] %v7810_v41 }
 0xaaa   :  { %v7767_v31 = vpop.f32.mrf.mxu2 }
 0xaab   :  { %v7672_v16 = vpop.f32.mrf.mxu0  ;;  %v7768_v7 = vadd.f32 %v7767_v31, %v7719_v48 }
 0xaac   :  { %v7721_v60 = vpop.f32.mrf.mxu1  ;;  %v7673_v61 = vadd.f32 %v15803_v17, %v7672_v16 }
 0xaae   :  { %v7811_v18 = vpop.f32.mrf.mxu3  ;;  %v7722_v42 = vadd.f32 %v7721_v60, %v7673_v61 }
 0xaaf   :  { %v7812_v34 = vadd.f32 %v7811_v18, %v7763_v54 }
 0xab1   :  { %7850 = vst [vmem:[%s15875_s6 + $0x8] sm:$0xff] %v7812_v34 }
 0xab2   :  { %v7770_v37 = vpop.f32.mrf.mxu2 }
 0xab3   :  { %v7674_v10 = vpop.f32.mrf.mxu0  ;;  %v7771_v20 = vadd.f32 %v7770_v37, %v7722_v42 }
 0xab4   :  { %v7723_v46 = vpop.f32.mrf.mxu1  ;;  %v7675_v40 = vadd.f32 %v15803_v17, %v7674_v10 }
 0xab6   :  { %v7814_v57 = vpop.f32.mrf.mxu3  ;;  %v7724_v58 = vadd.f32 %v7723_v46, %v7675_v40 }
 0xab7   :  { %v7815_v52 = vadd.f32 %v7814_v57, %v7766_v3 }
 0xab9   :  { %7851 = vst [vmem:[%s15875_s6 + $0x10] sm:$0xff] %v7815_v52 }
 0xaba   :  { %v7772_v49 = vpop.f32.mrf.mxu2 }
 0xabb   :  { %v7677_v43 = vpop.f32.mrf.mxu0  ;;  %v7773_v24 = vadd.f32 %v7772_v49, %v7724_v58 }
 0xabc   :  { %v7726_v47 = vpop.f32.mrf.mxu1  ;;  %v7678_v5 = vadd.f32 %v15803_v17, %v7677_v43 }
 0xabe   :  { %v7816_v29 = vpop.f32.mrf.mxu3  ;;  %v7727_v39 = vadd.f32 %v7726_v47, %v7678_v5 }
 0xabf   :  { %v7817_v4 = vadd.f32 %v7816_v29, %v7768_v7 }
 0xac1   :  { %7852 = vst [vmem:[%s15875_s6 + $0x18] sm:$0xff] %v7817_v4 }
 0xac2   :  { %v7775_v9 = vpop.f32.mrf.mxu2 }
 0xac3   :  { %v7679_v12 = vpop.f32.mrf.mxu0  ;;  %v7776_v59 = vadd.f32 %v7775_v9, %v7727_v39 }
 0xac4   :  { %v7728_v1 = vpop.f32.mrf.mxu1  ;;  %v7680_v35 = vadd.f32 %v15803_v17, %v7679_v12 }
 0xac6   :  { %v7819_v50 = vpop.f32.mrf.mxu3  ;;  %v7729_v0 = vadd.f32 %v7728_v1, %v7680_v35 }
 0xac7   :  { %v7820_v30 = vadd.f32 %v7819_v50, %v7771_v20 }
 0xac9   :  { %7853 = vst [vmem:[%s15875_s6 + $0x20] sm:$0xff] %v7820_v30 }
 0xaca   :  { %v7777_v38 = vpop.f32.mrf.mxu2 }
 0xacb   :  { %v7682_v51 = vpop.f32.mrf.mxu0  ;;  %v7778_v55 = vadd.f32 %v7777_v38, %v7729_v0 }
 0xacc   :  { %v7731_v28 = vpop.f32.mrf.mxu1  ;;  %v7683_v25 = vadd.f32 %v15803_v17, %v7682_v51 }
 0xace   :  { %v7821_v44 = vpop.f32.mrf.mxu3  ;;  %v7732_v13 = vadd.f32 %v7731_v28, %v7683_v25 }
 0xacf   :  { %v7822_v63 = vadd.f32 %v7821_v44, %v7773_v24 }
 0xad1   :  { %7854 = vst [vmem:[%s15875_s6 + $0x28] sm:$0xff] %v7822_v63 }
 0xad2   :  { %v7780_v22 = vpop.f32.mrf.mxu2 }
 0xad3   :  { %v7684_v8 = vpop.f32.mrf.mxu0  ;;  %v7781_v19 = vadd.f32 %v7780_v22, %v7732_v13 }
 0xad4   :  { %v7733_v14 = vpop.f32.mrf.mxu1  ;;  %v7685_v32 = vadd.f32 %v15803_v17, %v7684_v8 }
 0xad6   :  { %v7824_v36 = vpop.f32.mrf.mxu3  ;;  %v7734_v41 = vadd.f32 %v7733_v14, %v7685_v32 }
 0xad7   :  { %v7825_v11 = vadd.f32 %v7824_v36, %v7776_v59 }
 0xad9   :  { %7855 = vst [vmem:[%s15875_s6 + $0x30] sm:$0xff] %v7825_v11 }
 0xada   :  { %v7782_v23 = vpop.f32.mrf.mxu2 }
 0xadb   :  { %v7687_v21 = vpop.f32.mrf.mxu0  ;;  %v7783_v45 = vadd.f32 %v7782_v23, %v7734_v41 }
 0xadc   :  { %v7736_v56 = vpop.f32.mrf.mxu1  ;;  %v7688_v60 = vadd.f32 %v15803_v17, %v7687_v21 }
 0xade   :  { %v7826_v15 = vpop.f32.mrf.mxu3  ;;  %v7737_v34 = vadd.f32 %v7736_v56, %v7688_v60 }
 0xadf   :  { %v7827_v6 = vadd.f32 %v7826_v15, %v7778_v55 }
 0xae1   :  { %7856 = vst [vmem:[%s15875_s6 + $0x38] sm:$0xff] %v7827_v6 }
 0xae2   :  { %v7785_v53 = vpop.f32.mrf.mxu2 }
 0xae3   :  { %v7689_v31 = vpop.f32.mrf.mxu0  ;;  %v7786_v37 = vadd.f32 %v7785_v53, %v7737_v34 }
 0xae4   :  { %v7738_v18 = vpop.f32.mrf.mxu1  ;;  %v7690_v3 = vadd.f32 %v15803_v17, %v7689_v31 }
 0xae6   :  { %v7829_v27 = vpop.f32.mrf.mxu3  ;;  %v7739_v57 = vadd.f32 %v7738_v18, %v7690_v3 }
 0xae7   :  { %v7830_v33 = vadd.f32 %v7829_v27, %v7781_v19 }
 0xae9   :  { %7857 = vst [vmem:[%s15875_s6 + $0x40] sm:$0xff] %v7830_v33 }
 0xaea   :  { %v7787_v2 = vpop.f32.mrf.mxu2 }
 0xaeb   :  { %v7692_v62 = vpop.f32.mrf.mxu0  ;;  %v7788_v49 = vadd.f32 %v7787_v2, %v7739_v57 }
 0xaec   :  { %v7741_v26 = vpop.f32.mrf.mxu1  ;;  %v7693_v43 = vadd.f32 %v15803_v17, %v7692_v62 }
 0xaee   :  { %v7831_v16 = vpop.f32.mrf.mxu3  ;;  %v7742_v61 = vadd.f32 %v7741_v26, %v7693_v43 }
 0xaef   :  { %v7832_v54 = vadd.f32 %v7831_v16, %v7783_v45 }
 0xaf1   :  { %7858 = vst [vmem:[%s15875_s6 + $0x48] sm:$0xff] %v7832_v54 }
 0xaf2   :  { %v7790_v52 = vpop.f32.mrf.mxu2 }
 0xaf3   :  { %v7694_v29 = vpop.f32.mrf.mxu0  ;;  %v7791_v47 = vadd.f32 %v7790_v52, %v7742_v61 }
 0xaf4   :  { %v7743_v4 = vpop.f32.mrf.mxu1  ;;  %v7695_v12 = vadd.f32 %v15803_v17, %v7694_v29 }
 0xaf6   :  { %v7834_v10 = vpop.f32.mrf.mxu3  ;;  %v7744_v40 = vadd.f32 %v7743_v4, %v7695_v12 }
 0xaf7   :  { %v7835_v46 = vadd.f32 %v7834_v10, %v7786_v37 }
 0xaf9   :  { %7859 = vst [vmem:[%s15875_s6 + $0x50] sm:$0xff] %v7835_v46 }
 0xafa   :  { %v7792_v9 = vpop.f32.mrf.mxu2 }
 0xafb   :  { %v7697_v50 = vpop.f32.mrf.mxu0  ;;  %v7793_v30 = vadd.f32 %v7792_v9, %v7744_v40 }
 0xafc   :  { %v7698_v38 = vadd.f32 %v15803_v17, %v7697_v50  ;;  %v7746_v24 = vpop.f32.mrf.mxu1 }
 0xafe   :  { %v7836_v48 = vpop.f32.mrf.mxu3  ;;  %v7747_v44 = vadd.f32 %v7746_v24, %v7698_v38 }
 0xaff   :  { %v7837_v7 = vadd.f32 %v7836_v48, %v7788_v49 }
 0xb01   :  { %7860 = vst [vmem:[%s15875_s6 + $0x58] sm:$0xff] %v7837_v7 }
 0xb02   :  { %v7795_v51 = vpop.f32.mrf.mxu2 }
 0xb03   :  { %v7699_v5 = vpop.f32.mrf.mxu0  ;;  %v7796_v63 = vadd.f32 %v7795_v51, %v7747_v44 }
 0xb04   :  { %v7700_v28 = vadd.f32 %v15803_v17, %v7699_v5  ;;  %v7748_v59 = vpop.f32.mrf.mxu1 }
 0xb06   :  { %v7839_v42 = vpop.f32.mrf.mxu3  ;;  %v7749_v35 = vadd.f32 %v7748_v59, %v7700_v28 }
 0xb07   :  { %v7840_v20 = vadd.f32 %v7839_v42, %v7791_v47 }
 0xb09   :  { %7861 = vst [vmem:[%s15875_s6 + $0x60] sm:$0xff] %v7840_v20 }
 0xb0a   :  { %v7797_v36 = vpop.f32.mrf.mxu2 }
 0xb0b   :  { %v7798_v11 = vadd.f32 %v7797_v36, %v7749_v35 }
 0xb0e   :  { %v7841_v1 = vpop.f32.mrf.mxu3 }
 0xb0f   :  { %v7842_v58 = vadd.f32 %v7841_v1, %v7793_v30 }
 0xb11   :  { %7862 = vst [vmem:[%s15875_s6 + $0x68] sm:$0xff] %v7842_v58 }
 0xb16   :  { %v7844_v39 = vpop.f32.mrf.mxu3 }
 0xb17   :  { %v7845_v22 = vadd.f32 %v7844_v39, %v7796_v63 }
 0xb19   :  { %7863 = vst [vmem:[%s15875_s6 + $0x70] sm:$0xff] %v7845_v22 }
 0xb1e   :  { %v7846_v8 = vpop.f32.mrf.mxu3 }
 0xb1f   :  { %v7847_v0 = vadd.f32 %v7846_v8, %v7798_v11 }
 0xb21   :  { %7864 = vst [vmem:[%s15875_s6 + $0x78] sm:$0xff] %v7847_v0 }

</bundles_post_ra>
